<compile_context>
chip_gen: v7x
topology: tpu7x:2x2x1
jax: 0.10.0
libtpu: 0.0.40
codegen_flags: <defaults>
</compile_context>

<pallas_src>
import functools

import numpy as np
import jax
import jax.numpy as jnp
from jax.experimental import pallas as pl
from jax.experimental.pallas import tpu as pltpu


# ----------------------------------------------------------------------------
# Kernel 1: fused-im2col complex conv + per-image BN statistic partial sums
# ----------------------------------------------------------------------------
def _conv_stats_kernel(xr_ref, xi_ref, w_ref, yr_ref, yi_ref, st_ref, acc_ref,
                       *, kh, kw, sh, sw, Ho, Wo, C):
    Mimg = Ho * Wo
    Cin = xr_ref.shape[-1]

    acc_ref[...] = jnp.zeros_like(acc_ref)

    def _sl(off, n, s):                                   # static tap slice
        return slice(off, off + n) if s == 1 else slice(off, off + (n - 1) * s + 1, s)

    # Accumulate the kh*kw shifted matmuls (fused im2col).  One MXU dot per
    # tap: rows = [xr ; xi], lanes of the weight = [w_re | w_im].
    for p in range(kh * kw):
        dh, dw = divmod(p, kw)
        xr_t = xr_ref[0, _sl(dh, Ho, sh), _sl(dw, Wo, sw), :]   # (Ho, Wo, Cin)
        xi_t = xi_ref[0, _sl(dh, Ho, sh), _sl(dw, Wo, sw), :]
        x2 = jnp.concatenate(
            [xr_t.reshape(Mimg, Cin).astype(jnp.bfloat16),
             xi_t.reshape(Mimg, Cin).astype(jnp.bfloat16)], axis=0)
        acc_ref[...] += jnp.dot(x2, w_ref[p],
                                preferred_element_type=jnp.float32)

    acc = acc_ref[...]
    top, bot = acc[:Mimg], acc[Mimg:]
    cr = top[:, :C] - bot[:, C:]          # conv_re(xr) - conv_im(xi)
    ci = bot[:, :C] + top[:, C:]          # conv_re(xi) + conv_im(xr)
    yr_ref[0] = cr
    yi_ref[0] = ci

    # Per-image partial sums for the complex batch-norm statistics.
    st_ref[0, 0:1, :] = jnp.sum(cr, axis=0, keepdims=True)
    st_ref[0, 1:2, :] = jnp.sum(ci, axis=0, keepdims=True)
    st_ref[0, 2:3, :] = jnp.sum(cr * cr, axis=0, keepdims=True)
    st_ref[0, 3:4, :] = jnp.sum(ci * ci, axis=0, keepdims=True)
    st_ref[0, 4:5, :] = jnp.sum(cr * ci, axis=0, keepdims=True)


def _conv_stats(xr_p, xi_p, w_cat, *, kh, kw, sh, sw, Ho, Wo, C):
    N, Hp, Wp, Cin = xr_p.shape
    Mimg = Ho * Wo
    kern = functools.partial(_conv_stats_kernel, kh=kh, kw=kw, sh=sh, sw=sw,
                             Ho=Ho, Wo=Wo, C=C)
    return pl.pallas_call(
        kern,
        out_shape=(jax.ShapeDtypeStruct((N, Mimg, C), jnp.float32),
                   jax.ShapeDtypeStruct((N, Mimg, C), jnp.float32),
                   jax.ShapeDtypeStruct((N, 5, C), jnp.float32)),
        grid_spec=pltpu.PrefetchScalarGridSpec(
            num_scalar_prefetch=0,
            grid=(N,),
            in_specs=[pl.BlockSpec((1, Hp, Wp, Cin), lambda n: (n, 0, 0, 0)),
                      pl.BlockSpec((1, Hp, Wp, Cin), lambda n: (n, 0, 0, 0)),
                      pl.BlockSpec((kh * kw, Cin, 2 * C), lambda n: (0, 0, 0))],
            out_specs=[pl.BlockSpec((1, Mimg, C), lambda n: (n, 0, 0)),
                       pl.BlockSpec((1, Mimg, C), lambda n: (n, 0, 0)),
                       pl.BlockSpec((1, 5, C), lambda n: (n, 0, 0))],
            scratch_shapes=[pltpu.VMEM((2 * Mimg, 2 * C), jnp.float32)]),
        compiler_params=pltpu.CompilerParams(
            dimension_semantics=("parallel",),
            vmem_limit_bytes=32 * 1024 * 1024),
    )(xr_p, xi_p, w_cat)


# ----------------------------------------------------------------------------
# Kernel 2: complex whitening + affine (batch-norm) + CLeakyReLU, lane-dense
# ----------------------------------------------------------------------------
def _bn_act_kernel(yr_ref, yi_ref, coef_ref, or_ref, oi_ref, *, slope):
    # coef rows: 0:Mr 1:Mi 2:Zrr 3:Zri 4:Zir 5:Zii 6:Br 7:Bi (lane-tiled)
    coef = coef_ref[...]
    xr = yr_ref[...] - coef[0:1, :]
    xi = yi_ref[...] - coef[1:2, :]
    zr = coef[2:3, :] * xr + coef[3:4, :] * xi + coef[6:7, :]
    zi = coef[4:5, :] * xr + coef[5:6, :] * xi + coef[7:8, :]
    or_ref[...] = jnp.where(zr >= 0, zr, slope * zr)
    oi_ref[...] = jnp.where(zi >= 0, zi, slope * zi)


def _bn_act(yr2, yi2, coef2, *, slope, tm):
    R, L = yr2.shape
    kern = functools.partial(_bn_act_kernel, slope=slope)
    return pl.pallas_call(
        kern,
        out_shape=(jax.ShapeDtypeStruct((R, L), jnp.float32),
                   jax.ShapeDtypeStruct((R, L), jnp.float32)),
        grid_spec=pltpu.PrefetchScalarGridSpec(
            num_scalar_prefetch=0,
            grid=(R // tm,),
            in_specs=[pl.BlockSpec((tm, L), lambda i: (i, 0)),
                      pl.BlockSpec((tm, L), lambda i: (i, 0)),
                      pl.BlockSpec((8, L), lambda i: (0, 0))],
            out_specs=[pl.BlockSpec((tm, L), lambda i: (i, 0)),
                       pl.BlockSpec((tm, L), lambda i: (i, 0))]),
        compiler_params=pltpu.CompilerParams(
            dimension_semantics=("parallel",),
            vmem_limit_bytes=32 * 1024 * 1024),
    )(yr2, yi2, coef2)


def _pick_row_tile(total_rows, cap=1024):
    t = min(total_rows, cap)
    while t > 0:
        if total_rows % t == 0 and (t % 8 == 0 or t == total_rows):
            return t
        t -= 1
    return total_rows


# ----------------------------------------------------------------------------
# Module wrapper
# ----------------------------------------------------------------------------
class Encoder:
    """Complex Conv2d (bias=False) -> ComplexBatchNorm -> CLeakyReLU."""

    def __init__(self, conv_cfg, leaky_slope, key=jax.random.PRNGKey(1)):
        in_ch, out_ch, ksize, stride, padding = conv_cfg
        self.in_ch, self.out_ch = in_ch, out_ch
        self.ksize, self.stride, self.padding = ksize, stride, padding
        self.slope = float(leaky_slope)
        self.eps = 1e-5
        kh, kw = ksize
        k1, k2, k3, k4 = jax.random.split(key, 4)
        fan = in_ch * kh * kw
        # conv weights, PyTorch OIHW layout
        self.w_re = (jax.random.normal(k1, (out_ch, in_ch, kh, kw), jnp.float32)
                     / np.sqrt(fan))
        self.w_im = (jax.random.normal(k2, (out_ch, in_ch, kh, kw), jnp.float32)
                     / np.sqrt(fan))
        # ComplexBatchNorm affine params (deterministic init)
        self.Wrr = jnp.ones((out_ch,), jnp.float32)
        self.Wri = jnp.full((out_ch,), 0.25, jnp.float32)
        self.Wii = jnp.ones((out_ch,), jnp.float32)
        self.Br = 0.05 * jax.random.normal(k3, (out_ch,), jnp.float32)
        self.Bi = 0.05 * jax.random.normal(k4, (out_ch,), jnp.float32)
        # TODO(synk): running-mean/covariance tracking (momentum update) and
        # eval-mode BN are not implemented; training-mode batch statistics are
        # used, matching the module's default forward behavior.

    def __call__(self, xr, xi):
        # xr, xi: NCHW float32
        kh, kw = self.ksize
        sh, sw = self.stride
        ph, pw = self.padding
        Cin, C = self.in_ch, self.out_ch

        N, _, H, W = xr.shape
        Ho = (H + 2 * ph - kh) // sh + 1
        Wo = (W + 2 * pw - kw) // sw + 1
        Mimg = Ho * Wo
        M = N * Mimg

        # TODO(synk): accepting NHWC at the boundary (or folding the final
        # transpose into kernel 2's out_spec) would save two HBM passes; NCHW
        # is kept to match the PyTorch interface.
        pad = ((0, 0), (ph, ph), (pw, pw), (0, 0))
        xr_p = jnp.pad(jnp.transpose(xr, (0, 2, 3, 1)), pad)   # (N, Hp, Wp, Cin)
        xi_p = jnp.pad(jnp.transpose(xi, (0, 2, 3, 1)), pad)

        # OIHW -> (kh*kw, Cin, Cout); [w_re | w_im] along lanes, bf16 MXU operands
        wr = jnp.transpose(self.w_re, (2, 3, 1, 0)).reshape(kh * kw, Cin, C)
        wi = jnp.transpose(self.w_im, (2, 3, 1, 0)).reshape(kh * kw, Cin, C)
        w_cat = jnp.concatenate([wr, wi], axis=-1).astype(jnp.bfloat16)

        # Pass 1: fused-im2col complex conv + per-image partial BN statistics.
        # TODO(synk): per-image blocking assumes one padded image fits VMEM;
        # very large spectrograms would need row-band tiling of H.
        yr3, yi3, part = _conv_stats(xr_p, xi_p, w_cat, kh=kh, kw=kw,
                                     sh=sh, sw=sw, Ho=Ho, Wo=Wo, C=C)

        # finalize complex batch-norm statistics (tiny per-channel scalar math)
        stats = jnp.sum(part, axis=0)                 # (5, C)
        Mf = float(M)
        Sr, Si, Srr, Sii, Sri = stats[0], stats[1], stats[2], stats[3], stats[4]
        Mr = Sr / Mf
        Mi = Si / Mf
        Vrr = Srr / Mf - Mr * Mr + self.eps
        Vii = Sii / Mf - Mi * Mi + self.eps
        Vri = Sri / Mf - Mr * Mi
        tau = Vrr + Vii
        delta = Vrr * Vii - Vri * Vri
        s = jnp.sqrt(delta)
        t = jnp.sqrt(tau + 2.0 * s)
        rst = 1.0 / (s * t)
        Urr = (s + Vii) * rst
        Uii = (s + Vrr) * rst
        Uri = -Vri * rst
        Zrr = self.Wrr * Urr + self.Wri * Uri
        Zri = self.Wrr * Uri + self.Wri * Uii
        Zir = self.Wri * Urr + self.Wii * Uri
        Zii = self.Wri * Uri + self.Wii * Uii
        coef = jnp.stack([Mr, Mi, Zrr, Zri, Zir, Zii, self.Br, self.Bi], axis=0)

        yr = yr3.reshape(M, C)
        yi = yi3.reshape(M, C)

        # Pass 2: lane-dense folding (C lanes -> 128 lanes) for BN + activation.
        if 128 % C == 0 and M % (128 // C) == 0:
            F = 128 // C
            yr2 = yr.reshape(M // F, 128)
            yi2 = yi.reshape(M // F, 128)
            coef2 = jnp.tile(coef, (1, F))            # lane l -> channel l % C
        else:
            yr2, yi2, coef2 = yr, yi, coef

        tm2 = _pick_row_tile(yr2.shape[0], cap=1024)
        or2, oi2 = _bn_act(yr2, yi2, coef2, slope=self.slope, tm=tm2)

        or_ = jnp.transpose(or2.reshape(N, Ho, Wo, C), (0, 3, 1, 2))
        oi_ = jnp.transpose(oi2.reshape(N, Ho, Wo, C), (0, 3, 1, 2))
        return or_, oi_


# ----------------------------------------------------------------------------
# Pure-JAX reference (mirrors the PyTorch semantics) for validation
# ----------------------------------------------------------------------------
def reference_forward(enc, xr, xi):
    sh, sw = enc.stride
    ph, pw = enc.padding
    conv = lambda x, w: jax.lax.conv_general_dilated(
        x, w, window_strides=(sh, sw), padding=((ph, ph), (pw, pw)),
        dimension_numbers=("NCHW", "OIHW", "NCHW"),
        precision=jax.lax.Precision.HIGHEST)
    cr = conv(xr, enc.w_re) - conv(xi, enc.w_im)
    ci = conv(xi, enc.w_re) + conv(xr, enc.w_im)
    redux = (0, 2, 3)
    Mr = cr.mean(redux, keepdims=True)
    Mi = ci.mean(redux, keepdims=True)
    xr_c, xi_c = cr - Mr, ci - Mi
    Vrr = (xr_c * xr_c).mean(redux, keepdims=True) + enc.eps
    Vii = (xi_c * xi_c).mean(redux, keepdims=True) + enc.eps
    Vri = (xr_c * xi_c).mean(redux, keepdims=True)
    tau = Vrr + Vii
    delta = Vrr * Vii - Vri * Vri
    s = jnp.sqrt(delta)
    t = jnp.sqrt(tau + 2.0 * s)
    rst = 1.0 / (s * t)
    Urr, Uii, Uri = (s + Vii) * rst, (s + Vrr) * rst, -Vri * rst
    rs = lambda v: v.reshape(1, -1, 1, 1)
    Wrr, Wri, Wii = rs(enc.Wrr), rs(enc.Wri), rs(enc.Wii)
    Zrr = Wrr * Urr + Wri * Uri
    Zri = Wrr * Uri + Wri * Uii
    Zir = Wri * Urr + Wii * Uri
    Zii = Wri * Uri + Wii * Uii
    yr = Zrr * xr_c + Zri * xi_c + rs(enc.Br)
    yi = Zir * xr_c + Zii * xi_c + rs(enc.Bi)
    sl = enc.slope
    return jnp.where(yr >= 0, yr, sl * yr), jnp.where(yi >= 0, yi, sl * yi)


if __name__ == "__main__":
    # conv_cfg = (in_ch, out_ch, kernel_size, stride, padding), bias=False
    conv_cfg = (4, 8, (3, 3), (1, 1), (1, 1))
    enc = Encoder(conv_cfg, leaky_slope=0.1)

    key = jax.random.PRNGKey(0)
    k1, k2 = jax.random.split(key)
    xr = jax.random.normal(k1, (2, 4, 16, 16), jnp.float32)
    xi = jax.random.normal(k2, (2, 4, 16, 16), jnp.float32)

    out_r, out_i = enc(xr, xi)
    jax.block_until_ready((out_r, out_i))

    ref_r, ref_i = reference_forward(enc, xr, xi)
    # conv operands run in bf16 on the MXU (f32 accumulation) -> compare at a
    # correspondingly relaxed tolerance against the f32 reference.
    np.testing.assert_allclose(np.asarray(out_r), np.asarray(ref_r),
                               rtol=2e-2, atol=2e-2)
    np.testing.assert_allclose(np.asarray(out_i), np.asarray(ref_i),
                               rtol=2e-2, atol=2e-2)
    assert out_r.shape == (2, 8, 16, 16) and out_i.shape == (2, 8, 16, 16)
    print("KERNEL_OK")
</pallas_src>

<mosaic_0001>
module attributes {stable_mosaic.version = 11 : i64} {
  func.func @_conv_stats_kernel(%arg0: i32, %arg1: memref<1x18x18x4xf32, #tpu.memory_space<vmem>>, %arg2: memref<1x18x18x4xf32, #tpu.memory_space<vmem>>, %arg3: memref<9x4x16xbf16, #tpu.memory_space<vmem>>, %arg4: memref<1x256x8xf32, #tpu.memory_space<vmem>>, %arg5: memref<1x256x8xf32, #tpu.memory_space<vmem>>, %arg6: memref<1x5x8xf32, #tpu.memory_space<vmem>>, %arg7: memref<512x16xf32, #tpu.memory_space<vmem>>) attributes {dimension_semantics = [#tpu.dimension_semantics<parallel>], iteration_bounds = array<i64: 2>, scalar_prefetch = 0 : i64, scratch_operands = 1 : i64, tpu.core_type = #tpu.core_type<tc>, window_params = [{transform_indices = @transform_0, window_bounds = array<i64: 1, 18, 18, 4>}, {transform_indices = @transform_1, window_bounds = array<i64: 1, 18, 18, 4>}, {pipeline_mode = #tpu.pipeline_mode<synchronous>, transform_indices = @transform_2, window_bounds = array<i64: 9, 4, 16>}, {transform_indices = @transform_3, window_bounds = array<i64: 1, 256, 8>}, {transform_indices = @transform_4, window_bounds = array<i64: 1, 256, 8>}, {transform_indices = @transform_5, window_bounds = array<i64: 1, 5, 8>}]} {
    %cst = arith.constant 0.000000e+00 : f32
    %0 = vector.broadcast %cst : f32 to vector<512x16xf32>
    %c0 = arith.constant 0 : index
    %c0_0 = arith.constant 0 : index
    %1 = vector.load %arg7[%c0, %c0_0] : memref<512x16xf32, #tpu.memory_space<vmem>>, vector<512x16xf32>
    tpu.vector_store %arg7[%c0, %c0_0], %0 {strides = array<i32>} : memref<512x16xf32, #tpu.memory_space<vmem>>, vector<512x16xf32>,
    %c0_1 = arith.constant 0 : index
    %c0_2 = arith.constant 0 : index
    %c0_3 = arith.constant 0 : index
    %c0_4 = arith.constant 0 : index
    %2 = vector.load %arg1[%c0_1, %c0_2, %c0_3, %c0_4] : memref<1x18x18x4xf32, #tpu.memory_space<vmem>>, vector<1x16x16x4xf32>
    %3 = vector.shape_cast %2 : vector<1x16x16x4xf32> to vector<16x16x4xf32>
    %c0_5 = arith.constant 0 : index
    %c0_6 = arith.constant 0 : index
    %c0_7 = arith.constant 0 : index
    %c0_8 = arith.constant 0 : index
    %4 = vector.load %arg2[%c0_5, %c0_6, %c0_7, %c0_8] : memref<1x18x18x4xf32, #tpu.memory_space<vmem>>, vector<1x16x16x4xf32>
    %5 = vector.shape_cast %4 : vector<1x16x16x4xf32> to vector<16x16x4xf32>
    %6 = vector.shape_cast %3 : vector<16x16x4xf32> to vector<256x4xf32>
    %7 = arith.truncf %6 : vector<256x4xf32> to vector<256x4xbf16>
    %8 = vector.shape_cast %5 : vector<16x16x4xf32> to vector<256x4xf32>
    %9 = arith.truncf %8 : vector<256x4xf32> to vector<256x4xbf16>
    %10 = tpu.concatenate %7, %9 in 0 : vector<256x4xbf16>, vector<256x4xbf16> -> vector<512x4xbf16>
    %c0_9 = arith.constant 0 : index
    %c0_10 = arith.constant 0 : index
    %11 = vector.load %arg7[%c0_9, %c0_10] : memref<512x16xf32, #tpu.memory_space<vmem>>, vector<512x16xf32>
    %c0_11 = arith.constant 0 : index
    %c0_12 = arith.constant 0 : index
    %c0_13 = arith.constant 0 : index
    %12 = vector.load %arg3[%c0_11, %c0_12, %c0_13] : memref<9x4x16xbf16, #tpu.memory_space<vmem>>, vector<1x4x16xbf16>
    %13 = vector.shape_cast %12 : vector<1x4x16xbf16> to vector<4x16xbf16>
    %cst_14 = arith.constant dense<0.000000e+00> : vector<512x16xf32>
    %14 = tpu.matmul %10, %13, %cst_14 {dimension_numbers = #tpu.dot_dimension_numbers<[1], [0], [0], [1], [0, 0, 1, 1], [], []>} : vector<512x4xbf16>, vector<4x16xbf16>, vector<512x16xf32> -> vector<512x16xf32>
    %15 = arith.addf %11, %14 : vector<512x16xf32>
    %c0_15 = arith.constant 0 : index
    %c0_16 = arith.constant 0 : index
    %16 = vector.load %arg7[%c0_15, %c0_16] : memref<512x16xf32, #tpu.memory_space<vmem>>, vector<512x16xf32>
    tpu.vector_store %arg7[%c0_15, %c0_16], %15 {strides = array<i32>} : memref<512x16xf32, #tpu.memory_space<vmem>>, vector<512x16xf32>,
    %c0_17 = arith.constant 0 : index
    %c0_18 = arith.constant 0 : index
    %c1 = arith.constant 1 : index
    %c0_19 = arith.constant 0 : index
    %17 = vector.load %arg1[%c0_17, %c0_18, %c1, %c0_19] : memref<1x18x18x4xf32, #tpu.memory_space<vmem>>, vector<1x16x16x4xf32>
    %18 = vector.shape_cast %17 : vector<1x16x16x4xf32> to vector<16x16x4xf32>
    %c0_20 = arith.constant 0 : index
    %c0_21 = arith.constant 0 : index
    %c1_22 = arith.constant 1 : index
    %c0_23 = arith.constant 0 : index
    %19 = vector.load %arg2[%c0_20, %c0_21, %c1_22, %c0_23] : memref<1x18x18x4xf32, #tpu.memory_space<vmem>>, vector<1x16x16x4xf32>
    %20 = vector.shape_cast %19 : vector<1x16x16x4xf32> to vector<16x16x4xf32>
    %21 = vector.shape_cast %18 : vector<16x16x4xf32> to vector<256x4xf32>
    %22 = arith.truncf %21 : vector<256x4xf32> to vector<256x4xbf16>
    %23 = vector.shape_cast %20 : vector<16x16x4xf32> to vector<256x4xf32>
    %24 = arith.truncf %23 : vector<256x4xf32> to vector<256x4xbf16>
    %25 = tpu.concatenate %22, %24 in 0 : vector<256x4xbf16>, vector<256x4xbf16> -> vector<512x4xbf16>
    %c0_24 = arith.constant 0 : index
    %c0_25 = arith.constant 0 : index
    %26 = vector.load %arg7[%c0_24, %c0_25] : memref<512x16xf32, #tpu.memory_space<vmem>>, vector<512x16xf32>
    %c1_26 = arith.constant 1 : index
    %c0_27 = arith.constant 0 : index
    %c0_28 = arith.constant 0 : index
    %27 = vector.load %arg3[%c1_26, %c0_27, %c0_28] : memref<9x4x16xbf16, #tpu.memory_space<vmem>>, vector<1x4x16xbf16>
    %28 = vector.shape_cast %27 : vector<1x4x16xbf16> to vector<4x16xbf16>
    %cst_29 = arith.constant dense<0.000000e+00> : vector<512x16xf32>
    %29 = tpu.matmul %25, %28, %cst_29 {dimension_numbers = #tpu.dot_dimension_numbers<[1], [0], [0], [1], [0, 0, 1, 1], [], []>} : vector<512x4xbf16>, vector<4x16xbf16>, vector<512x16xf32> -> vector<512x16xf32>
    %30 = arith.addf %26, %29 : vector<512x16xf32>
    %c0_30 = arith.constant 0 : index
    %c0_31 = arith.constant 0 : index
    %31 = vector.load %arg7[%c0_30, %c0_31] : memref<512x16xf32, #tpu.memory_space<vmem>>, vector<512x16xf32>
    tpu.vector_store %arg7[%c0_30, %c0_31], %30 {strides = array<i32>} : memref<512x16xf32, #tpu.memory_space<vmem>>, vector<512x16xf32>,
    %c0_32 = arith.constant 0 : index
    %c0_33 = arith.constant 0 : index
    %c2 = arith.constant 2 : index
    %c0_34 = arith.constant 0 : index
    %32 = vector.load %arg1[%c0_32, %c0_33, %c2, %c0_34] : memref<1x18x18x4xf32, #tpu.memory_space<vmem>>, vector<1x16x16x4xf32>
    %33 = vector.shape_cast %32 : vector<1x16x16x4xf32> to vector<16x16x4xf32>
    %c0_35 = arith.constant 0 : index
    %c0_36 = arith.constant 0 : index
    %c2_37 = arith.constant 2 : index
    %c0_38 = arith.constant 0 : index
    %34 = vector.load %arg2[%c0_35, %c0_36, %c2_37, %c0_38] : memref<1x18x18x4xf32, #tpu.memory_space<vmem>>, vector<1x16x16x4xf32>
    %35 = vector.shape_cast %34 : vector<1x16x16x4xf32> to vector<16x16x4xf32>
    %36 = vector.shape_cast %33 : vector<16x16x4xf32> to vector<256x4xf32>
    %37 = arith.truncf %36 : vector<256x4xf32> to vector<256x4xbf16>
    %38 = vector.shape_cast %35 : vector<16x16x4xf32> to vector<256x4xf32>
    %39 = arith.truncf %38 : vector<256x4xf32> to vector<256x4xbf16>
    %40 = tpu.concatenate %37, %39 in 0 : vector<256x4xbf16>, vector<256x4xbf16> -> vector<512x4xbf16>
    %c0_39 = arith.constant 0 : index
    %c0_40 = arith.constant 0 : index
    %41 = vector.load %arg7[%c0_39, %c0_40] : memref<512x16xf32, #tpu.memory_space<vmem>>, vector<512x16xf32>
    %c2_41 = arith.constant 2 : index
    %c0_42 = arith.constant 0 : index
    %c0_43 = arith.constant 0 : index
    %42 = vector.load %arg3[%c2_41, %c0_42, %c0_43] : memref<9x4x16xbf16, #tpu.memory_space<vmem>>, vector<1x4x16xbf16>
    %43 = vector.shape_cast %42 : vector<1x4x16xbf16> to vector<4x16xbf16>
    %cst_44 = arith.constant dense<0.000000e+00> : vector<512x16xf32>
    %44 = tpu.matmul %40, %43, %cst_44 {dimension_numbers = #tpu.dot_dimension_numbers<[1], [0], [0], [1], [0, 0, 1, 1], [], []>} : vector<512x4xbf16>, vector<4x16xbf16>, vector<512x16xf32> -> vector<512x16xf32>
    %45 = arith.addf %41, %44 : vector<512x16xf32>
    %c0_45 = arith.constant 0 : index
    %c0_46 = arith.constant 0 : index
    %46 = vector.load %arg7[%c0_45, %c0_46] : memref<512x16xf32, #tpu.memory_space<vmem>>, vector<512x16xf32>
    tpu.vector_store %arg7[%c0_45, %c0_46], %45 {strides = array<i32>} : memref<512x16xf32, #tpu.memory_space<vmem>>, vector<512x16xf32>,
    %c0_47 = arith.constant 0 : index
    %c1_48 = arith.constant 1 : index
    %c0_49 = arith.constant 0 : index
    %c0_50 = arith.constant 0 : index
    %47 = vector.load %arg1[%c0_47, %c1_48, %c0_49, %c0_50] : memref<1x18x18x4xf32, #tpu.memory_space<vmem>>, vector<1x16x16x4xf32>
    %48 = vector.shape_cast %47 : vector<1x16x16x4xf32> to vector<16x16x4xf32>
    %c0_51 = arith.constant 0 : index
    %c1_52 = arith.constant 1 : index
    %c0_53 = arith.constant 0 : index
    %c0_54 = arith.constant 0 : index
    %49 = vector.load %arg2[%c0_51, %c1_52, %c0_53, %c0_54] : memref<1x18x18x4xf32, #tpu.memory_space<vmem>>, vector<1x16x16x4xf32>
    %50 = vector.shape_cast %49 : vector<1x16x16x4xf32> to vector<16x16x4xf32>
    %51 = vector.shape_cast %48 : vector<16x16x4xf32> to vector<256x4xf32>
    %52 = arith.truncf %51 : vector<256x4xf32> to vector<256x4xbf16>
    %53 = vector.shape_cast %50 : vector<16x16x4xf32> to vector<256x4xf32>
    %54 = arith.truncf %53 : vector<256x4xf32> to vector<256x4xbf16>
    %55 = tpu.concatenate %52, %54 in 0 : vector<256x4xbf16>, vector<256x4xbf16> -> vector<512x4xbf16>
    %c0_55 = arith.constant 0 : index
    %c0_56 = arith.constant 0 : index
    %56 = vector.load %arg7[%c0_55, %c0_56] : memref<512x16xf32, #tpu.memory_space<vmem>>, vector<512x16xf32>
    %c3 = arith.constant 3 : index
    %c0_57 = arith.constant 0 : index
    %c0_58 = arith.constant 0 : index
    %57 = vector.load %arg3[%c3, %c0_57, %c0_58] : memref<9x4x16xbf16, #tpu.memory_space<vmem>>, vector<1x4x16xbf16>
    %58 = vector.shape_cast %57 : vector<1x4x16xbf16> to vector<4x16xbf16>
    %cst_59 = arith.constant dense<0.000000e+00> : vector<512x16xf32>
    %59 = tpu.matmul %55, %58, %cst_59 {dimension_numbers = #tpu.dot_dimension_numbers<[1], [0], [0], [1], [0, 0, 1, 1], [], []>} : vector<512x4xbf16>, vector<4x16xbf16>, vector<512x16xf32> -> vector<512x16xf32>
    %60 = arith.addf %56, %59 : vector<512x16xf32>
    %c0_60 = arith.constant 0 : index
    %c0_61 = arith.constant 0 : index
    %61 = vector.load %arg7[%c0_60, %c0_61] : memref<512x16xf32, #tpu.memory_space<vmem>>, vector<512x16xf32>
    tpu.vector_store %arg7[%c0_60, %c0_61], %60 {strides = array<i32>} : memref<512x16xf32, #tpu.memory_space<vmem>>, vector<512x16xf32>,
    %c0_62 = arith.constant 0 : index
    %c1_63 = arith.constant 1 : index
    %c1_64 = arith.constant 1 : index
    %c0_65 = arith.constant 0 : index
    %62 = vector.load %arg1[%c0_62, %c1_63, %c1_64, %c0_65] : memref<1x18x18x4xf32, #tpu.memory_space<vmem>>, vector<1x16x16x4xf32>
    %63 = vector.shape_cast %62 : vector<1x16x16x4xf32> to vector<16x16x4xf32>
    %c0_66 = arith.constant 0 : index
    %c1_67 = arith.constant 1 : index
    %c1_68 = arith.constant 1 : index
    %c0_69 = arith.constant 0 : index
    %64 = vector.load %arg2[%c0_66, %c1_67, %c1_68, %c0_69] : memref<1x18x18x4xf32, #tpu.memory_space<vmem>>, vector<1x16x16x4xf32>
    %65 = vector.shape_cast %64 : vector<1x16x16x4xf32> to vector<16x16x4xf32>
    %66 = vector.shape_cast %63 : vector<16x16x4xf32> to vector<256x4xf32>
    %67 = arith.truncf %66 : vector<256x4xf32> to vector<256x4xbf16>
    %68 = vector.shape_cast %65 : vector<16x16x4xf32> to vector<256x4xf32>
    %69 = arith.truncf %68 : vector<256x4xf32> to vector<256x4xbf16>
    %70 = tpu.concatenate %67, %69 in 0 : vector<256x4xbf16>, vector<256x4xbf16> -> vector<512x4xbf16>
    %c0_70 = arith.constant 0 : index
    %c0_71 = arith.constant 0 : index
    %71 = vector.load %arg7[%c0_70, %c0_71] : memref<512x16xf32, #tpu.memory_space<vmem>>, vector<512x16xf32>
    %c4 = arith.constant 4 : index
    %c0_72 = arith.constant 0 : index
    %c0_73 = arith.constant 0 : index
    %72 = vector.load %arg3[%c4, %c0_72, %c0_73] : memref<9x4x16xbf16, #tpu.memory_space<vmem>>, vector<1x4x16xbf16>
    %73 = vector.shape_cast %72 : vector<1x4x16xbf16> to vector<4x16xbf16>
    %cst_74 = arith.constant dense<0.000000e+00> : vector<512x16xf32>
    %74 = tpu.matmul %70, %73, %cst_74 {dimension_numbers = #tpu.dot_dimension_numbers<[1], [0], [0], [1], [0, 0, 1, 1], [], []>} : vector<512x4xbf16>, vector<4x16xbf16>, vector<512x16xf32> -> vector<512x16xf32>
    %75 = arith.addf %71, %74 : vector<512x16xf32>
    %c0_75 = arith.constant 0 : index
    %c0_76 = arith.constant 0 : index
    %76 = vector.load %arg7[%c0_75, %c0_76] : memref<512x16xf32, #tpu.memory_space<vmem>>, vector<512x16xf32>
    tpu.vector_store %arg7[%c0_75, %c0_76], %75 {strides = array<i32>} : memref<512x16xf32, #tpu.memory_space<vmem>>, vector<512x16xf32>,
    %c0_77 = arith.constant 0 : index
    %c1_78 = arith.constant 1 : index
    %c2_79 = arith.constant 2 : index
    %c0_80 = arith.constant 0 : index
    %77 = vector.load %arg1[%c0_77, %c1_78, %c2_79, %c0_80] : memref<1x18x18x4xf32, #tpu.memory_space<vmem>>, vector<1x16x16x4xf32>
    %78 = vector.shape_cast %77 : vector<1x16x16x4xf32> to vector<16x16x4xf32>
    %c0_81 = arith.constant 0 : index
    %c1_82 = arith.constant 1 : index
    %c2_83 = arith.constant 2 : index
    %c0_84 = arith.constant 0 : index
    %79 = vector.load %arg2[%c0_81, %c1_82, %c2_83, %c0_84] : memref<1x18x18x4xf32, #tpu.memory_space<vmem>>, vector<1x16x16x4xf32>
    %80 = vector.shape_cast %79 : vector<1x16x16x4xf32> to vector<16x16x4xf32>
    %81 = vector.shape_cast %78 : vector<16x16x4xf32> to vector<256x4xf32>
    %82 = arith.truncf %81 : vector<256x4xf32> to vector<256x4xbf16>
    %83 = vector.shape_cast %80 : vector<16x16x4xf32> to vector<256x4xf32>
    %84 = arith.truncf %83 : vector<256x4xf32> to vector<256x4xbf16>
    %85 = tpu.concatenate %82, %84 in 0 : vector<256x4xbf16>, vector<256x4xbf16> -> vector<512x4xbf16>
    %c0_85 = arith.constant 0 : index
    %c0_86 = arith.constant 0 : index
    %86 = vector.load %arg7[%c0_85, %c0_86] : memref<512x16xf32, #tpu.memory_space<vmem>>, vector<512x16xf32>
    %c5 = arith.constant 5 : index
    %c0_87 = arith.constant 0 : index
    %c0_88 = arith.constant 0 : index
    %87 = vector.load %arg3[%c5, %c0_87, %c0_88] : memref<9x4x16xbf16, #tpu.memory_space<vmem>>, vector<1x4x16xbf16>
    %88 = vector.shape_cast %87 : vector<1x4x16xbf16> to vector<4x16xbf16>
    %cst_89 = arith.constant dense<0.000000e+00> : vector<512x16xf32>
    %89 = tpu.matmul %85, %88, %cst_89 {dimension_numbers = #tpu.dot_dimension_numbers<[1], [0], [0], [1], [0, 0, 1, 1], [], []>} : vector<512x4xbf16>, vector<4x16xbf16>, vector<512x16xf32> -> vector<512x16xf32>
    %90 = arith.addf %86, %89 : vector<512x16xf32>
    %c0_90 = arith.constant 0 : index
    %c0_91 = arith.constant 0 : index
    %91 = vector.load %arg7[%c0_90, %c0_91] : memref<512x16xf32, #tpu.memory_space<vmem>>, vector<512x16xf32>
    tpu.vector_store %arg7[%c0_90, %c0_91], %90 {strides = array<i32>} : memref<512x16xf32, #tpu.memory_space<vmem>>, vector<512x16xf32>,
    %c0_92 = arith.constant 0 : index
    %c2_93 = arith.constant 2 : index
    %c0_94 = arith.constant 0 : index
    %c0_95 = arith.constant 0 : index
    %92 = vector.load %arg1[%c0_92, %c2_93, %c0_94, %c0_95] : memref<1x18x18x4xf32, #tpu.memory_space<vmem>>, vector<1x16x16x4xf32>
    %93 = vector.shape_cast %92 : vector<1x16x16x4xf32> to vector<16x16x4xf32>
    %c0_96 = arith.constant 0 : index
    %c2_97 = arith.constant 2 : index
    %c0_98 = arith.constant 0 : index
    %c0_99 = arith.constant 0 : index
    %94 = vector.load %arg2[%c0_96, %c2_97, %c0_98, %c0_99] : memref<1x18x18x4xf32, #tpu.memory_space<vmem>>, vector<1x16x16x4xf32>
    %95 = vector.shape_cast %94 : vector<1x16x16x4xf32> to vector<16x16x4xf32>
    %96 = vector.shape_cast %93 : vector<16x16x4xf32> to vector<256x4xf32>
    %97 = arith.truncf %96 : vector<256x4xf32> to vector<256x4xbf16>
    %98 = vector.shape_cast %95 : vector<16x16x4xf32> to vector<256x4xf32>
    %99 = arith.truncf %98 : vector<256x4xf32> to vector<256x4xbf16>
    %100 = tpu.concatenate %97, %99 in 0 : vector<256x4xbf16>, vector<256x4xbf16> -> vector<512x4xbf16>
    %c0_100 = arith.constant 0 : index
    %c0_101 = arith.constant 0 : index
    %101 = vector.load %arg7[%c0_100, %c0_101] : memref<512x16xf32, #tpu.memory_space<vmem>>, vector<512x16xf32>
    %c6 = arith.constant 6 : index
    %c0_102 = arith.constant 0 : index
    %c0_103 = arith.constant 0 : index
    %102 = vector.load %arg3[%c6, %c0_102, %c0_103] : memref<9x4x16xbf16, #tpu.memory_space<vmem>>, vector<1x4x16xbf16>
    %103 = vector.shape_cast %102 : vector<1x4x16xbf16> to vector<4x16xbf16>
    %cst_104 = arith.constant dense<0.000000e+00> : vector<512x16xf32>
    %104 = tpu.matmul %100, %103, %cst_104 {dimension_numbers = #tpu.dot_dimension_numbers<[1], [0], [0], [1], [0, 0, 1, 1], [], []>} : vector<512x4xbf16>, vector<4x16xbf16>, vector<512x16xf32> -> vector<512x16xf32>
    %105 = arith.addf %101, %104 : vector<512x16xf32>
    %c0_105 = arith.constant 0 : index
    %c0_106 = arith.constant 0 : index
    %106 = vector.load %arg7[%c0_105, %c0_106] : memref<512x16xf32, #tpu.memory_space<vmem>>, vector<512x16xf32>
    tpu.vector_store %arg7[%c0_105, %c0_106], %105 {strides = array<i32>} : memref<512x16xf32, #tpu.memory_space<vmem>>, vector<512x16xf32>,
    %c0_107 = arith.constant 0 : index
    %c2_108 = arith.constant 2 : index
    %c1_109 = arith.constant 1 : index
    %c0_110 = arith.constant 0 : index
    %107 = vector.load %arg1[%c0_107, %c2_108, %c1_109, %c0_110] : memref<1x18x18x4xf32, #tpu.memory_space<vmem>>, vector<1x16x16x4xf32>
    %108 = vector.shape_cast %107 : vector<1x16x16x4xf32> to vector<16x16x4xf32>
    %c0_111 = arith.constant 0 : index
    %c2_112 = arith.constant 2 : index
    %c1_113 = arith.constant 1 : index
    %c0_114 = arith.constant 0 : index
    %109 = vector.load %arg2[%c0_111, %c2_112, %c1_113, %c0_114] : memref<1x18x18x4xf32, #tpu.memory_space<vmem>>, vector<1x16x16x4xf32>
    %110 = vector.shape_cast %109 : vector<1x16x16x4xf32> to vector<16x16x4xf32>
    %111 = vector.shape_cast %108 : vector<16x16x4xf32> to vector<256x4xf32>
    %112 = arith.truncf %111 : vector<256x4xf32> to vector<256x4xbf16>
    %113 = vector.shape_cast %110 : vector<16x16x4xf32> to vector<256x4xf32>
    %114 = arith.truncf %113 : vector<256x4xf32> to vector<256x4xbf16>
    %115 = tpu.concatenate %112, %114 in 0 : vector<256x4xbf16>, vector<256x4xbf16> -> vector<512x4xbf16>
    %c0_115 = arith.constant 0 : index
    %c0_116 = arith.constant 0 : index
    %116 = vector.load %arg7[%c0_115, %c0_116] : memref<512x16xf32, #tpu.memory_space<vmem>>, vector<512x16xf32>
    %c7 = arith.constant 7 : index
    %c0_117 = arith.constant 0 : index
    %c0_118 = arith.constant 0 : index
    %117 = vector.load %arg3[%c7, %c0_117, %c0_118] : memref<9x4x16xbf16, #tpu.memory_space<vmem>>, vector<1x4x16xbf16>
    %118 = vector.shape_cast %117 : vector<1x4x16xbf16> to vector<4x16xbf16>
    %cst_119 = arith.constant dense<0.000000e+00> : vector<512x16xf32>
    %119 = tpu.matmul %115, %118, %cst_119 {dimension_numbers = #tpu.dot_dimension_numbers<[1], [0], [0], [1], [0, 0, 1, 1], [], []>} : vector<512x4xbf16>, vector<4x16xbf16>, vector<512x16xf32> -> vector<512x16xf32>
    %120 = arith.addf %116, %119 : vector<512x16xf32>
    %c0_120 = arith.constant 0 : index
    %c0_121 = arith.constant 0 : index
    %121 = vector.load %arg7[%c0_120, %c0_121] : memref<512x16xf32, #tpu.memory_space<vmem>>, vector<512x16xf32>
    tpu.vector_store %arg7[%c0_120, %c0_121], %120 {strides = array<i32>} : memref<512x16xf32, #tpu.memory_space<vmem>>, vector<512x16xf32>,
    %c0_122 = arith.constant 0 : index
    %c2_123 = arith.constant 2 : index
    %c2_124 = arith.constant 2 : index
    %c0_125 = arith.constant 0 : index
    %122 = vector.load %arg1[%c0_122, %c2_123, %c2_124, %c0_125] : memref<1x18x18x4xf32, #tpu.memory_space<vmem>>, vector<1x16x16x4xf32>
    %123 = vector.shape_cast %122 : vector<1x16x16x4xf32> to vector<16x16x4xf32>
    %c0_126 = arith.constant 0 : index
    %c2_127 = arith.constant 2 : index
    %c2_128 = arith.constant 2 : index
    %c0_129 = arith.constant 0 : index
    %124 = vector.load %arg2[%c0_126, %c2_127, %c2_128, %c0_129] : memref<1x18x18x4xf32, #tpu.memory_space<vmem>>, vector<1x16x16x4xf32>
    %125 = vector.shape_cast %124 : vector<1x16x16x4xf32> to vector<16x16x4xf32>
    %126 = vector.shape_cast %123 : vector<16x16x4xf32> to vector<256x4xf32>
    %127 = arith.truncf %126 : vector<256x4xf32> to vector<256x4xbf16>
    %128 = vector.shape_cast %125 : vector<16x16x4xf32> to vector<256x4xf32>
    %129 = arith.truncf %128 : vector<256x4xf32> to vector<256x4xbf16>
    %130 = tpu.concatenate %127, %129 in 0 : vector<256x4xbf16>, vector<256x4xbf16> -> vector<512x4xbf16>
    %c0_130 = arith.constant 0 : index
    %c0_131 = arith.constant 0 : index
    %131 = vector.load %arg7[%c0_130, %c0_131] : memref<512x16xf32, #tpu.memory_space<vmem>>, vector<512x16xf32>
    %c8 = arith.constant 8 : index
    %c0_132 = arith.constant 0 : index
    %c0_133 = arith.constant 0 : index
    %132 = vector.load %arg3[%c8, %c0_132, %c0_133] : memref<9x4x16xbf16, #tpu.memory_space<vmem>>, vector<1x4x16xbf16>
    %133 = vector.shape_cast %132 : vector<1x4x16xbf16> to vector<4x16xbf16>
    %cst_134 = arith.constant dense<0.000000e+00> : vector<512x16xf32>
    %134 = tpu.matmul %130, %133, %cst_134 {dimension_numbers = #tpu.dot_dimension_numbers<[1], [0], [0], [1], [0, 0, 1, 1], [], []>} : vector<512x4xbf16>, vector<4x16xbf16>, vector<512x16xf32> -> vector<512x16xf32>
    %135 = arith.addf %131, %134 : vector<512x16xf32>
    %c0_135 = arith.constant 0 : index
    %c0_136 = arith.constant 0 : index
    %136 = vector.load %arg7[%c0_135, %c0_136] : memref<512x16xf32, #tpu.memory_space<vmem>>, vector<512x16xf32>
    tpu.vector_store %arg7[%c0_135, %c0_136], %135 {strides = array<i32>} : memref<512x16xf32, #tpu.memory_space<vmem>>, vector<512x16xf32>,
    %c0_137 = arith.constant 0 : index
    %c0_138 = arith.constant 0 : index
    %137 = vector.load %arg7[%c0_137, %c0_138] : memref<512x16xf32, #tpu.memory_space<vmem>>, vector<512x16xf32>
    %138 = vector.extract_strided_slice %137 {offsets = [0, 0], sizes = [256, 16], strides = [1, 1]} : vector<512x16xf32> to vector<256x16xf32>
    %139 = vector.extract_strided_slice %137 {offsets = [256, 0], sizes = [256, 16], strides = [1, 1]} : vector<512x16xf32> to vector<256x16xf32>
    %140 = vector.extract_strided_slice %138 {offsets = [0, 0], sizes = [256, 8], strides = [1, 1]} : vector<256x16xf32> to vector<256x8xf32>
    %141 = vector.extract_strided_slice %139 {offsets = [0, 8], sizes = [256, 8], strides = [1, 1]} : vector<256x16xf32> to vector<256x8xf32>
    %142 = arith.subf %140, %141 : vector<256x8xf32>
    %143 = vector.extract_strided_slice %139 {offsets = [0, 0], sizes = [256, 8], strides = [1, 1]} : vector<256x16xf32> to vector<256x8xf32>
    %144 = vector.extract_strided_slice %138 {offsets = [0, 8], sizes = [256, 8], strides = [1, 1]} : vector<256x16xf32> to vector<256x8xf32>
    %145 = arith.addf %143, %144 : vector<256x8xf32>
    %c0_139 = arith.constant 0 : index
    %c0_140 = arith.constant 0 : index
    %c0_141 = arith.constant 0 : index
    %146 = vector.load %arg4[%c0_139, %c0_140, %c0_141] : memref<1x256x8xf32, #tpu.memory_space<vmem>>, vector<1x256x8xf32>
    %147 = vector.shape_cast %146 : vector<1x256x8xf32> to vector<256x8xf32>
    %148 = vector.shape_cast %142 : vector<256x8xf32> to vector<1x256x8xf32>
    tpu.vector_store %arg4[%c0_139, %c0_140, %c0_141], %148 {strides = array<i32>} : memref<1x256x8xf32, #tpu.memory_space<vmem>>, vector<1x256x8xf32>,
    %c0_142 = arith.constant 0 : index
    %c0_143 = arith.constant 0 : index
    %c0_144 = arith.constant 0 : index
    %149 = vector.load %arg5[%c0_142, %c0_143, %c0_144] : memref<1x256x8xf32, #tpu.memory_space<vmem>>, vector<1x256x8xf32>
    %150 = vector.shape_cast %149 : vector<1x256x8xf32> to vector<256x8xf32>
    %151 = vector.shape_cast %145 : vector<256x8xf32> to vector<1x256x8xf32>
    tpu.vector_store %arg5[%c0_142, %c0_143, %c0_144], %151 {strides = array<i32>} : memref<1x256x8xf32, #tpu.memory_space<vmem>>, vector<1x256x8xf32>,
    %cst_145 = arith.constant dense<0.000000e+00> : vector<8xf32>
    %152 = vector.multi_reduction <add>, %142, %cst_145 [0] : vector<256x8xf32> to vector<8xf32>
    %153 = vector.shape_cast %152 : vector<8xf32> to vector<1x8xf32>
    %c0_146 = arith.constant 0 : index
    %c0_147 = arith.constant 0 : index
    %c0_148 = arith.constant 0 : index
    %154 = vector.load %arg6[%c0_146, %c0_147, %c0_148] : memref<1x5x8xf32, #tpu.memory_space<vmem>>, vector<1x1x8xf32>
    %155 = vector.shape_cast %154 : vector<1x1x8xf32> to vector<1x8xf32>
    %156 = vector.shape_cast %153 : vector<1x8xf32> to vector<1x1x8xf32>
    tpu.vector_store %arg6[%c0_146, %c0_147, %c0_148], %156 {strides = array<i32>} : memref<1x5x8xf32, #tpu.memory_space<vmem>>, vector<1x1x8xf32>,
    %cst_149 = arith.constant dense<0.000000e+00> : vector<8xf32>
    %157 = vector.multi_reduction <add>, %145, %cst_149 [0] : vector<256x8xf32> to vector<8xf32>
    %158 = vector.shape_cast %157 : vector<8xf32> to vector<1x8xf32>
    %c0_150 = arith.constant 0 : index
    %c1_151 = arith.constant 1 : index
    %c0_152 = arith.constant 0 : index
    %159 = vector.load %arg6[%c0_150, %c1_151, %c0_152] : memref<1x5x8xf32, #tpu.memory_space<vmem>>, vector<1x1x8xf32>
    %160 = vector.shape_cast %159 : vector<1x1x8xf32> to vector<1x8xf32>
    %161 = vector.shape_cast %158 : vector<1x8xf32> to vector<1x1x8xf32>
    tpu.vector_store %arg6[%c0_150, %c1_151, %c0_152], %161 {strides = array<i32>} : memref<1x5x8xf32, #tpu.memory_space<vmem>>, vector<1x1x8xf32>,
    %162 = arith.mulf %142, %142 : vector<256x8xf32>
    %cst_153 = arith.constant dense<0.000000e+00> : vector<8xf32>
    %163 = vector.multi_reduction <add>, %162, %cst_153 [0] : vector<256x8xf32> to vector<8xf32>
    %164 = vector.shape_cast %163 : vector<8xf32> to vector<1x8xf32>
    %c0_154 = arith.constant 0 : index
    %c2_155 = arith.constant 2 : index
    %c0_156 = arith.constant 0 : index
    %165 = vector.load %arg6[%c0_154, %c2_155, %c0_156] : memref<1x5x8xf32, #tpu.memory_space<vmem>>, vector<1x1x8xf32>
    %166 = vector.shape_cast %165 : vector<1x1x8xf32> to vector<1x8xf32>
    %167 = vector.shape_cast %164 : vector<1x8xf32> to vector<1x1x8xf32>
    tpu.vector_store %arg6[%c0_154, %c2_155, %c0_156], %167 {strides = array<i32>} : memref<1x5x8xf32, #tpu.memory_space<vmem>>, vector<1x1x8xf32>,
    %168 = arith.mulf %145, %145 : vector<256x8xf32>
    %cst_157 = arith.constant dense<0.000000e+00> : vector<8xf32>
    %169 = vector.multi_reduction <add>, %168, %cst_157 [0] : vector<256x8xf32> to vector<8xf32>
    %170 = vector.shape_cast %169 : vector<8xf32> to vector<1x8xf32>
    %c0_158 = arith.constant 0 : index
    %c3_159 = arith.constant 3 : index
    %c0_160 = arith.constant 0 : index
    %171 = vector.load %arg6[%c0_158, %c3_159, %c0_160] : memref<1x5x8xf32, #tpu.memory_space<vmem>>, vector<1x1x8xf32>
    %172 = vector.shape_cast %171 : vector<1x1x8xf32> to vector<1x8xf32>
    %173 = vector.shape_cast %170 : vector<1x8xf32> to vector<1x1x8xf32>
    tpu.vector_store %arg6[%c0_158, %c3_159, %c0_160], %173 {strides = array<i32>} : memref<1x5x8xf32, #tpu.memory_space<vmem>>, vector<1x1x8xf32>,
    %174 = arith.mulf %142, %145 : vector<256x8xf32>
    %cst_161 = arith.constant dense<0.000000e+00> : vector<8xf32>
    %175 = vector.multi_reduction <add>, %174, %cst_161 [0] : vector<256x8xf32> to vector<8xf32>
    %176 = vector.shape_cast %175 : vector<8xf32> to vector<1x8xf32>
    %c0_162 = arith.constant 0 : index
    %c4_163 = arith.constant 4 : index
    %c0_164 = arith.constant 0 : index
    %177 = vector.load %arg6[%c0_162, %c4_163, %c0_164] : memref<1x5x8xf32, #tpu.memory_space<vmem>>, vector<1x1x8xf32>
    %178 = vector.shape_cast %177 : vector<1x1x8xf32> to vector<1x8xf32>
    %179 = vector.shape_cast %176 : vector<1x8xf32> to vector<1x1x8xf32>
    tpu.vector_store %arg6[%c0_162, %c4_163, %c0_164], %179 {strides = array<i32>} : memref<1x5x8xf32, #tpu.memory_space<vmem>>, vector<1x1x8xf32>,
    return
  }
  func.func @transform_0(%arg0: i32) -> (i32, i32, i32, i32) {
    %c0_i32 = arith.constant 0 : i32
    %c0_i32_0 = arith.constant 0 : i32
    %c0_i32_1 = arith.constant 0 : i32
    %c0_i32_2 = arith.constant 0 : i32
    return %arg0, %c0_i32, %c0_i32_0, %c0_i32_1 : i32, i32, i32, i32
  }
  func.func @transform_1(%arg0: i32) -> (i32, i32, i32, i32) {
    %c0_i32 = arith.constant 0 : i32
    %c0_i32_0 = arith.constant 0 : i32
    %c0_i32_1 = arith.constant 0 : i32
    %c0_i32_2 = arith.constant 0 : i32
    return %arg0, %c0_i32, %c0_i32_0, %c0_i32_1 : i32, i32, i32, i32
  }
  func.func @transform_2(%arg0: i32) -> (i32, i32, i32) {
    %c0_i32 = arith.constant 0 : i32
    %c0_i32_0 = arith.constant 0 : i32
    %c0_i32_1 = arith.constant 0 : i32
    %c0_i32_2 = arith.constant 0 : i32
    return %c0_i32, %c0_i32_0, %c0_i32_1 : i32, i32, i32
  }
  func.func @transform_3(%arg0: i32) -> (i32, i32, i32) {
    %c0_i32 = arith.constant 0 : i32
    %c0_i32_0 = arith.constant 0 : i32
    %c0_i32_1 = arith.constant 0 : i32
    return %arg0, %c0_i32, %c0_i32_0 : i32, i32, i32
  }
  func.func @transform_4(%arg0: i32) -> (i32, i32, i32) {
    %c0_i32 = arith.constant 0 : i32
    %c0_i32_0 = arith.constant 0 : i32
    %c0_i32_1 = arith.constant 0 : i32
    return %arg0, %c0_i32, %c0_i32_0 : i32, i32, i32
  }
  func.func @transform_5(%arg0: i32) -> (i32, i32, i32) {
    %c0_i32 = arith.constant 0 : i32
    %c0_i32_0 = arith.constant 0 : i32
    %c0_i32_1 = arith.constant 0 : i32
    return %arg0, %c0_i32, %c0_i32_0 : i32, i32, i32
  }
}

</mosaic_0001>

<bundles_post_ra>
// kernel: tpu_custom_call.1
= control target key start
LH: loop header
LB: loop body
LE: loop exit
PB: predicated region body
PF: predicated region fallthrough
CT: control target
= control target key end

     0   :  { %s9152_s18 = smov 0   ;;  %s11725_s0 = inlined_call_operand.vmem [shape: f32[2,18,18,4], index: 0, kind: input, shape index: {}]   ;;  %s11726_s1 = inlined_call_operand.vmem [shape: f32[2,18,18,4], index: 1, kind: input, shape index: {}]   ;;  %s11727_s2 = inlined_call_operand.vmem [shape: bf16[9,4,16], index: 2, kind: input, shape index: {}]   ;;  %s11728_s3 = inlined_call_operand.vmem [shape: f32[2,256,8], index: 3, kind: output, shape index: {0}]   ;;  %s11729_s4 = inlined_call_operand.vmem [shape: f32[2,256,8], index: 4, kind: output, shape index: {1}]   ;;  %s11730_s5 = inlined_call_operand.vmem [shape: f32[2,5,8], index: 5, kind: output, shape index: {2}]  }
   0x1 LB: > { %s7468_s19 = sadd.s32 4294967295, %s9118_s18   ;;  %p7472_p0 = scmp.ge.s32.totalorder %s9118_s18, 1  ;;  %s9118_s18 = sphi %s9152_s18, %s16_s18  }
   0x2   : > { %p202_p1 = scmp.lt.s32.totalorder %s9118_s18, 3 }
   0x4   : > { %p203_p2 = pnand %p7472_p0, %p202_p1 }
   0x5   : > { %v494_v0 = vld [vmem:[%s11727_s2] sm:$0x3] (!%p203_p2)  ;;  %vm592_vm0 = vcmask (!%p203_p2), 1041408   ;;  %p244_p3 = scmp.lt.s32.totalorder (!%p203_p2), %s7468_s19, 1  ;;  %v7512_v2 = vld [vmem:[%s11727_s2 + $0x2] sm:$0x3] (!%p203_p2) }
   0x6   : > { %206 = sbr.rel (%p203_p2) target bundleno = 1024 (0x400), region = 32  ;;  %9058 = vmatprep.subr.msk.bf16.mxu1 (!%p203_p2), %vm592_vm0, %v494_v0  ;;  %v594_v1 = vsel (!%p203_p2), %vm592_vm0, %v494_v0, 0  ;;  %9057 = vmatprep.subr.msk.bf16.mxu0 (!%p203_p2), %vm592_vm0, %v494_v0  ;;  %v7545_v3 = vld [vmem:[%s11727_s2 + $0x4] sm:$0x3] (!%p203_p2)  ;;  %vm495_vm1 = vcmask (!%p203_p2), 31744   ;;  %v1272_v12 = vsel (!%p203_p2), %vm592_vm0, %v7512_v2, 0 }
   0x7   : > { %9056 = vmatpush3.bf16.msra.mxu1 (!%p203_p2), %v594_v1  ;;  %8462 = vmatpush3.bf16.msra.mxu0 (!%p203_p2), %v594_v1  ;;  %v1950_v19 = vsel (!%p203_p2), %vm592_vm0, %v7545_v3, 0  ;;  %v9205_v20 = vld [vmem:[%s11727_s2 + $0x6] sm:$0x3] (!%p203_p2)  ;;  %v9214_v24 = vld [vmem:[%s11727_s2 + $0x8] sm:$0x3] (!%p203_p2)  ;;  %vm269_vm2 = vcmask (!%p203_p2), 130048  }
   0x8   : > { %9059 = vmatprep.subr.msk.bf16.mxu1 (!%p203_p2), %vm592_vm0, %v7512_v2  ;;  %9060 = vmatprep.subr.msk.bf16.mxu0 (!%p203_p2), %vm592_vm0, %v7545_v3  ;;  %vm6825_vm3 = vcmask (!%p203_p2), 64512   ;;  %vm6959_vm4 = vcmask (!%p203_p2), 57344  }
   0xd   : > { %s11732_s19 = smov (!%p244_p3, %s7468_s19), 1 }
   0xe   : > { %s9067_s26 = smul.u32 432, %s11732_s19  ;;  %s8162_s27 = sshll.u32 %s11732_s19, 8 }
   0xf   : > { %s10963_s30 = scalar_lea.vmem %s11729_s4, %s8162_s27  ;;  %s11186_s8 = scalar_lea.vmem %s11728_s3, %s8162_s27 }
  0x10   : > { %s9180_s29 = scalar_lea.vmem %s11726_s1, %s9067_s26  ;;  %s9185_s7 = scalar_lea.vmem %s11725_s0, %s9067_s26 }
  0x11   : > { %v366_v4 = vld [vmem:[%s9180_s29] sm:$0xff]  ;;  %v367_v5 = vld [vmem:[%s9180_s29 + $0x8] sm:$0xff]  ;;  %v368_v6 = vld [vmem:[%s9180_s29 + $0x18] sm:$0xff]  ;;  %s9121_s26 = smov 120   ;;  %s7479_s9 = sshll.u32 %s11732_s19, 3 }
  0x12   : > { %v414_v7 = vpack.c.bf16 %v367_v5, %v366_v4  ;;  %v369_v8 = vld [vmem:[%s9180_s29 + $0x20] sm:$0xff]  ;;  %v335_v10 = vld [vmem:[%s9185_s7 + $0x8] sm:$0xff]  ;;  %v336_v14 = vld [vmem:[%s9185_s7 + $0x18] sm:$0xff]  ;;  %s11598_s19 = scalar_lea.vmem %s11730_s5, %s7479_s9 }
  0x13   : > { %v334_v9 = vld [vmem:[%s9185_s7] sm:$0xff]  ;;  %v415_v11 = vpack.c.bf16 %v369_v8, %v368_v6  ;;  %v370_v16 = vld [vmem:[%s9180_s29 + $0x30] sm:$0xff]  ;;  %v371_v18 = vld [vmem:[%s9180_s29 + $0x38] sm:$0xff] }
  0x14   : > { %v398_v13 = vpack.c.bf16 %v335_v10, %v334_v9  ;;  %v337_v15 = vld [vmem:[%s9185_s7 + $0x20] sm:$0xff]  ;;  %8495 = vmatprep.mubr.msk.bf16.mxu1 %vm495_vm1, %v414_v7  ;;  %v416_v21 = vpack.c.bf16 %v371_v18, %v370_v16  ;;  %v338_v22 = vld [vmem:[%s9185_s7 + $0x30] sm:$0xff]  ;;  %v339_v23 = vld [vmem:[%s9185_s7 + $0x38] sm:$0xff] }
  0x15   : > { %v9198_v17 = vpack.c.bf16 %v337_v15, %v336_v14  ;;  %8496 = vmatmul.mubr.msk.bf16.vlgmr.msra.gmra.mrb[0].mxu1 %vm495_vm1, %v415_v11  ;;  %v372_v25 = vld [vmem:[%s9180_s29 + $0x48] sm:$0xff]  ;;  %v373_v26 = vld [vmem:[%s9180_s29 + $0x50] sm:$0xff]  ;;  %v9220_v27 = vpack.c.bf16 %v339_v23, %v338_v22  ;;  %v374_v30 = vld [vmem:[%s9180_s29 + $0x60] sm:$0xff] }
  0x16   : > { %8463 = vmatprep.mubr.msk.bf16.mxu0 %vm495_vm1, %v398_v13  ;;  %8528 = vmatpush3.bf16.msra.mxu1 %v1272_v12  ;;  %v340_v28 = vld [vmem:[%s9185_s7 + $0x48] sm:$0xff]  ;;  %v341_v29 = vld [vmem:[%s9185_s7 + $0x50] sm:$0xff]  ;;  %v342_v32 = vld [vmem:[%s9185_s7 + $0x60] sm:$0xff]  ;;  %v417_v34 = vpack.c.bf16 %v373_v26, %v372_v25 }
  0x17   : > { %8464 = vmatmul.mubr.msk.bf16.vlgmr.msra.gmra.mrb[0].mxu0 %vm495_vm1, %v9198_v17  ;;  %8499 = vmatprep.mubr.msk.bf16.mxu1 %vm495_vm1, %v416_v21  ;;  %v375_v31 = vld [vmem:[%s9180_s29 + $0x68] sm:$0xff]  ;;  %v9235_v35 = vpack.c.bf16 %v341_v29, %v340_v28  ;;  %v376_v38 = vld [vmem:[%s9180_s29 + $0x78] sm:$0xff]  ;;  %v377_v39 = vld [vmem:[%s9180_s29 + $0x80] sm:$0xff] }
  0x18   : > { %8594 = vmatpush3.bf16.msra.mxu0 %v1950_v19  ;;  %8467 = vmatprep.mubr.msk.bf16.mxu0 %vm495_vm1, %v9220_v27  ;;  %v343_v33 = vld [vmem:[%s9185_s7 + $0x68] sm:$0xff]  ;;  %v418_v36 = vpack.c.bf16 %v375_v31, %v374_v30  ;;  %v344_v40 = vld [vmem:[%s9185_s7 + $0x78] sm:$0xff]  ;;  %v345_v41 = vld [vmem:[%s9185_s7 + $0x80] sm:$0xff]  ;;  %v419_v46 = vpack.c.bf16 %v377_v39, %v376_v38 }
  0x19   : > { %9061 = vmatprep.subr.msk.bf16.mxu1 %vm592_vm0, %v9205_v20  ;;  %9062 = vmatprep.subr.msk.bf16.mxu0 %vm592_vm0, %v9214_v24  ;;  %v9237_v37 = vpack.c.bf16 %v343_v33, %v342_v32  ;;  %v378_v42 = vld [vmem:[%s9180_s29 + $0x90] sm:$0xff]  ;;  %v379_v43 = vld [vmem:[%s9180_s29 + $0x98] sm:$0xff]  ;;  %v9253_v47 = vpack.c.bf16 %v345_v41, %v344_v40  ;;  %v380_v50 = vld [vmem:[%s9180_s29 + $0xa8] sm:$0xff] }
  0x1a   : > { %v346_v44 = vld [vmem:[%s9185_s7 + $0x90] sm:$0xff]  ;;  %v347_v45 = vld [vmem:[%s9185_s7 + $0x98] sm:$0xff]  ;;  %v420_v48 = vpack.c.bf16 %v379_v43, %v378_v42  ;;  %v348_v52 = vld [vmem:[%s9185_s7 + $0xa8] sm:$0xff] }
  0x1b   : > { %v9255_v49 = vpack.c.bf16 %v347_v45, %v346_v44  ;;  %v381_v51 = vld [vmem:[%s9180_s29 + $0xb0] sm:$0xff]  ;;  %v382_v54 = vld [vmem:[%s9180_s29 + $0xc0] sm:$0xff]  ;;  %v383_v55 = vld [vmem:[%s9180_s29 + $0xc8] sm:$0xff] }
  0x1c   : > { %v349_v53 = vld [vmem:[%s9185_s7 + $0xb0] sm:$0xff]  ;;  %v350_v56 = vld [vmem:[%s9185_s7 + $0xc0] sm:$0xff]  ;;  %v351_v57 = vld [vmem:[%s9185_s7 + $0xc8] sm:$0xff]  ;;  %v421_v58 = vpack.c.bf16 %v381_v51, %v380_v50  ;;  %v422_v60 = vpack.c.bf16 %v383_v55, %v382_v54 }
  0x1d   : > { %8500 = vmatmul.mubr.msk.bf16.gmra.mrb[4].mxu1 %vm495_vm1, %v417_v34  ;;  %v9271_v59 = vpack.c.bf16 %v349_v53, %v348_v52  ;;  %v9273_v61 = vpack.c.bf16 %v351_v57, %v350_v56  ;;  %v384_v62 = vld [vmem:[%s9180_s29 + $0xd8] sm:$0xff]  ;;  %v385_v63 = vld [vmem:[%s9180_s29 + $0xe0] sm:$0xff]  ;;  %v386_v2 = vld [vmem:[%s9180_s29 + $0xf0] sm:$0xff] }
  0x1e   : > { %8503 = vmatprep.mubr.msk.bf16.mxu1 %vm495_vm1, %v418_v36  ;;  %v352_v0 = vld [vmem:[%s9185_s7 + $0xd8] sm:$0xff]  ;;  %v353_v1 = vld [vmem:[%s9185_s7 + $0xe0] sm:$0xff]  ;;  %v354_v4 = vld [vmem:[%s9185_s7 + $0xf0] sm:$0xff]  ;;  %v423_v6 = vpack.c.bf16 %v385_v63, %v384_v62 }
  0x1f   : > { %8468 = vmatmul.mubr.msk.bf16.gmra.mrb[4].mxu0 %vm495_vm1, %v9235_v35  ;;  %v387_v3 = vld [vmem:[%s9180_s29 + $0xf8] sm:$0xff]  ;;  %v9289_v7 = vpack.c.bf16 %v353_v1, %v352_v0  ;;  %v388_v10 = vld [vmem:[%s9180_s29 + $0x108] sm:$0xff]  ;;  %v389_v11 = vld [vmem:[%s9180_s29 + $0x110] sm:$0xff] }
  0x20   : > { %8471 = vmatprep.mubr.msk.bf16.mxu0 %vm495_vm1, %v9237_v37  ;;  %v355_v5 = vld [vmem:[%s9185_s7 + $0xf8] sm:$0xff]  ;;  %v424_v8 = vpack.c.bf16 %v387_v3, %v386_v2  ;;  %v356_v12 = vld [vmem:[%s9185_s7 + $0x108] sm:$0xff]  ;;  %v357_v13 = vld [vmem:[%s9185_s7 + $0x110] sm:$0xff]  ;;  %v425_v19 = vpack.c.bf16 %v389_v11, %v388_v10  ;;  %v2630_v2 = vsel %vm592_vm0, %v9205_v20, 0 }
  0x21   : > { %v9291_v9 = vpack.c.bf16 %v355_v5, %v354_v4  ;;  %v390_v14 = vld [vmem:[%s9180_s29 + $0x120] sm:$0xff]  ;;  %v391_v15 = vld [vmem:[%s9180_s29 + $0x128] sm:$0xff]  ;;  %v409_v21 = vpack.c.bf16 %v357_v13, %v356_v12  ;;  %v392_v25 = vld [vmem:[%s9180_s29 + $0x138] sm:$0xff] }
  0x22   : > { %v358_v16 = vld [vmem:[%s9185_s7 + $0x120] sm:$0xff]  ;;  %v359_v18 = vld [vmem:[%s9185_s7 + $0x128] sm:$0xff]  ;;  %v426_v22 = vpack.c.bf16 %v391_v15, %v390_v14  ;;  %v360_v28 = vld [vmem:[%s9185_s7 + $0x138] sm:$0xff] }
  0x23   : > { %v410_v23 = vpack.c.bf16 %v359_v18, %v358_v16  ;;  %v393_v26 = vld [vmem:[%s9180_s29 + $0x140] sm:$0xff]  ;;  %v394_v30 = vld [vmem:[%s9180_s29 + $0x150] sm:$0xff]  ;;  %v395_v31 = vld [vmem:[%s9180_s29 + $0x158] sm:$0xff] }
  0x24   : > { %v361_v29 = vld [vmem:[%s9185_s7 + $0x140] sm:$0xff]  ;;  %v362_v32 = vld [vmem:[%s9185_s7 + $0x150] sm:$0xff]  ;;  %v363_v33 = vld [vmem:[%s9185_s7 + $0x158] sm:$0xff]  ;;  %v427_v34 = vpack.c.bf16 %v393_v26, %v392_v25  ;;  %v428_v38 = vpack.c.bf16 %v395_v31, %v394_v30 }
  0x25   : > { %8504 = vmatmul.mubr.msk.bf16.gmra.mrb[8].mxu1 %vm495_vm1, %v419_v46  ;;  %v411_v36 = vpack.c.bf16 %v361_v29, %v360_v28  ;;  %v412_v39 = vpack.c.bf16 %v363_v33, %v362_v32  ;;  %v396_v40 = vld [vmem:[%s9180_s29 + $0x168] sm:$0xff]  ;;  %v397_v41 = vld [vmem:[%s9180_s29 + $0x170] sm:$0xff]  ;;  %v1015_v54 = vld [vmem:[%s9185_s7 + $0x19] sm:$0xff]  ;;  %v9120_v33 = vmov 0.0  }
  0x26   : > { %8507 = vmatprep.mubr.msk.bf16.mxu1 %vm495_vm1, %v420_v48  ;;  %v364_v42 = vld [vmem:[%s9185_s7 + $0x168] sm:$0xff]  ;;  %v365_v43 = vld [vmem:[%s9185_s7 + $0x170] sm:$0xff]  ;;  %v429_v50 = vpack.c.bf16 %v397_v41, %v396_v40  ;;  %v1018_v57 = vld [vmem:[%s9185_s7 + $0x39] sm:$0xff]  ;;  %304 = vst.msk [vmem:[#allocation2 + $0x110] sm:$0xff] %vm269_vm2, %v9120_v33 }
  0x27   : > { %8472 = vmatmul.mubr.msk.bf16.gmra.mrb[8].mxu0 %vm495_vm1, %v9253_v47  ;;  %v1013_v44 = vld [vmem:[%s9185_s7 + $0x1] sm:$0xff]  ;;  %v1014_v45 = vld [vmem:[%s9185_s7 + $0x9] sm:$0xff]  ;;  %v413_v51 = vpack.c.bf16 %v365_v43, %v364_v42  ;;  %v1017_v56 = vld [vmem:[%s9185_s7 + $0x31] sm:$0xff]  ;;  %270 = vst.msk [vmem:[#allocation2] sm:$0xff] %vm269_vm2, %v9120_v33 }
  0x28   : > { %8475 = vmatprep.mubr.msk.bf16.mxu0 %vm495_vm1, %v9255_v49  ;;  %v1691_v46 = vld [vmem:[%s9185_s7 + $0x2] sm:$0xff]  ;;  %v1692_v48 = vld [vmem:[%s9185_s7 + $0xa] sm:$0xff]  ;;  %v1077_v52 = vpack.c.bf16 %v1014_v45, %v1013_v44  ;;  %v1695_v63 = vld [vmem:[%s9185_s7 + $0x32] sm:$0xff]  ;;  %v9345_v1 = vpack.c.bf16 %v1018_v57, %v1017_v56  ;;  %271 = vst.msk [vmem:[#allocation2 + $0x8] sm:$0xff] %vm269_vm2, %v9120_v33 }
  0x29   : > { %v1755_v53 = vpack.c.bf16 %v1692_v48, %v1691_v46  ;;  %v1016_v55 = vld [vmem:[%s9185_s7 + $0x21] sm:$0xff]  ;;  %v9352_v5 = vld [vmem:[%s11727_s2 + $0xa] sm:$0x3]  ;;  %v1698_v12 = vld [vmem:[%s9185_s7 + $0x52] sm:$0xff]  ;;  %272 = vst.msk [vmem:[#allocation2 + $0x10] sm:$0xff] %vm269_vm2, %v9120_v33 }
  0x2a   : > { %v9341_v62 = vpack.c.bf16 %v1016_v55, %v1015_v54  ;;  %v1696_v0 = vld [vmem:[%s9185_s7 + $0x3a] sm:$0xff]  ;;  %v1019_v20 = vld [vmem:[%s9185_s7 + $0x49] sm:$0xff]  ;;  %v9391_v25 = vld [vmem:[%s9185_s7 + $0x91] sm:$0xff]  ;;  %273 = vst.msk [vmem:[#allocation2 + $0x18] sm:$0xff] %vm269_vm2, %v9120_v33 }
  0x2b   : > { %v1757_v4 = vpack.c.bf16 %v1696_v0, %v1695_v63  ;;  %v1021_v10 = vld [vmem:[%s9185_s7 + $0x61] sm:$0xff]  ;;  %v1022_v11 = vld [vmem:[%s9185_s7 + $0x69] sm:$0xff]  ;;  %v9394_v26 = vld [vmem:[%s9185_s7 + $0x99] sm:$0xff]  ;;  %274 = vst.msk [vmem:[#allocation2 + $0x20] sm:$0xff] %vm269_vm2, %v9120_v33 }
  0x2c   : > { %v1699_v14 = vld [vmem:[%s9185_s7 + $0x62] sm:$0xff]  ;;  %v1700_v15 = vld [vmem:[%s9185_s7 + $0x6a] sm:$0xff]  ;;  %v9374_v16 = vpack.c.bf16 %v1022_v11, %v1021_v10  ;;  %v9398_v28 = vld [vmem:[%s9185_s7 + $0x7a] sm:$0xff]  ;;  %275 = vst.msk [vmem:[#allocation2 + $0x28] sm:$0xff] %vm269_vm2, %v9120_v33 }
  0x2d   : > { %8508 = vmatmul.mubr.msk.bf16.gmra.mrb[12].mxu1 %vm495_vm1, %v421_v58  ;;  %v1693_v58 = vld [vmem:[%s9185_s7 + $0x1a] sm:$0xff]  ;;  %v9401_v29 = vld [vmem:[%s9185_s7 + $0x82] sm:$0xff]  ;;  %v9406_v31 = vld [vmem:[%s9185_s7 + $0x92] sm:$0xff]  ;;  %276 = vst.msk [vmem:[#allocation2 + $0x30] sm:$0xff] %vm269_vm2, %v9120_v33 }
  0x2e   : > { %8511 = vmatprep.mubr.msk.bf16.mxu1 %vm495_vm1, %v422_v60  ;;  %v1694_v60 = vld [vmem:[%s9185_s7 + $0x22] sm:$0xff]  ;;  %v9409_v32 = vld [vmem:[%s9185_s7 + $0x9a] sm:$0xff]  ;;  %277 = vst.msk [vmem:[#allocation2 + $0x38] sm:$0xff] %vm269_vm2, %v9120_v33  ;;  %278 = vst.msk [vmem:[#allocation2 + $0x40] sm:$0xff] %vm269_vm2, %v9120_v33 }
  0x2f   : > { %8476 = vmatmul.mubr.msk.bf16.gmra.mrb[12].mxu0 %vm495_vm1, %v9271_v59  ;;  %v1756_v3 = vpack.c.bf16 %v1694_v60, %v1693_v58  ;;  %279 = vst.msk [vmem:[#allocation2 + $0x48] sm:$0xff] %vm269_vm2, %v9120_v33  ;;  %280 = vst.msk [vmem:[#allocation2 + $0x50] sm:$0xff] %vm269_vm2, %v9120_v33  ;;  %v1028_v40 = vld [vmem:[%s9185_s7 + $0xb1] sm:$0xff]  ;;  %v1029_v41 = vld [vmem:[%s9185_s7 + $0xc1] sm:$0xff] }
  0x30   : > { %8479 = vmatprep.mubr.msk.bf16.mxu0 %vm495_vm1, %v9273_v61  ;;  %281 = vst.msk [vmem:[#allocation2 + $0x58] sm:$0xff] %vm269_vm2, %v9120_v33  ;;  %282 = vst.msk [vmem:[#allocation2 + $0x60] sm:$0xff] %vm269_vm2, %v9120_v33  ;;  %v1030_v42 = vld [vmem:[%s9185_s7 + $0xc9] sm:$0xff]  ;;  %v1706_v44 = vld [vmem:[%s9185_s7 + $0xb2] sm:$0xff] }
  0x31   : > { %283 = vst.msk [vmem:[#allocation2 + $0x68] sm:$0xff] %vm269_vm2, %v9120_v33  ;;  %284 = vst.msk [vmem:[#allocation2 + $0x70] sm:$0xff] %vm269_vm2, %v9120_v33  ;;  %v1705_v43 = vld [vmem:[%s9185_s7 + $0xaa] sm:$0xff]  ;;  %v1707_v46 = vld [vmem:[%s9185_s7 + $0xc2] sm:$0xff] }
  0x32   : > { %285 = vst.msk [vmem:[#allocation2 + $0x78] sm:$0xff] %vm269_vm2, %v9120_v33  ;;  %286 = vst.msk [vmem:[#allocation2 + $0x80] sm:$0xff] %vm269_vm2, %v9120_v33  ;;  %v1708_v48 = vld [vmem:[%s9185_s7 + $0xca] sm:$0xff]  ;;  %v1032_v54 = vld [vmem:[%s9185_s7 + $0xe1] sm:$0xff] }
  0x33   : > { %287 = vst.msk [vmem:[#allocation2 + $0x88] sm:$0xff] %vm269_vm2, %v9120_v33  ;;  %288 = vst.msk [vmem:[#allocation2 + $0x90] sm:$0xff] %vm269_vm2, %v9120_v33  ;;  %v1033_v55 = vld [vmem:[%s9185_s7 + $0xf1] sm:$0xff]  ;;  %v1034_v56 = vld [vmem:[%s9185_s7 + $0xf9] sm:$0xff] }
  0x34   : > { %289 = vst.msk [vmem:[#allocation2 + $0x98] sm:$0xff] %vm269_vm2, %v9120_v33  ;;  %290 = vst.msk [vmem:[#allocation2 + $0xa0] sm:$0xff] %vm269_vm2, %v9120_v33  ;;  %v1709_v57 = vld [vmem:[%s9185_s7 + $0xda] sm:$0xff]  ;;  %v1710_v58 = vld [vmem:[%s9185_s7 + $0xe2] sm:$0xff] }
  0x35   : > { %8512 = vmatmul.mubr.msk.bf16.gmra.mrb[16].mxu1 %vm495_vm1, %v423_v6  ;;  %v3308_v6 = vsel %vm592_vm0, %v9214_v24, 0  ;;  %v1697_v24 = vld [vmem:[%s9185_s7 + $0x4a] sm:$0xff]  ;;  %291 = vst.msk [vmem:[#allocation2 + $0xa8] sm:$0xff] %vm269_vm2, %v9120_v33  ;;  %292 = vst.msk [vmem:[#allocation2 + $0xb0] sm:$0xff] %vm269_vm2, %v9120_v33  ;;  %v1711_v63 = vld [vmem:[%s9185_s7 + $0xf2] sm:$0xff] }
  0x36   : > { %8515 = vmatprep.mubr.msk.bf16.mxu1 %vm495_vm1, %v424_v8  ;;  %v1020_v8 = vld [vmem:[%s9185_s7 + $0x51] sm:$0xff]  ;;  %v1758_v18 = vpack.c.bf16 %v1698_v12, %v1697_v24  ;;  %293 = vst.msk [vmem:[#allocation2 + $0xb8] sm:$0xff] %vm269_vm2, %v9120_v33  ;;  %294 = vst.msk [vmem:[#allocation2 + $0xc0] sm:$0xff] %vm269_vm2, %v9120_v33  ;;  %v1712_v0 = vld [vmem:[%s9185_s7 + $0xfa] sm:$0xff] }
  0x37   : > { %8480 = vmatmul.mubr.msk.bf16.gmra.mrb[16].mxu0 %vm495_vm1, %v9289_v7  ;;  %v9370_v13 = vpack.c.bf16 %v1020_v8, %v1019_v20  ;;  %295 = vst.msk [vmem:[#allocation2 + $0xc8] sm:$0xff] %vm269_vm2, %v9120_v33  ;;  %296 = vst.msk [vmem:[#allocation2 + $0xd0] sm:$0xff] %vm269_vm2, %v9120_v33  ;;  %v1036_v20 = vld [vmem:[%s9185_s7 + $0x111] sm:$0xff]  ;;  %v1037_v8 = vld [vmem:[%s9185_s7 + $0x121] sm:$0xff] }
  0x38   : > { %8483 = vmatprep.mubr.msk.bf16.mxu0 %vm495_vm1, %v9291_v9  ;;  %297 = vst.msk [vmem:[#allocation2 + $0xd8] sm:$0xff] %vm269_vm2, %v9120_v33  ;;  %298 = vst.msk [vmem:[#allocation2 + $0xe0] sm:$0xff] %vm269_vm2, %v9120_v33  ;;  %v1038_v10 = vld [vmem:[%s9185_s7 + $0x129] sm:$0xff]  ;;  %v1714_v24 = vld [vmem:[%s9185_s7 + $0x112] sm:$0xff] }
  0x39   : > { %299 = vst.msk [vmem:[#allocation2 + $0xe8] sm:$0xff] %vm269_vm2, %v9120_v33  ;;  %300 = vst.msk [vmem:[#allocation2 + $0xf0] sm:$0xff] %vm269_vm2, %v9120_v33  ;;  %v1713_v11 = vld [vmem:[%s9185_s7 + $0x10a] sm:$0xff] }
  0x3a   : > { %301 = vst.msk [vmem:[#allocation2 + $0xf8] sm:$0xff] %vm269_vm2, %v9120_v33  ;;  %302 = vst.msk [vmem:[#allocation2 + $0x100] sm:$0xff] %vm269_vm2, %v9120_v33 }
  0x3b   : > { %303 = vst.msk [vmem:[#allocation2 + $0x108] sm:$0xff] %vm269_vm2, %v9120_v33  ;;  %305 = vst.msk [vmem:[#allocation2 + $0x118] sm:$0xff] %vm269_vm2, %v9120_v33 }
  0x3c   : > { %306 = vst.msk [vmem:[#allocation2 + $0x120] sm:$0xff] %vm269_vm2, %v9120_v33  ;;  %307 = vst.msk [vmem:[#allocation2 + $0x128] sm:$0xff] %vm269_vm2, %v9120_v33 }
  0x3d   : > { %8516 = vmatmul.mubr.msk.bf16.gmra.mrb[20].mxu1 %vm495_vm1, %v425_v19  ;;  %v1759_v19 = vpack.c.bf16 %v1700_v15, %v1699_v14  ;;  %308 = vst.msk [vmem:[#allocation2 + $0x130] sm:$0xff] %vm269_vm2, %v9120_v33  ;;  %309 = vst.msk [vmem:[#allocation2 + $0x138] sm:$0xff] %vm269_vm2, %v9120_v33  ;;  %v1715_v14 = vld [vmem:[%s9185_s7 + $0x122] sm:$0xff]  ;;  %v1716_v15 = vld [vmem:[%s9185_s7 + $0x12a] sm:$0xff] }
  0x3e   : > { %8519 = vmatprep.mubr.msk.bf16.mxu1 %vm495_vm1, %v426_v22  ;;  %v1023_v22 = vld [vmem:[%s9185_s7 + $0x79] sm:$0xff]  ;;  %310 = vst.msk [vmem:[#allocation2 + $0x140] sm:$0xff] %vm269_vm2, %v9120_v33  ;;  %311 = vst.msk [vmem:[#allocation2 + $0x148] sm:$0xff] %vm269_vm2, %v9120_v33 }
  0x3f   : > { %8484 = vmatmul.mubr.msk.bf16.gmra.mrb[20].mxu0 %vm495_vm1, %v409_v21  ;;  %v9381_v21 = vld [vmem:[%s11727_s2 + $0xc] sm:$0x3]  ;;  %312 = vst.msk [vmem:[#allocation2 + $0x150] sm:$0xff] %vm269_vm2, %v9120_v33  ;;  %313 = vst.msk [vmem:[#allocation2 + $0x158] sm:$0xff] %vm269_vm2, %v9120_v33 }
  0x40   : > { %8487 = vmatprep.mubr.msk.bf16.mxu0 %vm495_vm1, %v410_v23  ;;  %v1024_v23 = vld [vmem:[%s9185_s7 + $0x81] sm:$0xff]  ;;  %314 = vst.msk [vmem:[#allocation2 + $0x160] sm:$0xff] %vm269_vm2, %v9120_v33  ;;  %315 = vst.msk [vmem:[#allocation2 + $0x168] sm:$0xff] %vm269_vm2, %v9120_v33 }
  0x41   : > { %v9403_v30 = vpack.c.bf16 %v1024_v23, %v1023_v22  ;;  %316 = vst.msk [vmem:[#allocation2 + $0x170] sm:$0xff] %vm269_vm2, %v9120_v33  ;;  %317 = vst.msk [vmem:[#allocation2 + $0x178] sm:$0xff] %vm269_vm2, %v9120_v33  ;;  %v1767_v22 = vpack.c.bf16 %v1716_v15, %v1715_v14  ;;  %v1039_v23 = vld [vmem:[%s9185_s7 + $0x139] sm:$0xff]  ;;  %v1051_v14 = vld [vmem:[%s9180_s29 + $0x49] sm:$0xff] }
  0x42   : > { %318 = vst.msk [vmem:[#allocation2 + $0x180] sm:$0xff] %vm269_vm2, %v9120_v33  ;;  %319 = vst.msk [vmem:[#allocation2 + $0x188] sm:$0xff] %vm269_vm2, %v9120_v33  ;;  %v1052_v15 = vld [vmem:[%s9180_s29 + $0x51] sm:$0xff] }
  0x43   : > { %320 = vst.msk [vmem:[#allocation2 + $0x190] sm:$0xff] %vm269_vm2, %v9120_v33  ;;  %321 = vst.msk [vmem:[#allocation2 + $0x198] sm:$0xff] %vm269_vm2, %v9120_v33 }
  0x44   : > { %322 = vst.msk [vmem:[#allocation2 + $0x1a0] sm:$0xff] %vm269_vm2, %v9120_v33  ;;  %323 = vst.msk [vmem:[#allocation2 + $0x1a8] sm:$0xff] %vm269_vm2, %v9120_v33 }
  0x45   : > { %8520 = vmatmul.mubr.msk.bf16.gmra.mrb[24].mxu1 %vm495_vm1, %v427_v34  ;;  %324 = vst.msk [vmem:[#allocation2 + $0x1b0] sm:$0xff] %vm269_vm2, %v9120_v33  ;;  %325 = vst.msk [vmem:[#allocation2 + $0x1b8] sm:$0xff] %vm269_vm2, %v9120_v33  ;;  %v9541_v34 = vpack.c.bf16 %v9394_v26, %v9391_v25  ;;  %v1040_v25 = vld [vmem:[%s9185_s7 + $0x141] sm:$0xff]  ;;  %v1041_v26 = vld [vmem:[%s9185_s7 + $0x151] sm:$0xff] }
  0x46   : > { %8523 = vmatprep.mubr.msk.bf16.mxu1 %vm495_vm1, %v428_v38  ;;  %326 = vst.msk [vmem:[#allocation2 + $0x1c0] sm:$0xff] %vm269_vm2, %v9120_v33  ;;  %327 = vst.msk [vmem:[#allocation2 + $0x1c8] sm:$0xff] %vm269_vm2, %v9120_v33  ;;  %v1761_v38 = vpack.c.bf16 %v9409_v32, %v9406_v31  ;;  %v1718_v31 = vld [vmem:[%s9185_s7 + $0x142] sm:$0xff]  ;;  %v9613_v32 = vpack.c.bf16 %v1040_v25, %v1039_v23  ;;  %v1729_v23 = vld [vmem:[%s9180_s29 + $0x4a] sm:$0xff] }
  0x47   : > { %8488 = vmatmul.mubr.msk.bf16.gmra.mrb[24].mxu0 %vm495_vm1, %v411_v36  ;;  %328 = vst.msk [vmem:[#allocation2 + $0x1d0] sm:$0xff] %vm269_vm2, %v9120_v33  ;;  %329 = vst.msk [vmem:[#allocation2 + $0x1d8] sm:$0xff] %vm269_vm2, %v9120_v33  ;;  %v1760_v36 = vpack.c.bf16 %v9401_v29, %v9398_v28  ;;  %v1042_v28 = vld [vmem:[%s9185_s7 + $0x159] sm:$0xff] }
  0x48   : > { %8491 = vmatprep.mubr.msk.bf16.mxu0 %vm495_vm1, %v412_v39  ;;  %330 = vst.msk [vmem:[#allocation2 + $0x1e0] sm:$0xff] %vm269_vm2, %v9120_v33  ;;  %331 = vst.msk [vmem:[#allocation2 + $0x1e8] sm:$0xff] %vm269_vm2, %v9120_v33  ;;  %v1027_v39 = vld [vmem:[%s9185_s7 + $0xa9] sm:$0xff]  ;;  %v1717_v29 = vld [vmem:[%s9185_s7 + $0x13a] sm:$0xff] }
  0x49   : > { %332 = vst.msk [vmem:[#allocation2 + $0x1f0] sm:$0xff] %vm269_vm2, %v9120_v33  ;;  %333 = vst.msk [vmem:[#allocation2 + $0x1f8] sm:$0xff] %vm269_vm2, %v9120_v33  ;;  %v9559_v45 = vpack.c.bf16 %v1028_v40, %v1027_v39  ;;  %v1719_v33 = vld [vmem:[%s9185_s7 + $0x152] sm:$0xff]  ;;  %v1768_v39 = vpack.c.bf16 %v1718_v31, %v1717_v29  ;;  %v1732_v29 = vld [vmem:[%s9180_s29 + $0x6a] sm:$0xff] }
  0x4a   : > { %v1730_v25 = vld [vmem:[%s9180_s29 + $0x52] sm:$0xff] }
  0x4d   : > { %8524 = vmatmul.mubr.msk.bf16.gmra.mrb[28].mxu1 %vm495_vm1, %v429_v50  ;;  %v9563_v50 = vpack.c.bf16 %v1030_v42, %v1029_v41  ;;  %v1043_v41 = vld [vmem:[%s9185_s7 + $0x169] sm:$0xff]  ;;  %v1044_v42 = vld [vmem:[%s9185_s7 + $0x171] sm:$0xff] }
  0x4e   : > { %8529 = vmatprep.mubr.msk.bf16.mxu1 %vm495_vm1, %v1077_v52  ;;  %v1763_v52 = vpack.c.bf16 %v1708_v48, %v1707_v46  ;;  %v1721_v46 = vld [vmem:[%s9185_s7 + $0x16a] sm:$0xff]  ;;  %v1722_v48 = vld [vmem:[%s9185_s7 + $0x172] sm:$0xff] }
  0x4f   : > { %8492 = vmatmul.mubr.msk.bf16.gmra.mrb[28].mxu0 %vm495_vm1, %v413_v51  ;;  %v1762_v51 = vpack.c.bf16 %v1706_v44, %v1705_v43  ;;  %v1045_v43 = vld [vmem:[%s9180_s29 + $0x1] sm:$0xff]  ;;  %v1046_v44 = vld [vmem:[%s9180_s29 + $0x9] sm:$0xff] }
  0x50   : > { %8595 = vmatprep.mubr.msk.bf16.mxu0 %vm495_vm1, %v1755_v53  ;;  %v1031_v53 = vld [vmem:[%s9185_s7 + $0xd9] sm:$0xff] }
  0x51   : > { %v9577_v60 = vpack.c.bf16 %v1032_v54, %v1031_v53  ;;  %v1724_v53 = vld [vmem:[%s9180_s29 + $0xa] sm:$0xff]  ;;  %v1093_v54 = vpack.c.bf16 %v1046_v44, %v1045_v43  ;;  %v1733_v43 = vld [vmem:[%s9180_s29 + $0x7a] sm:$0xff]  ;;  %v1734_v44 = vld [vmem:[%s9180_s29 + $0x82] sm:$0xff] }
  0x55   : > { %8530 = vmatmul.mubr.msk.bf16.vlgmr.msra.gmra.mrb[32].mxu1 %vm495_vm1, %v9341_v62 }
  0x56   : > { %8660 = vmatpush3.bf16.msra.mxu1 %v2630_v2  ;;  %8533 = vmatprep.mubr.msk.bf16.mxu1 %vm495_vm1, %v9345_v1  ;;  %v9581_v2 = vpack.c.bf16 %v1034_v56, %v1033_v55  ;;  %v1770_v55 = vpack.c.bf16 %v1722_v48, %v1721_v46  ;;  %v1735_v48 = vld [vmem:[%s9180_s29 + $0x92] sm:$0xff] }
  0x57   : > { %8596 = vmatmul.mubr.msk.bf16.vlgmr.msra.gmra.mrb[32].mxu0 %vm495_vm1, %v1756_v3  ;;  %9063 = vmatprep.subr.msk.bf16.mxu1 %vm592_vm0, %v9352_v5  ;;  %v1764_v3 = vpack.c.bf16 %v1710_v58, %v1709_v57  ;;  %v1047_v57 = vld [vmem:[%s9180_s29 + $0x19] sm:$0xff]  ;;  %v1048_v58 = vld [vmem:[%s9180_s29 + $0x21] sm:$0xff] }
  0x58   : > { %8726 = vmatpush3.bf16.msra.mxu0 %v3308_v6  ;;  %8599 = vmatprep.mubr.msk.bf16.mxu0 %vm495_vm1, %v1757_v4  ;;  %v1765_v4 = vpack.c.bf16 %v1712_v0, %v1711_v63  ;;  %v1035_v6 = vld [vmem:[%s9185_s7 + $0x109] sm:$0xff]  ;;  %v1049_v63 = vld [vmem:[%s9180_s29 + $0x31] sm:$0xff]  ;;  %v1050_v0 = vld [vmem:[%s9180_s29 + $0x39] sm:$0xff] }
  0x59   : > { %9064 = vmatprep.subr.msk.bf16.mxu0 %vm592_vm0, %v9381_v21  ;;  %v9595_v12 = vpack.c.bf16 %v1036_v20, %v1035_v6  ;;  %v1094_v6 = vpack.c.bf16 %v1048_v58, %v1047_v57  ;;  %v1727_v20 = vld [vmem:[%s9180_s29 + $0x32] sm:$0xff]  ;;  %v1061_v58 = vld [vmem:[%s9180_s29 + $0xc1] sm:$0xff] }
  0x5a   : > { %v1060_v57 = vld [vmem:[%s9180_s29 + $0xb1] sm:$0xff] }
  0x5d   : > { %8534 = vmatmul.mubr.msk.bf16.gmra.mrb[36].mxu1 %vm495_vm1, %v9370_v13 }
  0x5e   : > { %8537 = vmatprep.mubr.msk.bf16.mxu1 %vm495_vm1, %v9374_v16 }
  0x5f   : > { %8600 = vmatmul.mubr.msk.bf16.gmra.mrb[36].mxu0 %vm495_vm1, %v1758_v18  ;;  %v9599_v18 = vpack.c.bf16 %v1038_v10, %v1037_v8  ;;  %v1728_v8 = vld [vmem:[%s9180_s29 + $0x3a] sm:$0xff]  ;;  %v1095_v10 = vpack.c.bf16 %v1050_v0, %v1049_v63  ;;  %v1062_v63 = vld [vmem:[%s9180_s29 + $0xc9] sm:$0xff] }
  0x60   : > { %8603 = vmatprep.mubr.msk.bf16.mxu0 %vm495_vm1, %v1759_v19  ;;  %v1766_v19 = vpack.c.bf16 %v1714_v24, %v1713_v11  ;;  %v1773_v24 = vpack.c.bf16 %v1728_v8, %v1727_v20  ;;  %v1737_v0 = vld [vmem:[%s9180_s29 + $0xaa] sm:$0xff]  ;;  %v1101_v8 = vpack.c.bf16 %v1062_v63, %v1061_v58  ;;  %v1074_v58 = vld [vmem:[%s9180_s29 + $0x159] sm:$0xff] }
  0x61   : > { %v1740_v20 = vld [vmem:[%s9180_s29 + $0xca] sm:$0xff]  ;;  %v1749_v63 = vld [vmem:[%s9180_s29 + $0x13a] sm:$0xff] }
  0x65   : > { %8538 = vmatmul.mubr.msk.bf16.gmra.mrb[40].mxu1 %vm495_vm1, %v9403_v30 }
  0x66   : > { %8541 = vmatprep.mubr.msk.bf16.mxu1 %vm495_vm1, %v9541_v34 }
  0x67   : > { %8604 = vmatmul.mubr.msk.bf16.gmra.mrb[40].mxu0 %vm495_vm1, %v1760_v36  ;;  %v1720_v36 = vld [vmem:[%s9185_s7 + $0x15a] sm:$0xff] }
  0x68   : > { %8607 = vmatprep.mubr.msk.bf16.mxu0 %vm495_vm1, %v1761_v38  ;;  %v9617_v38 = vpack.c.bf16 %v1042_v28, %v1041_v26  ;;  %v1769_v40 = vpack.c.bf16 %v1720_v36, %v1719_v33  ;;  %v1096_v26 = vpack.c.bf16 %v1052_v15, %v1051_v14  ;;  %v1731_v28 = vld [vmem:[%s9180_s29 + $0x62] sm:$0xff]  ;;  %v1774_v33 = vpack.c.bf16 %v1730_v25, %v1729_v23  ;;  %v1065_v15 = vld [vmem:[%s9180_s29 + $0xf1] sm:$0xff] }
  0x69   : > { %v1775_v36 = vpack.c.bf16 %v1732_v29, %v1731_v28  ;;  %v1064_v14 = vld [vmem:[%s9180_s29 + $0xe1] sm:$0xff] }
  0x6a   : > { %v1742_v23 = vld [vmem:[%s9180_s29 + $0xe2] sm:$0xff]  ;;  %v1744_v28 = vld [vmem:[%s9180_s29 + $0xfa] sm:$0xff] }
  0x6d   : > { %8542 = vmatmul.mubr.msk.bf16.gmra.mrb[44].mxu1 %vm495_vm1, %v9559_v45 }
  0x6e   : > { %8545 = vmatprep.mubr.msk.bf16.mxu1 %vm495_vm1, %v9563_v50 }
  0x6f   : > { %8608 = vmatmul.mubr.msk.bf16.gmra.mrb[44].mxu0 %vm495_vm1, %v1762_v51  ;;  %v9631_v51 = vpack.c.bf16 %v1044_v42, %v1043_v41  ;;  %v1057_v41 = vld [vmem:[%s9180_s29 + $0x91] sm:$0xff]  ;;  %v1058_v42 = vld [vmem:[%s9180_s29 + $0x99] sm:$0xff] }
  0x70   : > { %8611 = vmatprep.mubr.msk.bf16.mxu0 %vm495_vm1, %v1763_v52  ;;  %v1723_v52 = vld [vmem:[%s9180_s29 + $0x2] sm:$0xff] }
  0x71   : > { %v1771_v56 = vpack.c.bf16 %v1724_v53, %v1723_v52  ;;  %v1736_v52 = vld [vmem:[%s9180_s29 + $0x9a] sm:$0xff]  ;;  %v1099_v53 = vpack.c.bf16 %v1058_v42, %v1057_v41  ;;  %v1070_v41 = vld [vmem:[%s9180_s29 + $0x129] sm:$0xff] }
  0x72   : > { %v1745_v42 = vld [vmem:[%s9180_s29 + $0x10a] sm:$0xff] }
  0x75   : > { %8546 = vmatmul.mubr.msk.bf16.gmra.mrb[48].mxu1 %vm495_vm1, %v9577_v60 }
  0x76   : > { %8549 = vmatprep.mubr.msk.bf16.mxu1 %vm495_vm1, %v9581_v2 }
  0x77   : > { %8612 = vmatmul.mubr.msk.bf16.gmra.mrb[48].mxu0 %vm495_vm1, %v1764_v3  ;;  %v1725_v3 = vld [vmem:[%s9180_s29 + $0x1a] sm:$0xff] }
  0x78   : > { %8615 = vmatprep.mubr.msk.bf16.mxu0 %vm495_vm1, %v1765_v4  ;;  %v1726_v4 = vld [vmem:[%s9180_s29 + $0x22] sm:$0xff] }
  0x79   : > { %v1772_v11 = vpack.c.bf16 %v1726_v4, %v1725_v3  ;;  %v1738_v3 = vld [vmem:[%s9180_s29 + $0xb2] sm:$0xff] }
  0x7d   : > { %8550 = vmatmul.mubr.msk.bf16.gmra.mrb[52].mxu1 %vm495_vm1, %v9595_v12 }
  0x7e   : > { %8553 = vmatprep.mubr.msk.bf16.mxu1 %vm495_vm1, %v9599_v18 }
  0x7f   : > { %8616 = vmatmul.mubr.msk.bf16.gmra.mrb[52].mxu0 %vm495_vm1, %v1766_v19  ;;  %v1053_v19 = vld [vmem:[%s9180_s29 + $0x61] sm:$0xff] }
  0x80   : > { %8619 = vmatprep.mubr.msk.bf16.mxu0 %vm495_vm1, %v1767_v22  ;;  %v1054_v22 = vld [vmem:[%s9180_s29 + $0x69] sm:$0xff] }
  0x81   : > { %v1097_v31 = vpack.c.bf16 %v1054_v22, %v1053_v19  ;;  %v1066_v19 = vld [vmem:[%s9180_s29 + $0xf9] sm:$0xff] }
  0x82   : > { %v1741_v22 = vld [vmem:[%s9180_s29 + $0xda] sm:$0xff]  ;;  %v1103_v29 = vpack.c.bf16 %v1066_v19, %v1065_v15  ;;  %v1754_v15 = vld [vmem:[%s9180_s29 + $0x172] sm:$0xff] }
  0x85   : > { %8554 = vmatmul.mubr.msk.bf16.gmra.mrb[56].mxu1 %vm495_vm1, %v9613_v32 }
  0x86   : > { %8557 = vmatprep.mubr.msk.bf16.mxu1 %vm495_vm1, %v9617_v38 }
  0x87   : > { %8620 = vmatmul.mubr.msk.bf16.gmra.mrb[56].mxu0 %vm495_vm1, %v1768_v39  ;;  %v1055_v39 = vld [vmem:[%s9180_s29 + $0x79] sm:$0xff] }
  0x88   : > { %8623 = vmatprep.mubr.msk.bf16.mxu0 %vm495_vm1, %v1769_v40  ;;  %v1056_v40 = vld [vmem:[%s9180_s29 + $0x81] sm:$0xff] }
  0x89   : > { %v1098_v46 = vpack.c.bf16 %v1056_v40, %v1055_v39  ;;  %v1068_v39 = vld [vmem:[%s9180_s29 + $0x111] sm:$0xff]  ;;  %v1069_v40 = vld [vmem:[%s9180_s29 + $0x121] sm:$0xff] }
  0x8d   : > { %8558 = vmatmul.mubr.msk.bf16.gmra.mrb[60].mxu1 %vm495_vm1, %v9631_v51 }
  0x8e   : > { %8561 = vmatprep.mubr.msk.bf16.mxu1 %vm495_vm1, %v1093_v54  ;;  %v1776_v54 = vpack.c.bf16 %v1734_v44, %v1733_v43  ;;  %v1746_v43 = vld [vmem:[%s9180_s29 + $0x112] sm:$0xff] }
  0x8f   : > { %8624 = vmatmul.mubr.msk.bf16.gmra.mrb[60].mxu0 %vm495_vm1, %v1770_v55  ;;  %v1777_v55 = vpack.c.bf16 %v1736_v52, %v1735_v48  ;;  %v1748_v48 = vld [vmem:[%s9180_s29 + $0x12a] sm:$0xff]  ;;  %v1105_v52 = vpack.c.bf16 %v1070_v41, %v1069_v40 }
  0x90   : > { %8627 = vmatprep.mubr.msk.bf16.mxu0 %vm495_vm1, %v1771_v56  ;;  %v1059_v56 = vld [vmem:[%s9180_s29 + $0xa9] sm:$0xff] }
  0x91   : > { %v1100_v4 = vpack.c.bf16 %v1060_v57, %v1059_v56  ;;  %v1072_v56 = vld [vmem:[%s9180_s29 + $0x141] sm:$0xff]  ;;  %v1073_v57 = vld [vmem:[%s9180_s29 + $0x151] sm:$0xff] }
  0x95   : > { %8562 = vmatmul.mubr.msk.bf16.gmra.mrb[64].mxu1 %vm495_vm1, %v1094_v6  ;;  %v1739_v6 = vld [vmem:[%s9180_s29 + $0xc2] sm:$0xff] }
  0x96   : > { %8565 = vmatprep.mubr.msk.bf16.mxu1 %vm495_vm1, %v1095_v10  ;;  %v1778_v10 = vpack.c.bf16 %v1738_v3, %v1737_v0  ;;  %v1750_v0 = vld [vmem:[%s9180_s29 + $0x142] sm:$0xff] }
  0x97   : > { %8628 = vmatmul.mubr.msk.bf16.gmra.mrb[64].mxu0 %vm495_vm1, %v1772_v11  ;;  %v1779_v11 = vpack.c.bf16 %v1740_v20, %v1739_v6  ;;  %v1752_v6 = vld [vmem:[%s9180_s29 + $0x15a] sm:$0xff]  ;;  %v1107_v20 = vpack.c.bf16 %v1074_v58, %v1073_v57  ;;  %v467_v57 = vld [vmem:[#allocation2 + $0x128] sm:$0xff] }
  0x98   : > { %8631 = vmatprep.mubr.msk.bf16.mxu0 %vm495_vm1, %v1773_v24  ;;  %v1063_v24 = vld [vmem:[%s9180_s29 + $0xd9] sm:$0xff] }
  0x99   : > { %v1102_v25 = vpack.c.bf16 %v1064_v14, %v1063_v24  ;;  %v1076_v24 = vld [vmem:[%s9180_s29 + $0x171] sm:$0xff] }
  0x9a   : > { %v1753_v14 = vld [vmem:[%s9180_s29 + $0x16a] sm:$0xff] }
  0x9d   : > { %8566 = vmatmul.mubr.msk.bf16.gmra.mrb[68].mxu1 %vm495_vm1, %v1096_v26  ;;  %v1743_v26 = vld [vmem:[%s9180_s29 + $0xf2] sm:$0xff] }
  0x9e   : > { %8569 = vmatprep.mubr.msk.bf16.mxu1 %vm495_vm1, %v1097_v31  ;;  %v1780_v31 = vpack.c.bf16 %v1742_v23, %v1741_v22  ;;  %v1786_v22 = vpack.c.bf16 %v1754_v15, %v1753_v14  ;;  %v3986_v23 = vsel %vm592_vm0, %v9352_v5, 0  ;;  %v430_v5 = vld [vmem:[#allocation2] sm:$0xff]  ;;  %v472_v15 = vld [vmem:[#allocation2 + $0x150] sm:$0xff] }
  0x9f   : > { %8632 = vmatmul.mubr.msk.bf16.gmra.mrb[68].mxu0 %vm495_vm1, %v1774_v33  ;;  %v1781_v33 = vpack.c.bf16 %v1744_v28, %v1743_v26 }
  0xa0   : > { %8635 = vmatprep.mubr.msk.bf16.mxu0 %vm495_vm1, %v1775_v36  ;;  %v1067_v36 = vld [vmem:[%s9180_s29 + $0x109] sm:$0xff] }
  0xa1   : > { %v1104_v44 = vpack.c.bf16 %v1068_v39, %v1067_v36 }
  0xa5   : > { %8570 = vmatmul.mubr.msk.bf16.gmra.mrb[72].mxu1 %vm495_vm1, %v1098_v46  ;;  %v1747_v46 = vld [vmem:[%s9180_s29 + $0x122] sm:$0xff] }
  0xa6   : > { %8573 = vmatprep.mubr.msk.bf16.mxu1 %vm495_vm1, %v1099_v53  ;;  %v1782_v53 = vpack.c.bf16 %v1746_v43, %v1745_v42  ;;  %v468_v43 = vld [vmem:[#allocation2 + $0x130] sm:$0xff] }
  0xa7   : > { %8636 = vmatmul.mubr.msk.bf16.gmra.mrb[72].mxu0 %vm495_vm1, %v1776_v54  ;;  %v1783_v54 = vpack.c.bf16 %v1748_v48, %v1747_v46  ;;  %v436_v46 = vld [vmem:[#allocation2 + $0x30] sm:$0xff]  ;;  %v7598_v48 = vld [vmem:[%s9185_s7 + $0x108] sm:$0xff] }
  0xa8   : > { %8639 = vmatprep.mubr.msk.bf16.mxu0 %vm495_vm1, %v1777_v55  ;;  %v1071_v55 = vld [vmem:[%s9180_s29 + $0x139] sm:$0xff] }
  0xa9   : > { %v1106_v3 = vpack.c.bf16 %v1072_v56, %v1071_v55 }
  0xad   : > { %8574 = vmatmul.mubr.msk.bf16.gmra.mrb[76].mxu1 %vm495_vm1, %v1100_v4  ;;  %v1751_v4 = vld [vmem:[%s9180_s29 + $0x152] sm:$0xff] }
  0xae   : > { %8577 = vmatprep.mubr.msk.bf16.mxu1 %vm495_vm1, %v1101_v8  ;;  %v1784_v8 = vpack.c.bf16 %v1750_v0, %v1749_v63  ;;  %v437_v63 = vld [vmem:[#allocation2 + $0x38] sm:$0xff] }
  0xaf   : > { %8640 = vmatmul.mubr.msk.bf16.gmra.mrb[76].mxu0 %vm495_vm1, %v1778_v10  ;;  %v1785_v10 = vpack.c.bf16 %v1752_v6, %v1751_v4  ;;  %v435_v6 = vld [vmem:[#allocation2 + $0x28] sm:$0xff] }
  0xb0   : > { %8643 = vmatprep.mubr.msk.bf16.mxu0 %vm495_vm1, %v1779_v11  ;;  %v1075_v11 = vld [vmem:[%s9180_s29 + $0x169] sm:$0xff] }
  0xb1   : > { %v1108_v19 = vpack.c.bf16 %v1076_v24, %v1075_v11 }
  0xb5   : > { %8578 = vmatmul.mubr.msk.bf16.gmra.mrb[80].mxu1 %vm495_vm1, %v1102_v25  ;;  %v4666_v25 = vsel %vm592_vm0, %v9381_v21, 0  ;;  %v463_v21 = vld [vmem:[#allocation2 + $0x108] sm:$0xff] }
  0xb6   : > { %8581 = vmatprep.mubr.msk.bf16.mxu1 %vm495_vm1, %v1103_v29 }
  0xb7   : > { %8644 = vmatmul.mubr.msk.bf16.gmra.mrb[80].mxu0 %vm495_vm1, %v1780_v31  ;;  %v431_v31 = vld [vmem:[#allocation2 + $0x8] sm:$0xff] }
  0xb8   : > { %8647 = vmatprep.mubr.msk.bf16.mxu0 %vm495_vm1, %v1781_v33 }
  0xbd   : > { %8582 = vmatmul.mubr.msk.bf16.gmra.mrb[84].mxu1 %vm495_vm1, %v1104_v44  ;;  %v466_v44 = vld [vmem:[#allocation2 + $0x120] sm:$0xff] }
  0xbe   : > { %8585 = vmatprep.mubr.msk.bf16.mxu1 %vm495_vm1, %v1105_v52 }
  0xbf   : > { %8648 = vmatmul.mubr.msk.bf16.gmra.mrb[84].mxu0 %vm495_vm1, %v1782_v53  ;;  %v469_v53 = vld [vmem:[#allocation2 + $0x138] sm:$0xff] }
  0xc0   : > { %8651 = vmatprep.mubr.msk.bf16.mxu0 %vm495_vm1, %v1783_v54  ;;  %v434_v54 = vld [vmem:[#allocation2 + $0x20] sm:$0xff] }
  0xc5   : > { %8586 = vmatmul.mubr.msk.bf16.gmra.mrb[88].mxu1 %vm495_vm1, %v1106_v3 }
  0xc6   : > { %8589 = vmatprep.mubr.msk.bf16.mxu1 %vm495_vm1, %v1107_v20 }
  0xc7   : > { %8652 = vmatmul.mubr.msk.bf16.gmra.mrb[88].mxu0 %vm495_vm1, %v1784_v8 }
  0xc8   : > { %8655 = vmatprep.mubr.msk.bf16.mxu0 %vm495_vm1, %v1785_v10 }
  0xcd   : > { %8590 = vmatmul.mubr.msk.bf16.gmra.mrb[92].mxu1 %vm495_vm1, %v1108_v19 }
  0xce   : > { %8661 = vmatprep.mubr.msk.bf16.mxu1 %vm495_vm1, %v9198_v17  ;;  %v8030_v17 = vld [vmem:[%s11727_s2 + $0xe] sm:$0x3] }
  0xcf   : > { %8656 = vmatmul.mubr.msk.bf16.gmra.mrb[92].mxu0 %vm495_vm1, %v1786_v22  ;;  %v470_v22 = vld [vmem:[#allocation2 + $0x140] sm:$0xff] }
  0xd0   : > { %8727 = vmatprep.mubr.msk.bf16.mxu0 %vm495_vm1, %v9341_v62 }
  0xd5   : > { %8662 = vmatmul.mubr.msk.bf16.vlgmr.msra.gmra.mrb[96].mxu1 %vm495_vm1, %v9220_v27  ;;  %v8127_v27 = vld [vmem:[%s11727_s2 + $0x10] sm:$0x3] }
  0xd6   : > { %8792 = vmatpush3.bf16.msra.mxu1 %v3986_v23  ;;  %8665 = vmatprep.mubr.msk.bf16.mxu1 %vm495_vm1, %v9235_v35  ;;  %v464_v35 = vld [vmem:[#allocation2 + $0x110] sm:$0xff]  ;;  %v7600_v23 = vld [vmem:[%s9185_s7 + $0x120] sm:$0xff] }
  0xd7   : > { %8728 = vmatmul.mubr.msk.bf16.vlgmr.msra.gmra.mrb[96].mxu0 %vm495_vm1, %v9345_v1  ;;  %9065 = vmatprep.subr.msk.bf16.mxu1 %vm592_vm0, %v8030_v17  ;;  %v465_v1 = vld [vmem:[#allocation2 + $0x118] sm:$0xff]  ;;  %v440_v17 = vld [vmem:[#allocation2 + $0x50] sm:$0xff] }
  0xd8   : > { %8858 = vmatpush3.bf16.msra.mxu0 %v4666_v25  ;;  %8731 = vmatprep.mubr.msk.bf16.mxu0 %vm495_vm1, %v9370_v13  ;;  %v7601_v25 = vld [vmem:[%s9185_s7 + $0x128] sm:$0xff] }
  0xd9   : > { %9066 = vmatprep.subr.msk.bf16.mxu0 %vm592_vm0, %v8127_v27  ;;  %v7603_v27 = vld [vmem:[%s9185_s7 + $0x140] sm:$0xff] }
  0xdd   : > { %8666 = vmatmul.mubr.msk.bf16.gmra.mrb[100].mxu1 %vm495_vm1, %v9237_v37  ;;  %v462_v37 = vld [vmem:[#allocation2 + $0x100] sm:$0xff] }
  0xde   : > { %8669 = vmatprep.mubr.msk.bf16.mxu1 %vm495_vm1, %v9253_v47  ;;  %v432_v47 = vld [vmem:[#allocation2 + $0x10] sm:$0xff] }
  0xdf   : > { %8732 = vmatmul.mubr.msk.bf16.gmra.mrb[100].mxu0 %vm495_vm1, %v9374_v16 }
  0xe0   : > { %8735 = vmatprep.mubr.msk.bf16.mxu0 %vm495_vm1, %v9403_v30 }
  0xe5   : > { %8670 = vmatmul.mubr.msk.bf16.gmra.mrb[104].mxu1 %vm495_vm1, %v9255_v49  ;;  %v433_v49 = vld [vmem:[#allocation2 + $0x18] sm:$0xff] }
  0xe6   : > { %8673 = vmatprep.mubr.msk.bf16.mxu1 %vm495_vm1, %v9271_v59 }
  0xe7   : > { %8736 = vmatmul.mubr.msk.bf16.gmra.mrb[104].mxu0 %vm495_vm1, %v9541_v34 }
  0xe8   : > { %v8497_v62 = vpop.f32.mrb[0].mxu1  ;;  %8739 = vmatprep.mubr.msk.bf16.mxu0 %vm495_vm1, %v9559_v45 }
  0xe9   : > { %v919_v13 = vadd.f32 %v8497_v62, %v464_v35  ;;  %v758_v16 = vpop.f32.mrb[1].mxu1 }
  0xea   : > { %v8465_v30 = vpop.f32.mrb[0].mxu0  ;;  %v917_v26 = vadd.f32 %v758_v16, %v462_v37  ;;  %v8498_v28 = vpop.f32.mrb[2].mxu1  ;;  %v473_v37 = vld [vmem:[#allocation2 + $0x158] sm:$0xff] }
  0xeb   : > { %v887_v29 = vadd.f32 %v8465_v30, %v432_v47  ;;  %v630_v59 = vpop.f32.mrb[1].mxu0  ;;  %983 = vst.msk [vmem:[#allocation2 + $0x110] sm:$0xff] %vm269_vm2, %v919_v13  ;;  %v920_v34 = vadd.f32 %v8498_v28, %v465_v1  ;;  %v761_v33 = vpop.f32.mrb[3].mxu1  ;;  %v438_v47 = vld [vmem:[#allocation2 + $0x40] sm:$0xff]  ;;  %v2446_v13 = vpack.c.bf16 %v7601_v25, %v7600_v23  ;;  %v7609_v23 = vld [vmem:[%s9185_s7 + $0x188] sm:$0xff] }
  0xec   : > { %v885_v36 = vadd.f32 %v630_v59, %v430_v5  ;;  %v8466_v39 = vpop.f32.mrb[2].mxu0  ;;  %981 = vst.msk [vmem:[#allocation2 + $0x100] sm:$0xff] %vm269_vm2, %v917_v26  ;;  %v918_v40 = vadd.f32 %v761_v33, %v463_v21  ;;  %v471_v5 = vld [vmem:[#allocation2 + $0x148] sm:$0xff]  ;;  %v441_v21 = vld [vmem:[#allocation2 + $0x58] sm:$0xff] }
  0xed   : > { %951 = vst.msk [vmem:[#allocation2 + $0x10] sm:$0xff] %vm269_vm2, %v887_v29  ;;  %v888_v45 = vadd.f32 %v8466_v39, %v433_v49  ;;  %v633_v41 = vpop.f32.mrb[3].mxu0  ;;  %984 = vst.msk [vmem:[#allocation2 + $0x118] sm:$0xff] %vm269_vm2, %v920_v34  ;;  %8674 = vmatmul.mubr.msk.bf16.gmra.mrb[108].mxu1 %vm495_vm1, %v9273_v61  ;;  %v7599_v61 = vld [vmem:[%s9185_s7 + $0x110] sm:$0xff]  ;;  %v479_v25 = vld [vmem:[#allocation2 + $0x188] sm:$0xff] }
  0xee   : > { %949 = vst.msk [vmem:[#allocation2] sm:$0xff] %vm269_vm2, %v885_v36  ;;  %v886_v42 = vadd.f32 %v633_v41, %v431_v31  ;;  %982 = vst.msk [vmem:[#allocation2 + $0x108] sm:$0xff] %vm269_vm2, %v918_v40  ;;  %8677 = vmatprep.mubr.msk.bf16.mxu1 %vm495_vm1, %v9289_v7  ;;  %v476_v40 = vld [vmem:[#allocation2 + $0x170] sm:$0xff]  ;;  %v474_v41 = vld [vmem:[#allocation2 + $0x160] sm:$0xff] }
  0xef   : > { %952 = vst.msk [vmem:[#allocation2 + $0x18] sm:$0xff] %vm269_vm2, %v888_v45  ;;  %8740 = vmatmul.mubr.msk.bf16.gmra.mrb[108].mxu0 %vm495_vm1, %v9563_v50  ;;  %v2445_v50 = vpack.c.bf16 %v7599_v61, %v7598_v48  ;;  %v7607_v48 = vld [vmem:[%s9185_s7 + $0x170] sm:$0xff] }
  0xf0   : > { %950 = vst.msk [vmem:[#allocation2 + $0x8] sm:$0xff] %vm269_vm2, %v886_v42  ;;  %v8501_v52 = vpop.f32.mrb[4].mxu1  ;;  %8743 = vmatprep.mubr.msk.bf16.mxu0 %vm495_vm1, %v9577_v60  ;;  %v7604_v42 = vld [vmem:[%s9185_s7 + $0x150] sm:$0xff] }
  0xf1   : > { %v923_v55 = vadd.f32 %v8501_v52, %v468_v43  ;;  %v774_v56 = vpop.f32.mrb[5].mxu1  ;;  %v7605_v43 = vld [vmem:[%s9185_s7 + $0x158] sm:$0xff] }
  0xf2   : > { %v8469_v58 = vpop.f32.mrb[4].mxu0  ;;  %v921_v7 = vadd.f32 %v774_v56, %v466_v44  ;;  %v8502_v0 = vpop.f32.mrb[6].mxu1  ;;  %v444_v44 = vld [vmem:[#allocation2 + $0x70] sm:$0xff]  ;;  %v477_v52 = vld [vmem:[#allocation2 + $0x178] sm:$0xff]  ;;  %v475_v56 = vld [vmem:[#allocation2 + $0x168] sm:$0xff] }
  0xf3   : > { %v891_v3 = vadd.f32 %v8469_v58, %v436_v46  ;;  %v646_v4 = vpop.f32.mrb[5].mxu0  ;;  %987 = vst.msk [vmem:[#allocation2 + $0x130] sm:$0xff] %vm269_vm2, %v923_v55  ;;  %v924_v20 = vadd.f32 %v8502_v0, %v469_v53  ;;  %v777_v8 = vpop.f32.mrb[7].mxu1  ;;  %v7606_v46 = vld [vmem:[%s9185_s7 + $0x168] sm:$0xff]  ;;  %v442_v53 = vld [vmem:[#allocation2 + $0x60] sm:$0xff] }
  0xf4   : > { %v889_v10 = vadd.f32 %v646_v4, %v434_v54  ;;  %v8470_v11 = vpop.f32.mrb[6].mxu0  ;;  %985 = vst.msk [vmem:[#allocation2 + $0x120] sm:$0xff] %vm269_vm2, %v921_v7  ;;  %v922_v60 = vadd.f32 %v777_v8, %v467_v57  ;;  %v2448_v57 = vpack.c.bf16 %v7605_v43, %v7604_v42  ;;  %v482_v42 = vld [vmem:[#allocation2 + $0x1a0] sm:$0xff] }
  0xf5   : > { %955 = vst.msk [vmem:[#allocation2 + $0x30] sm:$0xff] %vm269_vm2, %v891_v3  ;;  %v892_v24 = vadd.f32 %v8470_v11, %v437_v63  ;;  %v649_v14 = vpop.f32.mrb[7].mxu0  ;;  %988 = vst.msk [vmem:[#allocation2 + $0x138] sm:$0xff] %vm269_vm2, %v924_v20  ;;  %8678 = vmatmul.mubr.msk.bf16.gmra.mrb[112].mxu1 %vm495_vm1, %v9291_v9  ;;  %v7602_v9 = vld [vmem:[%s9185_s7 + $0x138] sm:$0xff] }
  0xf6   : > { %953 = vst.msk [vmem:[#allocation2 + $0x20] sm:$0xff] %vm269_vm2, %v889_v10  ;;  %v890_v19 = vadd.f32 %v649_v14, %v435_v6  ;;  %986 = vst.msk [vmem:[#allocation2 + $0x128] sm:$0xff] %vm269_vm2, %v922_v60  ;;  %8681 = vmatprep.mubr.msk.bf16.mxu1 %vm495_vm1, %v2445_v50  ;;  %v2447_v29 = vpack.c.bf16 %v7603_v27, %v7602_v9  ;;  %v445_v63 = vld [vmem:[#allocation2 + $0x78] sm:$0xff]  ;;  %v2449_v6 = vpack.c.bf16 %v7607_v48, %v7606_v46  ;;  %v478_v14 = vld [vmem:[#allocation2 + $0x180] sm:$0xff] }
  0xf7   : > { %956 = vst.msk [vmem:[#allocation2 + $0x38] sm:$0xff] %vm269_vm2, %v892_v24  ;;  %8744 = vmatmul.mubr.msk.bf16.gmra.mrb[112].mxu0 %vm495_vm1, %v9581_v2  ;;  %v439_v2 = vld [vmem:[#allocation2 + $0x48] sm:$0xff]  ;;  %v480_v24 = vld [vmem:[#allocation2 + $0x190] sm:$0xff]  ;;  %v7610_v9 = vld [vmem:[%s9180_s29 + $0x18] sm:$0xff] }
  0xf8   : > { %954 = vst.msk [vmem:[#allocation2 + $0x28] sm:$0xff] %vm269_vm2, %v890_v19  ;;  %v8505_v35 = vpop.f32.mrb[8].mxu1  ;;  %8747 = vmatprep.mubr.msk.bf16.mxu0 %vm495_vm1, %v9595_v12  ;;  %v481_v19 = vld [vmem:[#allocation2 + $0x198] sm:$0xff]  ;;  %v7611_v27 = vld [vmem:[%s9180_s29 + $0x20] sm:$0xff]  ;;  %v7612_v46 = vld [vmem:[%s9180_s29 + $0x30] sm:$0xff] }
  0xf9   : > { %v927_v62 = vadd.f32 %v8505_v35, %v472_v15  ;;  %v790_v1 = vpop.f32.mrb[9].mxu1  ;;  %v7613_v48 = vld [vmem:[%s9180_s29 + $0x38] sm:$0xff] }
  0xfa   : > { %v8473_v16 = vpop.f32.mrb[8].mxu0  ;;  %v925_v30 = vadd.f32 %v790_v1, %v470_v22  ;;  %v8506_v49 = vpop.f32.mrb[10].mxu1  ;;  %v7608_v22 = vld [vmem:[%s9185_s7 + $0x180] sm:$0xff] }
  0xfb   : > { %v895_v26 = vadd.f32 %v8473_v16, %v440_v17  ;;  %v662_v28 = vpop.f32.mrb[9].mxu0  ;;  %991 = vst.msk [vmem:[#allocation2 + $0x150] sm:$0xff] %vm269_vm2, %v927_v62  ;;  %v928_v59 = vadd.f32 %v8506_v49, %v473_v37  ;;  %v793_v31 = vpop.f32.mrb[11].mxu1  ;;  %v448_v17 = vld [vmem:[#allocation2 + $0x90] sm:$0xff]  ;;  %v446_v37 = vld [vmem:[#allocation2 + $0x80] sm:$0xff] }
  0xfc   : > { %v893_v34 = vadd.f32 %v662_v28, %v438_v47  ;;  %v8474_v33 = vpop.f32.mrb[10].mxu0  ;;  %989 = vst.msk [vmem:[#allocation2 + $0x140] sm:$0xff] %vm269_vm2, %v925_v30  ;;  %v926_v12 = vadd.f32 %v793_v31, %v471_v5  ;;  %v7705_v47 = vld [vmem:[%s9185_s7 + $0x181] sm:$0xff]  ;;  %v7706_v62 = vld [vmem:[%s9185_s7 + $0x189] sm:$0xff]  ;;  %v7707_v30 = vld [vmem:[%s9180_s29 + $0x19] sm:$0xff] }
  0xfd   : > { %959 = vst.msk [vmem:[#allocation2 + $0x50] sm:$0xff] %vm269_vm2, %v895_v26  ;;  %v896_v36 = vadd.f32 %v8474_v33, %v441_v21  ;;  %v665_v39 = vpop.f32.mrb[11].mxu0  ;;  %992 = vst.msk [vmem:[#allocation2 + $0x158] sm:$0xff] %vm269_vm2, %v928_v59  ;;  %8682 = vmatmul.mubr.msk.bf16.gmra.mrb[116].mxu1 %vm495_vm1, %v2446_v13  ;;  %v2450_v13 = vpack.c.bf16 %v7609_v23, %v7608_v22  ;;  %v449_v21 = vld [vmem:[#allocation2 + $0x98] sm:$0xff]  ;;  %v7708_v49 = vld [vmem:[%s9180_s29 + $0x21] sm:$0xff]  ;;  %v2451_v59 = vpack.c.bf16 %v7611_v27, %v7610_v9 }
  0xfe   : > { %957 = vst.msk [vmem:[#allocation2 + $0x40] sm:$0xff] %vm269_vm2, %v893_v34  ;;  %v894_v45 = vadd.f32 %v665_v39, %v439_v2  ;;  %990 = vst.msk [vmem:[#allocation2 + $0x148] sm:$0xff] %vm269_vm2, %v926_v12  ;;  %8685 = vmatprep.mubr.msk.bf16.mxu1 %vm495_vm1, %v2447_v29  ;;  %v447_v29 = vld [vmem:[#allocation2 + $0x88] sm:$0xff]  ;;  %v3128_v12 = vpack.c.bf16 %v7706_v62, %v7705_v47  ;;  %v488_v9 = vld [vmem:[#allocation2 + $0x1d0] sm:$0xff] }
  0xff   : > { %960 = vst.msk [vmem:[#allocation2 + $0x58] sm:$0xff] %vm269_vm2, %v896_v36  ;;  %8748 = vmatmul.mubr.msk.bf16.gmra.mrb[116].mxu0 %vm495_vm1, %v9599_v18  ;;  %v443_v18 = vld [vmem:[#allocation2 + $0x68] sm:$0xff]  ;;  %v486_v27 = vld [vmem:[#allocation2 + $0x1c0] sm:$0xff] }
 0x100   : > { %958 = vst.msk [vmem:[#allocation2 + $0x48] sm:$0xff] %vm269_vm2, %v894_v45  ;;  %v8509_v61 = vpop.f32.mrb[12].mxu1  ;;  %8751 = vmatprep.mubr.msk.bf16.mxu0 %vm495_vm1, %v9613_v32  ;;  %v3129_v45 = vpack.c.bf16 %v7708_v49, %v7707_v30  ;;  %v7616_v47 = vld [vmem:[%s9180_s29 + $0x60] sm:$0xff]  ;;  %v7617_v62 = vld [vmem:[%s9180_s29 + $0x68] sm:$0xff] }
 0x101   : > { %v931_v54 = vadd.f32 %v8509_v61, %v476_v40  ;;  %v806_v55 = vpop.f32.mrb[13].mxu1  ;;  %v483_v61 = vld [vmem:[#allocation2 + $0x1a8] sm:$0xff]  ;;  %v454_v30 = vld [vmem:[#allocation2 + $0xc0] sm:$0xff] }
 0x102   : > { %v8477_v58 = vpop.f32.mrb[12].mxu0  ;;  %v929_v7 = vadd.f32 %v806_v55, %v474_v41  ;;  %v8510_v0 = vpop.f32.mrb[14].mxu1  ;;  %v484_v41 = vld [vmem:[#allocation2 + $0x1b0] sm:$0xff]  ;;  %v7713_v49 = vld [vmem:[%s9180_s29 + $0x61] sm:$0xff] }
 0x103   : > { %v899_v3 = vadd.f32 %v8477_v58, %v444_v44  ;;  %v678_v4 = vpop.f32.mrb[13].mxu0  ;;  %995 = vst.msk [vmem:[#allocation2 + $0x170] sm:$0xff] %vm269_vm2, %v931_v54  ;;  %v932_v50 = vadd.f32 %v8510_v0, %v477_v52  ;;  %v809_v20 = vpop.f32.mrb[15].mxu1  ;;  %v485_v44 = vld [vmem:[#allocation2 + $0x1b8] sm:$0xff]  ;;  %v452_v52 = vld [vmem:[#allocation2 + $0xb0] sm:$0xff]  ;;  %v2452_v0 = vpack.c.bf16 %v7613_v48, %v7612_v46 }
 0x104   : > { %v897_v8 = vadd.f32 %v678_v4, %v442_v53  ;;  %v8478_v10 = vpop.f32.mrb[14].mxu0  ;;  %993 = vst.msk [vmem:[#allocation2 + $0x160] sm:$0xff] %vm269_vm2, %v929_v7  ;;  %v930_v32 = vadd.f32 %v809_v20, %v475_v56  ;;  %v7614_v53 = vld [vmem:[%s9180_s29 + $0x48] sm:$0xff]  ;;  %v7615_v54 = vld [vmem:[%s9180_s29 + $0x50] sm:$0xff]  ;;  %v450_v56 = vld [vmem:[#allocation2 + $0xa0] sm:$0xff] }
 0x105   : > { %963 = vst.msk [vmem:[#allocation2 + $0x70] sm:$0xff] %vm269_vm2, %v899_v3  ;;  %v900_v11 = vadd.f32 %v8478_v10, %v445_v63  ;;  %v681_v60 = vpop.f32.mrb[15].mxu0  ;;  %996 = vst.msk [vmem:[#allocation2 + $0x178] sm:$0xff] %vm269_vm2, %v932_v50  ;;  %8686 = vmatmul.mubr.msk.bf16.gmra.mrb[120].mxu1 %vm495_vm1, %v2448_v57  ;;  %v7709_v57 = vld [vmem:[%s9180_s29 + $0x31] sm:$0xff]  ;;  %v7710_v58 = vld [vmem:[%s9180_s29 + $0x39] sm:$0xff] }
 0x106   : > { %961 = vst.msk [vmem:[#allocation2 + $0x60] sm:$0xff] %vm269_vm2, %v897_v8  ;;  %v898_v15 = vadd.f32 %v681_v60, %v443_v18  ;;  %994 = vst.msk [vmem:[#allocation2 + $0x168] sm:$0xff] %vm269_vm2, %v930_v32  ;;  %8689 = vmatprep.mubr.msk.bf16.mxu1 %vm495_vm1, %v2449_v6  ;;  %v453_v4 = vld [vmem:[#allocation2 + $0xb8] sm:$0xff]  ;;  %v7711_v18 = vld [vmem:[%s9180_s29 + $0x49] sm:$0xff] }
 0x107   : > { %964 = vst.msk [vmem:[#allocation2 + $0x78] sm:$0xff] %vm269_vm2, %v900_v11  ;;  %8752 = vmatmul.mubr.msk.bf16.gmra.mrb[120].mxu0 %vm495_vm1, %v9617_v38  ;;  %v7712_v6 = vld [vmem:[%s9180_s29 + $0x51] sm:$0xff]  ;;  %v451_v32 = vld [vmem:[#allocation2 + $0xa8] sm:$0xff]  ;;  %v2453_v11 = vpack.c.bf16 %v7615_v54, %v7614_v53  ;;  %v490_v54 = vld [vmem:[#allocation2 + $0x1e0] sm:$0xff] }
 0x108   : > { %962 = vst.msk [vmem:[#allocation2 + $0x68] sm:$0xff] %vm269_vm2, %v898_v15  ;;  %v8513_v35 = vpop.f32.mrb[16].mxu1  ;;  %8755 = vmatprep.mubr.msk.bf16.mxu0 %vm495_vm1, %v9631_v51  ;;  %v492_v53 = vld [vmem:[#allocation2 + $0x1f0] sm:$0xff] }
 0x109   : > { %v935_v1 = vadd.f32 %v8513_v35, %v480_v24  ;;  %v822_v5 = vpop.f32.mrb[17].mxu1 }
 0x10a   : > { %v8481_v16 = vpop.f32.mrb[16].mxu0  ;;  %v933_v26 = vadd.f32 %v822_v5, %v478_v14  ;;  %v8514_v28 = vpop.f32.mrb[18].mxu1  ;;  %v456_v5 = vld [vmem:[#allocation2 + $0xd0] sm:$0xff] }
 0x10b   : > { %v903_v38 = vadd.f32 %v8481_v16, %v448_v17  ;;  %v694_v2 = vpop.f32.mrb[17].mxu0  ;;  %999 = vst.msk [vmem:[#allocation2 + $0x190] sm:$0xff] %vm269_vm2, %v935_v1  ;;  %v936_v31 = vadd.f32 %v8514_v28, %v481_v19  ;;  %v825_v34 = vpop.f32.mrb[19].mxu1  ;;  %v3130_v19 = vpack.c.bf16 %v7710_v58, %v7709_v57  ;;  %v3131_v17 = vpack.c.bf16 %v7712_v6, %v7711_v18  ;;  %v487_v1 = vld [vmem:[#allocation2 + $0x1c8] sm:$0xff]  ;;  %v7619_v16 = vld [vmem:[%s9180_s29 + $0x80] sm:$0xff]  ;;  %v7620_v57 = vld [vmem:[%s9180_s29 + $0x90] sm:$0xff] }
 0x10c   : > { %v901_v51 = vadd.f32 %v694_v2, %v446_v37  ;;  %v8482_v33 = vpop.f32.mrb[18].mxu0  ;;  %997 = vst.msk [vmem:[#allocation2 + $0x180] sm:$0xff] %vm269_vm2, %v933_v26  ;;  %v934_v36 = vadd.f32 %v825_v34, %v479_v25  ;;  %v489_v37 = vld [vmem:[#allocation2 + $0x1d8] sm:$0xff]  ;;  %v7714_v26 = vld [vmem:[%s9180_s29 + $0x69] sm:$0xff]  ;;  %v2454_v2 = vpack.c.bf16 %v7617_v62, %v7616_v47  ;;  %v7716_v34 = vld [vmem:[%s9180_s29 + $0x81] sm:$0xff] }
 0x10d   : > { %967 = vst.msk [vmem:[#allocation2 + $0x90] sm:$0xff] %vm269_vm2, %v903_v38  ;;  %v904_v39 = vadd.f32 %v8482_v33, %v449_v21  ;;  %v697_v40 = vpop.f32.mrb[19].mxu0  ;;  %1000 = vst.msk [vmem:[#allocation2 + $0x198] sm:$0xff] %vm269_vm2, %v936_v31  ;;  %8690 = vmatmul.mubr.msk.bf16.gmra.mrb[124].mxu1 %vm495_vm1, %v2450_v13  ;;  %v7618_v13 = vld [vmem:[%s9180_s29 + $0x78] sm:$0xff]  ;;  %v458_v18 = vld [vmem:[#allocation2 + $0xe0] sm:$0xff] }
 0x10e   : > { %965 = vst.msk [vmem:[#allocation2 + $0x80] sm:$0xff] %vm269_vm2, %v901_v51  ;;  %v902_v43 = vadd.f32 %v697_v40, %v447_v29  ;;  %998 = vst.msk [vmem:[#allocation2 + $0x188] sm:$0xff] %vm269_vm2, %v934_v36  ;;  %8693 = vmatprep.mubr.msk.bf16.mxu1 %vm495_vm1, %v2451_v59  ;;  %v457_v59 = vld [vmem:[#allocation2 + $0xd8] sm:$0xff]  ;;  %v2455_v40 = vpack.c.bf16 %v7619_v16, %v7618_v13  ;;  %v7624_v16 = vld [vmem:[%s9180_s29 + $0xc0] sm:$0xff] }
 0x10f   : > { %968 = vst.msk [vmem:[#allocation2 + $0x98] sm:$0xff] %vm269_vm2, %v904_v39  ;;  %8756 = vmatmul.mubr.msk.bf16.gmra.mrb[124].mxu0 %vm495_vm1, %v3128_v12  ;;  %v7715_v31 = vld [vmem:[%s9180_s29 + $0x79] sm:$0xff]  ;;  %v455_v39 = vld [vmem:[#allocation2 + $0xc8] sm:$0xff]  ;;  %v7717_v6 = vld [vmem:[%s9180_s29 + $0x91] sm:$0xff] }
 0x110   : > { %966 = vst.msk [vmem:[#allocation2 + $0x88] sm:$0xff] %vm269_vm2, %v902_v43  ;;  %v8517_v55 = vpop.f32.mrb[20].mxu1  ;;  %8759 = vmatprep.mubr.msk.bf16.mxu0 %vm495_vm1, %v3129_v45  ;;  %v7621_v58 = vld [vmem:[%s9180_s29 + $0x98] sm:$0xff] }
 0x111   : > { %v939_v63 = vadd.f32 %v8517_v55, %v484_v41  ;;  %v838_v7 = vpop.f32.mrb[21].mxu1 }
 0x112   : > { %v8485_v3 = vpop.f32.mrb[20].mxu0  ;;  %v937_v50 = vadd.f32 %v838_v7, %v482_v42  ;;  %v8518_v20 = vpop.f32.mrb[22].mxu1  ;;  %v460_v7 = vld [vmem:[#allocation2 + $0xf0] sm:$0xff] }
 0x113   : > { %v907_v8 = vadd.f32 %v8485_v3, %v452_v52  ;;  %v710_v10 = vpop.f32.mrb[21].mxu0  ;;  %1003 = vst.msk [vmem:[#allocation2 + $0x1b0] sm:$0xff] %vm269_vm2, %v939_v63  ;;  %v940_v60 = vadd.f32 %v8518_v20, %v485_v44  ;;  %v841_v24 = vpop.f32.mrb[23].mxu1  ;;  %v3132_v44 = vpack.c.bf16 %v7714_v26, %v7713_v49  ;;  %v3133_v52 = vpack.c.bf16 %v7716_v34, %v7715_v31  ;;  %v491_v63 = vld [vmem:[#allocation2 + $0x1e8] sm:$0xff]  ;;  %v7623_v3 = vld [vmem:[%s9180_s29 + $0xb0] sm:$0xff]  ;;  %v7627_v49 = vld [vmem:[%s9180_s29 + $0xe0] sm:$0xff] }
 0x114   : > { %v905_v14 = vadd.f32 %v710_v10, %v450_v56  ;;  %v8486_v15 = vpop.f32.mrb[22].mxu0  ;;  %1001 = vst.msk [vmem:[#allocation2 + $0x1a0] sm:$0xff] %vm269_vm2, %v937_v50  ;;  %v938_v22 = vadd.f32 %v841_v24, %v483_v61  ;;  %v493_v56 = vld [vmem:[#allocation2 + $0x1f8] sm:$0xff]  ;;  %v2456_v10 = vpack.c.bf16 %v7621_v58, %v7620_v57  ;;  %v1111_v26 = vld [vmem:[#allocation2 + $0x10] sm:$0xff] }
 0x115   : > { %971 = vst.msk [vmem:[#allocation2 + $0xb0] sm:$0xff] %vm269_vm2, %v907_v8  ;;  %v908_v23 = vadd.f32 %v8486_v15, %v453_v4  ;;  %v713_v25 = vpop.f32.mrb[23].mxu0  ;;  %1004 = vst.msk [vmem:[#allocation2 + $0x1b8] sm:$0xff] %vm269_vm2, %v940_v60  ;;  %8694 = vmatmul.mubr.msk.bf16.gmra.mrb[128].mxu1 %vm495_vm1, %v2452_v0  ;;  %v7622_v0 = vld [vmem:[%s9180_s29 + $0xa8] sm:$0xff]  ;;  %v7718_v50 = vld [vmem:[%s9180_s29 + $0x99] sm:$0xff] }
 0x116   : > { %969 = vst.msk [vmem:[#allocation2 + $0xa0] sm:$0xff] %vm269_vm2, %v905_v14  ;;  %v906_v35 = vadd.f32 %v713_v25, %v451_v32  ;;  %1002 = vst.msk [vmem:[#allocation2 + $0x1a8] sm:$0xff] %vm269_vm2, %v938_v22  ;;  %8697 = vmatprep.mubr.msk.bf16.mxu1 %vm495_vm1, %v2453_v11  ;;  %v461_v11 = vld [vmem:[#allocation2 + $0xf8] sm:$0xff]  ;;  %v7719_v60 = vld [vmem:[%s9180_s29 + $0xa9] sm:$0xff]  ;;  %v2457_v25 = vpack.c.bf16 %v7623_v3, %v7622_v0 }
 0x117   : > { %972 = vst.msk [vmem:[#allocation2 + $0xb8] sm:$0xff] %vm269_vm2, %v908_v23  ;;  %8760 = vmatmul.mubr.msk.bf16.gmra.mrb[128].mxu0 %vm495_vm1, %v3130_v19  ;;  %v7720_v24 = vld [vmem:[%s9180_s29 + $0xb1] sm:$0xff]  ;;  %v459_v23 = vld [vmem:[#allocation2 + $0xe8] sm:$0xff]  ;;  %v7726_v0 = vld [vmem:[%s9180_s29 + $0xf9] sm:$0xff] }
 0x118   : > { %970 = vst.msk [vmem:[#allocation2 + $0xa8] sm:$0xff] %vm269_vm2, %v906_v35  ;;  %v8521_v21 = vpop.f32.mrb[24].mxu1  ;;  %8763 = vmatprep.mubr.msk.bf16.mxu0 %vm495_vm1, %v3131_v17  ;;  %v7631_v57 = vld [vmem:[%s9180_s29 + $0x110] sm:$0xff] }
 0x119   : > { %v943_v28 = vadd.f32 %v8521_v21, %v488_v9  ;;  %v854_v38 = vpop.f32.mrb[25].mxu1  ;;  %v7625_v21 = vld [vmem:[%s9180_s29 + $0xc8] sm:$0xff]  ;;  %v1115_v58 = vld [vmem:[#allocation2 + $0x30] sm:$0xff] }
 0x11a   : > { %v8489_v29 = vpop.f32.mrb[24].mxu0  ;;  %v941_v51 = vadd.f32 %v854_v38, %v486_v27  ;;  %v8522_v33 = vpop.f32.mrb[26].mxu1  ;;  %v7721_v38 = vld [vmem:[%s9180_s29 + $0xc1] sm:$0xff]  ;;  %v2458_v34 = vpack.c.bf16 %v7625_v21, %v7624_v16 }
 0x11b   : > { %v911_v12 = vadd.f32 %v8489_v29, %v456_v5  ;;  %v726_v36 = vpop.f32.mrb[25].mxu0  ;;  %1007 = vst.msk [vmem:[#allocation2 + $0x1d0] sm:$0xff] %vm269_vm2, %v943_v28  ;;  %v944_v45 = vadd.f32 %v8522_v33, %v489_v37  ;;  %v857_v41 = vpop.f32.mrb[27].mxu1  ;;  %v3134_v37 = vpack.c.bf16 %v7718_v50, %v7717_v6  ;;  %v3135_v5 = vpack.c.bf16 %v7720_v24, %v7719_v60  ;;  %v7724_v33 = vld [vmem:[%s9180_s29 + $0xe1] sm:$0xff]  ;;  %v7727_v50 = vld [vmem:[%s9180_s29 + $0x109] sm:$0xff] }
 0x11c   : > { %v909_v42 = vadd.f32 %v726_v36, %v454_v30  ;;  %v8490_v43 = vpop.f32.mrb[26].mxu0  ;;  %1005 = vst.msk [vmem:[#allocation2 + $0x1c0] sm:$0xff] %vm269_vm2, %v941_v51  ;;  %v942_v46 = vadd.f32 %v857_v41, %v487_v1  ;;  %v7626_v30 = vld [vmem:[%s9180_s29 + $0xd8] sm:$0xff]  ;;  %v7632_v16 = vld [vmem:[%s9180_s29 + $0x120] sm:$0xff]  ;;  %v7633_v21 = vld [vmem:[%s9180_s29 + $0x128] sm:$0xff] }
 0x11d   : > { %975 = vst.msk [vmem:[#allocation2 + $0xd0] sm:$0xff] %vm269_vm2, %v911_v12  ;;  %v912_v48 = vadd.f32 %v8490_v43, %v457_v59  ;;  %v729_v61 = vpop.f32.mrb[27].mxu0  ;;  %1008 = vst.msk [vmem:[#allocation2 + $0x1d8] sm:$0xff] %vm269_vm2, %v944_v45  ;;  %8698 = vmatmul.mubr.msk.bf16.gmra.mrb[132].mxu1 %vm495_vm1, %v2454_v2  ;;  %v7722_v2 = vld [vmem:[%s9180_s29 + $0xc9] sm:$0xff]  ;;  %v1109_v59 = vld [vmem:[#allocation2] sm:$0xff]  ;;  %v2459_v45 = vpack.c.bf16 %v7627_v49, %v7626_v30 }
 0x11e   : > { %973 = vst.msk [vmem:[#allocation2 + $0xc0] sm:$0xff] %vm269_vm2, %v909_v42  ;;  %v910_v55 = vadd.f32 %v729_v61, %v455_v39  ;;  %1006 = vst.msk [vmem:[#allocation2 + $0x1c8] sm:$0xff] %vm269_vm2, %v942_v46  ;;  %8701 = vmatprep.mubr.msk.bf16.mxu1 %vm495_vm1, %v2455_v40  ;;  %v7723_v51 = vld [vmem:[%s9180_s29 + $0xd9] sm:$0xff]  ;;  %v1110_v42 = vld [vmem:[#allocation2 + $0x8] sm:$0xff]  ;;  %v3136_v46 = vpack.c.bf16 %v7722_v2, %v7721_v38 }
 0x11f   : > { %976 = vst.msk [vmem:[#allocation2 + $0xd8] sm:$0xff] %vm269_vm2, %v912_v48  ;;  %8764 = vmatmul.mubr.msk.bf16.gmra.mrb[132].mxu0 %vm495_vm1, %v3132_v44  ;;  %v1112_v36 = vld [vmem:[#allocation2 + $0x18] sm:$0xff]  ;;  %v7635_v49 = vld [vmem:[%s9180_s29 + $0x140] sm:$0xff]  ;;  %v7730_v2 = vld [vmem:[%s9180_s29 + $0x129] sm:$0xff] }
 0x120   : > { %974 = vst.msk [vmem:[#allocation2 + $0xc8] sm:$0xff] %vm269_vm2, %v910_v55  ;;  %v8525_v4 = vpop.f32.mrb[28].mxu1  ;;  %8767 = vmatprep.mubr.msk.bf16.mxu0 %vm495_vm1, %v3133_v52  ;;  %v3137_v52 = vpack.c.bf16 %v7724_v33, %v7723_v51  ;;  %v7629_v55 = vld [vmem:[%s9180_s29 + $0xf8] sm:$0xff]  ;;  %v7729_v38 = vld [vmem:[%s9180_s29 + $0x121] sm:$0xff] }
 0x121   : > { %v947_v20 = vadd.f32 %v8525_v4, %v492_v53  ;;  %v870_v8 = vpop.f32.mrb[29].mxu1  ;;  %v1113_v4 = vld [vmem:[#allocation2 + $0x20] sm:$0xff]  ;;  %v7634_v30 = vld [vmem:[%s9180_s29 + $0x138] sm:$0xff] }
 0x122   : > { %v8493_v32 = vpop.f32.mrb[28].mxu0  ;;  %v945_v14 = vadd.f32 %v870_v8, %v490_v54  ;;  %v8526_v15 = vpop.f32.mrb[30].mxu1  ;;  %v7628_v54 = vld [vmem:[%s9180_s29 + $0xf0] sm:$0xff]  ;;  %v7731_v51 = vld [vmem:[%s9180_s29 + $0x139] sm:$0xff]  ;;  %v7732_v33 = vld [vmem:[%s9180_s29 + $0x141] sm:$0xff] }
 0x123   : > { %v915_v19 = vadd.f32 %v8493_v32, %v460_v7  ;;  %v742_v22 = vpop.f32.mrb[29].mxu0  ;;  %1011 = vst.msk [vmem:[#allocation2 + $0x1f0] sm:$0xff] %vm269_vm2, %v947_v20  ;;  %v948_v17 = vadd.f32 %v8526_v15, %v493_v56  ;;  %v873_v9 = vpop.f32.mrb[31].mxu1  ;;  %v7630_v56 = vld [vmem:[%s9180_s29 + $0x108] sm:$0xff]  ;;  %v7725_v7 = vld [vmem:[%s9180_s29 + $0xf1] sm:$0xff]  ;;  %v2460_v6 = vpack.c.bf16 %v7629_v55, %v7628_v54 }
 0x124   : > { %v913_v27 = vadd.f32 %v742_v22, %v458_v18  ;;  %v8494_v35 = vpop.f32.mrb[30].mxu0  ;;  %1009 = vst.msk [vmem:[#allocation2 + $0x1e0] sm:$0xff] %vm269_vm2, %v945_v14  ;;  %v946_v47 = vadd.f32 %v873_v9, %v491_v63  ;;  %v7728_v20 = vld [vmem:[%s9180_s29 + $0x111] sm:$0xff]  ;;  %v2461_v24 = vpack.c.bf16 %v7631_v57, %v7630_v56  ;;  %v1114_v22 = vld [vmem:[#allocation2 + $0x28] sm:$0xff]  ;;  %v3141_v57 = vpack.c.bf16 %v7732_v33, %v7731_v51 }
 0x125   : > { %979 = vst.msk [vmem:[#allocation2 + $0xf0] sm:$0xff] %vm269_vm2, %v915_v19  ;;  %v916_v62 = vadd.f32 %v8494_v35, %v461_v11  ;;  %v745_v1 = vpop.f32.mrb[31].mxu0  ;;  %1012 = vst.msk [vmem:[#allocation2 + $0x1f8] sm:$0xff] %vm269_vm2, %v948_v17  ;;  %8702 = vmatmul.mubr.msk.bf16.gmra.mrb[136].mxu1 %vm495_vm1, %v2456_v10  ;;  %v1116_v32 = vld [vmem:[#allocation2 + $0x38] sm:$0xff]  ;;  %v3138_v17 = vpack.c.bf16 %v7726_v0, %v7725_v7  ;;  %v1127_v51 = vld [vmem:[#allocation2 + $0x90] sm:$0xff] }
 0x126   : > { %977 = vst.msk [vmem:[#allocation2 + $0xe0] sm:$0xff] %vm269_vm2, %v913_v27  ;;  %v914_v13 = vadd.f32 %v745_v1, %v459_v23  ;;  %1010 = vst.msk [vmem:[#allocation2 + $0x1e8] sm:$0xff] %vm269_vm2, %v946_v47  ;;  %8705 = vmatprep.mubr.msk.bf16.mxu1 %vm495_vm1, %v2457_v25  ;;  %v3139_v47 = vpack.c.bf16 %v7728_v20, %v7727_v50  ;;  %v1123_v50 = vld [vmem:[#allocation2 + $0x70] sm:$0xff] }
 0x127   : > { %980 = vst.msk [vmem:[#allocation2 + $0xf8] sm:$0xff] %vm269_vm2, %v916_v62  ;;  %8768 = vmatmul.mubr.msk.bf16.gmra.mrb[136].mxu0 %vm495_vm1, %v3134_v37 }
 0x128   : > { %978 = vst.msk [vmem:[#allocation2 + $0xe8] sm:$0xff] %vm269_vm2, %v914_v13  ;;  %v8531_v28 = vpop.f32.mrb[32].mxu1  ;;  %8771 = vmatprep.mubr.msk.bf16.mxu0 %vm495_vm1, %v3135_v5 }
 0x129   : > { %v1565_v29 = vadd.f32 %v8531_v28, %v1111_v26  ;;  %v1308_v31 = vpop.f32.mrb[33].mxu1  ;;  %v1119_v26 = vld [vmem:[#allocation2 + $0x50] sm:$0xff] }
 0x12a   : > { %v1563_v12 = vadd.f32 %v1308_v31, %v1109_v59  ;;  %v8532_v39 = vpop.f32.mrb[34].mxu1  ;;  %v8597_v40 = vpop.f32.mrb[32].mxu0  ;;  %v1117_v59 = vld [vmem:[#allocation2 + $0x40] sm:$0xff] }
 0x12b   : > { %1629 = vst.msk [vmem:[#allocation2 + $0x10] sm:$0xff] %vm269_vm2, %v1565_v29  ;;  %v1566_v41 = vadd.f32 %v8532_v39, %v1112_v36  ;;  %v1311_v43 = vpop.f32.mrb[35].mxu1  ;;  %v1986_v44 = vpop.f32.mrb[33].mxu0  ;;  %v1120_v39 = vld [vmem:[#allocation2 + $0x58] sm:$0xff] }
 0x12c   : > { %1627 = vst.msk [vmem:[#allocation2] sm:$0xff] %vm269_vm2, %v1563_v12  ;;  %v1564_v48 = vadd.f32 %v1311_v43, %v1110_v42  ;;  %v8598_v61 = vpop.f32.mrb[34].mxu0 }
 0x12d   : > { %1630 = vst.msk [vmem:[#allocation2 + $0x18] sm:$0xff] %vm269_vm2, %v1566_v41  ;;  %8706 = vmatmul.mubr.msk.bf16.gmra.mrb[140].mxu1 %vm495_vm1, %v2458_v34  ;;  %v1989_v53 = vpop.f32.mrb[35].mxu0  ;;  %v2462_v34 = vpack.c.bf16 %v7633_v21, %v7632_v16  ;;  %v2463_v41 = vpack.c.bf16 %v7635_v49, %v7634_v30 }
 0x12e   : > { %1628 = vst.msk [vmem:[#allocation2 + $0x8] sm:$0xff] %vm269_vm2, %v1564_v48  ;;  %8709 = vmatprep.mubr.msk.bf16.mxu1 %vm495_vm1, %v2459_v45 }
 0x12f   : > { %8772 = vmatmul.mubr.msk.bf16.gmra.mrb[140].mxu0 %vm495_vm1, %v3136_v46  ;;  %v1118_v46 = vld [vmem:[#allocation2 + $0x48] sm:$0xff] }
 0x130   : > { %v8535_v63 = vpop.f32.mrb[36].mxu1  ;;  %8775 = vmatprep.mubr.msk.bf16.mxu0 %vm495_vm1, %v3137_v52  ;;  %v3140_v52 = vpack.c.bf16 %v7730_v2, %v7729_v38 }
 0x131   : > { %v1569_v3 = vadd.f32 %v8535_v63, %v1115_v58  ;;  %v1324_v18 = vpop.f32.mrb[37].mxu1 }
 0x132   : > { %v1789_v8 = vld [vmem:[#allocation2 + $0x10] sm:$0xff]  ;;  %v1567_v10 = vadd.f32 %v1324_v18, %v1113_v4  ;;  %v8536_v11 = vpop.f32.mrb[38].mxu1  ;;  %v8601_v60 = vpop.f32.mrb[36].mxu0  ;;  %v7637_v4 = vld [vmem:[%s9180_s29 + $0x158] sm:$0xff]  ;;  %v7638_v18 = vld [vmem:[%s9180_s29 + $0x168] sm:$0xff] }
 0x133   : > { %v2243_v14 = vadd.f32 %v8597_v40, %v1789_v8  ;;  %1633 = vst.msk [vmem:[#allocation2 + $0x30] sm:$0xff] %vm269_vm2, %v1569_v3  ;;  %v1787_v15 = vld [vmem:[#allocation2] sm:$0xff]  ;;  %v1570_v19 = vadd.f32 %v8536_v11, %v1116_v32  ;;  %v1327_v23 = vpop.f32.mrb[39].mxu1  ;;  %v2002_v25 = vpop.f32.mrb[37].mxu0  ;;  %v7636_v3 = vld [vmem:[%s9180_s29 + $0x150] sm:$0xff] }
 0x134   : > { %v2241_v9 = vadd.f32 %v1986_v44, %v1787_v15  ;;  %1631 = vst.msk [vmem:[#allocation2 + $0x20] sm:$0xff] %vm269_vm2, %v1567_v10  ;;  %v1790_v27 = vld [vmem:[#allocation2 + $0x18] sm:$0xff]  ;;  %v1568_v35 = vadd.f32 %v1327_v23, %v1114_v22  ;;  %v8602_v37 = vpop.f32.mrb[38].mxu0  ;;  %v1121_v11 = vld [vmem:[#allocation2 + $0x60] sm:$0xff] }
 0x135   : > { %2307 = vst.msk [vmem:[#allocation2 + $0x10] sm:$0xff] %vm269_vm2, %v2243_v14  ;;  %v2244_v62 = vadd.f32 %v8598_v61, %v1790_v27  ;;  %1634 = vst.msk [vmem:[#allocation2 + $0x38] sm:$0xff] %vm269_vm2, %v1570_v19  ;;  %v1788_v1 = vld [vmem:[#allocation2 + $0x8] sm:$0xff]  ;;  %8710 = vmatmul.mubr.msk.bf16.gmra.mrb[144].mxu1 %vm495_vm1, %v2460_v6  ;;  %v2005_v5 = vpop.f32.mrb[39].mxu0  ;;  %v7639_v6 = vld [vmem:[%s9180_s29 + $0x170] sm:$0xff] }
 0x136   : > { %2305 = vst.msk [vmem:[#allocation2] sm:$0xff] %vm269_vm2, %v2241_v9  ;;  %v2242_v13 = vadd.f32 %v1989_v53, %v1788_v1  ;;  %1632 = vst.msk [vmem:[#allocation2 + $0x28] sm:$0xff] %vm269_vm2, %v1568_v35  ;;  %8713 = vmatprep.mubr.msk.bf16.mxu1 %vm495_vm1, %v2461_v24  ;;  %v7733_v8 = vld [vmem:[%s9180_s29 + $0x151] sm:$0xff]  ;;  %v7734_v10 = vld [vmem:[%s9180_s29 + $0x159] sm:$0xff]  ;;  %v2464_v24 = vpack.c.bf16 %v7637_v4, %v7636_v3  ;;  %v2465_v9 = vpack.c.bf16 %v7639_v6, %v7638_v18 }
 0x137   : > { %2308 = vst.msk [vmem:[#allocation2 + $0x18] sm:$0xff] %vm269_vm2, %v2244_v62  ;;  %8776 = vmatmul.mubr.msk.bf16.gmra.mrb[144].mxu0 %vm495_vm1, %v3138_v17  ;;  %v7735_v14 = vld [vmem:[%s9180_s29 + $0x169] sm:$0xff]  ;;  %v7736_v15 = vld [vmem:[%s9180_s29 + $0x171] sm:$0xff] }
 0x138   : > { %2306 = vst.msk [vmem:[#allocation2 + $0x8] sm:$0xff] %vm269_vm2, %v2242_v13  ;;  %v8539_v28 = vpop.f32.mrb[40].mxu1  ;;  %8779 = vmatprep.mubr.msk.bf16.mxu0 %vm495_vm1, %v3139_v47  ;;  %v1124_v23 = vld [vmem:[#allocation2 + $0x78] sm:$0xff]  ;;  %v1122_v47 = vld [vmem:[#allocation2 + $0x68] sm:$0xff]  ;;  %v3143_v49 = vpack.c.bf16 %v7736_v15, %v7735_v14  ;;  %v1131_v14 = vld [vmem:[#allocation2 + $0xb0] sm:$0xff] }
 0x139   : > { %v1573_v29 = vadd.f32 %v8539_v28, %v1119_v26  ;;  %v1340_v31 = vpop.f32.mrb[41].mxu1 }
 0x13a   : > { %v1793_v12 = vld [vmem:[#allocation2 + $0x30] sm:$0xff]  ;;  %v1571_v36 = vadd.f32 %v1340_v31, %v1117_v59  ;;  %v8540_v40 = vpop.f32.mrb[42].mxu1  ;;  %v8605_v45 = vpop.f32.mrb[40].mxu0  ;;  %v7641_v59 = vld [vmem:[%s9180_s29 + $0x188] sm:$0xff]  ;;  %v7772_v31 = vld [vmem:[%s9185_s7 + $0x1a] sm:$0xff] }
 0x13b   : > { %v2247_v42 = vadd.f32 %v8601_v60, %v1793_v12  ;;  %1637 = vst.msk [vmem:[#allocation2 + $0x50] sm:$0xff] %vm269_vm2, %v1573_v29  ;;  %v1791_v43 = vld [vmem:[#allocation2 + $0x20] sm:$0xff]  ;;  %v1574_v44 = vadd.f32 %v8540_v40, %v1120_v39  ;;  %v1343_v48 = vpop.f32.mrb[43].mxu1  ;;  %v2018_v61 = vpop.f32.mrb[41].mxu0 }
 0x13c   : > { %v2245_v53 = vadd.f32 %v2002_v25, %v1791_v43  ;;  %1635 = vst.msk [vmem:[#allocation2 + $0x40] sm:$0xff] %vm269_vm2, %v1571_v36  ;;  %v1794_v54 = vld [vmem:[#allocation2 + $0x38] sm:$0xff]  ;;  %v1572_v55 = vadd.f32 %v1343_v48, %v1118_v46  ;;  %v8606_v56 = vpop.f32.mrb[42].mxu0  ;;  %v7640_v29 = vld [vmem:[%s9180_s29 + $0x180] sm:$0xff]  ;;  %v7738_v36 = vld [vmem:[%s9180_s29 + $0x189] sm:$0xff] }
 0x13d   : > { %2311 = vst.msk [vmem:[#allocation2 + $0x30] sm:$0xff] %vm269_vm2, %v2247_v42  ;;  %v2248_v58 = vadd.f32 %v8602_v37, %v1794_v54  ;;  %1638 = vst.msk [vmem:[#allocation2 + $0x58] sm:$0xff] %vm269_vm2, %v1574_v44  ;;  %v1792_v63 = vld [vmem:[#allocation2 + $0x28] sm:$0xff]  ;;  %8714 = vmatmul.mubr.msk.bf16.gmra.mrb[148].mxu1 %vm495_vm1, %v2462_v34  ;;  %v2021_v7 = vpop.f32.mrb[43].mxu0  ;;  %v1125_v40 = vld [vmem:[#allocation2 + $0x80] sm:$0xff] }
 0x13e   : > { %2309 = vst.msk [vmem:[#allocation2 + $0x20] sm:$0xff] %vm269_vm2, %v2245_v53  ;;  %v2246_v0 = vadd.f32 %v2005_v5, %v1792_v63  ;;  %1636 = vst.msk [vmem:[#allocation2 + $0x48] sm:$0xff] %vm269_vm2, %v1572_v55  ;;  %8717 = vmatprep.mubr.msk.bf16.mxu1 %vm495_vm1, %v2463_v41  ;;  %v3142_v5 = vpack.c.bf16 %v7734_v10, %v7733_v8  ;;  %v7773_v34 = vld [vmem:[%s9185_s7 + $0x22] sm:$0xff]  ;;  %v2466_v41 = vpack.c.bf16 %v7641_v59, %v7640_v29  ;;  %v7869_v42 = vld [vmem:[%s9185_s7 + $0x30] sm:$0xff] }
 0x13f   : > { %2312 = vst.msk [vmem:[#allocation2 + $0x38] sm:$0xff] %vm269_vm2, %v2248_v58  ;;  %8780 = vmatmul.mubr.msk.bf16.gmra.mrb[148].mxu0 %vm495_vm1, %v3140_v52  ;;  %v7737_v12 = vld [vmem:[%s9180_s29 + $0x181] sm:$0xff]  ;;  %v7870_v43 = vld [vmem:[%s9185_s7 + $0x38] sm:$0xff]  ;;  %v3791_v53 = vpack.c.bf16 %v7773_v34, %v7772_v31 }
 0x140   : > { %2310 = vst.msk [vmem:[#allocation2 + $0x28] sm:$0xff] %vm269_vm2, %v2246_v0  ;;  %v8543_v20 = vpop.f32.mrb[44].mxu1  ;;  %8783 = vmatprep.mubr.msk.bf16.mxu0 %vm495_vm1, %v3141_v57  ;;  %v1128_v48 = vld [vmem:[#allocation2 + $0x98] sm:$0xff]  ;;  %v1126_v57 = vld [vmem:[#allocation2 + $0x88] sm:$0xff]  ;;  %v4471_v6 = vpack.c.bf16 %v7870_v43, %v7869_v42 }
 0x141   : > { %v1577_v32 = vadd.f32 %v8543_v20, %v1123_v50  ;;  %v1356_v60 = vpop.f32.mrb[45].mxu1  ;;  %v7778_v42 = vld [vmem:[%s9185_s7 + $0x62] sm:$0xff]  ;;  %v7779_v43 = vld [vmem:[%s9185_s7 + $0x6a] sm:$0xff] }
 0x142   : > { %v1797_v19 = vld [vmem:[#allocation2 + $0x50] sm:$0xff]  ;;  %v1575_v22 = vadd.f32 %v1356_v60, %v1121_v11  ;;  %v8544_v25 = vpop.f32.mrb[46].mxu1  ;;  %v8609_v17 = vpop.f32.mrb[44].mxu0  ;;  %v7775_v11 = vld [vmem:[%s9185_s7 + $0x3a] sm:$0xff] }
 0x143   : > { %v2251_v27 = vadd.f32 %v8605_v45, %v1797_v19  ;;  %1641 = vst.msk [vmem:[#allocation2 + $0x70] sm:$0xff] %vm269_vm2, %v1577_v32  ;;  %v1795_v35 = vld [vmem:[#allocation2 + $0x40] sm:$0xff]  ;;  %v1578_v37 = vadd.f32 %v8544_v25, %v1124_v23  ;;  %v1359_v62 = vpop.f32.mrb[47].mxu1  ;;  %v2034_v1 = vpop.f32.mrb[45].mxu0  ;;  %v7774_v32 = vld [vmem:[%s9185_s7 + $0x32] sm:$0xff]  ;;  %v7776_v60 = vld [vmem:[%s9185_s7 + $0x4a] sm:$0xff] }
 0x144   : > { %v2249_v13 = vadd.f32 %v2018_v61, %v1795_v35  ;;  %1639 = vst.msk [vmem:[#allocation2 + $0x60] sm:$0xff] %vm269_vm2, %v1575_v22  ;;  %v1798_v16 = vld [vmem:[#allocation2 + $0x58] sm:$0xff]  ;;  %v1576_v21 = vadd.f32 %v1359_v62, %v1122_v47  ;;  %v8610_v30 = vpop.f32.mrb[46].mxu0  ;;  %v7871_v19 = vld [vmem:[%s9185_s7 + $0x48] sm:$0xff]  ;;  %v7872_v22 = vld [vmem:[%s9185_s7 + $0x50] sm:$0xff] }
 0x145   : > { %2315 = vst.msk [vmem:[#allocation2 + $0x50] sm:$0xff] %vm269_vm2, %v2251_v27  ;;  %v2252_v26 = vadd.f32 %v8606_v56, %v1798_v16  ;;  %1642 = vst.msk [vmem:[#allocation2 + $0x78] sm:$0xff] %vm269_vm2, %v1578_v37  ;;  %v1796_v28 = vld [vmem:[#allocation2 + $0x48] sm:$0xff]  ;;  %8718 = vmatmul.mubr.msk.bf16.gmra.mrb[152].mxu1 %vm495_vm1, %v2464_v24  ;;  %v2037_v38 = vpop.f32.mrb[47].mxu0  ;;  %v7777_v24 = vld [vmem:[%s9185_s7 + $0x52] sm:$0xff]  ;;  %v4472_v29 = vpack.c.bf16 %v7872_v22, %v7871_v19 }
 0x146   : > { %2313 = vst.msk [vmem:[#allocation2 + $0x40] sm:$0xff] %vm269_vm2, %v2249_v13  ;;  %v2250_v2 = vadd.f32 %v2021_v7, %v1796_v28  ;;  %1640 = vst.msk [vmem:[#allocation2 + $0x68] sm:$0xff] %vm269_vm2, %v1576_v21  ;;  %8721 = vmatprep.mubr.msk.bf16.mxu1 %vm495_vm1, %v2465_v9  ;;  %v3144_v7 = vpack.c.bf16 %v7738_v36, %v7737_v12  ;;  %v1129_v25 = vld [vmem:[#allocation2 + $0xa0] sm:$0xff]  ;;  %v3792_v9 = vpack.c.bf16 %v7775_v11, %v7774_v32  ;;  %v7874_v35 = vld [vmem:[%s9185_s7 + $0x68] sm:$0xff] }
 0x147   : > { %2316 = vst.msk [vmem:[#allocation2 + $0x58] sm:$0xff] %vm269_vm2, %v2252_v26  ;;  %8784 = vmatmul.mubr.msk.bf16.gmra.mrb[152].mxu0 %vm495_vm1, %v3142_v5  ;;  %v7873_v27 = vld [vmem:[%s9185_s7 + $0x60] sm:$0xff]  ;;  %v1132_v62 = vld [vmem:[#allocation2 + $0xb8] sm:$0xff]  ;;  %v3793_v13 = vpack.c.bf16 %v7777_v24, %v7776_v60  ;;  %v9078_v28 = vld [vmem:[%s11727_s2 + $0xe] sm:$0x3] }
 0x148   : > { %2314 = vst.msk [vmem:[#allocation2 + $0x48] sm:$0xff] %vm269_vm2, %v2250_v2  ;;  %v8547_v33 = vpop.f32.mrb[48].mxu1  ;;  %8787 = vmatprep.mubr.msk.bf16.mxu0 %vm495_vm1, %v3143_v49  ;;  %v1130_v49 = vld [vmem:[#allocation2 + $0xa8] sm:$0xff] }
 0x149   : > { %v1581_v39 = vadd.f32 %v8547_v33, %v1127_v51  ;;  %v1372_v45 = vpop.f32.mrb[49].mxu1  ;;  %v4473_v33 = vpack.c.bf16 %v7874_v35, %v7873_v27  ;;  %v7782_v27 = vld [vmem:[%s9185_s7 + $0x92] sm:$0xff]  ;;  %v7783_v35 = vld [vmem:[%s9185_s7 + $0x9a] sm:$0xff] }
 0x14a   : > { %v1801_v44 = vld [vmem:[#allocation2 + $0x70] sm:$0xff]  ;;  %v1579_v46 = vadd.f32 %v1372_v45, %v1125_v40  ;;  %v8548_v61 = vpop.f32.mrb[50].mxu1  ;;  %v8613_v52 = vpop.f32.mrb[48].mxu0 }
 0x14b   : > { %v2255_v54 = vadd.f32 %v8609_v17, %v1801_v44  ;;  %1645 = vst.msk [vmem:[#allocation2 + $0x90] sm:$0xff] %vm269_vm2, %v1581_v39  ;;  %v1799_v55 = vld [vmem:[#allocation2 + $0x60] sm:$0xff]  ;;  %v1582_v56 = vadd.f32 %v8548_v61, %v1128_v48  ;;  %v1375_v58 = vpop.f32.mrb[51].mxu1  ;;  %v2050_v63 = vpop.f32.mrb[49].mxu0  ;;  %v9079_v40 = vld [vmem:[%s11727_s2 + $0x10] sm:$0x3] }
 0x14c   : > { %v2253_v0 = vadd.f32 %v2034_v1, %v1799_v55  ;;  %1643 = vst.msk [vmem:[#allocation2 + $0x80] sm:$0xff] %vm269_vm2, %v1579_v46  ;;  %v1802_v3 = vld [vmem:[#allocation2 + $0x78] sm:$0xff]  ;;  %v1580_v4 = vadd.f32 %v1375_v58, %v1126_v57  ;;  %v8614_v18 = vpop.f32.mrb[50].mxu0  ;;  %v6022_v45 = vsel %vm592_vm0, %v9079_v40, 0  ;;  %v7781_v46 = vld [vmem:[%s9185_s7 + $0x82] sm:$0xff]  ;;  %v1135_v48 = vld [vmem:[#allocation2 + $0xd0] sm:$0xff]  ;;  %v3794_v57 = vpack.c.bf16 %v7779_v43, %v7778_v42 }
 0x14d   : > { %2319 = vst.msk [vmem:[#allocation2 + $0x70] sm:$0xff] %vm269_vm2, %v2255_v54  ;;  %v2256_v50 = vadd.f32 %v8610_v30, %v1802_v3  ;;  %1646 = vst.msk [vmem:[#allocation2 + $0x98] sm:$0xff] %vm269_vm2, %v1582_v56  ;;  %v1800_v20 = vld [vmem:[#allocation2 + $0x68] sm:$0xff]  ;;  %8722 = vmatmul.mubr.msk.bf16.gmra.mrb[156].mxu1 %vm495_vm1, %v2466_v41  ;;  %v2053_v8 = vpop.f32.mrb[51].mxu0  ;;  %v7780_v44 = vld [vmem:[%s9185_s7 + $0x7a] sm:$0xff] }
 0x14e   : > { %2317 = vst.msk [vmem:[#allocation2 + $0x60] sm:$0xff] %vm269_vm2, %v2253_v0  ;;  %v2254_v10 = vadd.f32 %v2037_v38, %v1800_v20  ;;  %1644 = vst.msk [vmem:[#allocation2 + $0x88] sm:$0xff] %vm269_vm2, %v1580_v4  ;;  %8793 = vmatprep.mubr.msk.bf16.mxu1 %vm495_vm1, %v3791_v53  ;;  %v5344_v38 = vsel %vm592_vm0, %v9078_v28, 0  ;;  %v7876_v53 = vld [vmem:[%s9185_s7 + $0x80] sm:$0xff]  ;;  %v7877_v58 = vld [vmem:[%s9185_s7 + $0x90] sm:$0xff] }
 0x14f   : > { %2320 = vst.msk [vmem:[#allocation2 + $0x78] sm:$0xff] %vm269_vm2, %v2256_v50  ;;  %8788 = vmatmul.mubr.msk.bf16.gmra.mrb[156].mxu0 %vm495_vm1, %v3144_v7  ;;  %v1133_v55 = vld [vmem:[#allocation2 + $0xc0] sm:$0xff]  ;;  %v1136_v3 = vld [vmem:[#allocation2 + $0xd8] sm:$0xff]  ;;  %v7882_v28 = vld [vmem:[%s9185_s7 + $0xc8] sm:$0xff] }
 0x150   : > { %2318 = vst.msk [vmem:[#allocation2 + $0x68] sm:$0xff] %vm269_vm2, %v2254_v10  ;;  %v8551_v15 = vpop.f32.mrb[52].mxu1  ;;  %8859 = vmatprep.mubr.msk.bf16.mxu0 %vm495_vm1, %v4471_v6  ;;  %v3795_v6 = vpack.c.bf16 %v7781_v46, %v7780_v44  ;;  %v1134_v10 = vld [vmem:[#allocation2 + $0xc8] sm:$0xff] }
 0x151   : > { %v1585_v23 = vadd.f32 %v8551_v15, %v1131_v14  ;;  %v1388_v17 = vpop.f32.mrb[53].mxu1 }
 0x152   : > { %v1805_v37 = vld [vmem:[#allocation2 + $0x90] sm:$0xff]  ;;  %v1583_v47 = vadd.f32 %v1388_v17, %v1129_v25  ;;  %v8552_v1 = vpop.f32.mrb[54].mxu1  ;;  %v8617_v5 = vpop.f32.mrb[52].mxu0 }
 0x153   : > { %v2259_v16 = vadd.f32 %v8613_v52, %v1805_v37  ;;  %1649 = vst.msk [vmem:[#allocation2 + $0xb0] sm:$0xff] %vm269_vm2, %v1585_v23  ;;  %v1803_v21 = vld [vmem:[#allocation2 + $0x80] sm:$0xff]  ;;  %v1586_v30 = vadd.f32 %v8552_v1, %v1132_v62  ;;  %v1391_v26 = vpop.f32.mrb[55].mxu1  ;;  %v2066_v2 = vpop.f32.mrb[53].mxu0  ;;  %v7875_v52 = vld [vmem:[%s9185_s7 + $0x78] sm:$0xff]  ;;  %v7784_v37 = vld [vmem:[%s9185_s7 + $0xaa] sm:$0xff] }
 0x154   : > { %v2257_v59 = vadd.f32 %v2050_v63, %v1803_v21  ;;  %1647 = vst.msk [vmem:[#allocation2 + $0xa0] sm:$0xff] %vm269_vm2, %v1583_v47  ;;  %v1806_v31 = vld [vmem:[#allocation2 + $0x98] sm:$0xff]  ;;  %v1584_v34 = vadd.f32 %v1391_v26, %v1130_v49  ;;  %v8618_v51 = vpop.f32.mrb[54].mxu0  ;;  %v4474_v60 = vpack.c.bf16 %v7876_v53, %v7875_v52  ;;  %v1139_v62 = vld [vmem:[#allocation2 + $0xf0] sm:$0xff]  ;;  %v1137_v21 = vld [vmem:[#allocation2 + $0xe0] sm:$0xff]  ;;  %v3796_v49 = vpack.c.bf16 %v7783_v35, %v7782_v27 }
 0x155   : > { %2323 = vst.msk [vmem:[#allocation2 + $0x90] sm:$0xff] %vm269_vm2, %v2259_v16  ;;  %v2260_v12 = vadd.f32 %v8614_v18, %v1806_v31  ;;  %1650 = vst.msk [vmem:[#allocation2 + $0xb8] sm:$0xff] %vm269_vm2, %v1586_v30  ;;  %v1804_v36 = vld [vmem:[#allocation2 + $0x88] sm:$0xff]  ;;  %8794 = vmatmul.mubr.msk.bf16.vlgmr.msra.gmra.mrb[160].mxu1 %vm495_vm1, %v3792_v9  ;;  %v2069_v39 = vpop.f32.mrb[55].mxu0  ;;  %v7878_v63 = vld [vmem:[%s9185_s7 + $0x98] sm:$0xff] }
 0x156   : > { %2321 = vst.msk [vmem:[#allocation2 + $0x80] sm:$0xff] %vm269_vm2, %v2257_v59  ;;  %v2258_v41 = vadd.f32 %v2053_v8, %v1804_v36  ;;  %1648 = vst.msk [vmem:[#allocation2 + $0xa8] sm:$0xff] %vm269_vm2, %v1584_v34  ;;  %8924 = vmatpush3.bf16.msra.mxu1 %v5344_v38  ;;  %8797 = vmatprep.mubr.msk.bf16.mxu1 %vm495_vm1, %v3793_v13  ;;  %v4475_v22 = vpack.c.bf16 %v7878_v63, %v7877_v58  ;;  %v7785_v47 = vld [vmem:[%s9185_s7 + $0xb2] sm:$0xff]  ;;  %v7881_v26 = vld [vmem:[%s9185_s7 + $0xc0] sm:$0xff] }
 0x157   : > { %2324 = vst.msk [vmem:[#allocation2 + $0x98] sm:$0xff] %vm269_vm2, %v2260_v12  ;;  %8860 = vmatmul.mubr.msk.bf16.vlgmr.msra.gmra.mrb[160].mxu0 %vm495_vm1, %v4472_v29  ;;  %v7880_v13 = vld [vmem:[%s9185_s7 + $0xb0] sm:$0xff]  ;;  %v1140_v29 = vld [vmem:[#allocation2 + $0xf8] sm:$0xff]  ;;  %v3797_v34 = vpack.c.bf16 %v7785_v47, %v7784_v37  ;;  %v1138_v36 = vld [vmem:[#allocation2 + $0xe8] sm:$0xff]  ;;  %v4477_v46 = vpack.c.bf16 %v7882_v28, %v7881_v26 }
 0x158   : > { %2322 = vst.msk [vmem:[#allocation2 + $0x88] sm:$0xff] %vm269_vm2, %v2258_v41  ;;  %v8555_v61 = vpop.f32.mrb[56].mxu1  ;;  %8990 = vmatpush3.bf16.msra.mxu0 %v6022_v45  ;;  %8863 = vmatprep.mubr.msk.bf16.mxu0 %vm495_vm1, %v4473_v33  ;;  %v1143_v58 = vld [vmem:[#allocation2 + $0x110] sm:$0xff] }
 0x159   : > { %v1589_v54 = vadd.f32 %v8555_v61, %v1135_v48  ;;  %v1404_v56 = vpop.f32.mrb[57].mxu1  ;;  %v1147_v26 = vld [vmem:[#allocation2 + $0x130] sm:$0xff] }
 0x15a   : > { %v1809_v7 = vld [vmem:[#allocation2 + $0xb0] sm:$0xff]  ;;  %v1587_v0 = vadd.f32 %v1404_v56, %v1133_v55  ;;  %v8556_v4 = vpop.f32.mrb[58].mxu1  ;;  %v8621_v18 = vpop.f32.mrb[56].mxu0  ;;  %v7788_v56 = vld [vmem:[%s9185_s7 + $0xda] sm:$0xff] }
 0x15b   : > { %v2263_v50 = vadd.f32 %v8617_v5, %v1809_v7  ;;  %1653 = vst.msk [vmem:[#allocation2 + $0xd0] sm:$0xff] %vm269_vm2, %v1589_v54  ;;  %v1807_v20 = vld [vmem:[#allocation2 + $0xa0] sm:$0xff]  ;;  %v1590_v8 = vadd.f32 %v8556_v4, %v1136_v3  ;;  %v1407_v32 = vpop.f32.mrb[59].mxu1  ;;  %v2082_v11 = vpop.f32.mrb[57].mxu0  ;;  %v7879_v5 = vld [vmem:[%s9185_s7 + $0xa8] sm:$0xff]  ;;  %v7883_v7 = vld [vmem:[%s9185_s7 + $0xd8] sm:$0xff] }
 0x15c   : > { %v2261_v24 = vadd.f32 %v2066_v2, %v1807_v20  ;;  %1651 = vst.msk [vmem:[#allocation2 + $0xc0] sm:$0xff] %vm269_vm2, %v1587_v0  ;;  %v1810_v14 = vld [vmem:[#allocation2 + $0xb8] sm:$0xff]  ;;  %v1588_v15 = vadd.f32 %v1407_v32, %v1134_v10  ;;  %v8622_v19 = vpop.f32.mrb[58].mxu0  ;;  %v4476_v45 = vpack.c.bf16 %v7880_v13, %v7879_v5  ;;  %v7786_v54 = vld [vmem:[%s9185_s7 + $0xc2] sm:$0xff]  ;;  %v7787_v55 = vld [vmem:[%s9185_s7 + $0xca] sm:$0xff] }
 0x15d   : > { %2327 = vst.msk [vmem:[#allocation2 + $0xb0] sm:$0xff] %vm269_vm2, %v2263_v50  ;;  %v2264_v23 = vadd.f32 %v8618_v51, %v1810_v14  ;;  %1654 = vst.msk [vmem:[#allocation2 + $0xd8] sm:$0xff] %vm269_vm2, %v1590_v8  ;;  %v1808_v25 = vld [vmem:[#allocation2 + $0xa8] sm:$0xff]  ;;  %8798 = vmatmul.mubr.msk.bf16.gmra.mrb[164].mxu1 %vm495_vm1, %v3794_v57  ;;  %v2085_v17 = vpop.f32.mrb[59].mxu0  ;;  %v7884_v0 = vld [vmem:[%s9185_s7 + $0xe0] sm:$0xff] }
 0x15e   : > { %2325 = vst.msk [vmem:[#allocation2 + $0xa0] sm:$0xff] %vm269_vm2, %v2261_v24  ;;  %v2262_v9 = vadd.f32 %v2069_v39, %v1808_v25  ;;  %1652 = vst.msk [vmem:[#allocation2 + $0xc8] sm:$0xff] %vm269_vm2, %v1588_v15  ;;  %8801 = vmatprep.mubr.msk.bf16.mxu1 %vm495_vm1, %v3795_v6  ;;  %v7789_v57 = vld [vmem:[%s9185_s7 + $0xe2] sm:$0xff]  ;;  %v3798_v6 = vpack.c.bf16 %v7787_v55, %v7786_v54  ;;  %v7885_v50 = vld [vmem:[%s9185_s7 + $0xf0] sm:$0xff] }
 0x15f   : > { %2328 = vst.msk [vmem:[#allocation2 + $0xb8] sm:$0xff] %vm269_vm2, %v2264_v23  ;;  %8864 = vmatmul.mubr.msk.bf16.gmra.mrb[164].mxu0 %vm495_vm1, %v4474_v60  ;;  %v1141_v4 = vld [vmem:[#allocation2 + $0x100] sm:$0xff]  ;;  %v7886_v20 = vld [vmem:[%s9185_s7 + $0xf8] sm:$0xff]  ;;  %v3799_v24 = vpack.c.bf16 %v7789_v57, %v7788_v56 }
 0x160   : > { %2326 = vst.msk [vmem:[#allocation2 + $0xa8] sm:$0xff] %vm269_vm2, %v2262_v9  ;;  %v8559_v1 = vpop.f32.mrb[60].mxu1  ;;  %8867 = vmatprep.mubr.msk.bf16.mxu0 %vm495_vm1, %v4475_v22  ;;  %v1144_v32 = vld [vmem:[#allocation2 + $0x118] sm:$0xff]  ;;  %v1142_v22 = vld [vmem:[#allocation2 + $0x108] sm:$0xff]  ;;  %v4479_v47 = vpack.c.bf16 %v7886_v20, %v7885_v50  ;;  %v1151_v50 = vld [vmem:[#allocation2 + $0x150] sm:$0xff] }
 0x161   : > { %v1593_v16 = vadd.f32 %v8559_v1, %v1139_v62  ;;  %v1420_v30 = vpop.f32.mrb[61].mxu1 }
 0x162   : > { %v1813_v38 = vld [vmem:[#allocation2 + $0xd0] sm:$0xff]  ;;  %v1591_v2 = vadd.f32 %v1420_v30, %v1137_v21  ;;  %v8560_v59 = vpop.f32.mrb[62].mxu1  ;;  %v8625_v31 = vpop.f32.mrb[60].mxu0  ;;  %v7791_v21 = vld [vmem:[%s9185_s7 + $0xfa] sm:$0xff] }
 0x163   : > { %v2267_v51 = vadd.f32 %v8621_v18, %v1813_v38  ;;  %1657 = vst.msk [vmem:[#allocation2 + $0xf0] sm:$0xff] %vm269_vm2, %v1593_v16  ;;  %v1811_v33 = vld [vmem:[#allocation2 + $0xc0] sm:$0xff]  ;;  %v1594_v12 = vadd.f32 %v8560_v59, %v1140_v29  ;;  %v1423_v39 = vpop.f32.mrb[63].mxu1  ;;  %v2098_v40 = vpop.f32.mrb[61].mxu0  ;;  %v7790_v16 = vld [vmem:[%s9185_s7 + $0xf2] sm:$0xff]  ;;  %v7792_v30 = vld [vmem:[%s9185_s7 + $0x10a] sm:$0xff] }
 0x164   : > { %v2265_v41 = vadd.f32 %v2082_v11, %v1811_v33  ;;  %1655 = vst.msk [vmem:[#allocation2 + $0xe0] sm:$0xff] %vm269_vm2, %v1591_v2  ;;  %v1814_v42 = vld [vmem:[#allocation2 + $0xd8] sm:$0xff]  ;;  %v1592_v43 = vadd.f32 %v1423_v39, %v1138_v36  ;;  %v8626_v44 = vpop.f32.mrb[62].mxu0  ;;  %v7887_v38 = vld [vmem:[%s9185_s7 + $0x108] sm:$0xff]  ;;  %v7888_v2 = vld [vmem:[%s9185_s7 + $0x110] sm:$0xff] }
 0x165   : > { %2331 = vst.msk [vmem:[#allocation2 + $0xd0] sm:$0xff] %vm269_vm2, %v2267_v51  ;;  %v2268_v48 = vadd.f32 %v8622_v19, %v1814_v42  ;;  %1658 = vst.msk [vmem:[#allocation2 + $0xf8] sm:$0xff] %vm269_vm2, %v1594_v12  ;;  %v1812_v61 = vld [vmem:[#allocation2 + $0xc8] sm:$0xff]  ;;  %8802 = vmatmul.mubr.msk.bf16.gmra.mrb[168].mxu1 %vm495_vm1, %v3796_v49  ;;  %v2101_v52 = vpop.f32.mrb[63].mxu0  ;;  %v7793_v49 = vld [vmem:[%s9185_s7 + $0x112] sm:$0xff] }
 0x166   : > { %2329 = vst.msk [vmem:[#allocation2 + $0xc0] sm:$0xff] %vm269_vm2, %v2265_v41  ;;  %v2266_v53 = vadd.f32 %v2085_v17, %v1812_v61  ;;  %1656 = vst.msk [vmem:[#allocation2 + $0xe8] sm:$0xff] %vm269_vm2, %v1592_v43  ;;  %8805 = vmatprep.mubr.msk.bf16.mxu1 %vm495_vm1, %v3797_v34  ;;  %v4478_v17 = vpack.c.bf16 %v7884_v0, %v7883_v7  ;;  %v1145_v59 = vld [vmem:[#allocation2 + $0x120] sm:$0xff]  ;;  %v3800_v34 = vpack.c.bf16 %v7791_v21, %v7790_v16  ;;  %v7890_v33 = vld [vmem:[%s9185_s7 + $0x128] sm:$0xff] }
 0x167   : > { %2332 = vst.msk [vmem:[#allocation2 + $0xd8] sm:$0xff] %vm269_vm2, %v2268_v48  ;;  %8868 = vmatmul.mubr.msk.bf16.gmra.mrb[168].mxu0 %vm495_vm1, %v4476_v45  ;;  %v7889_v51 = vld [vmem:[%s9185_s7 + $0x120] sm:$0xff]  ;;  %v1148_v39 = vld [vmem:[#allocation2 + $0x138] sm:$0xff]  ;;  %v3801_v41 = vpack.c.bf16 %v7793_v49, %v7792_v30 }
 0x168   : > { %2330 = vst.msk [vmem:[#allocation2 + $0xc8] sm:$0xff] %vm269_vm2, %v2266_v53  ;;  %v8563_v63 = vpop.f32.mrb[64].mxu1  ;;  %8871 = vmatprep.mubr.msk.bf16.mxu0 %vm495_vm1, %v4477_v46  ;;  %v1146_v46 = vld [vmem:[#allocation2 + $0x128] sm:$0xff]  ;;  %v4481_v57 = vpack.c.bf16 %v7890_v33, %v7889_v51  ;;  %v1155_v51 = vld [vmem:[#allocation2 + $0x170] sm:$0xff] }
 0x169   : > { %v1597_v3 = vadd.f32 %v8563_v63, %v1143_v58  ;;  %v1436_v18 = vpop.f32.mrb[65].mxu1 }
 0x16a   : > { %v1817_v8 = vld [vmem:[#allocation2 + $0xf0] sm:$0xff]  ;;  %v1595_v10 = vadd.f32 %v1436_v18, %v1141_v4  ;;  %v8564_v11 = vpop.f32.mrb[66].mxu1  ;;  %v8629_v60 = vpop.f32.mrb[64].mxu0  ;;  %v7796_v18 = vld [vmem:[%s9185_s7 + $0x13a] sm:$0xff] }
 0x16b   : > { %v2271_v14 = vadd.f32 %v8625_v31, %v1817_v8  ;;  %1661 = vst.msk [vmem:[#allocation2 + $0x110] sm:$0xff] %vm269_vm2, %v1597_v3  ;;  %v1815_v15 = vld [vmem:[#allocation2 + $0xe0] sm:$0xff]  ;;  %v1598_v19 = vadd.f32 %v8564_v11, %v1144_v32  ;;  %v1439_v23 = vpop.f32.mrb[67].mxu1  ;;  %v2114_v25 = vpop.f32.mrb[65].mxu0  ;;  %v7795_v4 = vld [vmem:[%s9185_s7 + $0x12a] sm:$0xff]  ;;  %v7891_v8 = vld [vmem:[%s9185_s7 + $0x138] sm:$0xff] }
 0x16c   : > { %v2269_v9 = vadd.f32 %v2098_v40, %v1815_v15  ;;  %1659 = vst.msk [vmem:[#allocation2 + $0x100] sm:$0xff] %vm269_vm2, %v1595_v10  ;;  %v1818_v27 = vld [vmem:[#allocation2 + $0xf8] sm:$0xff]  ;;  %v1596_v35 = vadd.f32 %v1439_v23, %v1142_v22  ;;  %v8630_v37 = vpop.f32.mrb[66].mxu0  ;;  %v7794_v3 = vld [vmem:[%s9185_s7 + $0x122] sm:$0xff] }
 0x16d   : > { %2335 = vst.msk [vmem:[#allocation2 + $0xf0] sm:$0xff] %vm269_vm2, %v2271_v14  ;;  %v2272_v62 = vadd.f32 %v8626_v44, %v1818_v27  ;;  %1662 = vst.msk [vmem:[#allocation2 + $0x118] sm:$0xff] %vm269_vm2, %v1598_v19  ;;  %v1816_v1 = vld [vmem:[#allocation2 + $0xe8] sm:$0xff]  ;;  %8806 = vmatmul.mubr.msk.bf16.gmra.mrb[172].mxu1 %vm495_vm1, %v3798_v6  ;;  %v2117_v5 = vpop.f32.mrb[67].mxu0  ;;  %v7892_v10 = vld [vmem:[%s9185_s7 + $0x140] sm:$0xff] }
 0x16e   : > { %2333 = vst.msk [vmem:[#allocation2 + $0xe0] sm:$0xff] %vm269_vm2, %v2269_v9  ;;  %v2270_v13 = vadd.f32 %v2101_v52, %v1816_v1  ;;  %1660 = vst.msk [vmem:[#allocation2 + $0x108] sm:$0xff] %vm269_vm2, %v1596_v35  ;;  %8809 = vmatprep.mubr.msk.bf16.mxu1 %vm495_vm1, %v3799_v24  ;;  %v4480_v52 = vpack.c.bf16 %v7888_v2, %v7887_v38  ;;  %v7797_v6 = vld [vmem:[%s9185_s7 + $0x142] sm:$0xff]  ;;  %v3802_v24 = vpack.c.bf16 %v7795_v4, %v7794_v3  ;;  %v7893_v14 = vld [vmem:[%s9185_s7 + $0x150] sm:$0xff] }
 0x16f   : > { %2336 = vst.msk [vmem:[#allocation2 + $0xf8] sm:$0xff] %vm269_vm2, %v2272_v62  ;;  %8872 = vmatmul.mubr.msk.bf16.gmra.mrb[172].mxu0 %vm495_vm1, %v4478_v17  ;;  %v1149_v11 = vld [vmem:[#allocation2 + $0x140] sm:$0xff]  ;;  %v7894_v15 = vld [vmem:[%s9185_s7 + $0x158] sm:$0xff]  ;;  %v3803_v9 = vpack.c.bf16 %v7797_v6, %v7796_v18 }
 0x170   : > { %2334 = vst.msk [vmem:[#allocation2 + $0xe8] sm:$0xff] %vm269_vm2, %v2270_v13  ;;  %v8567_v28 = vpop.f32.mrb[68].mxu1  ;;  %8875 = vmatprep.mubr.msk.bf16.mxu0 %vm495_vm1, %v4479_v47  ;;  %v1152_v23 = vld [vmem:[#allocation2 + $0x158] sm:$0xff]  ;;  %v1150_v47 = vld [vmem:[#allocation2 + $0x148] sm:$0xff]  ;;  %v4483_v49 = vpack.c.bf16 %v7894_v15, %v7893_v14  ;;  %v1159_v14 = vld [vmem:[#allocation2 + $0x190] sm:$0xff] }
 0x171   : > { %v1601_v29 = vadd.f32 %v8567_v28, %v1147_v26  ;;  %v1452_v31 = vpop.f32.mrb[69].mxu1 }
 0x172   : > { %v1821_v12 = vld [vmem:[#allocation2 + $0x110] sm:$0xff]  ;;  %v1599_v36 = vadd.f32 %v1452_v31, %v1145_v59  ;;  %v8568_v40 = vpop.f32.mrb[70].mxu1  ;;  %v8633_v45 = vpop.f32.mrb[68].mxu0  ;;  %v7799_v59 = vld [vmem:[%s9185_s7 + $0x15a] sm:$0xff] }
 0x173   : > { %v2275_v42 = vadd.f32 %v8629_v60, %v1821_v12  ;;  %1665 = vst.msk [vmem:[#allocation2 + $0x130] sm:$0xff] %vm269_vm2, %v1601_v29  ;;  %v1819_v43 = vld [vmem:[#allocation2 + $0x100] sm:$0xff]  ;;  %v1602_v44 = vadd.f32 %v8568_v40, %v1148_v39  ;;  %v1455_v48 = vpop.f32.mrb[71].mxu1  ;;  %v2130_v61 = vpop.f32.mrb[69].mxu0  ;;  %v7798_v29 = vld [vmem:[%s9185_s7 + $0x152] sm:$0xff]  ;;  %v7800_v31 = vld [vmem:[%s9185_s7 + $0x16a] sm:$0xff] }
 0x174   : > { %v2273_v53 = vadd.f32 %v2114_v25, %v1819_v43  ;;  %1663 = vst.msk [vmem:[#allocation2 + $0x120] sm:$0xff] %vm269_vm2, %v1599_v36  ;;  %v1822_v54 = vld [vmem:[#allocation2 + $0x118] sm:$0xff]  ;;  %v1600_v55 = vadd.f32 %v1455_v48, %v1146_v46  ;;  %v8634_v56 = vpop.f32.mrb[70].mxu0  ;;  %v7895_v12 = vld [vmem:[%s9185_s7 + $0x168] sm:$0xff]  ;;  %v7896_v36 = vld [vmem:[%s9185_s7 + $0x170] sm:$0xff] }
 0x175   : > { %2339 = vst.msk [vmem:[#allocation2 + $0x110] sm:$0xff] %vm269_vm2, %v2275_v42  ;;  %v2276_v58 = vadd.f32 %v8630_v37, %v1822_v54  ;;  %1666 = vst.msk [vmem:[#allocation2 + $0x138] sm:$0xff] %vm269_vm2, %v1602_v44  ;;  %v1820_v63 = vld [vmem:[#allocation2 + $0x108] sm:$0xff]  ;;  %8810 = vmatmul.mubr.msk.bf16.gmra.mrb[176].mxu1 %vm495_vm1, %v3800_v34  ;;  %v2133_v7 = vpop.f32.mrb[71].mxu0  ;;  %v7801_v34 = vld [vmem:[%s9185_s7 + $0x172] sm:$0xff] }
 0x176   : > { %2337 = vst.msk [vmem:[#allocation2 + $0x100] sm:$0xff] %vm269_vm2, %v2273_v53  ;;  %v2274_v0 = vadd.f32 %v2117_v5, %v1820_v63  ;;  %1664 = vst.msk [vmem:[#allocation2 + $0x128] sm:$0xff] %vm269_vm2, %v1600_v55  ;;  %8813 = vmatprep.mubr.msk.bf16.mxu1 %vm495_vm1, %v3801_v41  ;;  %v4482_v5 = vpack.c.bf16 %v7892_v10, %v7891_v8  ;;  %v1153_v40 = vld [vmem:[#allocation2 + $0x160] sm:$0xff]  ;;  %v3804_v41 = vpack.c.bf16 %v7799_v59, %v7798_v29  ;;  %v7898_v43 = vld [vmem:[%s9185_s7 + $0x188] sm:$0xff] }
 0x177   : > { %2340 = vst.msk [vmem:[#allocation2 + $0x118] sm:$0xff] %vm269_vm2, %v2276_v58  ;;  %8876 = vmatmul.mubr.msk.bf16.gmra.mrb[176].mxu0 %vm495_vm1, %v4480_v52  ;;  %v7897_v42 = vld [vmem:[%s9185_s7 + $0x180] sm:$0xff]  ;;  %v1156_v48 = vld [vmem:[#allocation2 + $0x178] sm:$0xff]  ;;  %v3805_v53 = vpack.c.bf16 %v7801_v34, %v7800_v31 }
 0x178   : > { %2338 = vst.msk [vmem:[#allocation2 + $0x108] sm:$0xff] %vm269_vm2, %v2274_v0  ;;  %v8571_v20 = vpop.f32.mrb[72].mxu1  ;;  %8879 = vmatprep.mubr.msk.bf16.mxu0 %vm495_vm1, %v4481_v57  ;;  %v1154_v57 = vld [vmem:[#allocation2 + $0x168] sm:$0xff]  ;;  %v4485_v6 = vpack.c.bf16 %v7898_v43, %v7897_v42  ;;  %v1163_v42 = vld [vmem:[#allocation2 + $0x1b0] sm:$0xff] }
 0x179   : > { %v1605_v32 = vadd.f32 %v8571_v20, %v1151_v50  ;;  %v1468_v60 = vpop.f32.mrb[73].mxu1 }
 0x17a   : > { %v1825_v19 = vld [vmem:[#allocation2 + $0x130] sm:$0xff]  ;;  %v1603_v22 = vadd.f32 %v1468_v60, %v1149_v11  ;;  %v8572_v25 = vpop.f32.mrb[74].mxu1  ;;  %v8637_v17 = vpop.f32.mrb[72].mxu0  ;;  %v7804_v60 = vld [vmem:[%s9180_s29 + $0x1a] sm:$0xff] }
 0x17b   : > { %v2279_v27 = vadd.f32 %v8633_v45, %v1825_v19  ;;  %1669 = vst.msk [vmem:[#allocation2 + $0x150] sm:$0xff] %vm269_vm2, %v1605_v32  ;;  %v1823_v35 = vld [vmem:[#allocation2 + $0x120] sm:$0xff]  ;;  %v1606_v37 = vadd.f32 %v8572_v25, %v1152_v23  ;;  %v1471_v62 = vpop.f32.mrb[75].mxu1  ;;  %v2146_v1 = vpop.f32.mrb[73].mxu0  ;;  %v7803_v11 = vld [vmem:[%s9185_s7 + $0x18a] sm:$0xff]  ;;  %v7899_v19 = vld [vmem:[%s9185_s7 + $0x198] sm:$0xff] }
 0x17c   : > { %v2277_v13 = vadd.f32 %v2130_v61, %v1823_v35  ;;  %1667 = vst.msk [vmem:[#allocation2 + $0x140] sm:$0xff] %vm269_vm2, %v1603_v22  ;;  %v1826_v16 = vld [vmem:[#allocation2 + $0x138] sm:$0xff]  ;;  %v1604_v21 = vadd.f32 %v1471_v62, %v1150_v47  ;;  %v8638_v30 = vpop.f32.mrb[74].mxu0  ;;  %v7802_v32 = vld [vmem:[%s9185_s7 + $0x182] sm:$0xff] }
 0x17d   : > { %2343 = vst.msk [vmem:[#allocation2 + $0x130] sm:$0xff] %vm269_vm2, %v2279_v27  ;;  %v2280_v26 = vadd.f32 %v8634_v56, %v1826_v16  ;;  %1670 = vst.msk [vmem:[#allocation2 + $0x158] sm:$0xff] %vm269_vm2, %v1606_v37  ;;  %v1824_v28 = vld [vmem:[#allocation2 + $0x128] sm:$0xff]  ;;  %8814 = vmatmul.mubr.msk.bf16.gmra.mrb[180].mxu1 %vm495_vm1, %v3802_v24  ;;  %v2149_v38 = vpop.f32.mrb[75].mxu0  ;;  %v7900_v22 = vld [vmem:[%s9185_s7 + $0x1a0] sm:$0xff] }
 0x17e   : > { %2341 = vst.msk [vmem:[#allocation2 + $0x120] sm:$0xff] %vm269_vm2, %v2277_v13  ;;  %v2278_v2 = vadd.f32 %v2133_v7, %v1824_v28  ;;  %1668 = vst.msk [vmem:[#allocation2 + $0x148] sm:$0xff] %vm269_vm2, %v1604_v21  ;;  %8817 = vmatprep.mubr.msk.bf16.mxu1 %vm495_vm1, %v3803_v9  ;;  %v4484_v7 = vpack.c.bf16 %v7896_v36, %v7895_v12  ;;  %v7805_v24 = vld [vmem:[%s9180_s29 + $0x22] sm:$0xff]  ;;  %v3806_v9 = vpack.c.bf16 %v7803_v11, %v7802_v32  ;;  %v7901_v27 = vld [vmem:[%s9180_s29 + $0x30] sm:$0xff] }
 0x17f   : > { %2344 = vst.msk [vmem:[#allocation2 + $0x138] sm:$0xff] %vm269_vm2, %v2280_v26  ;;  %8880 = vmatmul.mubr.msk.bf16.gmra.mrb[180].mxu0 %vm495_vm1, %v4482_v5  ;;  %v1157_v25 = vld [vmem:[#allocation2 + $0x180] sm:$0xff]  ;;  %v7902_v35 = vld [vmem:[%s9180_s29 + $0x38] sm:$0xff]  ;;  %v3807_v13 = vpack.c.bf16 %v7805_v24, %v7804_v60 }
 0x180   : > { %2342 = vst.msk [vmem:[#allocation2 + $0x128] sm:$0xff] %vm269_vm2, %v2278_v2  ;;  %v8575_v33 = vpop.f32.mrb[76].mxu1  ;;  %8883 = vmatprep.mubr.msk.bf16.mxu0 %vm495_vm1, %v4483_v49  ;;  %v1160_v62 = vld [vmem:[#allocation2 + $0x198] sm:$0xff]  ;;  %v1158_v49 = vld [vmem:[#allocation2 + $0x188] sm:$0xff]  ;;  %v4487_v34 = vpack.c.bf16 %v7902_v35, %v7901_v27  ;;  %v1167_v27 = vld [vmem:[#allocation2 + $0x1d0] sm:$0xff] }
 0x181   : > { %v1609_v39 = vadd.f32 %v8575_v33, %v1155_v51  ;;  %v1484_v45 = vpop.f32.mrb[77].mxu1 }
 0x182   : > { %v1829_v44 = vld [vmem:[#allocation2 + $0x150] sm:$0xff]  ;;  %v1607_v46 = vadd.f32 %v1484_v45, %v1153_v40  ;;  %v8576_v61 = vpop.f32.mrb[78].mxu1  ;;  %v8641_v52 = vpop.f32.mrb[76].mxu0  ;;  %v7807_v40 = vld [vmem:[%s9180_s29 + $0x3a] sm:$0xff] }
 0x183   : > { %v2283_v54 = vadd.f32 %v8637_v17, %v1829_v44  ;;  %1673 = vst.msk [vmem:[#allocation2 + $0x170] sm:$0xff] %vm269_vm2, %v1609_v39  ;;  %v1827_v55 = vld [vmem:[#allocation2 + $0x140] sm:$0xff]  ;;  %v1610_v56 = vadd.f32 %v8576_v61, %v1156_v48  ;;  %v1487_v58 = vpop.f32.mrb[79].mxu1  ;;  %v2162_v63 = vpop.f32.mrb[77].mxu0  ;;  %v7806_v39 = vld [vmem:[%s9180_s29 + $0x32] sm:$0xff]  ;;  %v7808_v45 = vld [vmem:[%s9180_s29 + $0x4a] sm:$0xff] }
 0x184   : > { %v2281_v0 = vadd.f32 %v2146_v1, %v1827_v55  ;;  %1671 = vst.msk [vmem:[#allocation2 + $0x160] sm:$0xff] %vm269_vm2, %v1607_v46  ;;  %v1830_v3 = vld [vmem:[#allocation2 + $0x158] sm:$0xff]  ;;  %v1608_v4 = vadd.f32 %v1487_v58, %v1154_v57  ;;  %v8642_v18 = vpop.f32.mrb[78].mxu0  ;;  %v7903_v44 = vld [vmem:[%s9180_s29 + $0x48] sm:$0xff]  ;;  %v7904_v46 = vld [vmem:[%s9180_s29 + $0x50] sm:$0xff] }
 0x185   : > { %2347 = vst.msk [vmem:[#allocation2 + $0x150] sm:$0xff] %vm269_vm2, %v2283_v54  ;;  %v2284_v50 = vadd.f32 %v8638_v30, %v1830_v3  ;;  %1674 = vst.msk [vmem:[#allocation2 + $0x178] sm:$0xff] %vm269_vm2, %v1610_v56  ;;  %v1828_v20 = vld [vmem:[#allocation2 + $0x148] sm:$0xff]  ;;  %8818 = vmatmul.mubr.msk.bf16.gmra.mrb[184].mxu1 %vm495_vm1, %v3804_v41  ;;  %v2165_v8 = vpop.f32.mrb[79].mxu0  ;;  %v7809_v41 = vld [vmem:[%s9180_s29 + $0x52] sm:$0xff] }
 0x186   : > { %2345 = vst.msk [vmem:[#allocation2 + $0x140] sm:$0xff] %vm269_vm2, %v2281_v0  ;;  %v2282_v10 = vadd.f32 %v2149_v38, %v1828_v20  ;;  %1672 = vst.msk [vmem:[#allocation2 + $0x168] sm:$0xff] %vm269_vm2, %v1608_v4  ;;  %8821 = vmatprep.mubr.msk.bf16.mxu1 %vm495_vm1, %v3805_v53  ;;  %v4486_v38 = vpack.c.bf16 %v7900_v22, %v7899_v19  ;;  %v1161_v61 = vld [vmem:[#allocation2 + $0x1a0] sm:$0xff]  ;;  %v3808_v53 = vpack.c.bf16 %v7807_v40, %v7806_v39  ;;  %v7906_v55 = vld [vmem:[%s9180_s29 + $0x68] sm:$0xff] }
 0x187   : > { %2348 = vst.msk [vmem:[#allocation2 + $0x158] sm:$0xff] %vm269_vm2, %v2284_v50  ;;  %8884 = vmatmul.mubr.msk.bf16.gmra.mrb[184].mxu0 %vm495_vm1, %v4484_v7  ;;  %v7905_v54 = vld [vmem:[%s9180_s29 + $0x60] sm:$0xff]  ;;  %v1164_v58 = vld [vmem:[#allocation2 + $0x1b8] sm:$0xff]  ;;  %v3809_v0 = vpack.c.bf16 %v7809_v41, %v7808_v45 }
 0x188   : > { %2346 = vst.msk [vmem:[#allocation2 + $0x148] sm:$0xff] %vm269_vm2, %v2282_v10  ;;  %v8579_v15 = vpop.f32.mrb[80].mxu1  ;;  %8887 = vmatprep.mubr.msk.bf16.mxu0 %vm495_vm1, %v4485_v6  ;;  %v1162_v6 = vld [vmem:[#allocation2 + $0x1a8] sm:$0xff]  ;;  %v4489_v24 = vpack.c.bf16 %v7906_v55, %v7905_v54  ;;  %v1171_v54 = vld [vmem:[#allocation2 + $0x1f0] sm:$0xff] }
 0x189   : > { %v1613_v23 = vadd.f32 %v8579_v15, %v1159_v14  ;;  %v1500_v17 = vpop.f32.mrb[81].mxu1 }
 0x18a   : > { %v1833_v37 = vld [vmem:[#allocation2 + $0x170] sm:$0xff]  ;;  %v1611_v47 = vadd.f32 %v1500_v17, %v1157_v25  ;;  %v8580_v1 = vpop.f32.mrb[82].mxu1  ;;  %v8645_v5 = vpop.f32.mrb[80].mxu0  ;;  %v7812_v17 = vld [vmem:[%s9180_s29 + $0x7a] sm:$0xff] }
 0x18b   : > { %v2287_v16 = vadd.f32 %v8641_v52, %v1833_v37  ;;  %1677 = vst.msk [vmem:[#allocation2 + $0x190] sm:$0xff] %vm269_vm2, %v1613_v23  ;;  %v1831_v21 = vld [vmem:[#allocation2 + $0x160] sm:$0xff]  ;;  %v1614_v30 = vadd.f32 %v8580_v1, %v1160_v62  ;;  %v1503_v26 = vpop.f32.mrb[83].mxu1  ;;  %v2178_v28 = vpop.f32.mrb[81].mxu0  ;;  %v7811_v25 = vld [vmem:[%s9180_s29 + $0x6a] sm:$0xff]  ;;  %v7907_v37 = vld [vmem:[%s9180_s29 + $0x78] sm:$0xff] }
 0x18c   : > { %v2285_v2 = vadd.f32 %v2162_v63, %v1831_v21  ;;  %1675 = vst.msk [vmem:[#allocation2 + $0x180] sm:$0xff] %vm269_vm2, %v1611_v47  ;;  %v1834_v29 = vld [vmem:[#allocation2 + $0x178] sm:$0xff]  ;;  %v1612_v59 = vadd.f32 %v1503_v26, %v1158_v49  ;;  %v8646_v31 = vpop.f32.mrb[82].mxu0  ;;  %v7810_v23 = vld [vmem:[%s9180_s29 + $0x62] sm:$0xff] }
 0x18d   : > { %2351 = vst.msk [vmem:[#allocation2 + $0x170] sm:$0xff] %vm269_vm2, %v2287_v16  ;;  %v2288_v51 = vadd.f32 %v8642_v18, %v1834_v29  ;;  %1678 = vst.msk [vmem:[#allocation2 + $0x198] sm:$0xff] %vm269_vm2, %v1614_v30  ;;  %v1832_v33 = vld [vmem:[#allocation2 + $0x168] sm:$0xff]  ;;  %8822 = vmatmul.mubr.msk.bf16.gmra.mrb[188].mxu1 %vm495_vm1, %v3806_v9  ;;  %v2181_v12 = vpop.f32.mrb[83].mxu0  ;;  %v7908_v47 = vld [vmem:[%s9180_s29 + $0x80] sm:$0xff] }
 0x18e   : > { %2349 = vst.msk [vmem:[#allocation2 + $0x160] sm:$0xff] %vm269_vm2, %v2285_v2  ;;  %v2286_v36 = vadd.f32 %v2165_v8, %v1832_v33  ;;  %1676 = vst.msk [vmem:[#allocation2 + $0x188] sm:$0xff] %vm269_vm2, %v1612_v59  ;;  %8825 = vmatprep.mubr.msk.bf16.mxu1 %vm495_vm1, %v3807_v13  ;;  %v4488_v8 = vpack.c.bf16 %v7904_v46, %v7903_v44  ;;  %v7813_v9 = vld [vmem:[%s9180_s29 + $0x82] sm:$0xff]  ;;  %v3810_v13 = vpack.c.bf16 %v7811_v25, %v7810_v23  ;;  %v7909_v16 = vld [vmem:[%s9180_s29 + $0x90] sm:$0xff] }
 0x18f   : > { %2352 = vst.msk [vmem:[#allocation2 + $0x178] sm:$0xff] %vm269_vm2, %v2288_v51  ;;  %8888 = vmatmul.mubr.msk.bf16.gmra.mrb[188].mxu0 %vm495_vm1, %v4486_v38  ;;  %v1165_v1 = vld [vmem:[#allocation2 + $0x1c0] sm:$0xff]  ;;  %v7910_v21 = vld [vmem:[%s9180_s29 + $0x98] sm:$0xff]  ;;  %v3811_v2 = vpack.c.bf16 %v7813_v9, %v7812_v17 }
 0x190   : > { %2350 = vst.msk [vmem:[#allocation2 + $0x168] sm:$0xff] %vm269_vm2, %v2286_v36  ;;  %v8583_v43 = vpop.f32.mrb[84].mxu1  ;;  %8891 = vmatprep.mubr.msk.bf16.mxu0 %vm495_vm1, %v4487_v34  ;;  %v1168_v26 = vld [vmem:[#allocation2 + $0x1d8] sm:$0xff]  ;;  %v1166_v34 = vld [vmem:[#allocation2 + $0x1c8] sm:$0xff]  ;;  %v4491_v41 = vpack.c.bf16 %v7910_v21, %v7909_v16  ;;  %v2469_v16 = vld [vmem:[#allocation2 + $0x10] sm:$0xff] }
 0x191   : > { %v1617_v48 = vadd.f32 %v8583_v43, %v1163_v42  ;;  %v1516_v52 = vpop.f32.mrb[85].mxu1 }
 0x192   : > { %v1837_v56 = vld [vmem:[#allocation2 + $0x190] sm:$0xff]  ;;  %v1615_v57 = vadd.f32 %v1516_v52, %v1161_v61  ;;  %v8584_v63 = vpop.f32.mrb[86].mxu1  ;;  %v8649_v7 = vpop.f32.mrb[84].mxu0  ;;  %v7815_v61 = vld [vmem:[%s9180_s29 + $0x9a] sm:$0xff] }
 0x193   : > { %v2291_v3 = vadd.f32 %v8645_v5, %v1837_v56  ;;  %1681 = vst.msk [vmem:[#allocation2 + $0x1b0] sm:$0xff] %vm269_vm2, %v1617_v48  ;;  %v1835_v4 = vld [vmem:[#allocation2 + $0x180] sm:$0xff]  ;;  %v1618_v18 = vadd.f32 %v8584_v63, %v1164_v58  ;;  %v1519_v50 = vpop.f32.mrb[87].mxu1  ;;  %v2194_v20 = vpop.f32.mrb[85].mxu0  ;;  %v7814_v48 = vld [vmem:[%s9180_s29 + $0x92] sm:$0xff]  ;;  %v7816_v52 = vld [vmem:[%s9180_s29 + $0xaa] sm:$0xff] }
 0x194   : > { %v2289_v10 = vadd.f32 %v2178_v28, %v1835_v4  ;;  %1679 = vst.msk [vmem:[#allocation2 + $0x1a0] sm:$0xff] %vm269_vm2, %v1615_v57  ;;  %v1838_v32 = vld [vmem:[#allocation2 + $0x198] sm:$0xff]  ;;  %v1616_v11 = vadd.f32 %v1519_v50, %v1162_v6  ;;  %v8650_v60 = vpop.f32.mrb[86].mxu0  ;;  %v7911_v56 = vld [vmem:[%s9180_s29 + $0xa8] sm:$0xff]  ;;  %v7912_v57 = vld [vmem:[%s9180_s29 + $0xb0] sm:$0xff] }
 0x195   : > { %2355 = vst.msk [vmem:[#allocation2 + $0x190] sm:$0xff] %vm269_vm2, %v2291_v3  ;;  %v2292_v14 = vadd.f32 %v8646_v31, %v1838_v32  ;;  %1682 = vst.msk [vmem:[#allocation2 + $0x1b8] sm:$0xff] %vm269_vm2, %v1618_v18  ;;  %v1836_v15 = vld [vmem:[#allocation2 + $0x188] sm:$0xff]  ;;  %8826 = vmatmul.mubr.msk.bf16.gmra.mrb[192].mxu1 %vm495_vm1, %v3808_v53  ;;  %v2197_v19 = vpop.f32.mrb[87].mxu0  ;;  %v7817_v53 = vld [vmem:[%s9180_s29 + $0xb2] sm:$0xff] }
 0x196   : > { %2353 = vst.msk [vmem:[#allocation2 + $0x180] sm:$0xff] %vm269_vm2, %v2289_v10  ;;  %v2290_v22 = vadd.f32 %v2181_v12, %v1836_v15  ;;  %1680 = vst.msk [vmem:[#allocation2 + $0x1a8] sm:$0xff] %vm269_vm2, %v1616_v11  ;;  %8829 = vmatprep.mubr.msk.bf16.mxu1 %vm495_vm1, %v3809_v0  ;;  %v4490_v12 = vpack.c.bf16 %v7908_v47, %v7907_v37  ;;  %v1169_v63 = vld [vmem:[#allocation2 + $0x1e0] sm:$0xff]  ;;  %v3812_v0 = vpack.c.bf16 %v7815_v61, %v7814_v48  ;;  %v7914_v4 = vld [vmem:[%s9180_s29 + $0xc8] sm:$0xff] }
 0x197   : > { %2356 = vst.msk [vmem:[#allocation2 + $0x198] sm:$0xff] %vm269_vm2, %v2292_v14  ;;  %8892 = vmatmul.mubr.msk.bf16.gmra.mrb[192].mxu0 %vm495_vm1, %v4488_v8  ;;  %v7913_v3 = vld [vmem:[%s9180_s29 + $0xc0] sm:$0xff]  ;;  %v1172_v50 = vld [vmem:[#allocation2 + $0x1f8] sm:$0xff]  ;;  %v3813_v10 = vpack.c.bf16 %v7817_v53, %v7816_v52 }
 0x198   : > { %2354 = vst.msk [vmem:[#allocation2 + $0x188] sm:$0xff] %vm269_vm2, %v2290_v22  ;;  %v8587_v35 = vpop.f32.mrb[88].mxu1  ;;  %8895 = vmatprep.mubr.msk.bf16.mxu0 %vm495_vm1, %v4489_v24  ;;  %v1170_v24 = vld [vmem:[#allocation2 + $0x1e8] sm:$0xff]  ;;  %v4493_v9 = vpack.c.bf16 %v7914_v4, %v7913_v3  ;;  %v2473_v3 = vld [vmem:[#allocation2 + $0x30] sm:$0xff] }
 0x199   : > { %v1621_v62 = vadd.f32 %v8587_v35, %v1167_v27  ;;  %v1532_v5 = vpop.f32.mrb[89].mxu1 }
 0x19a   : > { %v1841_v30 = vld [vmem:[#allocation2 + $0x1b0] sm:$0xff]  ;;  %v1619_v49 = vadd.f32 %v1532_v5, %v1165_v1  ;;  %v8588_v28 = vpop.f32.mrb[90].mxu1  ;;  %v8653_v38 = vpop.f32.mrb[88].mxu0  ;;  %v7820_v5 = vld [vmem:[%s9180_s29 + $0xda] sm:$0xff] }
 0x19b   : > { %v2295_v29 = vadd.f32 %v8649_v7, %v1841_v30  ;;  %1685 = vst.msk [vmem:[#allocation2 + $0x1d0] sm:$0xff] %vm269_vm2, %v1621_v62  ;;  %v1839_v59 = vld [vmem:[#allocation2 + $0x1a0] sm:$0xff]  ;;  %v1622_v31 = vadd.f32 %v8588_v28, %v1168_v26  ;;  %v1535_v51 = vpop.f32.mrb[91].mxu1  ;;  %v2210_v33 = vpop.f32.mrb[89].mxu0  ;;  %v7819_v1 = vld [vmem:[%s9180_s29 + $0xca] sm:$0xff]  ;;  %v7915_v30 = vld [vmem:[%s9180_s29 + $0xd8] sm:$0xff] }
 0x19c   : > { %v2293_v36 = vadd.f32 %v2194_v20, %v1839_v59  ;;  %1683 = vst.msk [vmem:[#allocation2 + $0x1c0] sm:$0xff] %vm269_vm2, %v1619_v49  ;;  %v1842_v39 = vld [vmem:[#allocation2 + $0x1b8] sm:$0xff]  ;;  %v1620_v40 = vadd.f32 %v1535_v51, %v1166_v34  ;;  %v8654_v45 = vpop.f32.mrb[90].mxu0  ;;  %v7818_v62 = vld [vmem:[%s9180_s29 + $0xc2] sm:$0xff] }
 0x19d   : > { %2359 = vst.msk [vmem:[#allocation2 + $0x1b0] sm:$0xff] %vm269_vm2, %v2295_v29  ;;  %v2296_v42 = vadd.f32 %v8650_v60, %v1842_v39  ;;  %1686 = vst.msk [vmem:[#allocation2 + $0x1d8] sm:$0xff] %vm269_vm2, %v1622_v31  ;;  %v1840_v43 = vld [vmem:[#allocation2 + $0x1a8] sm:$0xff]  ;;  %8830 = vmatmul.mubr.msk.bf16.gmra.mrb[196].mxu1 %vm495_vm1, %v3810_v13  ;;  %v2213_v44 = vpop.f32.mrb[91].mxu0  ;;  %v7916_v49 = vld [vmem:[%s9180_s29 + $0xe0] sm:$0xff] }
 0x19e   : > { %2357 = vst.msk [vmem:[#allocation2 + $0x1a0] sm:$0xff] %vm269_vm2, %v2293_v36  ;;  %v2294_v46 = vadd.f32 %v2197_v19, %v1840_v43  ;;  %1684 = vst.msk [vmem:[#allocation2 + $0x1c8] sm:$0xff] %vm269_vm2, %v1620_v40  ;;  %8833 = vmatprep.mubr.msk.bf16.mxu1 %vm495_vm1, %v3811_v2  ;;  %v4492_v19 = vpack.c.bf16 %v7912_v57, %v7911_v56  ;;  %v7821_v13 = vld [vmem:[%s9180_s29 + $0xe2] sm:$0xff]  ;;  %v3814_v2 = vpack.c.bf16 %v7819_v1, %v7818_v62  ;;  %v7917_v29 = vld [vmem:[%s9180_s29 + $0xf0] sm:$0xff] }
 0x19f   : > { %2360 = vst.msk [vmem:[#allocation2 + $0x1b8] sm:$0xff] %vm269_vm2, %v2296_v42  ;;  %8896 = vmatmul.mubr.msk.bf16.gmra.mrb[196].mxu0 %vm495_vm1, %v4490_v12  ;;  %v2467_v28 = vld [vmem:[#allocation2] sm:$0xff]  ;;  %v7918_v59 = vld [vmem:[%s9180_s29 + $0xf8] sm:$0xff]  ;;  %v3815_v36 = vpack.c.bf16 %v7821_v13, %v7820_v5 }
 0x1a0   : > { %2358 = vst.msk [vmem:[#allocation2 + $0x1a8] sm:$0xff] %vm269_vm2, %v2294_v46  ;;  %v8591_v55 = vpop.f32.mrb[92].mxu1  ;;  %8899 = vmatprep.mubr.msk.bf16.mxu0 %vm495_vm1, %v4491_v41  ;;  %v2470_v51 = vld [vmem:[#allocation2 + $0x18] sm:$0xff]  ;;  %v2468_v41 = vld [vmem:[#allocation2 + $0x8] sm:$0xff]  ;;  %v4495_v53 = vpack.c.bf16 %v7918_v59, %v7917_v29  ;;  %v2477_v29 = vld [vmem:[#allocation2 + $0x50] sm:$0xff] }
 0x1a1   : > { %v1625_v58 = vadd.f32 %v8591_v55, %v1171_v54  ;;  %v1548_v7 = vpop.f32.mrb[93].mxu1 }
 0x1a2   : > { %v1845_v18 = vld [vmem:[#allocation2 + $0x1d0] sm:$0xff]  ;;  %v1623_v6 = vadd.f32 %v1548_v7, %v1169_v63  ;;  %v8592_v20 = vpop.f32.mrb[94].mxu1  ;;  %v8657_v8 = vpop.f32.mrb[92].mxu0  ;;  %v7823_v63 = vld [vmem:[%s9180_s29 + $0xfa] sm:$0xff] }
 0x1a3   : > { %v2299_v32 = vadd.f32 %v8653_v38, %v1845_v18  ;;  %1689 = vst.msk [vmem:[#allocation2 + $0x1f0] sm:$0xff] %vm269_vm2, %v1625_v58  ;;  %v1843_v11 = vld [vmem:[#allocation2 + $0x1c0] sm:$0xff]  ;;  %v1626_v60 = vadd.f32 %v8592_v20, %v1172_v50  ;;  %v1551_v14 = vpop.f32.mrb[95].mxu1  ;;  %v2226_v15 = vpop.f32.mrb[93].mxu0  ;;  %v7822_v58 = vld [vmem:[%s9180_s29 + $0xf2] sm:$0xff]  ;;  %v7824_v7 = vld [vmem:[%s9180_s29 + $0x10a] sm:$0xff] }
 0x1a4   : > { %v2297_v22 = vadd.f32 %v2210_v33, %v1843_v11  ;;  %1687 = vst.msk [vmem:[#allocation2 + $0x1e0] sm:$0xff] %vm269_vm2, %v1623_v6  ;;  %v1846_v23 = vld [vmem:[#allocation2 + $0x1d8] sm:$0xff]  ;;  %v1624_v25 = vadd.f32 %v1551_v14, %v1170_v24  ;;  %v8658_v17 = vpop.f32.mrb[94].mxu0  ;;  %v7919_v18 = vld [vmem:[%s9180_s29 + $0x108] sm:$0xff]  ;;  %v7920_v6 = vld [vmem:[%s9180_s29 + $0x110] sm:$0xff] }
 0x1a5   : > { %2363 = vst.msk [vmem:[#allocation2 + $0x1d0] sm:$0xff] %vm269_vm2, %v2299_v32  ;;  %v2300_v27 = vadd.f32 %v8654_v45, %v1846_v23  ;;  %1690 = vst.msk [vmem:[#allocation2 + $0x1f8] sm:$0xff] %vm269_vm2, %v1626_v60  ;;  %v1844_v35 = vld [vmem:[#allocation2 + $0x1c8] sm:$0xff]  ;;  %8834 = vmatmul.mubr.msk.bf16.gmra.mrb[200].mxu1 %vm495_vm1, %v3812_v0  ;;  %v2229_v37 = vpop.f32.mrb[95].mxu0  ;;  %v7825_v0 = vld [vmem:[%s9180_s29 + $0x112] sm:$0xff] }
 0x1a6   : > { %2361 = vst.msk [vmem:[#allocation2 + $0x1c0] sm:$0xff] %vm269_vm2, %v2297_v22  ;;  %v2298_v47 = vadd.f32 %v2213_v44, %v1844_v35  ;;  %1688 = vst.msk [vmem:[#allocation2 + $0x1e8] sm:$0xff] %vm269_vm2, %v1624_v25  ;;  %8837 = vmatprep.mubr.msk.bf16.mxu1 %vm495_vm1, %v3813_v10  ;;  %v4494_v44 = vpack.c.bf16 %v7916_v49, %v7915_v30  ;;  %v2471_v20 = vld [vmem:[#allocation2 + $0x20] sm:$0xff]  ;;  %v3816_v10 = vpack.c.bf16 %v7823_v63, %v7822_v58  ;;  %v7922_v11 = vld [vmem:[%s9180_s29 + $0x128] sm:$0xff] }
 0x1a7   : > { %2364 = vst.msk [vmem:[#allocation2 + $0x1d8] sm:$0xff] %vm269_vm2, %v2300_v27  ;;  %8900 = vmatmul.mubr.msk.bf16.gmra.mrb[200].mxu0 %vm495_vm1, %v4492_v19  ;;  %v7921_v32 = vld [vmem:[%s9180_s29 + $0x120] sm:$0xff]  ;;  %v2474_v14 = vld [vmem:[#allocation2 + $0x38] sm:$0xff]  ;;  %v3817_v22 = vpack.c.bf16 %v7825_v0, %v7824_v7 }
 0x1a8   : > { %2362 = vst.msk [vmem:[#allocation2 + $0x1c8] sm:$0xff] %vm269_vm2, %v2298_v47  ;;  %v8663_v21 = vpop.f32.mrb[96].mxu1  ;;  %8903 = vmatprep.mubr.msk.bf16.mxu0 %vm495_vm1, %v4493_v9  ;;  %v2472_v9 = vld [vmem:[#allocation2 + $0x28] sm:$0xff]  ;;  %v4497_v13 = vpack.c.bf16 %v7922_v11, %v7921_v32  ;;  %v2481_v32 = vld [vmem:[#allocation2 + $0x70] sm:$0xff] }
 0x1a9   : > { %v2923_v26 = vadd.f32 %v8663_v21, %v2469_v16  ;;  %v2666_v38 = vpop.f32.mrb[97].mxu1 }
 0x1aa   : > { %v1849_v31 = vld [vmem:[#allocation2 + $0x1f0] sm:$0xff]  ;;  %v2921_v34 = vadd.f32 %v2666_v38, %v2467_v28  ;;  %v8664_v33 = vpop.f32.mrb[98].mxu1  ;;  %v8729_v12 = vpop.f32.mrb[96].mxu0  ;;  %v7828_v38 = vld [vmem:[%s9180_s29 + $0x13a] sm:$0xff] }
 0x1ab   : > { %v2303_v39 = vadd.f32 %v8657_v8, %v1849_v31  ;;  %v1847_v40 = vld [vmem:[#allocation2 + $0x1e0] sm:$0xff]  ;;  %2987 = vst.msk [vmem:[#allocation2 + $0x10] sm:$0xff] %vm269_vm2, %v2923_v26  ;;  %v2924_v45 = vadd.f32 %v8664_v33, %v2470_v51  ;;  %v2669_v42 = vpop.f32.mrb[99].mxu1  ;;  %v3344_v43 = vpop.f32.mrb[97].mxu0  ;;  %v7827_v28 = vld [vmem:[%s9180_s29 + $0x12a] sm:$0xff]  ;;  %v7923_v31 = vld [vmem:[%s9180_s29 + $0x138] sm:$0xff] }
 0x1ac   : > { %v2301_v46 = vadd.f32 %v2226_v15, %v1847_v40  ;;  %v1850_v48 = vld [vmem:[#allocation2 + $0x1f8] sm:$0xff]  ;;  %2985 = vst.msk [vmem:[#allocation2] sm:$0xff] %vm269_vm2, %v2921_v34  ;;  %v2922_v61 = vadd.f32 %v2669_v42, %v2468_v41  ;;  %v8730_v52 = vpop.f32.mrb[98].mxu0  ;;  %v7826_v26 = vld [vmem:[%s9180_s29 + $0x122] sm:$0xff] }
 0x1ad   : > { %2367 = vst.msk [vmem:[#allocation2 + $0x1f0] sm:$0xff] %vm269_vm2, %v2303_v39  ;;  %v2304_v54 = vadd.f32 %v8658_v17, %v1850_v48  ;;  %v1848_v55 = vld [vmem:[#allocation2 + $0x1e8] sm:$0xff]  ;;  %2988 = vst.msk [vmem:[#allocation2 + $0x18] sm:$0xff] %vm269_vm2, %v2924_v45  ;;  %8838 = vmatmul.mubr.msk.bf16.gmra.mrb[204].mxu1 %vm495_vm1, %v3814_v2  ;;  %v3347_v56 = vpop.f32.mrb[99].mxu0  ;;  %v7924_v34 = vld [vmem:[%s9180_s29 + $0x140] sm:$0xff] }
 0x1ae   : > { %2365 = vst.msk [vmem:[#allocation2 + $0x1e0] sm:$0xff] %vm269_vm2, %v2301_v46  ;;  %v2302_v57 = vadd.f32 %v2229_v37, %v1848_v55  ;;  %2986 = vst.msk [vmem:[#allocation2 + $0x8] sm:$0xff] %vm269_vm2, %v2922_v61  ;;  %8841 = vmatprep.mubr.msk.bf16.mxu1 %vm495_vm1, %v3815_v36  ;;  %v4496_v37 = vpack.c.bf16 %v7920_v6, %v7919_v18  ;;  %v7829_v2 = vld [vmem:[%s9180_s29 + $0x142] sm:$0xff]  ;;  %v3818_v36 = vpack.c.bf16 %v7827_v28, %v7826_v26  ;;  %v7925_v39 = vld [vmem:[%s9180_s29 + $0x150] sm:$0xff] }
 0x1af   : > { %2368 = vst.msk [vmem:[#allocation2 + $0x1f8] sm:$0xff] %vm269_vm2, %v2304_v54  ;;  %8904 = vmatmul.mubr.msk.bf16.gmra.mrb[204].mxu0 %vm495_vm1, %v4494_v44  ;;  %v2475_v33 = vld [vmem:[#allocation2 + $0x40] sm:$0xff]  ;;  %v7926_v40 = vld [vmem:[%s9180_s29 + $0x158] sm:$0xff]  ;;  %v3819_v46 = vpack.c.bf16 %v7829_v2, %v7828_v38 }
 0x1b0   : > { %2366 = vst.msk [vmem:[#allocation2 + $0x1e8] sm:$0xff] %vm269_vm2, %v2302_v57  ;;  %v8667_v4 = vpop.f32.mrb[100].mxu1  ;;  %8907 = vmatprep.mubr.msk.bf16.mxu0 %vm495_vm1, %v4495_v53  ;;  %v2478_v42 = vld [vmem:[#allocation2 + $0x58] sm:$0xff]  ;;  %v2476_v53 = vld [vmem:[#allocation2 + $0x48] sm:$0xff]  ;;  %v4499_v0 = vpack.c.bf16 %v7926_v40, %v7925_v39  ;;  %v2485_v39 = vld [vmem:[#allocation2 + $0x90] sm:$0xff] }
 0x1b1   : > { %v2927_v50 = vadd.f32 %v8667_v4, %v2473_v3  ;;  %v2682_v8 = vpop.f32.mrb[101].mxu1 }
 0x1b2   : > { %v3147_v60 = vld [vmem:[#allocation2 + $0x10] sm:$0xff]  ;;  %v2925_v24 = vadd.f32 %v2682_v8, %v2471_v20  ;;  %v8668_v15 = vpop.f32.mrb[102].mxu1  ;;  %v8733_v19 = vpop.f32.mrb[100].mxu0  ;;  %v7831_v20 = vld [vmem:[%s9180_s29 + $0x15a] sm:$0xff] }
 0x1b3   : > { %v3601_v23 = vadd.f32 %v8729_v12, %v3147_v60  ;;  %2991 = vst.msk [vmem:[#allocation2 + $0x30] sm:$0xff] %vm269_vm2, %v2927_v50  ;;  %v3145_v25 = vld [vmem:[#allocation2] sm:$0xff]  ;;  %v2928_v17 = vadd.f32 %v8668_v15, %v2474_v14  ;;  %v2685_v27 = vpop.f32.mrb[103].mxu1  ;;  %v3360_v35 = vpop.f32.mrb[101].mxu0  ;;  %v7830_v50 = vld [vmem:[%s9180_s29 + $0x152] sm:$0xff]  ;;  %v7832_v8 = vld [vmem:[%s9180_s29 + $0x16a] sm:$0xff] }
 0x1b4   : > { %v3599_v47 = vadd.f32 %v3344_v43, %v3145_v25  ;;  %2989 = vst.msk [vmem:[#allocation2 + $0x20] sm:$0xff] %vm269_vm2, %v2925_v24  ;;  %v3148_v62 = vld [vmem:[#allocation2 + $0x18] sm:$0xff]  ;;  %v2926_v1 = vadd.f32 %v2685_v27, %v2472_v9  ;;  %v8734_v5 = vpop.f32.mrb[102].mxu0  ;;  %v7927_v60 = vld [vmem:[%s9180_s29 + $0x168] sm:$0xff]  ;;  %v7928_v24 = vld [vmem:[%s9180_s29 + $0x170] sm:$0xff] }
 0x1b5   : > { %3665 = vst.msk [vmem:[#allocation2 + $0x10] sm:$0xff] %vm269_vm2, %v3601_v23  ;;  %v3602_v16 = vadd.f32 %v8730_v52, %v3148_v62  ;;  %2992 = vst.msk [vmem:[#allocation2 + $0x38] sm:$0xff] %vm269_vm2, %v2928_v17  ;;  %v3146_v21 = vld [vmem:[#allocation2 + $0x8] sm:$0xff]  ;;  %8842 = vmatmul.mubr.msk.bf16.gmra.mrb[208].mxu1 %vm495_vm1, %v3816_v10  ;;  %v3363_v30 = vpop.f32.mrb[103].mxu0  ;;  %v7833_v10 = vld [vmem:[%s9180_s29 + $0x172] sm:$0xff] }
 0x1b6   : > { %3663 = vst.msk [vmem:[#allocation2] sm:$0xff] %vm269_vm2, %v3599_v47  ;;  %v3600_v49 = vadd.f32 %v3347_v56, %v3146_v21  ;;  %2990 = vst.msk [vmem:[#allocation2 + $0x28] sm:$0xff] %vm269_vm2, %v2926_v1  ;;  %8845 = vmatprep.mubr.msk.bf16.mxu1 %vm495_vm1, %v3817_v22  ;;  %v4498_v56 = vpack.c.bf16 %v7924_v34, %v7923_v31  ;;  %v2479_v15 = vld [vmem:[#allocation2 + $0x60] sm:$0xff]  ;;  %v3820_v22 = vpack.c.bf16 %v7831_v20, %v7830_v50  ;;  %v7930_v25 = vld [vmem:[%s9180_s29 + $0x188] sm:$0xff] }
 0x1b7   : > { %3666 = vst.msk [vmem:[#allocation2 + $0x18] sm:$0xff] %vm269_vm2, %v3602_v16  ;;  %8908 = vmatmul.mubr.msk.bf16.gmra.mrb[208].mxu0 %vm495_vm1, %v4496_v37  ;;  %v7929_v23 = vld [vmem:[%s9180_s29 + $0x180] sm:$0xff]  ;;  %v2482_v27 = vld [vmem:[#allocation2 + $0x78] sm:$0xff]  ;;  %v3821_v47 = vpack.c.bf16 %v7833_v10, %v7832_v8 }
 0x1b8   : > { %3664 = vst.msk [vmem:[#allocation2 + $0x8] sm:$0xff] %vm269_vm2, %v3600_v49  ;;  %v8671_v59 = vpop.f32.mrb[104].mxu1  ;;  %8911 = vmatprep.mubr.msk.bf16.mxu0 %vm495_vm1, %v4497_v13  ;;  %v2480_v13 = vld [vmem:[#allocation2 + $0x68] sm:$0xff]  ;;  %v4501_v2 = vpack.c.bf16 %v7930_v25, %v7929_v23  ;;  %v2489_v23 = vld [vmem:[#allocation2 + $0xb0] sm:$0xff] }
 0x1b9   : > { %v2931_v51 = vadd.f32 %v8671_v59, %v2477_v29  ;;  %v2698_v12 = vpop.f32.mrb[105].mxu1 }
 0x1ba   : > { %v3151_v45 = vld [vmem:[#allocation2 + $0x30] sm:$0xff]  ;;  %v2929_v41 = vadd.f32 %v2698_v12, %v2475_v33  ;;  %v8672_v43 = vpop.f32.mrb[106].mxu1  ;;  %v8737_v44 = vpop.f32.mrb[104].mxu0 }
 0x1bb   : > { %v3605_v48 = vadd.f32 %v8733_v19, %v3151_v45  ;;  %2995 = vst.msk [vmem:[#allocation2 + $0x50] sm:$0xff] %vm269_vm2, %v2931_v51  ;;  %v3149_v61 = vld [vmem:[#allocation2 + $0x20] sm:$0xff]  ;;  %v2932_v52 = vadd.f32 %v8672_v43, %v2478_v42  ;;  %v2701_v54 = vpop.f32.mrb[107].mxu1  ;;  %v3376_v55 = vpop.f32.mrb[105].mxu0  ;;  %v7835_v33 = vld [vmem:[%s9180_s29 + $0x18a] sm:$0xff]  ;;  %v7931_v45 = vld [vmem:[%s9180_s29 + $0x198] sm:$0xff] }
 0x1bc   : > { %v3603_v57 = vadd.f32 %v3360_v35, %v3149_v61  ;;  %2993 = vst.msk [vmem:[#allocation2 + $0x40] sm:$0xff] %vm269_vm2, %v2929_v41  ;;  %v3152_v58 = vld [vmem:[#allocation2 + $0x38] sm:$0xff]  ;;  %v2930_v63 = vadd.f32 %v2701_v54, %v2476_v53  ;;  %v8738_v7 = vpop.f32.mrb[106].mxu0  ;;  %v7834_v51 = vld [vmem:[%s9180_s29 + $0x182] sm:$0xff] }
 0x1bd   : > { %3669 = vst.msk [vmem:[#allocation2 + $0x30] sm:$0xff] %vm269_vm2, %v3605_v48  ;;  %v3606_v3 = vadd.f32 %v8734_v5, %v3152_v58  ;;  %2996 = vst.msk [vmem:[#allocation2 + $0x58] sm:$0xff] %vm269_vm2, %v2932_v52  ;;  %v3150_v4 = vld [vmem:[#allocation2 + $0x28] sm:$0xff]  ;;  %8846 = vmatmul.mubr.msk.bf16.gmra.mrb[212].mxu1 %vm495_vm1, %v3818_v36  ;;  %v3379_v18 = vpop.f32.mrb[107].mxu0  ;;  %v7966_v12 = vld [vmem:[%s9185_s7 + $0x31] sm:$0xff] }
 0x1be   : > { %3667 = vst.msk [vmem:[#allocation2 + $0x20] sm:$0xff] %vm269_vm2, %v3603_v57  ;;  %v3604_v6 = vadd.f32 %v3363_v30, %v3150_v4  ;;  %2994 = vst.msk [vmem:[#allocation2 + $0x48] sm:$0xff] %vm269_vm2, %v2930_v63  ;;  %8849 = vmatprep.mubr.msk.bf16.mxu1 %vm495_vm1, %v3819_v46  ;;  %v4500_v30 = vpack.c.bf16 %v7928_v24, %v7927_v60  ;;  %v7967_v36 = vld [vmem:[%s9185_s7 + $0x39] sm:$0xff]  ;;  %v3822_v46 = vpack.c.bf16 %v7835_v33, %v7834_v51 }
 0x1bf   : > { %3670 = vst.msk [vmem:[#allocation2 + $0x38] sm:$0xff] %vm269_vm2, %v3606_v3  ;;  %8912 = vmatmul.mubr.msk.bf16.gmra.mrb[212].mxu0 %vm495_vm1, %v4498_v56  ;;  %v7932_v41 = vld [vmem:[%s9180_s29 + $0x1a0] sm:$0xff]  ;;  %v8063_v48 = vld [vmem:[%s9185_s7 + $0x32] sm:$0xff]  ;;  %v5149_v57 = vpack.c.bf16 %v7967_v36, %v7966_v12 }
 0x1c0   : > { %3668 = vst.msk [vmem:[#allocation2 + $0x28] sm:$0xff] %vm269_vm2, %v3604_v6  ;;  %v8675_v11 = vpop.f32.mrb[108].mxu1  ;;  %8915 = vmatprep.mubr.msk.bf16.mxu0 %vm495_vm1, %v4499_v0  ;;  %v2483_v43 = vld [vmem:[#allocation2 + $0x80] sm:$0xff]  ;;  %v2486_v54 = vld [vmem:[#allocation2 + $0x98] sm:$0xff]  ;;  %v2484_v0 = vld [vmem:[#allocation2 + $0x88] sm:$0xff] }
 0x1c1   : > { %v2935_v14 = vadd.f32 %v8675_v11, %v2481_v32  ;;  %v2714_v19 = vpop.f32.mrb[109].mxu1  ;;  %v8064_v61 = vld [vmem:[%s9185_s7 + $0x3a] sm:$0xff] }
 0x1c2   : > { %v3155_v17 = vld [vmem:[#allocation2 + $0x50] sm:$0xff]  ;;  %v2933_v9 = vadd.f32 %v2714_v19, %v2479_v15  ;;  %v8676_v35 = vpop.f32.mrb[110].mxu1  ;;  %v8741_v37 = vpop.f32.mrb[108].mxu0  ;;  %v5827_v10 = vpack.c.bf16 %v8064_v61, %v8063_v48  ;;  %v7970_v19 = vld [vmem:[%s9185_s7 + $0x61] sm:$0xff] }
 0x1c3   : > { %v3609_v62 = vadd.f32 %v8737_v44, %v3155_v17  ;;  %2999 = vst.msk [vmem:[#allocation2 + $0x70] sm:$0xff] %vm269_vm2, %v2935_v14  ;;  %v3153_v1 = vld [vmem:[#allocation2 + $0x40] sm:$0xff]  ;;  %v2936_v5 = vadd.f32 %v8676_v35, %v2482_v27  ;;  %v2717_v16 = vpop.f32.mrb[111].mxu1  ;;  %v3392_v21 = vpop.f32.mrb[109].mxu0  ;;  %v7968_v14 = vld [vmem:[%s9185_s7 + $0x49] sm:$0xff]  ;;  %v7969_v15 = vld [vmem:[%s9185_s7 + $0x51] sm:$0xff] }
 0x1c4   : > { %v3607_v49 = vadd.f32 %v3376_v55, %v3153_v1  ;;  %2997 = vst.msk [vmem:[#allocation2 + $0x60] sm:$0xff] %vm269_vm2, %v2933_v9  ;;  %v3156_v26 = vld [vmem:[#allocation2 + $0x58] sm:$0xff]  ;;  %v2934_v28 = vadd.f32 %v2717_v16, %v2480_v13  ;;  %v8742_v38 = vpop.f32.mrb[110].mxu0  ;;  %v8065_v17 = vld [vmem:[%s9185_s7 + $0x4a] sm:$0xff]  ;;  %v2487_v35 = vld [vmem:[#allocation2 + $0xa0] sm:$0xff] }
 0x1c5   : > { %3673 = vst.msk [vmem:[#allocation2 + $0x50] sm:$0xff] %vm269_vm2, %v3609_v62  ;;  %v3610_v29 = vadd.f32 %v8738_v7, %v3156_v26  ;;  %3000 = vst.msk [vmem:[#allocation2 + $0x78] sm:$0xff] %vm269_vm2, %v2936_v5  ;;  %v3154_v59 = vld [vmem:[#allocation2 + $0x48] sm:$0xff]  ;;  %8850 = vmatmul.mubr.msk.bf16.gmra.mrb[216].mxu1 %vm495_vm1, %v3820_v22  ;;  %v3395_v31 = vpop.f32.mrb[111].mxu0  ;;  %v8066_v9 = vld [vmem:[%s9185_s7 + $0x52] sm:$0xff] }
 0x1c6   : > { %3671 = vst.msk [vmem:[#allocation2 + $0x40] sm:$0xff] %vm269_vm2, %v3607_v49  ;;  %v3608_v34 = vadd.f32 %v3379_v18, %v3154_v59  ;;  %2998 = vst.msk [vmem:[#allocation2 + $0x68] sm:$0xff] %vm269_vm2, %v2934_v28  ;;  %8853 = vmatprep.mubr.msk.bf16.mxu1 %vm495_vm1, %v3821_v47  ;;  %v4502_v18 = vpack.c.bf16 %v7932_v41, %v7931_v45  ;;  %v7971_v22 = vld [vmem:[%s9185_s7 + $0x69] sm:$0xff]  ;;  %v5150_v47 = vpack.c.bf16 %v7969_v15, %v7968_v14  ;;  %v2490_v16 = vld [vmem:[#allocation2 + $0xb8] sm:$0xff] }
 0x1c7   : > { %3674 = vst.msk [vmem:[#allocation2 + $0x58] sm:$0xff] %vm269_vm2, %v3610_v29  ;;  %8916 = vmatmul.mubr.msk.bf16.gmra.mrb[216].mxu0 %vm495_vm1, %v4500_v30  ;;  %v8067_v62 = vld [vmem:[%s9185_s7 + $0x62] sm:$0xff]  ;;  %v8068_v1 = vld [vmem:[%s9185_s7 + $0x6a] sm:$0xff]  ;;  %v5151_v49 = vpack.c.bf16 %v7971_v22, %v7970_v19 }
 0x1c8   : > { %3672 = vst.msk [vmem:[#allocation2 + $0x48] sm:$0xff] %vm269_vm2, %v3608_v34  ;;  %v8679_v40 = vpop.f32.mrb[112].mxu1  ;;  %8919 = vmatprep.mubr.msk.bf16.mxu0 %vm495_vm1, %v4501_v2  ;;  %v2488_v2 = vld [vmem:[#allocation2 + $0xa8] sm:$0xff]  ;;  %v5829_v36 = vpack.c.bf16 %v8068_v1, %v8067_v62  ;;  %v2493_v48 = vld [vmem:[#allocation2 + $0xd0] sm:$0xff] }
 0x1c9   : > { %v2939_v42 = vadd.f32 %v8679_v40, %v2485_v39  ;;  %v2730_v44 = vpop.f32.mrb[113].mxu1  ;;  %v2497_v62 = vld [vmem:[#allocation2 + $0xf0] sm:$0xff] }
 0x1ca   : > { %v3159_v52 = vld [vmem:[#allocation2 + $0x70] sm:$0xff]  ;;  %v2937_v53 = vadd.f32 %v2730_v44, %v2483_v43  ;;  %v8680_v55 = vpop.f32.mrb[114].mxu1  ;;  %v8745_v56 = vpop.f32.mrb[112].mxu0  ;;  %v7973_v43 = vld [vmem:[%s9185_s7 + $0x81] sm:$0xff] }
 0x1cb   : > { %v3613_v58 = vadd.f32 %v8741_v37, %v3159_v52  ;;  %3003 = vst.msk [vmem:[#allocation2 + $0x90] sm:$0xff] %vm269_vm2, %v2939_v42  ;;  %v3157_v63 = vld [vmem:[#allocation2 + $0x60] sm:$0xff]  ;;  %v2940_v7 = vadd.f32 %v8680_v55, %v2486_v54  ;;  %v2733_v3 = vpop.f32.mrb[115].mxu1  ;;  %v3408_v4 = vpop.f32.mrb[113].mxu0  ;;  %v7974_v44 = vld [vmem:[%s9185_s7 + $0x91] sm:$0xff] }
 0x1cc   : > { %v3611_v6 = vadd.f32 %v3392_v21, %v3157_v63  ;;  %3001 = vst.msk [vmem:[#allocation2 + $0x80] sm:$0xff] %vm269_vm2, %v2937_v53  ;;  %v3160_v50 = vld [vmem:[#allocation2 + $0x78] sm:$0xff]  ;;  %v2938_v20 = vadd.f32 %v2733_v3, %v2484_v0  ;;  %v8746_v8 = vpop.f32.mrb[114].mxu0  ;;  %v8070_v53 = vld [vmem:[%s9185_s7 + $0x82] sm:$0xff] }
 0x1cd   : > { %3677 = vst.msk [vmem:[#allocation2 + $0x70] sm:$0xff] %vm269_vm2, %v3613_v58  ;;  %v3614_v32 = vadd.f32 %v8742_v38, %v3160_v50  ;;  %3004 = vst.msk [vmem:[#allocation2 + $0x98] sm:$0xff] %vm269_vm2, %v2940_v7  ;;  %v3158_v11 = vld [vmem:[#allocation2 + $0x68] sm:$0xff]  ;;  %8854 = vmatmul.mubr.msk.bf16.gmra.mrb[220].mxu1 %vm495_vm1, %v3822_v46  ;;  %v3411_v60 = vpop.f32.mrb[115].mxu0  ;;  %v7972_v42 = vld [vmem:[%s9185_s7 + $0x79] sm:$0xff] }
 0x1ce   : > { %3675 = vst.msk [vmem:[#allocation2 + $0x60] sm:$0xff] %vm269_vm2, %v3611_v6  ;;  %v3612_v24 = vadd.f32 %v3395_v31, %v3158_v11  ;;  %3002 = vst.msk [vmem:[#allocation2 + $0x88] sm:$0xff] %vm269_vm2, %v2938_v20  ;;  %8925 = vmatprep.mubr.msk.bf16.mxu1 %vm495_vm1, %v5149_v57  ;;  %v5828_v31 = vpack.c.bf16 %v8066_v9, %v8065_v17  ;;  %v7975_v46 = vld [vmem:[%s9185_s7 + $0x99] sm:$0xff]  ;;  %v5152_v57 = vpack.c.bf16 %v7973_v43, %v7972_v42 }
 0x1cf   : > { %3678 = vst.msk [vmem:[#allocation2 + $0x78] sm:$0xff] %vm269_vm2, %v3614_v32  ;;  %8920 = vmatmul.mubr.msk.bf16.gmra.mrb[220].mxu0 %vm495_vm1, %v4502_v18  ;;  %v8069_v52 = vld [vmem:[%s9185_s7 + $0x7a] sm:$0xff]  ;;  %v8071_v58 = vld [vmem:[%s9185_s7 + $0x92] sm:$0xff]  ;;  %v5153_v6 = vpack.c.bf16 %v7975_v46, %v7974_v44 }
 0x1d0   : > { %3676 = vst.msk [vmem:[#allocation2 + $0x68] sm:$0xff] %vm269_vm2, %v3612_v24  ;;  %v8683_v25 = vpop.f32.mrb[116].mxu1  ;;  %8991 = vmatprep.mubr.msk.bf16.mxu0 %vm495_vm1, %v5827_v10  ;;  %v2491_v55 = vld [vmem:[#allocation2 + $0xc0] sm:$0xff]  ;;  %v2494_v3 = vld [vmem:[#allocation2 + $0xd8] sm:$0xff]  ;;  %v2492_v10 = vld [vmem:[#allocation2 + $0xc8] sm:$0xff] }
 0x1d1   : > { %v2943_v27 = vadd.f32 %v8683_v25, %v2489_v23  ;;  %v2746_v37 = vpop.f32.mrb[117].mxu1  ;;  %v8072_v63 = vld [vmem:[%s9185_s7 + $0x9a] sm:$0xff] }
 0x1d2   : > { %v3163_v5 = vld [vmem:[#allocation2 + $0x90] sm:$0xff]  ;;  %v2941_v13 = vadd.f32 %v2746_v37, %v2487_v35  ;;  %v8684_v21 = vpop.f32.mrb[118].mxu1  ;;  %v8749_v30 = vpop.f32.mrb[116].mxu0  ;;  %v5831_v22 = vpack.c.bf16 %v8072_v63, %v8071_v58  ;;  %v7978_v37 = vld [vmem:[%s9185_s7 + $0xc1] sm:$0xff] }
 0x1d3   : > { %v3617_v26 = vadd.f32 %v8745_v56, %v3163_v5  ;;  %3007 = vst.msk [vmem:[#allocation2 + $0xb0] sm:$0xff] %vm269_vm2, %v2943_v27  ;;  %v3161_v28 = vld [vmem:[#allocation2 + $0x80] sm:$0xff]  ;;  %v2944_v38 = vadd.f32 %v8684_v21, %v2490_v16  ;;  %v2749_v29 = vpop.f32.mrb[119].mxu1  ;;  %v3424_v59 = vpop.f32.mrb[117].mxu0  ;;  %v7976_v27 = vld [vmem:[%s9185_s7 + $0xa9] sm:$0xff]  ;;  %v7977_v35 = vld [vmem:[%s9185_s7 + $0xb1] sm:$0xff] }
 0x1d4   : > { %v3615_v34 = vadd.f32 %v3408_v4, %v3161_v28  ;;  %3005 = vst.msk [vmem:[#allocation2 + $0xa0] sm:$0xff] %vm269_vm2, %v2941_v13  ;;  %v3164_v51 = vld [vmem:[#allocation2 + $0x98] sm:$0xff]  ;;  %v2942_v33 = vadd.f32 %v2749_v29, %v2488_v2  ;;  %v8750_v12 = vpop.f32.mrb[118].mxu0  ;;  %v8073_v5 = vld [vmem:[%s9185_s7 + $0xaa] sm:$0xff]  ;;  %v2495_v21 = vld [vmem:[#allocation2 + $0xe0] sm:$0xff] }
 0x1d5   : > { %3681 = vst.msk [vmem:[#allocation2 + $0x90] sm:$0xff] %vm269_vm2, %v3617_v26  ;;  %v3618_v39 = vadd.f32 %v8746_v8, %v3164_v51  ;;  %3008 = vst.msk [vmem:[#allocation2 + $0xb8] sm:$0xff] %vm269_vm2, %v2944_v38  ;;  %v3162_v40 = vld [vmem:[#allocation2 + $0x88] sm:$0xff]  ;;  %8926 = vmatmul.mubr.msk.bf16.vlgmr.msra.gmra.mrb[224].mxu1 %vm495_vm1, %v5150_v47  ;;  %v3427_v45 = vpop.f32.mrb[119].mxu0  ;;  %v8074_v13 = vld [vmem:[%s9185_s7 + $0xb2] sm:$0xff] }
 0x1d6   : > { %3679 = vst.msk [vmem:[#allocation2 + $0x80] sm:$0xff] %vm269_vm2, %v3615_v34  ;;  %v3616_v41 = vadd.f32 %v3411_v60, %v3162_v40  ;;  %3006 = vst.msk [vmem:[#allocation2 + $0xa8] sm:$0xff] %vm269_vm2, %v2942_v33  ;;  %8929 = vmatprep.mubr.msk.bf16.mxu1 %vm495_vm1, %v5151_v49  ;;  %v5830_v60 = vpack.c.bf16 %v8070_v53, %v8069_v52  ;;  %v7979_v47 = vld [vmem:[%s9185_s7 + $0xc9] sm:$0xff]  ;;  %v5154_v49 = vpack.c.bf16 %v7977_v35, %v7976_v27  ;;  %v2498_v29 = vld [vmem:[#allocation2 + $0xf8] sm:$0xff] }
 0x1d7   : > { %3682 = vst.msk [vmem:[#allocation2 + $0x98] sm:$0xff] %vm269_vm2, %v3618_v39  ;;  %8992 = vmatmul.mubr.msk.bf16.vlgmr.msra.gmra.mrb[224].mxu0 %vm495_vm1, %v5828_v31  ;;  %v8075_v26 = vld [vmem:[%s9185_s7 + $0xc2] sm:$0xff]  ;;  %v8076_v28 = vld [vmem:[%s9185_s7 + $0xca] sm:$0xff]  ;;  %v5155_v34 = vpack.c.bf16 %v7979_v47, %v7978_v37 }
 0x1d8   : > { %3680 = vst.msk [vmem:[#allocation2 + $0x88] sm:$0xff] %vm269_vm2, %v3616_v41  ;;  %v8687_v61 = vpop.f32.mrb[120].mxu1  ;;  %8995 = vmatprep.mubr.msk.bf16.mxu0 %vm495_vm1, %v5829_v36  ;;  %v2496_v36 = vld [vmem:[#allocation2 + $0xe8] sm:$0xff]  ;;  %v5833_v46 = vpack.c.bf16 %v8076_v28, %v8075_v26  ;;  %v2501_v58 = vld [vmem:[#allocation2 + $0x110] sm:$0xff] }
 0x1d9   : > { %v2947_v54 = vadd.f32 %v8687_v61, %v2493_v48  ;;  %v2762_v56 = vpop.f32.mrb[121].mxu1  ;;  %v2505_v26 = vld [vmem:[#allocation2 + $0x130] sm:$0xff] }
 0x1da   : > { %v3167_v7 = vld [vmem:[#allocation2 + $0xb0] sm:$0xff]  ;;  %v2945_v0 = vadd.f32 %v2762_v56, %v2491_v55  ;;  %v8688_v4 = vpop.f32.mrb[122].mxu1  ;;  %v8753_v18 = vpop.f32.mrb[120].mxu0  ;;  %v7981_v55 = vld [vmem:[%s9185_s7 + $0xe1] sm:$0xff] }
 0x1db   : > { %v3621_v50 = vadd.f32 %v8749_v30, %v3167_v7  ;;  %3011 = vst.msk [vmem:[#allocation2 + $0xd0] sm:$0xff] %vm269_vm2, %v2947_v54  ;;  %v3165_v20 = vld [vmem:[#allocation2 + $0xa0] sm:$0xff]  ;;  %v2948_v8 = vadd.f32 %v8688_v4, %v2494_v3  ;;  %v2765_v32 = vpop.f32.mrb[123].mxu1  ;;  %v3440_v11 = vpop.f32.mrb[121].mxu0  ;;  %v7982_v56 = vld [vmem:[%s9185_s7 + $0xf1] sm:$0xff] }
 0x1dc   : > { %v3619_v24 = vadd.f32 %v3424_v59, %v3165_v20  ;;  %3009 = vst.msk [vmem:[#allocation2 + $0xc0] sm:$0xff] %vm269_vm2, %v2945_v0  ;;  %v3168_v14 = vld [vmem:[#allocation2 + $0xb8] sm:$0xff]  ;;  %v2946_v15 = vadd.f32 %v2765_v32, %v2492_v10  ;;  %v8754_v19 = vpop.f32.mrb[122].mxu0  ;;  %v8078_v0 = vld [vmem:[%s9185_s7 + $0xe2] sm:$0xff] }
 0x1dd   : > { %3685 = vst.msk [vmem:[#allocation2 + $0xb0] sm:$0xff] %vm269_vm2, %v3621_v50  ;;  %v3622_v23 = vadd.f32 %v8750_v12, %v3168_v14  ;;  %3012 = vst.msk [vmem:[#allocation2 + $0xd8] sm:$0xff] %vm269_vm2, %v2948_v8  ;;  %v3166_v25 = vld [vmem:[#allocation2 + $0xa8] sm:$0xff]  ;;  %8930 = vmatmul.mubr.msk.bf16.gmra.mrb[228].mxu1 %vm495_vm1, %v5152_v57  ;;  %v3443_v17 = vpop.f32.mrb[123].mxu0  ;;  %v7980_v54 = vld [vmem:[%s9185_s7 + $0xd9] sm:$0xff] }
 0x1de   : > { %3683 = vst.msk [vmem:[#allocation2 + $0xa0] sm:$0xff] %vm269_vm2, %v3619_v24  ;;  %v3620_v9 = vadd.f32 %v3427_v45, %v3166_v25  ;;  %3010 = vst.msk [vmem:[#allocation2 + $0xc8] sm:$0xff] %vm269_vm2, %v2946_v15  ;;  %8933 = vmatprep.mubr.msk.bf16.mxu1 %vm495_vm1, %v5153_v6  ;;  %v5832_v45 = vpack.c.bf16 %v8074_v13, %v8073_v5  ;;  %v7983_v57 = vld [vmem:[%s9185_s7 + $0xf9] sm:$0xff]  ;;  %v5156_v6 = vpack.c.bf16 %v7981_v55, %v7980_v54 }
 0x1df   : > { %3686 = vst.msk [vmem:[#allocation2 + $0xb8] sm:$0xff] %vm269_vm2, %v3622_v23  ;;  %8996 = vmatmul.mubr.msk.bf16.gmra.mrb[228].mxu0 %vm495_vm1, %v5830_v60  ;;  %v8077_v7 = vld [vmem:[%s9185_s7 + $0xda] sm:$0xff]  ;;  %v8079_v50 = vld [vmem:[%s9185_s7 + $0xf2] sm:$0xff]  ;;  %v5157_v24 = vpack.c.bf16 %v7983_v57, %v7982_v56 }
 0x1e0   : > { %3684 = vst.msk [vmem:[#allocation2 + $0xa8] sm:$0xff] %vm269_vm2, %v3620_v9  ;;  %v8691_v1 = vpop.f32.mrb[124].mxu1  ;;  %8999 = vmatprep.mubr.msk.bf16.mxu0 %vm495_vm1, %v5831_v22  ;;  %v2499_v4 = vld [vmem:[#allocation2 + $0x100] sm:$0xff]  ;;  %v2502_v32 = vld [vmem:[#allocation2 + $0x118] sm:$0xff]  ;;  %v2500_v22 = vld [vmem:[#allocation2 + $0x108] sm:$0xff] }
 0x1e1   : > { %v2951_v16 = vadd.f32 %v8691_v1, %v2497_v62  ;;  %v2778_v30 = vpop.f32.mrb[125].mxu1  ;;  %v8080_v20 = vld [vmem:[%s9185_s7 + $0xfa] sm:$0xff] }
 0x1e2   : > { %v3171_v38 = vld [vmem:[#allocation2 + $0xd0] sm:$0xff]  ;;  %v2949_v2 = vadd.f32 %v2778_v30, %v2495_v21  ;;  %v8692_v59 = vpop.f32.mrb[126].mxu1  ;;  %v8757_v31 = vpop.f32.mrb[124].mxu0  ;;  %v5835_v47 = vpack.c.bf16 %v8080_v20, %v8079_v50  ;;  %v7986_v30 = vld [vmem:[%s9185_s7 + $0x121] sm:$0xff] }
 0x1e3   : > { %v3625_v51 = vadd.f32 %v8753_v18, %v3171_v38  ;;  %3015 = vst.msk [vmem:[#allocation2 + $0xf0] sm:$0xff] %vm269_vm2, %v2951_v16  ;;  %v3169_v33 = vld [vmem:[#allocation2 + $0xc0] sm:$0xff]  ;;  %v2952_v12 = vadd.f32 %v8692_v59, %v2498_v29  ;;  %v2781_v39 = vpop.f32.mrb[127].mxu1  ;;  %v3456_v40 = vpop.f32.mrb[125].mxu0  ;;  %v7984_v16 = vld [vmem:[%s9185_s7 + $0x109] sm:$0xff]  ;;  %v7985_v21 = vld [vmem:[%s9185_s7 + $0x111] sm:$0xff] }
 0x1e4   : > { %v3623_v41 = vadd.f32 %v3440_v11, %v3169_v33  ;;  %3013 = vst.msk [vmem:[#allocation2 + $0xe0] sm:$0xff] %vm269_vm2, %v2949_v2  ;;  %v3172_v42 = vld [vmem:[#allocation2 + $0xd8] sm:$0xff]  ;;  %v2950_v43 = vadd.f32 %v2781_v39, %v2496_v36  ;;  %v8758_v44 = vpop.f32.mrb[126].mxu0  ;;  %v8081_v38 = vld [vmem:[%s9185_s7 + $0x10a] sm:$0xff]  ;;  %v2503_v59 = vld [vmem:[#allocation2 + $0x120] sm:$0xff] }
 0x1e5   : > { %3689 = vst.msk [vmem:[#allocation2 + $0xd0] sm:$0xff] %vm269_vm2, %v3625_v51  ;;  %v3626_v48 = vadd.f32 %v8754_v19, %v3172_v42  ;;  %3016 = vst.msk [vmem:[#allocation2 + $0xf8] sm:$0xff] %vm269_vm2, %v2952_v12  ;;  %v3170_v61 = vld [vmem:[#allocation2 + $0xc8] sm:$0xff]  ;;  %8934 = vmatmul.mubr.msk.bf16.gmra.mrb[232].mxu1 %vm495_vm1, %v5154_v49  ;;  %v3459_v52 = vpop.f32.mrb[127].mxu0  ;;  %v8082_v2 = vld [vmem:[%s9185_s7 + $0x112] sm:$0xff] }
 0x1e6   : > { %3687 = vst.msk [vmem:[#allocation2 + $0xc0] sm:$0xff] %vm269_vm2, %v3623_v41  ;;  %v3624_v53 = vadd.f32 %v3443_v17, %v3170_v61  ;;  %3014 = vst.msk [vmem:[#allocation2 + $0xe8] sm:$0xff] %vm269_vm2, %v2950_v43  ;;  %8937 = vmatprep.mubr.msk.bf16.mxu1 %vm495_vm1, %v5155_v34  ;;  %v5834_v17 = vpack.c.bf16 %v8078_v0, %v8077_v7  ;;  %v7987_v49 = vld [vmem:[%s9185_s7 + $0x129] sm:$0xff]  ;;  %v5158_v34 = vpack.c.bf16 %v7985_v21, %v7984_v16  ;;  %v2506_v39 = vld [vmem:[#allocation2 + $0x138] sm:$0xff] }
 0x1e7   : > { %3690 = vst.msk [vmem:[#allocation2 + $0xd8] sm:$0xff] %vm269_vm2, %v3626_v48  ;;  %9000 = vmatmul.mubr.msk.bf16.gmra.mrb[232].mxu0 %vm495_vm1, %v5832_v45  ;;  %v8083_v51 = vld [vmem:[%s9185_s7 + $0x122] sm:$0xff]  ;;  %v8084_v33 = vld [vmem:[%s9185_s7 + $0x12a] sm:$0xff]  ;;  %v5159_v41 = vpack.c.bf16 %v7987_v49, %v7986_v30 }
 0x1e8   : > { %3688 = vst.msk [vmem:[#allocation2 + $0xc8] sm:$0xff] %vm269_vm2, %v3624_v53  ;;  %v8695_v63 = vpop.f32.mrb[128].mxu1  ;;  %9003 = vmatprep.mubr.msk.bf16.mxu0 %vm495_vm1, %v5833_v46  ;;  %v2504_v46 = vld [vmem:[#allocation2 + $0x128] sm:$0xff]  ;;  %v5837_v57 = vpack.c.bf16 %v8084_v33, %v8083_v51  ;;  %v2509_v50 = vld [vmem:[#allocation2 + $0x150] sm:$0xff] }
 0x1e9   : > { %v2955_v3 = vadd.f32 %v8695_v63, %v2501_v58  ;;  %v2794_v18 = vpop.f32.mrb[129].mxu1  ;;  %v2513_v51 = vld [vmem:[#allocation2 + $0x170] sm:$0xff] }
 0x1ea   : > { %v3175_v8 = vld [vmem:[#allocation2 + $0xf0] sm:$0xff]  ;;  %v2953_v10 = vadd.f32 %v2794_v18, %v2499_v4  ;;  %v8696_v11 = vpop.f32.mrb[130].mxu1  ;;  %v8761_v60 = vpop.f32.mrb[128].mxu0  ;;  %v7989_v4 = vld [vmem:[%s9185_s7 + $0x141] sm:$0xff] }
 0x1eb   : > { %v3629_v14 = vadd.f32 %v8757_v31, %v3175_v8  ;;  %3019 = vst.msk [vmem:[#allocation2 + $0x110] sm:$0xff] %vm269_vm2, %v2955_v3  ;;  %v3173_v15 = vld [vmem:[#allocation2 + $0xe0] sm:$0xff]  ;;  %v2956_v19 = vadd.f32 %v8696_v11, %v2502_v32  ;;  %v2797_v23 = vpop.f32.mrb[131].mxu1  ;;  %v3472_v25 = vpop.f32.mrb[129].mxu0  ;;  %v7990_v18 = vld [vmem:[%s9185_s7 + $0x151] sm:$0xff] }
 0x1ec   : > { %v3627_v9 = vadd.f32 %v3456_v40, %v3173_v15  ;;  %3017 = vst.msk [vmem:[#allocation2 + $0x100] sm:$0xff] %vm269_vm2, %v2953_v10  ;;  %v3176_v27 = vld [vmem:[#allocation2 + $0xf8] sm:$0xff]  ;;  %v2954_v35 = vadd.f32 %v2797_v23, %v2500_v22  ;;  %v8762_v37 = vpop.f32.mrb[130].mxu0  ;;  %v8086_v10 = vld [vmem:[%s9185_s7 + $0x142] sm:$0xff] }
 0x1ed   : > { %3693 = vst.msk [vmem:[#allocation2 + $0xf0] sm:$0xff] %vm269_vm2, %v3629_v14  ;;  %v3630_v62 = vadd.f32 %v8758_v44, %v3176_v27  ;;  %3020 = vst.msk [vmem:[#allocation2 + $0x118] sm:$0xff] %vm269_vm2, %v2956_v19  ;;  %v3174_v1 = vld [vmem:[#allocation2 + $0xe8] sm:$0xff]  ;;  %8938 = vmatmul.mubr.msk.bf16.gmra.mrb[236].mxu1 %vm495_vm1, %v5156_v6  ;;  %v3475_v5 = vpop.f32.mrb[131].mxu0  ;;  %v7988_v3 = vld [vmem:[%s9185_s7 + $0x139] sm:$0xff] }
 0x1ee   : > { %3691 = vst.msk [vmem:[#allocation2 + $0xe0] sm:$0xff] %vm269_vm2, %v3627_v9  ;;  %v3628_v13 = vadd.f32 %v3459_v52, %v3174_v1  ;;  %3018 = vst.msk [vmem:[#allocation2 + $0x108] sm:$0xff] %vm269_vm2, %v2954_v35  ;;  %8941 = vmatprep.mubr.msk.bf16.mxu1 %vm495_vm1, %v5157_v24  ;;  %v5836_v52 = vpack.c.bf16 %v8082_v2, %v8081_v38  ;;  %v7991_v6 = vld [vmem:[%s9185_s7 + $0x159] sm:$0xff]  ;;  %v5160_v24 = vpack.c.bf16 %v7989_v4, %v7988_v3 }
 0x1ef   : > { %3694 = vst.msk [vmem:[#allocation2 + $0xf8] sm:$0xff] %vm269_vm2, %v3630_v62  ;;  %9004 = vmatmul.mubr.msk.bf16.gmra.mrb[236].mxu0 %vm495_vm1, %v5834_v17  ;;  %v8085_v8 = vld [vmem:[%s9185_s7 + $0x13a] sm:$0xff]  ;;  %v8087_v14 = vld [vmem:[%s9185_s7 + $0x152] sm:$0xff]  ;;  %v5161_v9 = vpack.c.bf16 %v7991_v6, %v7990_v18 }
 0x1f0   : > { %3692 = vst.msk [vmem:[#allocation2 + $0xe8] sm:$0xff] %vm269_vm2, %v3628_v13  ;;  %v8699_v28 = vpop.f32.mrb[132].mxu1  ;;  %9007 = vmatprep.mubr.msk.bf16.mxu0 %vm495_vm1, %v5835_v47  ;;  %v2507_v11 = vld [vmem:[#allocation2 + $0x140] sm:$0xff]  ;;  %v2510_v23 = vld [vmem:[#allocation2 + $0x158] sm:$0xff]  ;;  %v2508_v47 = vld [vmem:[#allocation2 + $0x148] sm:$0xff] }
 0x1f1   : > { %v2959_v29 = vadd.f32 %v8699_v28, %v2505_v26  ;;  %v2810_v31 = vpop.f32.mrb[133].mxu1  ;;  %v8088_v15 = vld [vmem:[%s9185_s7 + $0x15a] sm:$0xff] }
 0x1f2   : > { %v3179_v12 = vld [vmem:[#allocation2 + $0x110] sm:$0xff]  ;;  %v2957_v36 = vadd.f32 %v2810_v31, %v2503_v59  ;;  %v8700_v40 = vpop.f32.mrb[134].mxu1  ;;  %v8765_v45 = vpop.f32.mrb[132].mxu0  ;;  %v5839_v49 = vpack.c.bf16 %v8088_v15, %v8087_v14  ;;  %v7994_v31 = vld [vmem:[%s9185_s7 + $0x181] sm:$0xff] }
 0x1f3   : > { %v3633_v42 = vadd.f32 %v8761_v60, %v3179_v12  ;;  %3023 = vst.msk [vmem:[#allocation2 + $0x130] sm:$0xff] %vm269_vm2, %v2959_v29  ;;  %v3177_v43 = vld [vmem:[#allocation2 + $0x100] sm:$0xff]  ;;  %v2960_v44 = vadd.f32 %v8700_v40, %v2506_v39  ;;  %v2813_v48 = vpop.f32.mrb[135].mxu1  ;;  %v3488_v61 = vpop.f32.mrb[133].mxu0  ;;  %v7992_v29 = vld [vmem:[%s9185_s7 + $0x169] sm:$0xff]  ;;  %v7993_v59 = vld [vmem:[%s9185_s7 + $0x171] sm:$0xff] }
 0x1f4   : > { %v3631_v53 = vadd.f32 %v3472_v25, %v3177_v43  ;;  %3021 = vst.msk [vmem:[#allocation2 + $0x120] sm:$0xff] %vm269_vm2, %v2957_v36  ;;  %v3180_v54 = vld [vmem:[#allocation2 + $0x118] sm:$0xff]  ;;  %v2958_v55 = vadd.f32 %v2813_v48, %v2504_v46  ;;  %v8766_v56 = vpop.f32.mrb[134].mxu0  ;;  %v8089_v12 = vld [vmem:[%s9185_s7 + $0x16a] sm:$0xff]  ;;  %v2511_v40 = vld [vmem:[#allocation2 + $0x160] sm:$0xff] }
 0x1f5   : > { %3697 = vst.msk [vmem:[#allocation2 + $0x110] sm:$0xff] %vm269_vm2, %v3633_v42  ;;  %v3634_v58 = vadd.f32 %v8762_v37, %v3180_v54  ;;  %3024 = vst.msk [vmem:[#allocation2 + $0x138] sm:$0xff] %vm269_vm2, %v2960_v44  ;;  %v3178_v63 = vld [vmem:[#allocation2 + $0x108] sm:$0xff]  ;;  %8942 = vmatmul.mubr.msk.bf16.gmra.mrb[240].mxu1 %vm495_vm1, %v5158_v34  ;;  %v3491_v7 = vpop.f32.mrb[135].mxu0  ;;  %v8090_v36 = vld [vmem:[%s9185_s7 + $0x172] sm:$0xff] }
 0x1f6   : > { %3695 = vst.msk [vmem:[#allocation2 + $0x100] sm:$0xff] %vm269_vm2, %v3631_v53  ;;  %v3632_v0 = vadd.f32 %v3475_v5, %v3178_v63  ;;  %3022 = vst.msk [vmem:[#allocation2 + $0x128] sm:$0xff] %vm269_vm2, %v2958_v55  ;;  %8945 = vmatprep.mubr.msk.bf16.mxu1 %vm495_vm1, %v5159_v41  ;;  %v5838_v5 = vpack.c.bf16 %v8086_v10, %v8085_v8  ;;  %v7995_v34 = vld [vmem:[%s9185_s7 + $0x189] sm:$0xff]  ;;  %v5162_v41 = vpack.c.bf16 %v7993_v59, %v7992_v29  ;;  %v2514_v48 = vld [vmem:[#allocation2 + $0x178] sm:$0xff] }
 0x1f7   : > { %3698 = vst.msk [vmem:[#allocation2 + $0x118] sm:$0xff] %vm269_vm2, %v3634_v58  ;;  %9008 = vmatmul.mubr.msk.bf16.gmra.mrb[240].mxu0 %vm495_vm1, %v5836_v52  ;;  %v8091_v42 = vld [vmem:[%s9185_s7 + $0x182] sm:$0xff]  ;;  %v8092_v43 = vld [vmem:[%s9185_s7 + $0x18a] sm:$0xff]  ;;  %v5163_v53 = vpack.c.bf16 %v7995_v34, %v7994_v31 }
 0x1f8   : > { %3696 = vst.msk [vmem:[#allocation2 + $0x108] sm:$0xff] %vm269_vm2, %v3632_v0  ;;  %v8703_v20 = vpop.f32.mrb[136].mxu1  ;;  %9011 = vmatprep.mubr.msk.bf16.mxu0 %vm495_vm1, %v5837_v57  ;;  %v2512_v57 = vld [vmem:[#allocation2 + $0x168] sm:$0xff]  ;;  %v5841_v6 = vpack.c.bf16 %v8092_v43, %v8091_v42  ;;  %v2517_v14 = vld [vmem:[#allocation2 + $0x190] sm:$0xff] }
 0x1f9   : > { %v2963_v32 = vadd.f32 %v8703_v20, %v2509_v50  ;;  %v2826_v60 = vpop.f32.mrb[137].mxu1  ;;  %v2521_v42 = vld [vmem:[#allocation2 + $0x1b0] sm:$0xff] }
 0x1fa   : > { %v3183_v19 = vld [vmem:[#allocation2 + $0x130] sm:$0xff]  ;;  %v2961_v22 = vadd.f32 %v2826_v60, %v2507_v11  ;;  %v8704_v25 = vpop.f32.mrb[138].mxu1  ;;  %v8769_v17 = vpop.f32.mrb[136].mxu0  ;;  %v7997_v11 = vld [vmem:[%s9185_s7 + $0x1a1] sm:$0xff] }
 0x1fb   : > { %v3637_v27 = vadd.f32 %v8765_v45, %v3183_v19  ;;  %3027 = vst.msk [vmem:[#allocation2 + $0x150] sm:$0xff] %vm269_vm2, %v2963_v32  ;;  %v3181_v35 = vld [vmem:[#allocation2 + $0x120] sm:$0xff]  ;;  %v2964_v37 = vadd.f32 %v8704_v25, %v2510_v23  ;;  %v2829_v62 = vpop.f32.mrb[139].mxu1  ;;  %v3504_v1 = vpop.f32.mrb[137].mxu0  ;;  %v7998_v60 = vld [vmem:[%s9180_s29 + $0x31] sm:$0xff] }
 0x1fc   : > { %v3635_v13 = vadd.f32 %v3488_v61, %v3181_v35  ;;  %3025 = vst.msk [vmem:[#allocation2 + $0x140] sm:$0xff] %vm269_vm2, %v2961_v22  ;;  %v3184_v16 = vld [vmem:[#allocation2 + $0x138] sm:$0xff]  ;;  %v2962_v21 = vadd.f32 %v2829_v62, %v2508_v47  ;;  %v8770_v30 = vpop.f32.mrb[138].mxu0  ;;  %v8094_v22 = vld [vmem:[%s9185_s7 + $0x1a2] sm:$0xff] }
 0x1fd   : > { %3701 = vst.msk [vmem:[#allocation2 + $0x130] sm:$0xff] %vm269_vm2, %v3637_v27  ;;  %v3638_v26 = vadd.f32 %v8766_v56, %v3184_v16  ;;  %3028 = vst.msk [vmem:[#allocation2 + $0x158] sm:$0xff] %vm269_vm2, %v2964_v37  ;;  %v3182_v28 = vld [vmem:[#allocation2 + $0x128] sm:$0xff]  ;;  %8946 = vmatmul.mubr.msk.bf16.gmra.mrb[244].mxu1 %vm495_vm1, %v5160_v24  ;;  %v3507_v38 = vpop.f32.mrb[139].mxu0  ;;  %v7996_v32 = vld [vmem:[%s9185_s7 + $0x199] sm:$0xff] }
 0x1fe   : > { %3699 = vst.msk [vmem:[#allocation2 + $0x120] sm:$0xff] %vm269_vm2, %v3635_v13  ;;  %v3636_v2 = vadd.f32 %v3491_v7, %v3182_v28  ;;  %3026 = vst.msk [vmem:[#allocation2 + $0x148] sm:$0xff] %vm269_vm2, %v2962_v21  ;;  %8949 = vmatprep.mubr.msk.bf16.mxu1 %vm495_vm1, %v5161_v9  ;;  %v5840_v7 = vpack.c.bf16 %v8090_v36, %v8089_v12  ;;  %v7999_v24 = vld [vmem:[%s9180_s29 + $0x39] sm:$0xff]  ;;  %v5164_v9 = vpack.c.bf16 %v7997_v11, %v7996_v32 }
 0x1ff   : > { %3702 = vst.msk [vmem:[#allocation2 + $0x138] sm:$0xff] %vm269_vm2, %v3638_v26  ;;  %9012 = vmatmul.mubr.msk.bf16.gmra.mrb[244].mxu0 %vm495_vm1, %v5838_v5  ;;  %v8093_v19 = vld [vmem:[%s9185_s7 + $0x19a] sm:$0xff]  ;;  %v8095_v27 = vld [vmem:[%s9180_s29 + $0x32] sm:$0xff]  ;;  %v5165_v13 = vpack.c.bf16 %v7999_v24, %v7998_v60 }
 0x200   : > { %3700 = vst.msk [vmem:[#allocation2 + $0x128] sm:$0xff] %vm269_vm2, %v3636_v2  ;;  %v8707_v33 = vpop.f32.mrb[140].mxu1  ;;  %9015 = vmatprep.mubr.msk.bf16.mxu0 %vm495_vm1, %v5839_v49  ;;  %v2515_v25 = vld [vmem:[#allocation2 + $0x180] sm:$0xff]  ;;  %v2518_v62 = vld [vmem:[#allocation2 + $0x198] sm:$0xff]  ;;  %v2516_v49 = vld [vmem:[#allocation2 + $0x188] sm:$0xff] }
 0x201   : > { %v2967_v39 = vadd.f32 %v8707_v33, %v2513_v51  ;;  %v2842_v45 = vpop.f32.mrb[141].mxu1  ;;  %v8096_v35 = vld [vmem:[%s9180_s29 + $0x3a] sm:$0xff] }
 0x202   : > { %v3187_v44 = vld [vmem:[#allocation2 + $0x150] sm:$0xff]  ;;  %v2965_v46 = vadd.f32 %v2842_v45, %v2511_v40  ;;  %v8708_v61 = vpop.f32.mrb[142].mxu1  ;;  %v8773_v52 = vpop.f32.mrb[140].mxu0  ;;  %v5843_v34 = vpack.c.bf16 %v8096_v35, %v8095_v27  ;;  %v8002_v45 = vld [vmem:[%s9180_s29 + $0x61] sm:$0xff] }
 0x203   : > { %v3641_v54 = vadd.f32 %v8769_v17, %v3187_v44  ;;  %3031 = vst.msk [vmem:[#allocation2 + $0x170] sm:$0xff] %vm269_vm2, %v2967_v39  ;;  %v3185_v55 = vld [vmem:[#allocation2 + $0x140] sm:$0xff]  ;;  %v2968_v56 = vadd.f32 %v8708_v61, %v2514_v48  ;;  %v2845_v58 = vpop.f32.mrb[143].mxu1  ;;  %v3520_v63 = vpop.f32.mrb[141].mxu0  ;;  %v8000_v39 = vld [vmem:[%s9180_s29 + $0x49] sm:$0xff]  ;;  %v8001_v40 = vld [vmem:[%s9180_s29 + $0x51] sm:$0xff] }
 0x204   : > { %v3639_v0 = vadd.f32 %v3504_v1, %v3185_v55  ;;  %3029 = vst.msk [vmem:[#allocation2 + $0x160] sm:$0xff] %vm269_vm2, %v2965_v46  ;;  %v3188_v3 = vld [vmem:[#allocation2 + $0x158] sm:$0xff]  ;;  %v2966_v4 = vadd.f32 %v2845_v58, %v2512_v57  ;;  %v8774_v18 = vpop.f32.mrb[142].mxu0  ;;  %v8097_v44 = vld [vmem:[%s9180_s29 + $0x4a] sm:$0xff]  ;;  %v2519_v61 = vld [vmem:[#allocation2 + $0x1a0] sm:$0xff] }
 0x205   : > { %3705 = vst.msk [vmem:[#allocation2 + $0x150] sm:$0xff] %vm269_vm2, %v3641_v54  ;;  %v3642_v50 = vadd.f32 %v8770_v30, %v3188_v3  ;;  %3032 = vst.msk [vmem:[#allocation2 + $0x178] sm:$0xff] %vm269_vm2, %v2968_v56  ;;  %v3186_v20 = vld [vmem:[#allocation2 + $0x148] sm:$0xff]  ;;  %8950 = vmatmul.mubr.msk.bf16.gmra.mrb[248].mxu1 %vm495_vm1, %v5162_v41  ;;  %v3523_v8 = vpop.f32.mrb[143].mxu0  ;;  %v8098_v46 = vld [vmem:[%s9180_s29 + $0x52] sm:$0xff] }
 0x206   : > { %3703 = vst.msk [vmem:[#allocation2 + $0x140] sm:$0xff] %vm269_vm2, %v3639_v0  ;;  %v3640_v10 = vadd.f32 %v3507_v38, %v3186_v20  ;;  %3030 = vst.msk [vmem:[#allocation2 + $0x168] sm:$0xff] %vm269_vm2, %v2966_v4  ;;  %8953 = vmatprep.mubr.msk.bf16.mxu1 %vm495_vm1, %v5163_v53  ;;  %v5842_v38 = vpack.c.bf16 %v8094_v22, %v8093_v19  ;;  %v8003_v41 = vld [vmem:[%s9180_s29 + $0x69] sm:$0xff]  ;;  %v5166_v53 = vpack.c.bf16 %v8001_v40, %v8000_v39  ;;  %v2522_v58 = vld [vmem:[#allocation2 + $0x1b8] sm:$0xff] }
 0x207   : > { %3706 = vst.msk [vmem:[#allocation2 + $0x158] sm:$0xff] %vm269_vm2, %v3642_v50  ;;  %9016 = vmatmul.mubr.msk.bf16.gmra.mrb[248].mxu0 %vm495_vm1, %v5840_v7  ;;  %v8099_v54 = vld [vmem:[%s9180_s29 + $0x62] sm:$0xff]  ;;  %v8100_v55 = vld [vmem:[%s9180_s29 + $0x6a] sm:$0xff]  ;;  %v5167_v0 = vpack.c.bf16 %v8003_v41, %v8002_v45 }
 0x208   : > { %3704 = vst.msk [vmem:[#allocation2 + $0x148] sm:$0xff] %vm269_vm2, %v3640_v10  ;;  %v8711_v15 = vpop.f32.mrb[144].mxu1  ;;  %9019 = vmatprep.mubr.msk.bf16.mxu0 %vm495_vm1, %v5841_v6  ;;  %v2520_v6 = vld [vmem:[#allocation2 + $0x1a8] sm:$0xff]  ;;  %v5845_v24 = vpack.c.bf16 %v8100_v55, %v8099_v54  ;;  %v2525_v27 = vld [vmem:[#allocation2 + $0x1d0] sm:$0xff] }
 0x209   : > { %v2971_v23 = vadd.f32 %v8711_v15, %v2517_v14  ;;  %v2858_v17 = vpop.f32.mrb[145].mxu1  ;;  %v2529_v54 = vld [vmem:[#allocation2 + $0x1f0] sm:$0xff] }
 0x20a   : > { %v3191_v37 = vld [vmem:[#allocation2 + $0x170] sm:$0xff]  ;;  %v2969_v47 = vadd.f32 %v2858_v17, %v2515_v25  ;;  %v8712_v1 = vpop.f32.mrb[146].mxu1  ;;  %v8777_v5 = vpop.f32.mrb[144].mxu0  ;;  %v8005_v25 = vld [vmem:[%s9180_s29 + $0x81] sm:$0xff] }
 0x20b   : > { %v3645_v16 = vadd.f32 %v8773_v52, %v3191_v37  ;;  %3035 = vst.msk [vmem:[#allocation2 + $0x190] sm:$0xff] %vm269_vm2, %v2971_v23  ;;  %v3189_v21 = vld [vmem:[#allocation2 + $0x160] sm:$0xff]  ;;  %v2972_v30 = vadd.f32 %v8712_v1, %v2518_v62  ;;  %v2861_v26 = vpop.f32.mrb[147].mxu1  ;;  %v3536_v28 = vpop.f32.mrb[145].mxu0  ;;  %v8006_v17 = vld [vmem:[%s9180_s29 + $0x91] sm:$0xff] }
 0x20c   : > { %v3643_v2 = vadd.f32 %v3520_v63, %v3189_v21  ;;  %3033 = vst.msk [vmem:[#allocation2 + $0x180] sm:$0xff] %vm269_vm2, %v2969_v47  ;;  %v3192_v29 = vld [vmem:[#allocation2 + $0x178] sm:$0xff]  ;;  %v2970_v59 = vadd.f32 %v2861_v26, %v2516_v49  ;;  %v8778_v31 = vpop.f32.mrb[146].mxu0  ;;  %v8102_v47 = vld [vmem:[%s9180_s29 + $0x82] sm:$0xff] }
 0x20d   : > { %3709 = vst.msk [vmem:[#allocation2 + $0x170] sm:$0xff] %vm269_vm2, %v3645_v16  ;;  %v3646_v51 = vadd.f32 %v8774_v18, %v3192_v29  ;;  %3036 = vst.msk [vmem:[#allocation2 + $0x198] sm:$0xff] %vm269_vm2, %v2972_v30  ;;  %v3190_v33 = vld [vmem:[#allocation2 + $0x168] sm:$0xff]  ;;  %8954 = vmatmul.mubr.msk.bf16.gmra.mrb[252].mxu1 %vm495_vm1, %v5164_v9  ;;  %v3539_v12 = vpop.f32.mrb[147].mxu0  ;;  %v8004_v23 = vld [vmem:[%s9180_s29 + $0x79] sm:$0xff] }
 0x20e   : > { %3707 = vst.msk [vmem:[#allocation2 + $0x160] sm:$0xff] %vm269_vm2, %v3643_v2  ;;  %v3644_v36 = vadd.f32 %v3523_v8, %v3190_v33  ;;  %3034 = vst.msk [vmem:[#allocation2 + $0x188] sm:$0xff] %vm269_vm2, %v2970_v59  ;;  %8957 = vmatprep.mubr.msk.bf16.mxu1 %vm495_vm1, %v5165_v13  ;;  %v5844_v8 = vpack.c.bf16 %v8098_v46, %v8097_v44  ;;  %v8007_v9 = vld [vmem:[%s9180_s29 + $0x99] sm:$0xff]  ;;  %v5168_v13 = vpack.c.bf16 %v8005_v25, %v8004_v23 }
 0x20f   : > { %3710 = vst.msk [vmem:[#allocation2 + $0x178] sm:$0xff] %vm269_vm2, %v3646_v51  ;;  %9020 = vmatmul.mubr.msk.bf16.gmra.mrb[252].mxu0 %vm495_vm1, %v5842_v38  ;;  %v8101_v37 = vld [vmem:[%s9180_s29 + $0x7a] sm:$0xff]  ;;  %v8103_v16 = vld [vmem:[%s9180_s29 + $0x92] sm:$0xff]  ;;  %v5169_v2 = vpack.c.bf16 %v8007_v9, %v8006_v17 }
 0x210   : > { %3708 = vst.msk [vmem:[#allocation2 + $0x168] sm:$0xff] %vm269_vm2, %v3644_v36  ;;  %v8715_v43 = vpop.f32.mrb[148].mxu1  ;;  %9023 = vmatprep.mubr.msk.bf16.mxu0 %vm495_vm1, %v5843_v34  ;;  %v2523_v1 = vld [vmem:[#allocation2 + $0x1c0] sm:$0xff]  ;;  %v2526_v26 = vld [vmem:[#allocation2 + $0x1d8] sm:$0xff]  ;;  %v2524_v34 = vld [vmem:[#allocation2 + $0x1c8] sm:$0xff] }
 0x211   : > { %v2975_v48 = vadd.f32 %v8715_v43, %v2521_v42  ;;  %v2874_v52 = vpop.f32.mrb[149].mxu1  ;;  %v8104_v21 = vld [vmem:[%s9180_s29 + $0x9a] sm:$0xff] }
 0x212   : > { %v3195_v56 = vld [vmem:[#allocation2 + $0x190] sm:$0xff]  ;;  %v2973_v57 = vadd.f32 %v2874_v52, %v2519_v61  ;;  %v8716_v63 = vpop.f32.mrb[150].mxu1  ;;  %v8781_v7 = vpop.f32.mrb[148].mxu0  ;;  %v5847_v41 = vpack.c.bf16 %v8104_v21, %v8103_v16  ;;  %v8010_v52 = vld [vmem:[%s9180_s29 + $0xc1] sm:$0xff] }
 0x213   : > { %v3649_v3 = vadd.f32 %v8777_v5, %v3195_v56  ;;  %3039 = vst.msk [vmem:[#allocation2 + $0x1b0] sm:$0xff] %vm269_vm2, %v2975_v48  ;;  %v3193_v4 = vld [vmem:[#allocation2 + $0x180] sm:$0xff]  ;;  %v2976_v18 = vadd.f32 %v8716_v63, %v2522_v58  ;;  %v2877_v50 = vpop.f32.mrb[151].mxu1  ;;  %v3552_v20 = vpop.f32.mrb[149].mxu0  ;;  %v8008_v48 = vld [vmem:[%s9180_s29 + $0xa9] sm:$0xff]  ;;  %v8009_v61 = vld [vmem:[%s9180_s29 + $0xb1] sm:$0xff] }
 0x214   : > { %v3647_v10 = vadd.f32 %v3536_v28, %v3193_v4  ;;  %3037 = vst.msk [vmem:[#allocation2 + $0x1a0] sm:$0xff] %vm269_vm2, %v2973_v57  ;;  %v3196_v32 = vld [vmem:[#allocation2 + $0x198] sm:$0xff]  ;;  %v2974_v11 = vadd.f32 %v2877_v50, %v2520_v6  ;;  %v8782_v60 = vpop.f32.mrb[150].mxu0  ;;  %v8105_v56 = vld [vmem:[%s9180_s29 + $0xaa] sm:$0xff]  ;;  %v2527_v63 = vld [vmem:[#allocation2 + $0x1e0] sm:$0xff] }
 0x215   : > { %3713 = vst.msk [vmem:[#allocation2 + $0x190] sm:$0xff] %vm269_vm2, %v3649_v3  ;;  %v3650_v14 = vadd.f32 %v8778_v31, %v3196_v32  ;;  %3040 = vst.msk [vmem:[#allocation2 + $0x1b8] sm:$0xff] %vm269_vm2, %v2976_v18  ;;  %v3194_v15 = vld [vmem:[#allocation2 + $0x188] sm:$0xff]  ;;  %8958 = vmatmul.mubr.msk.bf16.gmra.mrb[0].mxu1 %vm495_vm1, %v5166_v53  ;;  %v3555_v19 = vpop.f32.mrb[151].mxu0  ;;  %v8106_v57 = vld [vmem:[%s9180_s29 + $0xb2] sm:$0xff] }
 0x216   : > { %3711 = vst.msk [vmem:[#allocation2 + $0x180] sm:$0xff] %vm269_vm2, %v3647_v10  ;;  %v3648_v22 = vadd.f32 %v3539_v12, %v3194_v15  ;;  %3038 = vst.msk [vmem:[#allocation2 + $0x1a8] sm:$0xff] %vm269_vm2, %v2974_v11  ;;  %8961 = vmatprep.mubr.msk.bf16.mxu1 %vm495_vm1, %v5167_v0  ;;  %v5846_v12 = vpack.c.bf16 %v8102_v47, %v8101_v37  ;;  %v8011_v53 = vld [vmem:[%s9180_s29 + $0xc9] sm:$0xff]  ;;  %v5170_v0 = vpack.c.bf16 %v8009_v61, %v8008_v48  ;;  %v2530_v50 = vld [vmem:[#allocation2 + $0x1f8] sm:$0xff] }
 0x217   : > { %3714 = vst.msk [vmem:[#allocation2 + $0x198] sm:$0xff] %vm269_vm2, %v3650_v14  ;;  %9024 = vmatmul.mubr.msk.bf16.gmra.mrb[0].mxu0 %vm495_vm1, %v5844_v8  ;;  %v8107_v3 = vld [vmem:[%s9180_s29 + $0xc2] sm:$0xff]  ;;  %v8108_v4 = vld [vmem:[%s9180_s29 + $0xca] sm:$0xff]  ;;  %v5171_v10 = vpack.c.bf16 %v8011_v53, %v8010_v52 }
 0x218   : > { %3712 = vst.msk [vmem:[#allocation2 + $0x188] sm:$0xff] %vm269_vm2, %v3648_v22  ;;  %v8719_v35 = vpop.f32.mrb[152].mxu1  ;;  %9027 = vmatprep.mubr.msk.bf16.mxu0 %vm495_vm1, %v5845_v24  ;;  %v2528_v24 = vld [vmem:[#allocation2 + $0x1e8] sm:$0xff]  ;;  %v5849_v9 = vpack.c.bf16 %v8108_v4, %v8107_v3  ;;  %v3825_v16 = vld [vmem:[#allocation2 + $0x10] sm:$0xff] }
 0x219   : > { %v2979_v62 = vadd.f32 %v8719_v35, %v2525_v27  ;;  %v2890_v5 = vpop.f32.mrb[153].mxu1  ;;  %v3829_v3 = vld [vmem:[#allocation2 + $0x30] sm:$0xff] }
 0x21a   : > { %v3199_v30 = vld [vmem:[#allocation2 + $0x1b0] sm:$0xff]  ;;  %v2977_v49 = vadd.f32 %v2890_v5, %v2523_v1  ;;  %v8720_v28 = vpop.f32.mrb[154].mxu1  ;;  %v8785_v38 = vpop.f32.mrb[152].mxu0  ;;  %v8013_v1 = vld [vmem:[%s9180_s29 + $0xe1] sm:$0xff] }
 0x21b   : > { %v3653_v29 = vadd.f32 %v8781_v7, %v3199_v30  ;;  %3043 = vst.msk [vmem:[#allocation2 + $0x1d0] sm:$0xff] %vm269_vm2, %v2979_v62  ;;  %v3197_v59 = vld [vmem:[#allocation2 + $0x1a0] sm:$0xff]  ;;  %v2980_v31 = vadd.f32 %v8720_v28, %v2526_v26  ;;  %v2893_v51 = vpop.f32.mrb[155].mxu1  ;;  %v3568_v33 = vpop.f32.mrb[153].mxu0  ;;  %v8014_v5 = vld [vmem:[%s9180_s29 + $0xf1] sm:$0xff] }
 0x21c   : > { %v3651_v36 = vadd.f32 %v3552_v20, %v3197_v59  ;;  %3041 = vst.msk [vmem:[#allocation2 + $0x1c0] sm:$0xff] %vm269_vm2, %v2977_v49  ;;  %v3200_v39 = vld [vmem:[#allocation2 + $0x1b8] sm:$0xff]  ;;  %v2978_v40 = vadd.f32 %v2893_v51, %v2524_v34  ;;  %v8786_v45 = vpop.f32.mrb[154].mxu0  ;;  %v8110_v49 = vld [vmem:[%s9180_s29 + $0xe2] sm:$0xff] }
 0x21d   : > { %3717 = vst.msk [vmem:[#allocation2 + $0x1b0] sm:$0xff] %vm269_vm2, %v3653_v29  ;;  %v3654_v42 = vadd.f32 %v8782_v60, %v3200_v39  ;;  %3044 = vst.msk [vmem:[#allocation2 + $0x1d8] sm:$0xff] %vm269_vm2, %v2980_v31  ;;  %v3198_v43 = vld [vmem:[#allocation2 + $0x1a8] sm:$0xff]  ;;  %8962 = vmatmul.mubr.msk.bf16.gmra.mrb[4].mxu1 %vm495_vm1, %v5168_v13  ;;  %v3571_v44 = vpop.f32.mrb[155].mxu0  ;;  %v8012_v62 = vld [vmem:[%s9180_s29 + $0xd9] sm:$0xff] }
 0x21e   : > { %3715 = vst.msk [vmem:[#allocation2 + $0x1a0] sm:$0xff] %vm269_vm2, %v3651_v36  ;;  %v3652_v46 = vadd.f32 %v3555_v19, %v3198_v43  ;;  %3042 = vst.msk [vmem:[#allocation2 + $0x1c8] sm:$0xff] %vm269_vm2, %v2978_v40  ;;  %8965 = vmatprep.mubr.msk.bf16.mxu1 %vm495_vm1, %v5169_v2  ;;  %v5848_v19 = vpack.c.bf16 %v8106_v57, %v8105_v56  ;;  %v8015_v13 = vld [vmem:[%s9180_s29 + $0xf9] sm:$0xff]  ;;  %v5172_v2 = vpack.c.bf16 %v8013_v1, %v8012_v62 }
 0x21f   : > { %3718 = vst.msk [vmem:[#allocation2 + $0x1b8] sm:$0xff] %vm269_vm2, %v3654_v42  ;;  %9028 = vmatmul.mubr.msk.bf16.gmra.mrb[4].mxu0 %vm495_vm1, %v5846_v12  ;;  %v8109_v30 = vld [vmem:[%s9180_s29 + $0xda] sm:$0xff]  ;;  %v8111_v29 = vld [vmem:[%s9180_s29 + $0xf2] sm:$0xff]  ;;  %v5173_v36 = vpack.c.bf16 %v8015_v13, %v8014_v5 }
 0x220   : > { %3716 = vst.msk [vmem:[#allocation2 + $0x1a8] sm:$0xff] %vm269_vm2, %v3652_v46  ;;  %v8723_v55 = vpop.f32.mrb[156].mxu1  ;;  %9031 = vmatprep.mubr.msk.bf16.mxu0 %vm495_vm1, %v5847_v41  ;;  %v3823_v28 = vld [vmem:[#allocation2] sm:$0xff]  ;;  %v3826_v51 = vld [vmem:[#allocation2 + $0x18] sm:$0xff]  ;;  %v3824_v41 = vld [vmem:[#allocation2 + $0x8] sm:$0xff] }
 0x221   : > { %v2983_v58 = vadd.f32 %v8723_v55, %v2529_v54  ;;  %v2906_v7 = vpop.f32.mrb[157].mxu1  ;;  %v8112_v59 = vld [vmem:[%s9180_s29 + $0xfa] sm:$0xff] }
 0x222   : > { %v3203_v18 = vld [vmem:[#allocation2 + $0x1d0] sm:$0xff]  ;;  %v2981_v6 = vadd.f32 %v2906_v7, %v2527_v63  ;;  %v8724_v20 = vpop.f32.mrb[158].mxu1  ;;  %v8789_v8 = vpop.f32.mrb[156].mxu0  ;;  %v5851_v53 = vpack.c.bf16 %v8112_v59, %v8111_v29  ;;  %v8018_v7 = vld [vmem:[%s9180_s29 + $0x121] sm:$0xff] }
 0x223   : > { %v3657_v32 = vadd.f32 %v8785_v38, %v3203_v18  ;;  %3047 = vst.msk [vmem:[#allocation2 + $0x1f0] sm:$0xff] %vm269_vm2, %v2983_v58  ;;  %v3201_v11 = vld [vmem:[#allocation2 + $0x1c0] sm:$0xff]  ;;  %v2984_v60 = vadd.f32 %v8724_v20, %v2530_v50  ;;  %v2909_v14 = vpop.f32.mrb[159].mxu1  ;;  %v3584_v15 = vpop.f32.mrb[157].mxu0  ;;  %v8016_v58 = vld [vmem:[%s9180_s29 + $0x109] sm:$0xff]  ;;  %v8017_v63 = vld [vmem:[%s9180_s29 + $0x111] sm:$0xff] }
 0x224   : > { %v3655_v22 = vadd.f32 %v3568_v33, %v3201_v11  ;;  %3045 = vst.msk [vmem:[#allocation2 + $0x1e0] sm:$0xff] %vm269_vm2, %v2981_v6  ;;  %v3204_v23 = vld [vmem:[#allocation2 + $0x1d8] sm:$0xff]  ;;  %v2982_v25 = vadd.f32 %v2909_v14, %v2528_v24  ;;  %v8790_v17 = vpop.f32.mrb[158].mxu0  ;;  %v8113_v18 = vld [vmem:[%s9180_s29 + $0x10a] sm:$0xff]  ;;  %v3827_v20 = vld [vmem:[#allocation2 + $0x20] sm:$0xff] }
 0x225   : > { %3721 = vst.msk [vmem:[#allocation2 + $0x1d0] sm:$0xff] %vm269_vm2, %v3657_v32  ;;  %v3658_v27 = vadd.f32 %v8786_v45, %v3204_v23  ;;  %3048 = vst.msk [vmem:[#allocation2 + $0x1f8] sm:$0xff] %vm269_vm2, %v2984_v60  ;;  %v3202_v35 = vld [vmem:[#allocation2 + $0x1c8] sm:$0xff]  ;;  %8966 = vmatmul.mubr.msk.bf16.gmra.mrb[8].mxu1 %vm495_vm1, %v5170_v0  ;;  %v3587_v37 = vpop.f32.mrb[159].mxu0  ;;  %v8114_v6 = vld [vmem:[%s9180_s29 + $0x112] sm:$0xff] }
 0x226   : > { %3719 = vst.msk [vmem:[#allocation2 + $0x1c0] sm:$0xff] %vm269_vm2, %v3655_v22  ;;  %v3656_v47 = vadd.f32 %v3571_v44, %v3202_v35  ;;  %3046 = vst.msk [vmem:[#allocation2 + $0x1e8] sm:$0xff] %vm269_vm2, %v2982_v25  ;;  %8969 = vmatprep.mubr.msk.bf16.mxu1 %vm495_vm1, %v5171_v10  ;;  %v5850_v44 = vpack.c.bf16 %v8110_v49, %v8109_v30  ;;  %v8019_v0 = vld [vmem:[%s9180_s29 + $0x129] sm:$0xff]  ;;  %v5174_v10 = vpack.c.bf16 %v8017_v63, %v8016_v58  ;;  %v3830_v14 = vld [vmem:[#allocation2 + $0x38] sm:$0xff] }
 0x227   : > { %3722 = vst.msk [vmem:[#allocation2 + $0x1d8] sm:$0xff] %vm269_vm2, %v3658_v27  ;;  %9032 = vmatmul.mubr.msk.bf16.gmra.mrb[8].mxu0 %vm495_vm1, %v5848_v19  ;;  %v8115_v32 = vld [vmem:[%s9180_s29 + $0x122] sm:$0xff]  ;;  %v8116_v11 = vld [vmem:[%s9180_s29 + $0x12a] sm:$0xff]  ;;  %v5175_v22 = vpack.c.bf16 %v8019_v0, %v8018_v7 }
 0x228   : > { %3720 = vst.msk [vmem:[#allocation2 + $0x1c8] sm:$0xff] %vm269_vm2, %v3656_v47  ;;  %v8795_v21 = vpop.f32.mrb[160].mxu1  ;;  %9035 = vmatprep.mubr.msk.bf16.mxu0 %vm495_vm1, %v5849_v9  ;;  %v3828_v9 = vld [vmem:[#allocation2 + $0x28] sm:$0xff]  ;;  %v5853_v13 = vpack.c.bf16 %v8116_v11, %v8115_v32  ;;  %v3833_v29 = vld [vmem:[#allocation2 + $0x50] sm:$0xff] }
 0x229   : > { %v4279_v26 = vadd.f32 %v8795_v21, %v3825_v16  ;;  %v4022_v38 = vpop.f32.mrb[161].mxu1  ;;  %v3837_v32 = vld [vmem:[#allocation2 + $0x70] sm:$0xff] }
 0x22a   : > { %v3207_v31 = vld [vmem:[#allocation2 + $0x1f0] sm:$0xff]  ;;  %v4277_v34 = vadd.f32 %v4022_v38, %v3823_v28  ;;  %v8796_v33 = vpop.f32.mrb[162].mxu1  ;;  %v8861_v12 = vpop.f32.mrb[160].mxu0  ;;  %v8021_v28 = vld [vmem:[%s9180_s29 + $0x141] sm:$0xff] }
 0x22b   : > { %v3661_v39 = vadd.f32 %v8789_v8, %v3207_v31  ;;  %v3205_v40 = vld [vmem:[#allocation2 + $0x1e0] sm:$0xff]  ;;  %4343 = vst.msk [vmem:[#allocation2 + $0x10] sm:$0xff] %vm269_vm2, %v4279_v26  ;;  %v4280_v45 = vadd.f32 %v8796_v33, %v3826_v51  ;;  %v4025_v42 = vpop.f32.mrb[163].mxu1  ;;  %v4702_v43 = vpop.f32.mrb[161].mxu0  ;;  %v8022_v38 = vld [vmem:[%s9180_s29 + $0x151] sm:$0xff] }
 0x22c   : > { %v3659_v46 = vadd.f32 %v3584_v15, %v3205_v40  ;;  %v3208_v48 = vld [vmem:[#allocation2 + $0x1f8] sm:$0xff]  ;;  %4341 = vst.msk [vmem:[#allocation2] sm:$0xff] %vm269_vm2, %v4277_v34  ;;  %v4278_v61 = vadd.f32 %v4025_v42, %v3824_v41  ;;  %v8862_v52 = vpop.f32.mrb[162].mxu0  ;;  %v8118_v34 = vld [vmem:[%s9180_s29 + $0x142] sm:$0xff] }
 0x22d   : > { %3725 = vst.msk [vmem:[#allocation2 + $0x1f0] sm:$0xff] %vm269_vm2, %v3661_v39  ;;  %v3662_v54 = vadd.f32 %v8790_v17, %v3208_v48  ;;  %v3206_v55 = vld [vmem:[#allocation2 + $0x1e8] sm:$0xff]  ;;  %4344 = vst.msk [vmem:[#allocation2 + $0x18] sm:$0xff] %vm269_vm2, %v4280_v45  ;;  %8970 = vmatmul.mubr.msk.bf16.gmra.mrb[12].mxu1 %vm495_vm1, %v5172_v2  ;;  %v4705_v56 = vpop.f32.mrb[163].mxu0  ;;  %v8020_v26 = vld [vmem:[%s9180_s29 + $0x139] sm:$0xff] }
 0x22e   : > { %3723 = vst.msk [vmem:[#allocation2 + $0x1e0] sm:$0xff] %vm269_vm2, %v3659_v46  ;;  %v3660_v57 = vadd.f32 %v3587_v37, %v3206_v55  ;;  %4342 = vst.msk [vmem:[#allocation2 + $0x8] sm:$0xff] %vm269_vm2, %v4278_v61  ;;  %8973 = vmatprep.mubr.msk.bf16.mxu1 %vm495_vm1, %v5173_v36  ;;  %v5852_v37 = vpack.c.bf16 %v8114_v6, %v8113_v18  ;;  %v8023_v2 = vld [vmem:[%s9180_s29 + $0x159] sm:$0xff]  ;;  %v5176_v36 = vpack.c.bf16 %v8021_v28, %v8020_v26 }
 0x22f   : > { %3726 = vst.msk [vmem:[#allocation2 + $0x1f8] sm:$0xff] %vm269_vm2, %v3662_v54  ;;  %9036 = vmatmul.mubr.msk.bf16.gmra.mrb[12].mxu0 %vm495_vm1, %v5850_v44  ;;  %v8117_v31 = vld [vmem:[%s9180_s29 + $0x13a] sm:$0xff]  ;;  %v8119_v39 = vld [vmem:[%s9180_s29 + $0x152] sm:$0xff]  ;;  %v5177_v46 = vpack.c.bf16 %v8023_v2, %v8022_v38 }
 0x230   : > { %3724 = vst.msk [vmem:[#allocation2 + $0x1e8] sm:$0xff] %vm269_vm2, %v3660_v57  ;;  %v8799_v4 = vpop.f32.mrb[164].mxu1  ;;  %9039 = vmatprep.mubr.msk.bf16.mxu0 %vm495_vm1, %v5851_v53  ;;  %v3831_v33 = vld [vmem:[#allocation2 + $0x40] sm:$0xff]  ;;  %v3834_v42 = vld [vmem:[#allocation2 + $0x58] sm:$0xff]  ;;  %v3832_v53 = vld [vmem:[#allocation2 + $0x48] sm:$0xff] }
 0x231   : > { %v4283_v50 = vadd.f32 %v8799_v4, %v3829_v3  ;;  %v4038_v8 = vpop.f32.mrb[165].mxu1  ;;  %v8120_v40 = vld [vmem:[%s9180_s29 + $0x15a] sm:$0xff] }
 0x232   : > { %v4505_v60 = vld [vmem:[#allocation2 + $0x10] sm:$0xff]  ;;  %v4281_v24 = vadd.f32 %v4038_v8, %v3827_v20  ;;  %v8800_v15 = vpop.f32.mrb[166].mxu1  ;;  %v8865_v19 = vpop.f32.mrb[164].mxu0  ;;  %v5855_v0 = vpack.c.bf16 %v8120_v40, %v8119_v39  ;;  %v8026_v8 = vld [vmem:[%s9180_s29 + $0x181] sm:$0xff] }
 0x233   : > { %v4959_v23 = vadd.f32 %v8861_v12, %v4505_v60  ;;  %4347 = vst.msk [vmem:[#allocation2 + $0x30] sm:$0xff] %vm269_vm2, %v4283_v50  ;;  %v4503_v25 = vld [vmem:[#allocation2] sm:$0xff]  ;;  %v4284_v17 = vadd.f32 %v8800_v15, %v3830_v14  ;;  %v4041_v27 = vpop.f32.mrb[167].mxu1  ;;  %v4718_v35 = vpop.f32.mrb[165].mxu0  ;;  %v8024_v50 = vld [vmem:[%s9180_s29 + $0x169] sm:$0xff]  ;;  %v8025_v20 = vld [vmem:[%s9180_s29 + $0x171] sm:$0xff] }
 0x234   : > { %v4957_v47 = vadd.f32 %v4702_v43, %v4503_v25  ;;  %4345 = vst.msk [vmem:[#allocation2 + $0x20] sm:$0xff] %vm269_vm2, %v4281_v24  ;;  %v4506_v62 = vld [vmem:[#allocation2 + $0x18] sm:$0xff]  ;;  %v4282_v1 = vadd.f32 %v4041_v27, %v3828_v9  ;;  %v8866_v5 = vpop.f32.mrb[166].mxu0  ;;  %v8121_v60 = vld [vmem:[%s9180_s29 + $0x16a] sm:$0xff]  ;;  %v3835_v15 = vld [vmem:[#allocation2 + $0x60] sm:$0xff] }
 0x235   : > { %5023 = vst.msk [vmem:[#allocation2 + $0x10] sm:$0xff] %vm269_vm2, %v4959_v23  ;;  %v4960_v16 = vadd.f32 %v8862_v52, %v4506_v62  ;;  %4348 = vst.msk [vmem:[#allocation2 + $0x38] sm:$0xff] %vm269_vm2, %v4284_v17  ;;  %v4504_v21 = vld [vmem:[#allocation2 + $0x8] sm:$0xff]  ;;  %8974 = vmatmul.mubr.msk.bf16.gmra.mrb[16].mxu1 %vm495_vm1, %v5174_v10  ;;  %v4721_v30 = vpop.f32.mrb[167].mxu0  ;;  %v8122_v24 = vld [vmem:[%s9180_s29 + $0x172] sm:$0xff] }
 0x236   : > { %5021 = vst.msk [vmem:[#allocation2] sm:$0xff] %vm269_vm2, %v4957_v47  ;;  %v4958_v49 = vadd.f32 %v4705_v56, %v4504_v21  ;;  %4346 = vst.msk [vmem:[#allocation2 + $0x28] sm:$0xff] %vm269_vm2, %v4282_v1  ;;  %8977 = vmatprep.mubr.msk.bf16.mxu1 %vm495_vm1, %v5175_v22  ;;  %v5854_v56 = vpack.c.bf16 %v8118_v34, %v8117_v31  ;;  %v8027_v10 = vld [vmem:[%s9180_s29 + $0x189] sm:$0xff]  ;;  %v5178_v22 = vpack.c.bf16 %v8025_v20, %v8024_v50  ;;  %v3838_v27 = vld [vmem:[#allocation2 + $0x78] sm:$0xff] }
 0x237   : > { %5024 = vst.msk [vmem:[#allocation2 + $0x18] sm:$0xff] %vm269_vm2, %v4960_v16  ;;  %9040 = vmatmul.mubr.msk.bf16.gmra.mrb[16].mxu0 %vm495_vm1, %v5852_v37  ;;  %v8123_v23 = vld [vmem:[%s9180_s29 + $0x182] sm:$0xff]  ;;  %v8124_v25 = vld [vmem:[%s9180_s29 + $0x18a] sm:$0xff]  ;;  %v5179_v47 = vpack.c.bf16 %v8027_v10, %v8026_v8  ;;  %v8125_v39 = vld [vmem:[%s9180_s29 + $0x19a] sm:$0xff] }
 0x238   : > { %5022 = vst.msk [vmem:[#allocation2 + $0x8] sm:$0xff] %vm269_vm2, %v4958_v49  ;;  %v8803_v59 = vpop.f32.mrb[168].mxu1  ;;  %9043 = vmatprep.mubr.msk.bf16.mxu0 %vm495_vm1, %v5853_v13  ;;  %v3836_v13 = vld [vmem:[#allocation2 + $0x68] sm:$0xff]  ;;  %v5857_v2 = vpack.c.bf16 %v8124_v25, %v8123_v23  ;;  %v3845_v8 = vld [vmem:[#allocation2 + $0xb0] sm:$0xff] }
 0x239   : > { %v4287_v51 = vadd.f32 %v8803_v59, %v3833_v29  ;;  %v4054_v12 = vpop.f32.mrb[169].mxu1  ;;  %v8126_v40 = vld [vmem:[%s9180_s29 + $0x1a2] sm:$0xff] }
 0x23a   : > { %v4509_v45 = vld [vmem:[#allocation2 + $0x30] sm:$0xff]  ;;  %v4285_v41 = vadd.f32 %v4054_v12, %v3831_v33  ;;  %v8804_v43 = vpop.f32.mrb[170].mxu1  ;;  %v8869_v44 = vpop.f32.mrb[168].mxu0  ;;  %v8029_v33 = vld [vmem:[%s9180_s29 + $0x1a1] sm:$0xff] }
 0x23b   : > { %v4963_v48 = vadd.f32 %v8865_v19, %v4509_v45  ;;  %4351 = vst.msk [vmem:[#allocation2 + $0x50] sm:$0xff] %vm269_vm2, %v4287_v51  ;;  %v4507_v61 = vld [vmem:[#allocation2 + $0x20] sm:$0xff]  ;;  %v4288_v52 = vadd.f32 %v8804_v43, %v3834_v42  ;;  %v4057_v54 = vpop.f32.mrb[171].mxu1  ;;  %v4734_v55 = vpop.f32.mrb[169].mxu0  ;;  %v3841_v12 = vld [vmem:[#allocation2 + $0x90] sm:$0xff] }
 0x23c   : > { %v4961_v57 = vadd.f32 %v4718_v35, %v4507_v61  ;;  %4349 = vst.msk [vmem:[#allocation2 + $0x40] sm:$0xff] %vm269_vm2, %v4285_v41  ;;  %v4510_v58 = vld [vmem:[#allocation2 + $0x38] sm:$0xff]  ;;  %v4286_v63 = vadd.f32 %v4057_v54, %v3832_v53  ;;  %v8870_v7 = vpop.f32.mrb[170].mxu0  ;;  %v3839_v41 = vld [vmem:[#allocation2 + $0x80] sm:$0xff] }
 0x23d   : > { %5027 = vst.msk [vmem:[#allocation2 + $0x30] sm:$0xff] %vm269_vm2, %v4963_v48  ;;  %v4964_v3 = vadd.f32 %v8866_v5, %v4510_v58  ;;  %4352 = vst.msk [vmem:[#allocation2 + $0x58] sm:$0xff] %vm269_vm2, %v4288_v52  ;;  %v4508_v4 = vld [vmem:[#allocation2 + $0x28] sm:$0xff]  ;;  %8978 = vmatmul.mubr.msk.bf16.gmra.mrb[20].mxu1 %vm495_vm1, %v5176_v36  ;;  %v4737_v18 = vpop.f32.mrb[171].mxu0  ;;  %v8028_v51 = vld [vmem:[%s9180_s29 + $0x199] sm:$0xff] }
 0x23e   : > { %5025 = vst.msk [vmem:[#allocation2 + $0x20] sm:$0xff] %vm269_vm2, %v4961_v57  ;;  %v4962_v6 = vadd.f32 %v4721_v30, %v4508_v4  ;;  %4350 = vst.msk [vmem:[#allocation2 + $0x48] sm:$0xff] %vm269_vm2, %v4286_v63  ;;  %8981 = vmatprep.mubr.msk.bf16.mxu1 %vm495_vm1, %v5177_v46  ;;  %v5856_v30 = vpack.c.bf16 %v8122_v24, %v8121_v60  ;;  %v5180_v43 = vpack.c.bf16 %v8029_v33, %v8028_v51  ;;  %v3842_v48 = vld [vmem:[#allocation2 + $0x98] sm:$0xff] }
 0x23f   : > { %5028 = vst.msk [vmem:[#allocation2 + $0x38] sm:$0xff] %vm269_vm2, %v4964_v3  ;;  %9044 = vmatmul.mubr.msk.bf16.gmra.mrb[20].mxu0 %vm495_vm1, %v5854_v56  ;;  %v3840_v56 = vld [vmem:[#allocation2 + $0x88] sm:$0xff]  ;;  %v5858_v63 = vpack.c.bf16 %v8126_v40, %v8125_v39 }
 0x240   : > { %5026 = vst.msk [vmem:[#allocation2 + $0x28] sm:$0xff] %vm269_vm2, %v4962_v6  ;;  %v8807_v11 = vpop.f32.mrb[172].mxu1  ;;  %9047 = vmatprep.mubr.msk.bf16.mxu0 %vm495_vm1, %v5855_v0 }
 0x241   : > { %v4291_v14 = vadd.f32 %v8807_v11, %v3837_v32  ;;  %v4070_v19 = vpop.f32.mrb[173].mxu1  ;;  %v3843_v11 = vld [vmem:[#allocation2 + $0xa0] sm:$0xff] }
 0x242   : > { %v4513_v17 = vld [vmem:[#allocation2 + $0x50] sm:$0xff]  ;;  %v4289_v9 = vadd.f32 %v4070_v19, %v3835_v15  ;;  %v8808_v35 = vpop.f32.mrb[174].mxu1  ;;  %v8873_v37 = vpop.f32.mrb[172].mxu0  ;;  %v3846_v15 = vld [vmem:[#allocation2 + $0xb8] sm:$0xff] }
 0x243   : > { %v4967_v62 = vadd.f32 %v8869_v44, %v4513_v17  ;;  %4355 = vst.msk [vmem:[#allocation2 + $0x70] sm:$0xff] %vm269_vm2, %v4291_v14  ;;  %v4511_v1 = vld [vmem:[#allocation2 + $0x40] sm:$0xff]  ;;  %v4292_v5 = vadd.f32 %v8808_v35, %v3838_v27  ;;  %v4073_v16 = vpop.f32.mrb[175].mxu1  ;;  %v4750_v21 = vpop.f32.mrb[173].mxu0 }
 0x244   : > { %v4965_v49 = vadd.f32 %v4734_v55, %v4511_v1  ;;  %4353 = vst.msk [vmem:[#allocation2 + $0x60] sm:$0xff] %vm269_vm2, %v4289_v9  ;;  %v4514_v26 = vld [vmem:[#allocation2 + $0x58] sm:$0xff]  ;;  %v4290_v28 = vadd.f32 %v4073_v16, %v3836_v13  ;;  %v8874_v38 = vpop.f32.mrb[174].mxu0  ;;  %v3844_v9 = vld [vmem:[#allocation2 + $0xa8] sm:$0xff] }
 0x245   : > { %5031 = vst.msk [vmem:[#allocation2 + $0x50] sm:$0xff] %vm269_vm2, %v4967_v62  ;;  %v4968_v29 = vadd.f32 %v8870_v7, %v4514_v26  ;;  %4356 = vst.msk [vmem:[#allocation2 + $0x78] sm:$0xff] %vm269_vm2, %v4292_v5  ;;  %v4512_v59 = vld [vmem:[#allocation2 + $0x48] sm:$0xff]  ;;  %8982 = vmatmul.mubr.msk.bf16.gmra.mrb[24].mxu1 %vm495_vm1, %v5178_v22  ;;  %v4753_v31 = vpop.f32.mrb[175].mxu0 }
 0x246   : > { %5029 = vst.msk [vmem:[#allocation2 + $0x40] sm:$0xff] %vm269_vm2, %v4965_v49  ;;  %v4966_v34 = vadd.f32 %v4737_v18, %v4512_v59  ;;  %4354 = vst.msk [vmem:[#allocation2 + $0x68] sm:$0xff] %vm269_vm2, %v4290_v28  ;;  %8985 = vmatprep.mubr.msk.bf16.mxu1 %vm495_vm1, %v5179_v47  ;;  %v3847_v28 = vld [vmem:[#allocation2 + $0xc0] sm:$0xff]  ;;  %v3850_v59 = vld [vmem:[#allocation2 + $0xd8] sm:$0xff] }
 0x247   : > { %5032 = vst.msk [vmem:[#allocation2 + $0x58] sm:$0xff] %vm269_vm2, %v4968_v29  ;;  %9048 = vmatmul.mubr.msk.bf16.gmra.mrb[24].mxu0 %vm495_vm1, %v5856_v30  ;;  %v3849_v30 = vld [vmem:[#allocation2 + $0xd0] sm:$0xff] }
 0x248   : > { %5030 = vst.msk [vmem:[#allocation2 + $0x48] sm:$0xff] %vm269_vm2, %v4966_v34  ;;  %v8811_v36 = vpop.f32.mrb[176].mxu1  ;;  %9051 = vmatprep.mubr.msk.bf16.mxu0 %vm495_vm1, %v5857_v2 }
 0x249   : > { %v4295_v45 = vadd.f32 %v8811_v36, %v3841_v12  ;;  %v4086_v42 = vpop.f32.mrb[177].mxu1  ;;  %v3848_v36 = vld [vmem:[#allocation2 + $0xc8] sm:$0xff] }
 0x24a   : > { %v4517_v44 = vld [vmem:[#allocation2 + $0x70] sm:$0xff]  ;;  %v4293_v46 = vadd.f32 %v4086_v42, %v3839_v41  ;;  %v8812_v61 = vpop.f32.mrb[178].mxu1  ;;  %v8877_v52 = vpop.f32.mrb[176].mxu0 }
 0x24b   : > { %v4971_v53 = vadd.f32 %v8873_v37, %v4517_v44  ;;  %4359 = vst.msk [vmem:[#allocation2 + $0x90] sm:$0xff] %vm269_vm2, %v4295_v45  ;;  %v4515_v54 = vld [vmem:[#allocation2 + $0x60] sm:$0xff]  ;;  %v4296_v55 = vadd.f32 %v8812_v61, %v3842_v48  ;;  %v4089_v57 = vpop.f32.mrb[179].mxu1  ;;  %v4766_v58 = vpop.f32.mrb[177].mxu0 }
 0x24c   : > { %v4969_v7 = vadd.f32 %v4750_v21, %v4515_v54  ;;  %4357 = vst.msk [vmem:[#allocation2 + $0x80] sm:$0xff] %vm269_vm2, %v4293_v46  ;;  %v4518_v0 = vld [vmem:[#allocation2 + $0x78] sm:$0xff]  ;;  %v4294_v3 = vadd.f32 %v4089_v57, %v3840_v56  ;;  %v8878_v4 = vpop.f32.mrb[178].mxu0 }
 0x24d   : > { %5035 = vst.msk [vmem:[#allocation2 + $0x70] sm:$0xff] %vm269_vm2, %v4971_v53  ;;  %v4972_v18 = vadd.f32 %v8874_v38, %v4518_v0  ;;  %4360 = vst.msk [vmem:[#allocation2 + $0x98] sm:$0xff] %vm269_vm2, %v4296_v55  ;;  %v4516_v6 = vld [vmem:[#allocation2 + $0x68] sm:$0xff]  ;;  %8986 = vmatmul.mubr.msk.bf16.gmra.mrb[28].mxu1 %vm495_vm1, %v5180_v43  ;;  %v4769_v50 = vpop.f32.mrb[179].mxu0  ;;  %v3851_v55 = vld [vmem:[#allocation2 + $0xe0] sm:$0xff] }
 0x24e   : > { %5033 = vst.msk [vmem:[#allocation2 + $0x60] sm:$0xff] %vm269_vm2, %v4969_v7  ;;  %v4970_v20 = vadd.f32 %v4753_v31, %v4516_v6  ;;  %4358 = vst.msk [vmem:[#allocation2 + $0x88] sm:$0xff] %vm269_vm2, %v4294_v3  ;;  %v3852_v6 = vld [vmem:[#allocation2 + $0xe8] sm:$0xff] }
 0x24f   : > { %5036 = vst.msk [vmem:[#allocation2 + $0x78] sm:$0xff] %vm269_vm2, %v4972_v18  ;;  %9052 = vmatmul.mubr.msk.bf16.gmra.mrb[28].mxu0 %vm495_vm1, %v5858_v63  ;;  %v3854_v63 = vld [vmem:[#allocation2 + $0xf8] sm:$0xff] }
 0x250   : > { %5034 = vst.msk [vmem:[#allocation2 + $0x68] sm:$0xff] %vm269_vm2, %v4970_v20  ;;  %v8815_v10 = vpop.f32.mrb[180].mxu1 }
 0x251   : > { %v4299_v32 = vadd.f32 %v8815_v10, %v3845_v8  ;;  %v4102_v60 = vpop.f32.mrb[181].mxu1 }
 0x252   : > { %v4521_v24 = vld [vmem:[#allocation2 + $0x90] sm:$0xff]  ;;  %v4297_v14 = vadd.f32 %v4102_v60, %v3843_v11  ;;  %v8816_v19 = vpop.f32.mrb[182].mxu1  ;;  %v8881_v22 = vpop.f32.mrb[180].mxu0 }
 0x253   : > { %v4975_v23 = vadd.f32 %v8877_v52, %v4521_v24  ;;  %4363 = vst.msk [vmem:[#allocation2 + $0xb0] sm:$0xff] %vm269_vm2, %v4299_v32  ;;  %v4519_v25 = vld [vmem:[#allocation2 + $0x80] sm:$0xff]  ;;  %v4300_v17 = vadd.f32 %v8816_v19, %v3846_v15  ;;  %v4105_v27 = vpop.f32.mrb[183].mxu1  ;;  %v4782_v35 = vpop.f32.mrb[181].mxu0  ;;  %v3853_v52 = vld [vmem:[#allocation2 + $0xf0] sm:$0xff] }
 0x254   : > { %v4973_v37 = vadd.f32 %v4766_v58, %v4519_v25  ;;  %4361 = vst.msk [vmem:[#allocation2 + $0xa0] sm:$0xff] %vm269_vm2, %v4297_v14  ;;  %v4522_v47 = vld [vmem:[#allocation2 + $0x98] sm:$0xff]  ;;  %v4298_v62 = vadd.f32 %v4105_v27, %v3844_v9  ;;  %v8882_v1 = vpop.f32.mrb[182].mxu0  ;;  %v3857_v19 = vld [vmem:[#allocation2 + $0x110] sm:$0xff]  ;;  %v3855_v25 = vld [vmem:[#allocation2 + $0x100] sm:$0xff] }
 0x255   : > { %5039 = vst.msk [vmem:[#allocation2 + $0x90] sm:$0xff] %vm269_vm2, %v4975_v23  ;;  %v4976_v5 = vadd.f32 %v8878_v4, %v4522_v47  ;;  %4364 = vst.msk [vmem:[#allocation2 + $0xb8] sm:$0xff] %vm269_vm2, %v4300_v17  ;;  %v4520_v13 = vld [vmem:[#allocation2 + $0x88] sm:$0xff]  ;;  %v4785_v16 = vpop.f32.mrb[183].mxu0 }
 0x256   : > { %5037 = vst.msk [vmem:[#allocation2 + $0x80] sm:$0xff] %vm269_vm2, %v4973_v37  ;;  %v4974_v21 = vadd.f32 %v4769_v50, %v4520_v13  ;;  %4362 = vst.msk [vmem:[#allocation2 + $0xa8] sm:$0xff] %vm269_vm2, %v4298_v62  ;;  %v3856_v13 = vld [vmem:[#allocation2 + $0x108] sm:$0xff] }
 0x257   : > { %5040 = vst.msk [vmem:[#allocation2 + $0x98] sm:$0xff] %vm269_vm2, %v4976_v5 }
 0x258   : > { %5038 = vst.msk [vmem:[#allocation2 + $0x88] sm:$0xff] %vm269_vm2, %v4974_v21  ;;  %v8819_v49 = vpop.f32.mrb[184].mxu1 }
 0x259   : > { %v4303_v26 = vadd.f32 %v8819_v49, %v3849_v30  ;;  %v4118_v38 = vpop.f32.mrb[185].mxu1 }
 0x25a   : > { %v4525_v2 = vld [vmem:[#allocation2 + $0xb0] sm:$0xff]  ;;  %v4301_v29 = vadd.f32 %v4118_v38, %v3847_v28  ;;  %v8820_v31 = vpop.f32.mrb[186].mxu1  ;;  %v8885_v34 = vpop.f32.mrb[184].mxu0 }
 0x25b   : > { %v4979_v51 = vadd.f32 %v8881_v22, %v4525_v2  ;;  %4367 = vst.msk [vmem:[#allocation2 + $0xd0] sm:$0xff] %vm269_vm2, %v4303_v26  ;;  %v4523_v33 = vld [vmem:[#allocation2 + $0xa0] sm:$0xff]  ;;  %v4304_v12 = vadd.f32 %v8820_v31, %v3850_v59  ;;  %v4121_v39 = vpop.f32.mrb[187].mxu1  ;;  %v4798_v40 = vpop.f32.mrb[185].mxu0  ;;  %v3861_v31 = vld [vmem:[#allocation2 + $0x130] sm:$0xff] }
 0x25c   : > { %v4977_v45 = vadd.f32 %v4782_v35, %v4523_v33  ;;  %4365 = vst.msk [vmem:[#allocation2 + $0xc0] sm:$0xff] %vm269_vm2, %v4301_v29  ;;  %v4526_v41 = vld [vmem:[#allocation2 + $0xb8] sm:$0xff]  ;;  %v4302_v42 = vadd.f32 %v4121_v39, %v3848_v36  ;;  %v8886_v43 = vpop.f32.mrb[186].mxu0  ;;  %v3859_v33 = vld [vmem:[#allocation2 + $0x120] sm:$0xff] }
 0x25d   : > { %5043 = vst.msk [vmem:[#allocation2 + $0xb0] sm:$0xff] %vm269_vm2, %v4979_v51  ;;  %v4980_v44 = vadd.f32 %v8882_v1, %v4526_v41  ;;  %4368 = vst.msk [vmem:[#allocation2 + $0xd8] sm:$0xff] %vm269_vm2, %v4304_v12  ;;  %v4524_v46 = vld [vmem:[#allocation2 + $0xa8] sm:$0xff]  ;;  %v4801_v48 = vpop.f32.mrb[187].mxu0  ;;  %v3858_v35 = vld [vmem:[#allocation2 + $0x118] sm:$0xff] }
 0x25e   : > { %5041 = vst.msk [vmem:[#allocation2 + $0xa0] sm:$0xff] %vm269_vm2, %v4977_v45  ;;  %v4978_v61 = vadd.f32 %v4785_v16, %v4524_v46  ;;  %4366 = vst.msk [vmem:[#allocation2 + $0xc8] sm:$0xff] %vm269_vm2, %v4302_v42  ;;  %v3860_v46 = vld [vmem:[#allocation2 + $0x128] sm:$0xff] }
 0x25f   : > { %5044 = vst.msk [vmem:[#allocation2 + $0xb8] sm:$0xff] %vm269_vm2, %v4980_v44 }
 0x260   : > { %5042 = vst.msk [vmem:[#allocation2 + $0xa8] sm:$0xff] %vm269_vm2, %v4978_v61  ;;  %v8823_v53 = vpop.f32.mrb[188].mxu1 }
 0x261   : > { %v4307_v54 = vadd.f32 %v8823_v53, %v3853_v52  ;;  %v4134_v56 = vpop.f32.mrb[189].mxu1 }
 0x262   : > { %v4529_v57 = vld [vmem:[#allocation2 + $0xd0] sm:$0xff]  ;;  %v4305_v58 = vadd.f32 %v4134_v56, %v3851_v55  ;;  %v8824_v7 = vpop.f32.mrb[190].mxu1  ;;  %v8889_v0 = vpop.f32.mrb[188].mxu0 }
 0x263   : > { %v4983_v3 = vadd.f32 %v8885_v34, %v4529_v57  ;;  %4371 = vst.msk [vmem:[#allocation2 + $0xf0] sm:$0xff] %vm269_vm2, %v4307_v54  ;;  %v4527_v4 = vld [vmem:[#allocation2 + $0xc0] sm:$0xff]  ;;  %v4308_v18 = vadd.f32 %v8824_v7, %v3854_v63  ;;  %v4137_v50 = vpop.f32.mrb[191].mxu1  ;;  %v4814_v20 = vpop.f32.mrb[189].mxu0  ;;  %v3865_v7 = vld [vmem:[#allocation2 + $0x150] sm:$0xff] }
 0x264   : > { %v4981_v8 = vadd.f32 %v4798_v40, %v4527_v4  ;;  %4369 = vst.msk [vmem:[#allocation2 + $0xe0] sm:$0xff] %vm269_vm2, %v4305_v58  ;;  %v4530_v10 = vld [vmem:[#allocation2 + $0xd8] sm:$0xff]  ;;  %v4306_v32 = vadd.f32 %v4137_v50, %v3852_v6  ;;  %v8890_v11 = vpop.f32.mrb[190].mxu0  ;;  %v3863_v4 = vld [vmem:[#allocation2 + $0x140] sm:$0xff] }
 0x265   : > { %5047 = vst.msk [vmem:[#allocation2 + $0xd0] sm:$0xff] %vm269_vm2, %v4983_v3  ;;  %v4984_v60 = vadd.f32 %v8886_v43, %v4530_v10  ;;  %4372 = vst.msk [vmem:[#allocation2 + $0xf8] sm:$0xff] %vm269_vm2, %v4308_v18  ;;  %v4528_v24 = vld [vmem:[#allocation2 + $0xc8] sm:$0xff]  ;;  %v4817_v14 = vpop.f32.mrb[191].mxu0  ;;  %v3862_v40 = vld [vmem:[#allocation2 + $0x138] sm:$0xff] }
 0x266   : > { %5045 = vst.msk [vmem:[#allocation2 + $0xc0] sm:$0xff] %vm269_vm2, %v4981_v8  ;;  %v4982_v15 = vadd.f32 %v4801_v48, %v4528_v24  ;;  %4370 = vst.msk [vmem:[#allocation2 + $0xe8] sm:$0xff] %vm269_vm2, %v4306_v32  ;;  %v3864_v24 = vld [vmem:[#allocation2 + $0x148] sm:$0xff] }
 0x267   : > { %5048 = vst.msk [vmem:[#allocation2 + $0xd8] sm:$0xff] %vm269_vm2, %v4984_v60 }
 0x268   : > { %5046 = vst.msk [vmem:[#allocation2 + $0xc8] sm:$0xff] %vm269_vm2, %v4982_v15  ;;  %v8827_v22 = vpop.f32.mrb[192].mxu1 }
 0x269   : > { %v4311_v23 = vadd.f32 %v8827_v22, %v3857_v19  ;;  %v4150_v17 = vpop.f32.mrb[193].mxu1 }
 0x26a   : > { %v4533_v9 = vld [vmem:[#allocation2 + $0xf0] sm:$0xff]  ;;  %v4309_v27 = vadd.f32 %v4150_v17, %v3855_v25  ;;  %v8828_v37 = vpop.f32.mrb[194].mxu1  ;;  %v8893_v47 = vpop.f32.mrb[192].mxu0 }
 0x26b   : > { %v4987_v62 = vadd.f32 %v8889_v0, %v4533_v9  ;;  %4375 = vst.msk [vmem:[#allocation2 + $0x110] sm:$0xff] %vm269_vm2, %v4311_v23  ;;  %v4531_v1 = vld [vmem:[#allocation2 + $0xe0] sm:$0xff]  ;;  %v4312_v5 = vadd.f32 %v8828_v37, %v3858_v35  ;;  %v4153_v16 = vpop.f32.mrb[195].mxu1  ;;  %v4830_v21 = vpop.f32.mrb[193].mxu0  ;;  %v3869_v37 = vld [vmem:[#allocation2 + $0x170] sm:$0xff] }
 0x26c   : > { %v4985_v30 = vadd.f32 %v4814_v20, %v4531_v1  ;;  %4373 = vst.msk [vmem:[#allocation2 + $0x100] sm:$0xff] %vm269_vm2, %v4309_v27  ;;  %v4534_v49 = vld [vmem:[#allocation2 + $0xf8] sm:$0xff]  ;;  %v4310_v26 = vadd.f32 %v4153_v16, %v3856_v13  ;;  %v8894_v28 = vpop.f32.mrb[194].mxu0  ;;  %v3867_v1 = vld [vmem:[#allocation2 + $0x160] sm:$0xff] }
 0x26d   : > { %5051 = vst.msk [vmem:[#allocation2 + $0xf0] sm:$0xff] %vm269_vm2, %v4987_v62  ;;  %v4988_v38 = vadd.f32 %v8890_v11, %v4534_v49  ;;  %4376 = vst.msk [vmem:[#allocation2 + $0x118] sm:$0xff] %vm269_vm2, %v4312_v5  ;;  %v4532_v2 = vld [vmem:[#allocation2 + $0xe8] sm:$0xff]  ;;  %v4833_v29 = vpop.f32.mrb[195].mxu0  ;;  %v3866_v20 = vld [vmem:[#allocation2 + $0x158] sm:$0xff] }
 0x26e   : > { %5049 = vst.msk [vmem:[#allocation2 + $0xe0] sm:$0xff] %vm269_vm2, %v4985_v30  ;;  %v4986_v59 = vadd.f32 %v4817_v14, %v4532_v2  ;;  %4374 = vst.msk [vmem:[#allocation2 + $0x108] sm:$0xff] %vm269_vm2, %v4310_v26  ;;  %v3868_v2 = vld [vmem:[#allocation2 + $0x168] sm:$0xff] }
 0x26f   : > { %5052 = vst.msk [vmem:[#allocation2 + $0xf8] sm:$0xff] %vm269_vm2, %v4988_v38 }
 0x270   : > { %5050 = vst.msk [vmem:[#allocation2 + $0xe8] sm:$0xff] %vm269_vm2, %v4986_v59  ;;  %v8831_v34 = vpop.f32.mrb[196].mxu1 }
 0x271   : > { %v4315_v51 = vadd.f32 %v8831_v34, %v3861_v31  ;;  %v4166_v12 = vpop.f32.mrb[197].mxu1 }
 0x272   : > { %v4537_v36 = vld [vmem:[#allocation2 + $0x110] sm:$0xff]  ;;  %v4313_v39 = vadd.f32 %v4166_v12, %v3859_v33  ;;  %v8832_v45 = vpop.f32.mrb[198].mxu1  ;;  %v8897_v41 = vpop.f32.mrb[196].mxu0 }
 0x273   : > { %v4991_v42 = vadd.f32 %v8893_v47, %v4537_v36  ;;  %4379 = vst.msk [vmem:[#allocation2 + $0x130] sm:$0xff] %vm269_vm2, %v4315_v51  ;;  %v4535_v43 = vld [vmem:[#allocation2 + $0x100] sm:$0xff]  ;;  %v4316_v44 = vadd.f32 %v8832_v45, %v3862_v40  ;;  %v4169_v48 = vpop.f32.mrb[199].mxu1  ;;  %v4846_v61 = vpop.f32.mrb[197].mxu0  ;;  %v3873_v45 = vld [vmem:[#allocation2 + $0x190] sm:$0xff] }
 0x274   : > { %v4989_v52 = vadd.f32 %v4830_v21, %v4535_v43  ;;  %4377 = vst.msk [vmem:[#allocation2 + $0x120] sm:$0xff] %vm269_vm2, %v4313_v39  ;;  %v4538_v53 = vld [vmem:[#allocation2 + $0x118] sm:$0xff]  ;;  %v4314_v54 = vadd.f32 %v4169_v48, %v3860_v46  ;;  %v8898_v55 = vpop.f32.mrb[198].mxu0  ;;  %v3871_v43 = vld [vmem:[#allocation2 + $0x180] sm:$0xff] }
 0x275   : > { %5055 = vst.msk [vmem:[#allocation2 + $0x110] sm:$0xff] %vm269_vm2, %v4991_v42  ;;  %v4992_v56 = vadd.f32 %v8894_v28, %v4538_v53  ;;  %4380 = vst.msk [vmem:[#allocation2 + $0x138] sm:$0xff] %vm269_vm2, %v4316_v44  ;;  %v4536_v57 = vld [vmem:[#allocation2 + $0x108] sm:$0xff]  ;;  %v4849_v58 = vpop.f32.mrb[199].mxu0  ;;  %v3870_v21 = vld [vmem:[#allocation2 + $0x178] sm:$0xff] }
 0x276   : > { %5053 = vst.msk [vmem:[#allocation2 + $0x100] sm:$0xff] %vm269_vm2, %v4989_v52  ;;  %v4990_v63 = vadd.f32 %v4833_v29, %v4536_v57  ;;  %4378 = vst.msk [vmem:[#allocation2 + $0x128] sm:$0xff] %vm269_vm2, %v4314_v54  ;;  %v3872_v57 = vld [vmem:[#allocation2 + $0x188] sm:$0xff] }
 0x277   : > { %5056 = vst.msk [vmem:[#allocation2 + $0x118] sm:$0xff] %vm269_vm2, %v4992_v56 }
 0x278   : > { %5054 = vst.msk [vmem:[#allocation2 + $0x108] sm:$0xff] %vm269_vm2, %v4990_v63  ;;  %v8835_v0 = vpop.f32.mrb[200].mxu1 }
 0x279   : > { %v4319_v3 = vadd.f32 %v8835_v0, %v3865_v7  ;;  %v4182_v18 = vpop.f32.mrb[201].mxu1 }
 0x27a   : > { %v4541_v6 = vld [vmem:[#allocation2 + $0x130] sm:$0xff]  ;;  %v4317_v50 = vadd.f32 %v4182_v18, %v3863_v4  ;;  %v8836_v8 = vpop.f32.mrb[202].mxu1  ;;  %v8901_v10 = vpop.f32.mrb[200].mxu0 }
 0x27b   : > { %v4995_v32 = vadd.f32 %v8897_v41, %v4541_v6  ;;  %4383 = vst.msk [vmem:[#allocation2 + $0x150] sm:$0xff] %vm269_vm2, %v4319_v3  ;;  %v4539_v11 = vld [vmem:[#allocation2 + $0x120] sm:$0xff]  ;;  %v4320_v60 = vadd.f32 %v8836_v8, %v3866_v20  ;;  %v4185_v14 = vpop.f32.mrb[203].mxu1  ;;  %v4862_v15 = vpop.f32.mrb[201].mxu0  ;;  %v3877_v8 = vld [vmem:[#allocation2 + $0x1b0] sm:$0xff] }
 0x27c   : > { %v4993_v19 = vadd.f32 %v4846_v61, %v4539_v11  ;;  %4381 = vst.msk [vmem:[#allocation2 + $0x140] sm:$0xff] %vm269_vm2, %v4317_v50  ;;  %v4542_v22 = vld [vmem:[#allocation2 + $0x138] sm:$0xff]  ;;  %v4318_v23 = vadd.f32 %v4185_v14, %v3864_v24  ;;  %v8902_v25 = vpop.f32.mrb[202].mxu0  ;;  %v3875_v11 = vld [vmem:[#allocation2 + $0x1a0] sm:$0xff] }
 0x27d   : > { %5059 = vst.msk [vmem:[#allocation2 + $0x130] sm:$0xff] %vm269_vm2, %v4995_v32  ;;  %v4996_v17 = vadd.f32 %v8898_v55, %v4542_v22  ;;  %4384 = vst.msk [vmem:[#allocation2 + $0x158] sm:$0xff] %vm269_vm2, %v4320_v60  ;;  %v4540_v9 = vld [vmem:[#allocation2 + $0x128] sm:$0xff]  ;;  %v4865_v27 = vpop.f32.mrb[203].mxu0  ;;  %v3874_v61 = vld [vmem:[#allocation2 + $0x198] sm:$0xff] }
 0x27e   : > { %5057 = vst.msk [vmem:[#allocation2 + $0x120] sm:$0xff] %vm269_vm2, %v4993_v19  ;;  %v4994_v35 = vadd.f32 %v4849_v58, %v4540_v9  ;;  %4382 = vst.msk [vmem:[#allocation2 + $0x148] sm:$0xff] %vm269_vm2, %v4318_v23  ;;  %v3876_v9 = vld [vmem:[#allocation2 + $0x1a8] sm:$0xff] }
 0x27f   : > { %5060 = vst.msk [vmem:[#allocation2 + $0x138] sm:$0xff] %vm269_vm2, %v4996_v17 }
 0x280   : > { %5058 = vst.msk [vmem:[#allocation2 + $0x128] sm:$0xff] %vm269_vm2, %v4994_v35  ;;  %v8839_v47 = vpop.f32.mrb[204].mxu1 }
 0x281   : > { %v4323_v62 = vadd.f32 %v8839_v47, %v3869_v37  ;;  %v4198_v5 = vpop.f32.mrb[205].mxu1 }
 0x282   : > { %v4545_v13 = vld [vmem:[#allocation2 + $0x150] sm:$0xff]  ;;  %v4321_v16 = vadd.f32 %v4198_v5, %v3867_v1  ;;  %v8840_v30 = vpop.f32.mrb[206].mxu1  ;;  %v8905_v49 = vpop.f32.mrb[204].mxu0 }
 0x283   : > { %v4999_v26 = vadd.f32 %v8901_v10, %v4545_v13  ;;  %4387 = vst.msk [vmem:[#allocation2 + $0x170] sm:$0xff] %vm269_vm2, %v4323_v62  ;;  %v4543_v28 = vld [vmem:[#allocation2 + $0x140] sm:$0xff]  ;;  %v4324_v38 = vadd.f32 %v8840_v30, %v3870_v21  ;;  %v4201_v29 = vpop.f32.mrb[207].mxu1  ;;  %v4878_v59 = vpop.f32.mrb[205].mxu0  ;;  %v3881_v30 = vld [vmem:[#allocation2 + $0x1d0] sm:$0xff] }
 0x284   : > { %v4997_v31 = vadd.f32 %v4862_v15, %v4543_v28  ;;  %4385 = vst.msk [vmem:[#allocation2 + $0x160] sm:$0xff] %vm269_vm2, %v4321_v16  ;;  %v4546_v34 = vld [vmem:[#allocation2 + $0x158] sm:$0xff]  ;;  %v4322_v51 = vadd.f32 %v4201_v29, %v3868_v2  ;;  %v8906_v33 = vpop.f32.mrb[206].mxu0  ;;  %v3879_v28 = vld [vmem:[#allocation2 + $0x1c0] sm:$0xff] }
 0x285   : > { %5063 = vst.msk [vmem:[#allocation2 + $0x150] sm:$0xff] %vm269_vm2, %v4999_v26  ;;  %v5000_v12 = vadd.f32 %v8902_v25, %v4546_v34  ;;  %4388 = vst.msk [vmem:[#allocation2 + $0x178] sm:$0xff] %vm269_vm2, %v4324_v38  ;;  %v4544_v36 = vld [vmem:[#allocation2 + $0x148] sm:$0xff]  ;;  %v4881_v39 = vpop.f32.mrb[207].mxu0  ;;  %v3878_v15 = vld [vmem:[#allocation2 + $0x1b8] sm:$0xff] }
 0x286   : > { %5061 = vst.msk [vmem:[#allocation2 + $0x140] sm:$0xff] %vm269_vm2, %v4997_v31  ;;  %v4998_v40 = vadd.f32 %v4865_v27, %v4544_v36  ;;  %4386 = vst.msk [vmem:[#allocation2 + $0x168] sm:$0xff] %vm269_vm2, %v4322_v51  ;;  %v3880_v36 = vld [vmem:[#allocation2 + $0x1c8] sm:$0xff] }
 0x287   : > { %5064 = vst.msk [vmem:[#allocation2 + $0x158] sm:$0xff] %vm269_vm2, %v5000_v12 }
 0x288   : > { %5062 = vst.msk [vmem:[#allocation2 + $0x148] sm:$0xff] %vm269_vm2, %v4998_v40  ;;  %v8843_v41 = vpop.f32.mrb[208].mxu1 }
 0x289   : > { %v4327_v42 = vadd.f32 %v8843_v41, %v3873_v45  ;;  %v4214_v44 = vpop.f32.mrb[209].mxu1 }
 0x28a   : > { %v4549_v46 = vld [vmem:[#allocation2 + $0x170] sm:$0xff]  ;;  %v4325_v48 = vadd.f32 %v4214_v44, %v3871_v43  ;;  %v8844_v52 = vpop.f32.mrb[210].mxu1  ;;  %v8909_v53 = vpop.f32.mrb[208].mxu0 }
 0x28b   : > { %v5003_v54 = vadd.f32 %v8905_v49, %v4549_v46  ;;  %4391 = vst.msk [vmem:[#allocation2 + $0x190] sm:$0xff] %vm269_vm2, %v4327_v42  ;;  %v4547_v55 = vld [vmem:[#allocation2 + $0x160] sm:$0xff]  ;;  %v4328_v56 = vadd.f32 %v8844_v52, %v3874_v61  ;;  %v4217_v58 = vpop.f32.mrb[211].mxu1  ;;  %v4894_v63 = vpop.f32.mrb[209].mxu0  ;;  %v3885_v52 = vld [vmem:[#allocation2 + $0x1f0] sm:$0xff] }
 0x28c   : > { %v5001_v7 = vadd.f32 %v4878_v59, %v4547_v55  ;;  %4389 = vst.msk [vmem:[#allocation2 + $0x180] sm:$0xff] %vm269_vm2, %v4325_v48  ;;  %v4550_v0 = vld [vmem:[#allocation2 + $0x178] sm:$0xff]  ;;  %v4326_v3 = vadd.f32 %v4217_v58, %v3872_v57  ;;  %v8910_v4 = vpop.f32.mrb[210].mxu0  ;;  %v3883_v55 = vld [vmem:[#allocation2 + $0x1e0] sm:$0xff] }
 0x28d   : > { %5067 = vst.msk [vmem:[#allocation2 + $0x170] sm:$0xff] %vm269_vm2, %v5003_v54  ;;  %v5004_v18 = vadd.f32 %v8906_v33, %v4550_v0  ;;  %4392 = vst.msk [vmem:[#allocation2 + $0x198] sm:$0xff] %vm269_vm2, %v4328_v56  ;;  %v4548_v6 = vld [vmem:[#allocation2 + $0x168] sm:$0xff]  ;;  %v4897_v50 = vpop.f32.mrb[211].mxu0  ;;  %v3882_v59 = vld [vmem:[#allocation2 + $0x1d8] sm:$0xff] }
 0x28e   : > { %5065 = vst.msk [vmem:[#allocation2 + $0x160] sm:$0xff] %vm269_vm2, %v5001_v7  ;;  %v5002_v20 = vadd.f32 %v4881_v39, %v4548_v6  ;;  %4390 = vst.msk [vmem:[#allocation2 + $0x188] sm:$0xff] %vm269_vm2, %v4326_v3  ;;  %v3884_v6 = vld [vmem:[#allocation2 + $0x1e8] sm:$0xff] }
 0x28f   : > { %5068 = vst.msk [vmem:[#allocation2 + $0x178] sm:$0xff] %vm269_vm2, %v5004_v18 }
 0x290   : > { %5066 = vst.msk [vmem:[#allocation2 + $0x168] sm:$0xff] %vm269_vm2, %v5002_v20  ;;  %v8847_v10 = vpop.f32.mrb[212].mxu1 }
 0x291   : > { %v4331_v32 = vadd.f32 %v8847_v10, %v3877_v8  ;;  %v4230_v60 = vpop.f32.mrb[213].mxu1 }
 0x292   : > { %v4553_v24 = vld [vmem:[#allocation2 + $0x190] sm:$0xff]  ;;  %v4329_v14 = vadd.f32 %v4230_v60, %v3875_v11  ;;  %v8848_v19 = vpop.f32.mrb[214].mxu1  ;;  %v8913_v22 = vpop.f32.mrb[212].mxu0 }
 0x293   : > { %v5007_v23 = vadd.f32 %v8909_v53, %v4553_v24  ;;  %4395 = vst.msk [vmem:[#allocation2 + $0x1b0] sm:$0xff] %vm269_vm2, %v4331_v32  ;;  %v4551_v25 = vld [vmem:[#allocation2 + $0x180] sm:$0xff]  ;;  %v4332_v17 = vadd.f32 %v8848_v19, %v3878_v15  ;;  %v4233_v27 = vpop.f32.mrb[215].mxu1  ;;  %v4910_v35 = vpop.f32.mrb[213].mxu0  ;;  %v5183_v19 = vld [vmem:[#allocation2 + $0x10] sm:$0xff] }
 0x294   : > { %v5005_v37 = vadd.f32 %v4894_v63, %v4551_v25  ;;  %4393 = vst.msk [vmem:[#allocation2 + $0x1a0] sm:$0xff] %vm269_vm2, %v4329_v14  ;;  %v4554_v47 = vld [vmem:[#allocation2 + $0x198] sm:$0xff]  ;;  %v4330_v62 = vadd.f32 %v4233_v27, %v3876_v9  ;;  %v8914_v1 = vpop.f32.mrb[214].mxu0  ;;  %v5181_v25 = vld [vmem:[#allocation2] sm:$0xff] }
 0x295   : > { %5071 = vst.msk [vmem:[#allocation2 + $0x190] sm:$0xff] %vm269_vm2, %v5007_v23  ;;  %v5008_v5 = vadd.f32 %v8910_v4, %v4554_v47  ;;  %4396 = vst.msk [vmem:[#allocation2 + $0x1b8] sm:$0xff] %vm269_vm2, %v4332_v17  ;;  %v4552_v13 = vld [vmem:[#allocation2 + $0x188] sm:$0xff]  ;;  %v4913_v16 = vpop.f32.mrb[215].mxu0  ;;  %v3886_v63 = vld [vmem:[#allocation2 + $0x1f8] sm:$0xff] }
 0x296   : > { %5069 = vst.msk [vmem:[#allocation2 + $0x180] sm:$0xff] %vm269_vm2, %v5005_v37  ;;  %v5006_v21 = vadd.f32 %v4897_v50, %v4552_v13  ;;  %4394 = vst.msk [vmem:[#allocation2 + $0x1a8] sm:$0xff] %vm269_vm2, %v4330_v62  ;;  %v5182_v13 = vld [vmem:[#allocation2 + $0x8] sm:$0xff] }
 0x297   : > { %5072 = vst.msk [vmem:[#allocation2 + $0x198] sm:$0xff] %vm269_vm2, %v5008_v5 }
 0x298   : > { %5070 = vst.msk [vmem:[#allocation2 + $0x188] sm:$0xff] %vm269_vm2, %v5006_v21  ;;  %v8851_v49 = vpop.f32.mrb[216].mxu1 }
 0x299   : > { %v4335_v26 = vadd.f32 %v8851_v49, %v3881_v30  ;;  %v4246_v38 = vpop.f32.mrb[217].mxu1 }
 0x29a   : > { %v4557_v2 = vld [vmem:[#allocation2 + $0x1b0] sm:$0xff]  ;;  %v4333_v29 = vadd.f32 %v4246_v38, %v3879_v28  ;;  %v8852_v31 = vpop.f32.mrb[218].mxu1  ;;  %v8917_v34 = vpop.f32.mrb[216].mxu0 }
 0x29b   : > { %v5011_v51 = vadd.f32 %v8913_v22, %v4557_v2  ;;  %4399 = vst.msk [vmem:[#allocation2 + $0x1d0] sm:$0xff] %vm269_vm2, %v4335_v26  ;;  %v4555_v33 = vld [vmem:[#allocation2 + $0x1a0] sm:$0xff]  ;;  %v4336_v12 = vadd.f32 %v8852_v31, %v3882_v59  ;;  %v4249_v39 = vpop.f32.mrb[219].mxu1  ;;  %v4926_v40 = vpop.f32.mrb[217].mxu0  ;;  %v5187_v31 = vld [vmem:[#allocation2 + $0x30] sm:$0xff] }
 0x29c   : > { %v5009_v45 = vadd.f32 %v4910_v35, %v4555_v33  ;;  %4397 = vst.msk [vmem:[#allocation2 + $0x1c0] sm:$0xff] %vm269_vm2, %v4333_v29  ;;  %v4558_v41 = vld [vmem:[#allocation2 + $0x1b8] sm:$0xff]  ;;  %v4334_v42 = vadd.f32 %v4249_v39, %v3880_v36  ;;  %v8918_v43 = vpop.f32.mrb[218].mxu0  ;;  %v5185_v33 = vld [vmem:[#allocation2 + $0x20] sm:$0xff] }
 0x29d   : > { %5075 = vst.msk [vmem:[#allocation2 + $0x1b0] sm:$0xff] %vm269_vm2, %v5011_v51  ;;  %v5012_v44 = vadd.f32 %v8914_v1, %v4558_v41  ;;  %4400 = vst.msk [vmem:[#allocation2 + $0x1d8] sm:$0xff] %vm269_vm2, %v4336_v12  ;;  %v4556_v46 = vld [vmem:[#allocation2 + $0x1a8] sm:$0xff]  ;;  %v4929_v48 = vpop.f32.mrb[219].mxu0  ;;  %v5184_v35 = vld [vmem:[#allocation2 + $0x18] sm:$0xff] }
 0x29e   : > { %5073 = vst.msk [vmem:[#allocation2 + $0x1a0] sm:$0xff] %vm269_vm2, %v5009_v45  ;;  %v5010_v61 = vadd.f32 %v4913_v16, %v4556_v46  ;;  %4398 = vst.msk [vmem:[#allocation2 + $0x1c8] sm:$0xff] %vm269_vm2, %v4334_v42  ;;  %v5186_v46 = vld [vmem:[#allocation2 + $0x28] sm:$0xff] }
 0x29f   : > { %5076 = vst.msk [vmem:[#allocation2 + $0x1b8] sm:$0xff] %vm269_vm2, %v5012_v44 }
 0x2a0   : > { %5074 = vst.msk [vmem:[#allocation2 + $0x1a8] sm:$0xff] %vm269_vm2, %v5010_v61  ;;  %v8855_v53 = vpop.f32.mrb[220].mxu1 }
 0x2a1   : > { %v4339_v54 = vadd.f32 %v8855_v53, %v3885_v52  ;;  %v4262_v56 = vpop.f32.mrb[221].mxu1 }
 0x2a2   : > { %v4561_v57 = vld [vmem:[#allocation2 + $0x1d0] sm:$0xff]  ;;  %v4337_v58 = vadd.f32 %v4262_v56, %v3883_v55  ;;  %v8856_v7 = vpop.f32.mrb[222].mxu1  ;;  %v8921_v0 = vpop.f32.mrb[220].mxu0 }
 0x2a3   : > { %v5015_v3 = vadd.f32 %v8917_v34, %v4561_v57  ;;  %4403 = vst.msk [vmem:[#allocation2 + $0x1f0] sm:$0xff] %vm269_vm2, %v4339_v54  ;;  %v4559_v4 = vld [vmem:[#allocation2 + $0x1c0] sm:$0xff]  ;;  %v4340_v18 = vadd.f32 %v8856_v7, %v3886_v63  ;;  %v4265_v50 = vpop.f32.mrb[223].mxu1  ;;  %v4942_v20 = vpop.f32.mrb[221].mxu0  ;;  %v5191_v7 = vld [vmem:[#allocation2 + $0x50] sm:$0xff] }
 0x2a4   : > { %v5013_v8 = vadd.f32 %v4926_v40, %v4559_v4  ;;  %4401 = vst.msk [vmem:[#allocation2 + $0x1e0] sm:$0xff] %vm269_vm2, %v4337_v58  ;;  %v4562_v10 = vld [vmem:[#allocation2 + $0x1d8] sm:$0xff]  ;;  %v4338_v32 = vadd.f32 %v4265_v50, %v3884_v6  ;;  %v8922_v11 = vpop.f32.mrb[222].mxu0  ;;  %v5189_v4 = vld [vmem:[#allocation2 + $0x40] sm:$0xff] }
 0x2a5   : > { %5079 = vst.msk [vmem:[#allocation2 + $0x1d0] sm:$0xff] %vm269_vm2, %v5015_v3  ;;  %v5016_v60 = vadd.f32 %v8918_v43, %v4562_v10  ;;  %4404 = vst.msk [vmem:[#allocation2 + $0x1f8] sm:$0xff] %vm269_vm2, %v4340_v18  ;;  %v4560_v24 = vld [vmem:[#allocation2 + $0x1c8] sm:$0xff]  ;;  %v4945_v14 = vpop.f32.mrb[223].mxu0  ;;  %v5188_v40 = vld [vmem:[#allocation2 + $0x38] sm:$0xff] }
 0x2a6   : > { %5077 = vst.msk [vmem:[#allocation2 + $0x1c0] sm:$0xff] %vm269_vm2, %v5013_v8  ;;  %v5014_v15 = vadd.f32 %v4929_v48, %v4560_v24  ;;  %4402 = vst.msk [vmem:[#allocation2 + $0x1e8] sm:$0xff] %vm269_vm2, %v4338_v32  ;;  %v5190_v24 = vld [vmem:[#allocation2 + $0x48] sm:$0xff] }
 0x2a7   : > { %5080 = vst.msk [vmem:[#allocation2 + $0x1d8] sm:$0xff] %vm269_vm2, %v5016_v60 }
 0x2a8   : > { %5078 = vst.msk [vmem:[#allocation2 + $0x1c8] sm:$0xff] %vm269_vm2, %v5014_v15  ;;  %v8927_v22 = vpop.f32.mrb[224].mxu1 }
 0x2a9   : > { %v5637_v23 = vadd.f32 %v8927_v22, %v5183_v19  ;;  %v5380_v17 = vpop.f32.mrb[225].mxu1 }
 0x2aa   : > { %v4565_v9 = vld [vmem:[#allocation2 + $0x1f0] sm:$0xff]  ;;  %v5635_v27 = vadd.f32 %v5380_v17, %v5181_v25  ;;  %v8928_v37 = vpop.f32.mrb[226].mxu1  ;;  %v8993_v47 = vpop.f32.mrb[224].mxu0 }
 0x2ab   : > { %v5019_v62 = vadd.f32 %v8921_v0, %v4565_v9  ;;  %v4563_v1 = vld [vmem:[#allocation2 + $0x1e0] sm:$0xff]  ;;  %5701 = vst.msk [vmem:[#allocation2 + $0x10] sm:$0xff] %vm269_vm2, %v5637_v23  ;;  %v5638_v5 = vadd.f32 %v8928_v37, %v5184_v35  ;;  %v5383_v16 = vpop.f32.mrb[227].mxu1  ;;  %v6058_v21 = vpop.f32.mrb[225].mxu0 }
 0x2ac   : > { %v5017_v30 = vadd.f32 %v4942_v20, %v4563_v1  ;;  %v4566_v49 = vld [vmem:[#allocation2 + $0x1f8] sm:$0xff]  ;;  %5699 = vst.msk [vmem:[#allocation2] sm:$0xff] %vm269_vm2, %v5635_v27  ;;  %v5636_v26 = vadd.f32 %v5383_v16, %v5182_v13  ;;  %v8994_v28 = vpop.f32.mrb[226].mxu0  ;;  %v5193_v13 = vld [vmem:[#allocation2 + $0x60] sm:$0xff] }
 0x2ad   : > { %5083 = vst.msk [vmem:[#allocation2 + $0x1f0] sm:$0xff] %vm269_vm2, %v5019_v62  ;;  %v5020_v38 = vadd.f32 %v8922_v11, %v4566_v49  ;;  %v4564_v2 = vld [vmem:[#allocation2 + $0x1e8] sm:$0xff]  ;;  %5702 = vst.msk [vmem:[#allocation2 + $0x18] sm:$0xff] %vm269_vm2, %v5638_v5  ;;  %v6061_v29 = vpop.f32.mrb[227].mxu0  ;;  %v5192_v20 = vld [vmem:[#allocation2 + $0x58] sm:$0xff] }
 0x2ae   : > { %5081 = vst.msk [vmem:[#allocation2 + $0x1e0] sm:$0xff] %vm269_vm2, %v5017_v30  ;;  %v5018_v59 = vadd.f32 %v4945_v14, %v4564_v2  ;;  %5700 = vst.msk [vmem:[#allocation2 + $0x8] sm:$0xff] %vm269_vm2, %v5636_v26  ;;  %v5196_v49 = vld [vmem:[#allocation2 + $0x78] sm:$0xff] }
 0x2af   : > { %5084 = vst.msk [vmem:[#allocation2 + $0x1f8] sm:$0xff] %vm269_vm2, %v5020_v38 }
 0x2b0   : > { %5082 = vst.msk [vmem:[#allocation2 + $0x1e8] sm:$0xff] %vm269_vm2, %v5018_v59  ;;  %v8931_v34 = vpop.f32.mrb[228].mxu1  ;;  %v5194_v59 = vld [vmem:[#allocation2 + $0x68] sm:$0xff] }
 0x2b1   : > { %v5641_v51 = vadd.f32 %v8931_v34, %v5187_v31  ;;  %v5396_v12 = vpop.f32.mrb[229].mxu1 }
 0x2b2   : > { %v5861_v36 = vld [vmem:[#allocation2 + $0x10] sm:$0xff]  ;;  %v5639_v39 = vadd.f32 %v5396_v12, %v5185_v33  ;;  %v8932_v45 = vpop.f32.mrb[230].mxu1  ;;  %v8997_v41 = vpop.f32.mrb[228].mxu0 }
 0x2b3   : > { %v6315_v42 = vadd.f32 %v8993_v47, %v5861_v36  ;;  %5705 = vst.msk [vmem:[#allocation2 + $0x30] sm:$0xff] %vm269_vm2, %v5641_v51  ;;  %v5859_v43 = vld [vmem:[#allocation2] sm:$0xff]  ;;  %v5642_v44 = vadd.f32 %v8932_v45, %v5188_v40  ;;  %v5399_v48 = vpop.f32.mrb[231].mxu1  ;;  %v6074_v61 = vpop.f32.mrb[229].mxu0  ;;  %v5195_v47 = vld [vmem:[#allocation2 + $0x70] sm:$0xff] }
 0x2b4   : > { %v6313_v52 = vadd.f32 %v6058_v21, %v5859_v43  ;;  %5703 = vst.msk [vmem:[#allocation2 + $0x20] sm:$0xff] %vm269_vm2, %v5639_v39  ;;  %v5862_v53 = vld [vmem:[#allocation2 + $0x18] sm:$0xff]  ;;  %v5640_v54 = vadd.f32 %v5399_v48, %v5186_v46  ;;  %v8998_v55 = vpop.f32.mrb[230].mxu0  ;;  %v5199_v43 = vld [vmem:[#allocation2 + $0x90] sm:$0xff] }
 0x2b5   : > { %6379 = vst.msk [vmem:[#allocation2 + $0x10] sm:$0xff] %vm269_vm2, %v6315_v42  ;;  %v6316_v56 = vadd.f32 %v8994_v28, %v5862_v53  ;;  %5706 = vst.msk [vmem:[#allocation2 + $0x38] sm:$0xff] %vm269_vm2, %v5642_v44  ;;  %v5860_v57 = vld [vmem:[#allocation2 + $0x8] sm:$0xff]  ;;  %v6077_v58 = vpop.f32.mrb[231].mxu0 }
 0x2b6   : > { %6377 = vst.msk [vmem:[#allocation2] sm:$0xff] %vm269_vm2, %v6313_v52  ;;  %v6314_v63 = vadd.f32 %v6061_v29, %v5860_v57  ;;  %5704 = vst.msk [vmem:[#allocation2 + $0x28] sm:$0xff] %vm269_vm2, %v5640_v54 }
 0x2b7   : > { %6380 = vst.msk [vmem:[#allocation2 + $0x18] sm:$0xff] %vm269_vm2, %v6316_v56 }
 0x2b8   : > { %6378 = vst.msk [vmem:[#allocation2 + $0x8] sm:$0xff] %vm269_vm2, %v6314_v63  ;;  %v8935_v0 = vpop.f32.mrb[232].mxu1 }
 0x2b9   : > { %v5645_v3 = vadd.f32 %v8935_v0, %v5191_v7  ;;  %v5412_v18 = vpop.f32.mrb[233].mxu1  ;;  %v5198_v0 = vld [vmem:[#allocation2 + $0x88] sm:$0xff] }
 0x2ba   : > { %v5865_v6 = vld [vmem:[#allocation2 + $0x30] sm:$0xff]  ;;  %v5643_v50 = vadd.f32 %v5412_v18, %v5189_v4  ;;  %v8936_v8 = vpop.f32.mrb[234].mxu1  ;;  %v9001_v10 = vpop.f32.mrb[232].mxu0 }
 0x2bb   : > { %v6319_v32 = vadd.f32 %v8997_v41, %v5865_v6  ;;  %5709 = vst.msk [vmem:[#allocation2 + $0x50] sm:$0xff] %vm269_vm2, %v5645_v3  ;;  %v5863_v11 = vld [vmem:[#allocation2 + $0x20] sm:$0xff]  ;;  %v5646_v60 = vadd.f32 %v8936_v8, %v5192_v20  ;;  %v5415_v14 = vpop.f32.mrb[235].mxu1  ;;  %v6090_v15 = vpop.f32.mrb[233].mxu0 }
 0x2bc   : > { %v6317_v19 = vadd.f32 %v6074_v61, %v5863_v11  ;;  %5707 = vst.msk [vmem:[#allocation2 + $0x40] sm:$0xff] %vm269_vm2, %v5643_v50  ;;  %v5866_v22 = vld [vmem:[#allocation2 + $0x38] sm:$0xff]  ;;  %v5644_v23 = vadd.f32 %v5415_v14, %v5190_v24  ;;  %v6443_v25 = vld [vmem:[#allocation2 + $0x10] sm:$0xff]  ;;  %v9002_v17 = vpop.f32.mrb[234].mxu0  ;;  %v5197_v61 = vld [vmem:[#allocation2 + $0x80] sm:$0xff] }
 0x2bd   : > { %6383 = vst.msk [vmem:[#allocation2 + $0x30] sm:$0xff] %vm269_vm2, %v6319_v32  ;;  %v6320_v9 = vadd.f32 %v8998_v55, %v5866_v22  ;;  %5710 = vst.msk [vmem:[#allocation2 + $0x58] sm:$0xff] %vm269_vm2, %v5646_v60  ;;  %v5864_v27 = vld [vmem:[#allocation2 + $0x28] sm:$0xff]  ;;  %6701 = vrot.lane.b32.xlu1 %v6443_v25, %s9121_s26  ;;  %v6093_v35 = vpop.f32.mrb[235].mxu0  ;;  %v6441_v1 = vld [vmem:[#allocation2] sm:$0xff] }
 0x2be   : > { %6381 = vst.msk [vmem:[#allocation2 + $0x20] sm:$0xff] %vm269_vm2, %v6317_v19  ;;  %v6318_v37 = vadd.f32 %v6077_v58, %v5864_v27  ;;  %5708 = vst.msk [vmem:[#allocation2 + $0x48] sm:$0xff] %vm269_vm2, %v5644_v23  ;;  %v6444_v36 = vld [vmem:[#allocation2 + $0x18] sm:$0xff]  ;;  %v5203_v24 = vld [vmem:[#allocation2 + $0xb0] sm:$0xff] }
 0x2bf   : > { %6384 = vst.msk [vmem:[#allocation2 + $0x38] sm:$0xff] %vm269_vm2, %v6320_v9  ;;  %v6442_v46 = vld [vmem:[#allocation2 + $0x8] sm:$0xff]  ;;  %v5200_v55 = vld [vmem:[#allocation2 + $0x98] sm:$0xff]  ;;  %v5201_v22 = vld [vmem:[#allocation2 + $0xa0] sm:$0xff] }
 0x2c0   : > { %6382 = vst.msk [vmem:[#allocation2 + $0x28] sm:$0xff] %vm269_vm2, %v6318_v37  ;;  %v8939_v62 = vpop.f32.mrb[236].mxu1  ;;  %v5204_v9 = vld [vmem:[#allocation2 + $0xb8] sm:$0xff] }
 0x2c1   : > { %v5649_v5 = vadd.f32 %v8939_v62, %v5195_v47  ;;  %v5428_v16 = vpop.f32.mrb[237].mxu1  ;;  %6697 = vrot.lane.b32.xlu1 %v6441_v1, %s9121_s26  ;;  %v5202_v1 = vld [vmem:[#allocation2 + $0xa8] sm:$0xff] }
 0x2c2   : > { %v5869_v21 = vld [vmem:[#allocation2 + $0x50] sm:$0xff]  ;;  %v5647_v30 = vadd.f32 %v5428_v16, %v5193_v13  ;;  %v8940_v26 = vpop.f32.mrb[238].mxu1  ;;  %v9005_v28 = vpop.f32.mrb[236].mxu0 }
 0x2c3   : > { %v6323_v38 = vadd.f32 %v9001_v10, %v5869_v21  ;;  %5713 = vst.msk [vmem:[#allocation2 + $0x70] sm:$0xff] %vm269_vm2, %v5649_v5  ;;  %v5867_v2 = vld [vmem:[#allocation2 + $0x40] sm:$0xff]  ;;  %v5650_v29 = vadd.f32 %v8940_v26, %v5196_v49  ;;  %v5431_v31 = vpop.f32.mrb[239].mxu1  ;;  %v6106_v34 = vpop.f32.mrb[237].mxu0 }
 0x2c4   : > { %v6321_v51 = vadd.f32 %v6090_v15, %v5867_v2  ;;  %5711 = vst.msk [vmem:[#allocation2 + $0x60] sm:$0xff] %vm269_vm2, %v5647_v30  ;;  %v5870_v33 = vld [vmem:[#allocation2 + $0x58] sm:$0xff]  ;;  %v5648_v12 = vadd.f32 %v5431_v31, %v5194_v59  ;;  %v9006_v39 = vpop.f32.mrb[238].mxu0  ;;  %v6447_v20 = vld [vmem:[#allocation2 + $0x30] sm:$0xff] }
 0x2c5   : > { %6387 = vst.msk [vmem:[#allocation2 + $0x50] sm:$0xff] %vm269_vm2, %v6323_v38  ;;  %v6324_v40 = vadd.f32 %v9002_v17, %v5870_v33  ;;  %5714 = vst.msk [vmem:[#allocation2 + $0x78] sm:$0xff] %vm269_vm2, %v5650_v29  ;;  %v5868_v45 = vld [vmem:[#allocation2 + $0x48] sm:$0xff]  ;;  %6703 = vrot.lane.b32.xlu1 %v6444_v36, %s9121_s26  ;;  %v6109_v41 = vpop.f32.mrb[239].mxu0  ;;  %v6445_v15 = vld [vmem:[#allocation2 + $0x20] sm:$0xff] }
 0x2c6   : > { %6385 = vst.msk [vmem:[#allocation2 + $0x40] sm:$0xff] %vm269_vm2, %v6321_v51  ;;  %v6322_v42 = vadd.f32 %v6093_v35, %v5868_v45  ;;  %5712 = vst.msk [vmem:[#allocation2 + $0x68] sm:$0xff] %vm269_vm2, %v5648_v12  ;;  %v6448_v49 = vld [vmem:[#allocation2 + $0x38] sm:$0xff]  ;;  %v5207_v59 = vld [vmem:[#allocation2 + $0xd0] sm:$0xff] }
 0x2c7   : > { %6388 = vst.msk [vmem:[#allocation2 + $0x58] sm:$0xff] %vm269_vm2, %v6324_v40  ;;  %v5205_v33 = vld [vmem:[#allocation2 + $0xc0] sm:$0xff]  ;;  %v5208_v40 = vld [vmem:[#allocation2 + $0xd8] sm:$0xff] }
 0x2c8   : > { %6386 = vst.msk [vmem:[#allocation2 + $0x48] sm:$0xff] %vm269_vm2, %v6322_v42  ;;  %v8943_v44 = vpop.f32.mrb[240].mxu1 }
 0x2c9   : > { %v5653_v48 = vadd.f32 %v8943_v44, %v5199_v43  ;;  %v5444_v52 = vpop.f32.mrb[241].mxu1  ;;  %6699 = vrot.lane.b32.xlu1 %v6442_v46, %s9121_s26  ;;  %v5206_v46 = vld [vmem:[#allocation2 + $0xc8] sm:$0xff] }
 0x2ca   : > { %v5873_v53 = vld [vmem:[#allocation2 + $0x70] sm:$0xff]  ;;  %v5651_v54 = vadd.f32 %v5444_v52, %v5197_v61  ;;  %v8944_v56 = vpop.f32.mrb[242].mxu1  ;;  %v9009_v57 = vpop.f32.mrb[240].mxu0 }
 0x2cb   : > { %v6327_v58 = vadd.f32 %v9005_v28, %v5873_v53  ;;  %5717 = vst.msk [vmem:[#allocation2 + $0x90] sm:$0xff] %vm269_vm2, %v5653_v48  ;;  %v5871_v63 = vld [vmem:[#allocation2 + $0x60] sm:$0xff]  ;;  %v5654_v7 = vadd.f32 %v8944_v56, %v5200_v55  ;;  %v5447_v3 = vpop.f32.mrb[243].mxu1  ;;  %v6122_v4 = vpop.f32.mrb[241].mxu0 }
 0x2cc   : > { %v6325_v18 = vadd.f32 %v6106_v34, %v5871_v63  ;;  %5715 = vst.msk [vmem:[#allocation2 + $0x80] sm:$0xff] %vm269_vm2, %v5651_v54  ;;  %v5874_v6 = vld [vmem:[#allocation2 + $0x78] sm:$0xff]  ;;  %v5652_v50 = vadd.f32 %v5447_v3, %v5198_v0  ;;  %v9010_v8 = vpop.f32.mrb[242].mxu0  ;;  %v6446_v34 = vld [vmem:[#allocation2 + $0x28] sm:$0xff]  ;;  %v6451_v55 = vld [vmem:[#allocation2 + $0x50] sm:$0xff] }
 0x2cd   : > { %6391 = vst.msk [vmem:[#allocation2 + $0x70] sm:$0xff] %vm269_vm2, %v6327_v58  ;;  %v6328_v10 = vadd.f32 %v9006_v39, %v5874_v6  ;;  %5718 = vst.msk [vmem:[#allocation2 + $0x98] sm:$0xff] %vm269_vm2, %v5654_v7  ;;  %v5872_v32 = vld [vmem:[#allocation2 + $0x68] sm:$0xff]  ;;  %6709 = vrot.lane.b32.xlu1 %v6447_v20, %s9121_s26  ;;  %v6125_v11 = vpop.f32.mrb[243].mxu0  ;;  %v5211_v0 = vld [vmem:[#allocation2 + $0xf0] sm:$0xff] }
 0x2ce   : > { %6389 = vst.msk [vmem:[#allocation2 + $0x60] sm:$0xff] %vm269_vm2, %v6325_v18  ;;  %v6326_v60 = vadd.f32 %v6109_v41, %v5872_v32  ;;  %5716 = vst.msk [vmem:[#allocation2 + $0x88] sm:$0xff] %vm269_vm2, %v5652_v50  ;;  %v5209_v6 = vld [vmem:[#allocation2 + $0xe0] sm:$0xff] }
 0x2cf   : > { %6392 = vst.msk [vmem:[#allocation2 + $0x78] sm:$0xff] %vm269_vm2, %v6328_v10  ;;  %v5212_v10 = vld [vmem:[#allocation2 + $0xf8] sm:$0xff] }
 0x2d0   : > { %6390 = vst.msk [vmem:[#allocation2 + $0x68] sm:$0xff] %vm269_vm2, %v6326_v60  ;;  %v8947_v14 = vpop.f32.mrb[244].mxu1 }
 0x2d1   : > { %v5657_v19 = vadd.f32 %v8947_v14, %v5203_v24  ;;  %v5460_v23 = vpop.f32.mrb[245].mxu1  ;;  %6705 = vrot.lane.b32.xlu1 %v6445_v15, %s9121_s26  ;;  %v5210_v15 = vld [vmem:[#allocation2 + $0xe8] sm:$0xff] }
 0x2d2   : > { %v5877_v25 = vld [vmem:[#allocation2 + $0x90] sm:$0xff]  ;;  %v5655_v17 = vadd.f32 %v5460_v23, %v5201_v22  ;;  %v8948_v27 = vpop.f32.mrb[246].mxu1  ;;  %v9013_v35 = vpop.f32.mrb[244].mxu0 }
 0x2d3   : > { %v6331_v37 = vadd.f32 %v9009_v57, %v5877_v25  ;;  %5721 = vst.msk [vmem:[#allocation2 + $0xb0] sm:$0xff] %vm269_vm2, %v5657_v19  ;;  %v5875_v47 = vld [vmem:[#allocation2 + $0x80] sm:$0xff]  ;;  %v5658_v62 = vadd.f32 %v8948_v27, %v5204_v9  ;;  %v5463_v5 = vpop.f32.mrb[247].mxu1  ;;  %v6138_v13 = vpop.f32.mrb[245].mxu0  ;;  %v6452_v9 = vld [vmem:[#allocation2 + $0x58] sm:$0xff] }
 0x2d4   : > { %v6329_v16 = vadd.f32 %v6122_v4, %v5875_v47  ;;  %5719 = vst.msk [vmem:[#allocation2 + $0xa0] sm:$0xff] %vm269_vm2, %v5655_v17  ;;  %v5878_v21 = vld [vmem:[#allocation2 + $0x98] sm:$0xff]  ;;  %v5656_v30 = vadd.f32 %v5463_v5, %v5202_v1  ;;  %v9014_v26 = vpop.f32.mrb[246].mxu0  ;;  %v6449_v4 = vld [vmem:[#allocation2 + $0x40] sm:$0xff]  ;;  %v5215_v1 = vld [vmem:[#allocation2 + $0x110] sm:$0xff] }
 0x2d5   : > { %6395 = vst.msk [vmem:[#allocation2 + $0x90] sm:$0xff] %vm269_vm2, %v6331_v37  ;;  %v6332_v28 = vadd.f32 %v9010_v8, %v5878_v21  ;;  %5722 = vst.msk [vmem:[#allocation2 + $0xb8] sm:$0xff] %vm269_vm2, %v5658_v62  ;;  %v5876_v38 = vld [vmem:[#allocation2 + $0x88] sm:$0xff]  ;;  %6711 = vrot.lane.b32.xlu1 %v6448_v49, %s9121_s26  ;;  %v6141_v2 = vpop.f32.mrb[247].mxu0  ;;  %v5213_v21 = vld [vmem:[#allocation2 + $0x100] sm:$0xff] }
 0x2d6   : > { %6393 = vst.msk [vmem:[#allocation2 + $0x80] sm:$0xff] %vm269_vm2, %v6329_v16  ;;  %v6330_v29 = vadd.f32 %v6125_v11, %v5876_v38  ;;  %5720 = vst.msk [vmem:[#allocation2 + $0xa8] sm:$0xff] %vm269_vm2, %v5656_v30 }
 0x2d7   : > { %6396 = vst.msk [vmem:[#allocation2 + $0x98] sm:$0xff] %vm269_vm2, %v6332_v28  ;;  %v5216_v28 = vld [vmem:[#allocation2 + $0x118] sm:$0xff] }
 0x2d8   : > { %6394 = vst.msk [vmem:[#allocation2 + $0x88] sm:$0xff] %vm269_vm2, %v6330_v29  ;;  %v8951_v31 = vpop.f32.mrb[248].mxu1 }
 0x2d9   : > { %v5661_v51 = vadd.f32 %v8951_v31, %v5207_v59  ;;  %v5476_v12 = vpop.f32.mrb[249].mxu1  ;;  %6707 = vrot.lane.b32.xlu1 %v6446_v34, %s9121_s26  ;;  %v5214_v34 = vld [vmem:[#allocation2 + $0x108] sm:$0xff] }
 0x2da   : > { %v5881_v36 = vld [vmem:[#allocation2 + $0xb0] sm:$0xff]  ;;  %v5659_v39 = vadd.f32 %v5476_v12, %v5205_v33  ;;  %v8952_v45 = vpop.f32.mrb[250].mxu1  ;;  %v9017_v41 = vpop.f32.mrb[248].mxu0 }
 0x2db   : > { %v6335_v42 = vadd.f32 %v9013_v35, %v5881_v36  ;;  %5725 = vst.msk [vmem:[#allocation2 + $0xd0] sm:$0xff] %vm269_vm2, %v5661_v51  ;;  %v5879_v43 = vld [vmem:[#allocation2 + $0xa0] sm:$0xff]  ;;  %v5662_v44 = vadd.f32 %v8952_v45, %v5208_v40  ;;  %v5479_v48 = vpop.f32.mrb[251].mxu1  ;;  %v6154_v61 = vpop.f32.mrb[249].mxu0  ;;  %v6455_v40 = vld [vmem:[#allocation2 + $0x70] sm:$0xff] }
 0x2dc   : > { %v6333_v52 = vadd.f32 %v6138_v13, %v5879_v43  ;;  %5723 = vst.msk [vmem:[#allocation2 + $0xc0] sm:$0xff] %vm269_vm2, %v5659_v39  ;;  %v5882_v53 = vld [vmem:[#allocation2 + $0xb8] sm:$0xff]  ;;  %v5660_v54 = vadd.f32 %v5479_v48, %v5206_v46  ;;  %v9018_v56 = vpop.f32.mrb[250].mxu0  ;;  %v6450_v13 = vld [vmem:[#allocation2 + $0x48] sm:$0xff]  ;;  %v5219_v46 = vld [vmem:[#allocation2 + $0x130] sm:$0xff] }
 0x2dd   : > { %6399 = vst.msk [vmem:[#allocation2 + $0xb0] sm:$0xff] %vm269_vm2, %v6335_v42  ;;  %v6336_v57 = vadd.f32 %v9014_v26, %v5882_v53  ;;  %5726 = vst.msk [vmem:[#allocation2 + $0xd8] sm:$0xff] %vm269_vm2, %v5662_v44  ;;  %v5880_v58 = vld [vmem:[#allocation2 + $0xa8] sm:$0xff]  ;;  %6717 = vrot.lane.b32.xlu1 %v6451_v55, %s9121_s26  ;;  %v6157_v63 = vpop.f32.mrb[251].mxu0  ;;  %v5217_v53 = vld [vmem:[#allocation2 + $0x120] sm:$0xff] }
 0x2de   : > { %6397 = vst.msk [vmem:[#allocation2 + $0xa0] sm:$0xff] %vm269_vm2, %v6333_v52  ;;  %v6334_v7 = vadd.f32 %v6141_v2, %v5880_v58  ;;  %5724 = vst.msk [vmem:[#allocation2 + $0xc8] sm:$0xff] %vm269_vm2, %v5660_v54 }
 0x2df   : > { %6400 = vst.msk [vmem:[#allocation2 + $0xb8] sm:$0xff] %vm269_vm2, %v6336_v57  ;;  %v5220_v57 = vld [vmem:[#allocation2 + $0x138] sm:$0xff] }
 0x2e0   : > { %6398 = vst.msk [vmem:[#allocation2 + $0xa8] sm:$0xff] %vm269_vm2, %v6334_v7  ;;  %v8955_v3 = vpop.f32.mrb[252].mxu1 }
 0x2e1   : > { %v5665_v18 = vadd.f32 %v8955_v3, %v5211_v0  ;;  %v5492_v50 = vpop.f32.mrb[253].mxu1  ;;  %6713 = vrot.lane.b32.xlu1 %v6449_v4, %s9121_s26  ;;  %v5218_v4 = vld [vmem:[#allocation2 + $0x128] sm:$0xff] }
 0x2e2   : > { %v5885_v20 = vld [vmem:[#allocation2 + $0xd0] sm:$0xff]  ;;  %v5663_v8 = vadd.f32 %v5492_v50, %v5209_v6  ;;  %v8956_v32 = vpop.f32.mrb[254].mxu1  ;;  %v9021_v11 = vpop.f32.mrb[252].mxu0 }
 0x2e3   : > { %v6339_v60 = vadd.f32 %v9017_v41, %v5885_v20  ;;  %5729 = vst.msk [vmem:[#allocation2 + $0xf0] sm:$0xff] %vm269_vm2, %v5665_v18  ;;  %v5883_v24 = vld [vmem:[#allocation2 + $0xc0] sm:$0xff]  ;;  %v5666_v14 = vadd.f32 %v8956_v32, %v5212_v10  ;;  %v5495_v19 = vpop.f32.mrb[255].mxu1  ;;  %v6170_v22 = vpop.f32.mrb[253].mxu0  ;;  %v6456_v10 = vld [vmem:[#allocation2 + $0x78] sm:$0xff] }
 0x2e4   : > { %v6337_v23 = vadd.f32 %v6154_v61, %v5883_v24  ;;  %5727 = vst.msk [vmem:[#allocation2 + $0xe0] sm:$0xff] %vm269_vm2, %v5663_v8  ;;  %v5886_v25 = vld [vmem:[#allocation2 + $0xd8] sm:$0xff]  ;;  %v5664_v17 = vadd.f32 %v5495_v19, %v5210_v15  ;;  %v9022_v27 = vpop.f32.mrb[254].mxu0  ;;  %v6453_v61 = vld [vmem:[#allocation2 + $0x60] sm:$0xff]  ;;  %v5223_v15 = vld [vmem:[#allocation2 + $0x150] sm:$0xff] }
 0x2e5   : > { %6403 = vst.msk [vmem:[#allocation2 + $0xd0] sm:$0xff] %vm269_vm2, %v6339_v60  ;;  %v6340_v35 = vadd.f32 %v9018_v56, %v5886_v25  ;;  %5730 = vst.msk [vmem:[#allocation2 + $0xf8] sm:$0xff] %vm269_vm2, %v5666_v14  ;;  %v5884_v37 = vld [vmem:[#allocation2 + $0xc8] sm:$0xff]  ;;  %6719 = vrot.lane.b32.xlu1 %v6452_v9, %s9121_s26  ;;  %v6173_v47 = vpop.f32.mrb[255].mxu0  ;;  %v5221_v25 = vld [vmem:[#allocation2 + $0x140] sm:$0xff] }
 0x2e6   : > { %6401 = vst.msk [vmem:[#allocation2 + $0xc0] sm:$0xff] %vm269_vm2, %v6337_v23  ;;  %v6338_v62 = vadd.f32 %v6157_v63, %v5884_v37  ;;  %5728 = vst.msk [vmem:[#allocation2 + $0xe8] sm:$0xff] %vm269_vm2, %v5664_v17 }
 0x2e7   : > { %6404 = vst.msk [vmem:[#allocation2 + $0xd8] sm:$0xff] %vm269_vm2, %v6340_v35 }
 0x2e8   : > { %6402 = vst.msk [vmem:[#allocation2 + $0xc8] sm:$0xff] %vm269_vm2, %v6338_v62  ;;  %v8959_v5 = vpop.f32.mrb[0].mxu1 }
 0x2e9   : > { %v5669_v16 = vadd.f32 %v8959_v5, %v5215_v1  ;;  %v5508_v30 = vpop.f32.mrb[1].mxu1  ;;  %6715 = vrot.lane.b32.xlu1 %v6450_v13, %s9121_s26  ;;  %v5222_v5 = vld [vmem:[#allocation2 + $0x148] sm:$0xff] }
 0x2ea   : > { %v5889_v49 = vld [vmem:[#allocation2 + $0xf0] sm:$0xff]  ;;  %v5667_v26 = vadd.f32 %v5508_v30, %v5213_v21  ;;  %v8960_v38 = vpop.f32.mrb[2].mxu1  ;;  %v9025_v2 = vpop.f32.mrb[0].mxu0 }
 0x2eb   : > { %v6343_v29 = vadd.f32 %v9021_v11, %v5889_v49  ;;  %5733 = vst.msk [vmem:[#allocation2 + $0x110] sm:$0xff] %vm269_vm2, %v5669_v16  ;;  %v5887_v59 = vld [vmem:[#allocation2 + $0xe0] sm:$0xff]  ;;  %v5670_v31 = vadd.f32 %v8960_v38, %v5216_v28  ;;  %v5511_v51 = vpop.f32.mrb[3].mxu1  ;;  %v6186_v33 = vpop.f32.mrb[1].mxu0  ;;  %v6459_v28 = vld [vmem:[#allocation2 + $0x90] sm:$0xff] }
 0x2ec   : > { %v6341_v12 = vadd.f32 %v6170_v22, %v5887_v59  ;;  %5731 = vst.msk [vmem:[#allocation2 + $0x100] sm:$0xff] %vm269_vm2, %v5667_v26  ;;  %v5890_v36 = vld [vmem:[#allocation2 + $0xf8] sm:$0xff]  ;;  %v5668_v39 = vadd.f32 %v5511_v51, %v5214_v34  ;;  %v9026_v45 = vpop.f32.mrb[2].mxu0  ;;  %v6454_v22 = vld [vmem:[#allocation2 + $0x68] sm:$0xff]  ;;  %v5227_v51 = vld [vmem:[#allocation2 + $0x170] sm:$0xff] }
 0x2ed   : > { %6407 = vst.msk [vmem:[#allocation2 + $0xf0] sm:$0xff] %vm269_vm2, %v6343_v29  ;;  %v6344_v41 = vadd.f32 %v9022_v27, %v5890_v36  ;;  %5734 = vst.msk [vmem:[#allocation2 + $0x118] sm:$0xff] %vm269_vm2, %v5670_v31  ;;  %v5888_v42 = vld [vmem:[#allocation2 + $0xe8] sm:$0xff]  ;;  %6725 = vrot.lane.b32.xlu1 %v6455_v40, %s9121_s26  ;;  %v6189_v43 = vpop.f32.mrb[3].mxu0  ;;  %v5224_v27 = vld [vmem:[#allocation2 + $0x158] sm:$0xff] }
 0x2ee   : > { %6405 = vst.msk [vmem:[#allocation2 + $0xe0] sm:$0xff] %vm269_vm2, %v6341_v12  ;;  %v6342_v44 = vadd.f32 %v6173_v47, %v5888_v42  ;;  %5732 = vst.msk [vmem:[#allocation2 + $0x108] sm:$0xff] %vm269_vm2, %v5668_v39  ;;  %v6457_v12 = vld [vmem:[#allocation2 + $0x80] sm:$0xff]  ;;  %v5228_v42 = vld [vmem:[#allocation2 + $0x178] sm:$0xff] }
 0x2ef   : > { %6408 = vst.msk [vmem:[#allocation2 + $0xf8] sm:$0xff] %vm269_vm2, %v6344_v41  ;;  %v5225_v40 = vld [vmem:[#allocation2 + $0x160] sm:$0xff] }
 0x2f0   : > { %6406 = vst.msk [vmem:[#allocation2 + $0xe8] sm:$0xff] %vm269_vm2, %v6342_v44  ;;  %v8963_v48 = vpop.f32.mrb[4].mxu1 }
 0x2f1   : > { %v5673_v52 = vadd.f32 %v8963_v48, %v5219_v46  ;;  %v5524_v54 = vpop.f32.mrb[5].mxu1  ;;  %6721 = vrot.lane.b32.xlu1 %v6453_v61, %s9121_s26 }
 0x2f2   : > { %v5893_v55 = vld [vmem:[#allocation2 + $0x110] sm:$0xff]  ;;  %v5671_v56 = vadd.f32 %v5524_v54, %v5217_v53  ;;  %v8964_v58 = vpop.f32.mrb[6].mxu1  ;;  %v9029_v63 = vpop.f32.mrb[4].mxu0 }
 0x2f3   : > { %v6347_v7 = vadd.f32 %v9025_v2, %v5893_v55  ;;  %5737 = vst.msk [vmem:[#allocation2 + $0x130] sm:$0xff] %vm269_vm2, %v5673_v52  ;;  %v5891_v0 = vld [vmem:[#allocation2 + $0x100] sm:$0xff]  ;;  %v5674_v3 = vadd.f32 %v8964_v58, %v5220_v57  ;;  %v5527_v18 = vpop.f32.mrb[7].mxu1  ;;  %v6202_v6 = vpop.f32.mrb[5].mxu0  ;;  %v5226_v52 = vld [vmem:[#allocation2 + $0x168] sm:$0xff] }
 0x2f4   : > { %v6345_v50 = vadd.f32 %v6186_v33, %v5891_v0  ;;  %5735 = vst.msk [vmem:[#allocation2 + $0x120] sm:$0xff] %vm269_vm2, %v5671_v56  ;;  %v5894_v20 = vld [vmem:[#allocation2 + $0x118] sm:$0xff]  ;;  %v5672_v8 = vadd.f32 %v5527_v18, %v5218_v4  ;;  %v9030_v32 = vpop.f32.mrb[6].mxu0 }
 0x2f5   : > { %6411 = vst.msk [vmem:[#allocation2 + $0x110] sm:$0xff] %vm269_vm2, %v6347_v7  ;;  %v6348_v11 = vadd.f32 %v9026_v45, %v5894_v20  ;;  %5738 = vst.msk [vmem:[#allocation2 + $0x138] sm:$0xff] %vm269_vm2, %v5674_v3  ;;  %v5892_v60 = vld [vmem:[#allocation2 + $0x108] sm:$0xff]  ;;  %6727 = vrot.lane.b32.xlu1 %v6456_v10, %s9121_s26  ;;  %v6205_v24 = vpop.f32.mrb[7].mxu0 }
 0x2f6   : > { %6409 = vst.msk [vmem:[#allocation2 + $0x100] sm:$0xff] %vm269_vm2, %v6345_v50  ;;  %v6346_v14 = vadd.f32 %v6189_v43, %v5892_v60  ;;  %5736 = vst.msk [vmem:[#allocation2 + $0x128] sm:$0xff] %vm269_vm2, %v5672_v8  ;;  %v5231_v50 = vld [vmem:[#allocation2 + $0x190] sm:$0xff]  ;;  %v6458_v8 = vld [vmem:[#allocation2 + $0x88] sm:$0xff] }
 0x2f7   : > { %6412 = vst.msk [vmem:[#allocation2 + $0x118] sm:$0xff] %vm269_vm2, %v6348_v11  ;;  %v5229_v11 = vld [vmem:[#allocation2 + $0x180] sm:$0xff] }
 0x2f8   : > { %6410 = vst.msk [vmem:[#allocation2 + $0x108] sm:$0xff] %vm269_vm2, %v6346_v14  ;;  %v8967_v19 = vpop.f32.mrb[8].mxu1  ;;  %v5232_v14 = vld [vmem:[#allocation2 + $0x198] sm:$0xff] }
 0x2f9   : > { %v5677_v23 = vadd.f32 %v8967_v19, %v5223_v15  ;;  %v5540_v17 = vpop.f32.mrb[9].mxu1  ;;  %6723 = vrot.lane.b32.xlu1 %v6454_v22, %s9121_s26 }
 0x2fa   : > { %v5675_v9 = vadd.f32 %v5540_v17, %v5221_v25  ;;  %v8968_v35 = vpop.f32.mrb[10].mxu1  ;;  %v5897_v37 = vld [vmem:[#allocation2 + $0x130] sm:$0xff]  ;;  %v9033_v47 = vpop.f32.mrb[8].mxu0  ;;  %v5230_v17 = vld [vmem:[#allocation2 + $0x188] sm:$0xff] }
 0x2fb   : > { %5741 = vst.msk [vmem:[#allocation2 + $0x150] sm:$0xff] %vm269_vm2, %v5677_v23  ;;  %v5678_v62 = vadd.f32 %v8968_v35, %v5224_v27  ;;  %v6351_v1 = vadd.f32 %v9029_v63, %v5897_v37  ;;  %v5543_v13 = vpop.f32.mrb[11].mxu1  ;;  %v5895_v16 = vld [vmem:[#allocation2 + $0x120] sm:$0xff]  ;;  %v6218_v21 = vpop.f32.mrb[9].mxu0  ;;  %v6460_v63 = vld [vmem:[#allocation2 + $0x98] sm:$0xff] }
 0x2fc   : > { %5739 = vst.msk [vmem:[#allocation2 + $0x140] sm:$0xff] %vm269_vm2, %v5675_v9  ;;  %v5676_v30 = vadd.f32 %v5543_v13, %v5222_v5  ;;  %v6349_v49 = vadd.f32 %v6202_v6, %v5895_v16  ;;  %v5898_v26 = vld [vmem:[#allocation2 + $0x138] sm:$0xff]  ;;  %v10843_v38 = vld [vmem:[#allocation2 + $0x110] sm:$0xff]  ;;  %v9034_v2 = vpop.f32.mrb[10].mxu0 }
 0x2fd   : > { %5742 = vst.msk [vmem:[#allocation2 + $0x158] sm:$0xff] %vm269_vm2, %v5678_v62  ;;  %6415 = vst.msk [vmem:[#allocation2 + $0x130] sm:$0xff] %vm269_vm2, %v6351_v1  ;;  %v6352_v29 = vadd.f32 %v9030_v32, %v5898_v26  ;;  %6733 = vrot.lane.b32.xlu1 %v6459_v28, %s9121_s26  ;;  %6541 = vrot.lane.b32.xlu0 %v10843_v38, %s9121_s26  ;;  %v5896_v59 = vld [vmem:[#allocation2 + $0x128] sm:$0xff]  ;;  %v6221_v31 = vpop.f32.mrb[11].mxu0  ;;  %v10854_v36 = vld [vmem:[#allocation2 + $0x100] sm:$0xff] }
 0x2fe   : > { %5740 = vst.msk [vmem:[#allocation2 + $0x148] sm:$0xff] %vm269_vm2, %v5676_v30  ;;  %6413 = vst.msk [vmem:[#allocation2 + $0x120] sm:$0xff] %vm269_vm2, %v6349_v49  ;;  %v6350_v34 = vadd.f32 %v6205_v24, %v5896_v59  ;;  %v10861_v7 = vld [vmem:[#allocation2 + $0x118] sm:$0xff]  ;;  %v6463_v1 = vld [vmem:[#allocation2 + $0xb0] sm:$0xff] }
 0x2ff   : > { %6416 = vst.msk [vmem:[#allocation2 + $0x138] sm:$0xff] %vm269_vm2, %v6352_v29  ;;  %v10872_v10 = vld [vmem:[#allocation2 + $0x108] sm:$0xff]  ;;  %v5235_v26 = vld [vmem:[#allocation2 + $0x1b0] sm:$0xff] }
 0x300   : > { %6414 = vst.msk [vmem:[#allocation2 + $0x128] sm:$0xff] %vm269_vm2, %v6350_v34  ;;  %v8971_v33 = vpop.f32.mrb[12].mxu1 }
 0x301   : > { %v5681_v39 = vadd.f32 %v8971_v33, %v5227_v51  ;;  %v5556_v45 = vpop.f32.mrb[13].mxu1  ;;  %6729 = vrot.lane.b32.xlu1 %v6457_v12, %s9121_s26  ;;  %6537 = vrot.lane.b32.xlu0 %v10854_v36, %s9121_s26  ;;  %v5236_v33 = vld [vmem:[#allocation2 + $0x1b8] sm:$0xff] }
 0x302   : > { %v5679_v41 = vadd.f32 %v5556_v45, %v5225_v40  ;;  %v8972_v43 = vpop.f32.mrb[14].mxu1  ;;  %v5901_v44 = vld [vmem:[#allocation2 + $0x150] sm:$0xff]  ;;  %v9037_v46 = vpop.f32.mrb[12].mxu0 }
 0x303   : > { %5745 = vst.msk [vmem:[#allocation2 + $0x170] sm:$0xff] %vm269_vm2, %v5681_v39  ;;  %v5682_v48 = vadd.f32 %v8972_v43, %v5228_v42  ;;  %v6355_v61 = vadd.f32 %v9033_v47, %v5901_v44  ;;  %v5559_v53 = vpop.f32.mrb[15].mxu1  ;;  %v5899_v54 = vld [vmem:[#allocation2 + $0x140] sm:$0xff]  ;;  %v6234_v55 = vpop.f32.mrb[13].mxu0  ;;  %v5234_v42 = vld [vmem:[#allocation2 + $0x1a8] sm:$0xff] }
 0x304   : > { %5743 = vst.msk [vmem:[#allocation2 + $0x160] sm:$0xff] %vm269_vm2, %v5679_v41  ;;  %v5680_v56 = vadd.f32 %v5559_v53, %v5226_v52  ;;  %v6353_v57 = vadd.f32 %v6218_v21, %v5899_v54  ;;  %v5902_v58 = vld [vmem:[#allocation2 + $0x158] sm:$0xff]  ;;  %v9038_v0 = vpop.f32.mrb[14].mxu0  ;;  %v10879_v5 = vld [vmem:[#allocation2 + $0x130] sm:$0xff] }
 0x305   : > { %5746 = vst.msk [vmem:[#allocation2 + $0x178] sm:$0xff] %vm269_vm2, %v5682_v48  ;;  %6419 = vst.msk [vmem:[#allocation2 + $0x150] sm:$0xff] %vm269_vm2, %v6355_v61  ;;  %v6356_v3 = vadd.f32 %v9034_v2, %v5902_v58  ;;  %6735 = vrot.lane.b32.xlu1 %v6460_v63, %s9121_s26  ;;  %6543 = vrot.lane.b32.xlu0 %v10861_v7, %s9121_s26  ;;  %v5900_v4 = vld [vmem:[#allocation2 + $0x148] sm:$0xff]  ;;  %v6237_v18 = vpop.f32.mrb[15].mxu0  ;;  %v6461_v2 = vld [vmem:[#allocation2 + $0xa0] sm:$0xff] }
 0x306   : > { %5744 = vst.msk [vmem:[#allocation2 + $0x168] sm:$0xff] %vm269_vm2, %v5680_v56  ;;  %6417 = vst.msk [vmem:[#allocation2 + $0x140] sm:$0xff] %vm269_vm2, %v6353_v57  ;;  %v6354_v6 = vadd.f32 %v6221_v31, %v5900_v4  ;;  %v10890_v29 = vld [vmem:[#allocation2 + $0x120] sm:$0xff]  ;;  %v6464_v53 = vld [vmem:[#allocation2 + $0xb8] sm:$0xff] }
 0x307   : > { %6420 = vst.msk [vmem:[#allocation2 + $0x158] sm:$0xff] %vm269_vm2, %v6356_v3  ;;  %v5233_v31 = vld [vmem:[#allocation2 + $0x1a0] sm:$0xff]  ;;  %v10897_v54 = vld [vmem:[#allocation2 + $0x138] sm:$0xff]  ;;  %v6462_v4 = vld [vmem:[#allocation2 + $0xa8] sm:$0xff] }
 0x308   : > { %6418 = vst.msk [vmem:[#allocation2 + $0x148] sm:$0xff] %vm269_vm2, %v6354_v6  ;;  %v8975_v20 = vpop.f32.mrb[16].mxu1 }
 0x309   : > { %v5685_v32 = vadd.f32 %v8975_v20, %v5231_v50  ;;  %v5572_v60 = vpop.f32.mrb[17].mxu1  ;;  %6731 = vrot.lane.b32.xlu1 %v6458_v8, %s9121_s26  ;;  %6539 = vrot.lane.b32.xlu0 %v10872_v10, %s9121_s26  ;;  %v5237_v50 = vld [vmem:[#allocation2 + $0x1c0] sm:$0xff] }
 0x30a   : > { %v5683_v24 = vadd.f32 %v5572_v60, %v5229_v11  ;;  %v8976_v15 = vpop.f32.mrb[18].mxu1  ;;  %v5905_v19 = vld [vmem:[#allocation2 + $0x170] sm:$0xff]  ;;  %v9041_v22 = vpop.f32.mrb[16].mxu0 }
 0x30b   : > { %5749 = vst.msk [vmem:[#allocation2 + $0x190] sm:$0xff] %vm269_vm2, %v5685_v32  ;;  %v5686_v23 = vadd.f32 %v8976_v15, %v5232_v14  ;;  %v6359_v25 = vadd.f32 %v9037_v46, %v5905_v19  ;;  %v5575_v9 = vpop.f32.mrb[19].mxu1  ;;  %v5903_v27 = vld [vmem:[#allocation2 + $0x160] sm:$0xff]  ;;  %v6250_v35 = vpop.f32.mrb[17].mxu0  ;;  %v5240_v32 = vld [vmem:[#allocation2 + $0x1d8] sm:$0xff]  ;;  %v5238_v19 = vld [vmem:[#allocation2 + $0x1c8] sm:$0xff] }
 0x30c   : > { %5747 = vst.msk [vmem:[#allocation2 + $0x180] sm:$0xff] %vm269_vm2, %v5683_v24  ;;  %v5684_v37 = vadd.f32 %v5575_v9, %v5230_v17  ;;  %v6357_v47 = vadd.f32 %v6234_v55, %v5903_v27  ;;  %v5906_v62 = vld [vmem:[#allocation2 + $0x178] sm:$0xff]  ;;  %v9042_v13 = vpop.f32.mrb[18].mxu0 }
 0x30d   : > { %5750 = vst.msk [vmem:[#allocation2 + $0x198] sm:$0xff] %vm269_vm2, %v5686_v23  ;;  %6423 = vst.msk [vmem:[#allocation2 + $0x170] sm:$0xff] %vm269_vm2, %v6359_v25  ;;  %v6360_v16 = vadd.f32 %v9038_v0, %v5906_v62  ;;  %6741 = vrot.lane.b32.xlu1 %v6463_v1, %s9121_s26  ;;  %6549 = vrot.lane.b32.xlu0 %v10879_v5, %s9121_s26  ;;  %v5904_v21 = vld [vmem:[#allocation2 + $0x168] sm:$0xff]  ;;  %v6253_v30 = vpop.f32.mrb[19].mxu0  ;;  %v5239_v0 = vld [vmem:[#allocation2 + $0x1d0] sm:$0xff] }
 0x30e   : > { %5748 = vst.msk [vmem:[#allocation2 + $0x188] sm:$0xff] %vm269_vm2, %v5684_v37  ;;  %6421 = vst.msk [vmem:[#allocation2 + $0x160] sm:$0xff] %vm269_vm2, %v6357_v47  ;;  %v6358_v49 = vadd.f32 %v6237_v18, %v5904_v21  ;;  %v10908_v18 = vld [vmem:[#allocation2 + $0x128] sm:$0xff]  ;;  %v10915_v37 = vld [vmem:[#allocation2 + $0x150] sm:$0xff] }
 0x30f   : > { %6424 = vst.msk [vmem:[#allocation2 + $0x178] sm:$0xff] %vm269_vm2, %v6360_v16  ;;  %v5243_v21 = vld [vmem:[#allocation2 + $0x1f0] sm:$0xff] }
 0x310   : > { %6422 = vst.msk [vmem:[#allocation2 + $0x168] sm:$0xff] %vm269_vm2, %v6358_v49  ;;  %v8979_v28 = vpop.f32.mrb[20].mxu1  ;;  %v6465_v49 = vld [vmem:[#allocation2 + $0xc0] sm:$0xff] }
 0x311   : > { %v5689_v59 = vadd.f32 %v8979_v28, %v5235_v26  ;;  %v5588_v34 = vpop.f32.mrb[21].mxu1  ;;  %6737 = vrot.lane.b32.xlu1 %v6461_v2, %s9121_s26  ;;  %6545 = vrot.lane.b32.xlu0 %v10890_v29, %s9121_s26  ;;  %v10926_v26 = vld [vmem:[#allocation2 + $0x140] sm:$0xff] }
 0x312   : > { %v5687_v51 = vadd.f32 %v5588_v34, %v5233_v31  ;;  %v8980_v12 = vpop.f32.mrb[22].mxu1  ;;  %v5909_v39 = vld [vmem:[#allocation2 + $0x190] sm:$0xff]  ;;  %v9045_v40 = vpop.f32.mrb[20].mxu0  ;;  %v5241_v2 = vld [vmem:[#allocation2 + $0x1e0] sm:$0xff]  ;;  %v5244_v34 = vld [vmem:[#allocation2 + $0x1f8] sm:$0xff] }
 0x313   : > { %5753 = vst.msk [vmem:[#allocation2 + $0x1b0] sm:$0xff] %vm269_vm2, %v5689_v59  ;;  %v5690_v45 = vadd.f32 %v8980_v12, %v5236_v33  ;;  %v6363_v41 = vadd.f32 %v9041_v22, %v5909_v39  ;;  %v5591_v43 = vpop.f32.mrb[23].mxu1  ;;  %v5907_v44 = vld [vmem:[#allocation2 + $0x180] sm:$0xff]  ;;  %v6266_v46 = vpop.f32.mrb[21].mxu0 }
 0x314   : > { %5751 = vst.msk [vmem:[#allocation2 + $0x1a0] sm:$0xff] %vm269_vm2, %v5687_v51  ;;  %v5688_v48 = vadd.f32 %v5591_v43, %v5234_v42  ;;  %v6361_v61 = vadd.f32 %v6250_v35, %v5907_v44  ;;  %v5910_v52 = vld [vmem:[#allocation2 + $0x198] sm:$0xff]  ;;  %v9046_v55 = vpop.f32.mrb[22].mxu0  ;;  %v6467_v35 = vld [vmem:[#allocation2 + $0xd0] sm:$0xff] }
 0x315   : > { %5754 = vst.msk [vmem:[#allocation2 + $0x1b8] sm:$0xff] %vm269_vm2, %v5690_v45  ;;  %6427 = vst.msk [vmem:[#allocation2 + $0x190] sm:$0xff] %vm269_vm2, %v6363_v41  ;;  %v6364_v56 = vadd.f32 %v9042_v13, %v5910_v52  ;;  %6743 = vrot.lane.b32.xlu1 %v6464_v53, %s9121_s26  ;;  %6551 = vrot.lane.b32.xlu0 %v10897_v54, %s9121_s26  ;;  %v5908_v57 = vld [vmem:[#allocation2 + $0x188] sm:$0xff]  ;;  %v6269_v58 = vpop.f32.mrb[23].mxu0  ;;  %v10933_v52 = vld [vmem:[#allocation2 + $0x158] sm:$0xff] }
 0x316   : > { %5752 = vst.msk [vmem:[#allocation2 + $0x1a8] sm:$0xff] %vm269_vm2, %v5688_v48  ;;  %6425 = vst.msk [vmem:[#allocation2 + $0x180] sm:$0xff] %vm269_vm2, %v6361_v61  ;;  %v6362_v63 = vadd.f32 %v6253_v30, %v5908_v57  ;;  %v5242_v45 = vld [vmem:[#allocation2 + $0x1e8] sm:$0xff]  ;;  %v6468_v61 = vld [vmem:[#allocation2 + $0xd8] sm:$0xff] }
 0x317   : > { %6428 = vst.msk [vmem:[#allocation2 + $0x198] sm:$0xff] %vm269_vm2, %v6364_v56 }
 0x318   : > { %6426 = vst.msk [vmem:[#allocation2 + $0x188] sm:$0xff] %vm269_vm2, %v6362_v63  ;;  %v8983_v3 = vpop.f32.mrb[24].mxu1  ;;  %v6466_v63 = vld [vmem:[#allocation2 + $0xc8] sm:$0xff] }
 0x319   : > { %v5693_v6 = vadd.f32 %v8983_v3, %v5239_v0  ;;  %v5604_v20 = vpop.f32.mrb[25].mxu1  ;;  %6739 = vrot.lane.b32.xlu1 %v6462_v4, %s9121_s26  ;;  %6547 = vrot.lane.b32.xlu0 %v10908_v18, %s9121_s26  ;;  %v10944_v0 = vld [vmem:[#allocation2 + $0x148] sm:$0xff] }
 0x31a   : > { %v5691_v8 = vadd.f32 %v5604_v20, %v5237_v50  ;;  %v8984_v11 = vpop.f32.mrb[26].mxu1  ;;  %v5913_v60 = vld [vmem:[#allocation2 + $0x1b0] sm:$0xff]  ;;  %v9049_v24 = vpop.f32.mrb[24].mxu0 }
 0x31b   : > { %5757 = vst.msk [vmem:[#allocation2 + $0x1d0] sm:$0xff] %vm269_vm2, %v5693_v6  ;;  %v5694_v14 = vadd.f32 %v8984_v11, %v5240_v32  ;;  %v6367_v15 = vadd.f32 %v9045_v40, %v5913_v60  ;;  %v5607_v22 = vpop.f32.mrb[27].mxu1  ;;  %v5911_v23 = vld [vmem:[#allocation2 + $0x1a0] sm:$0xff]  ;;  %v6282_v25 = vpop.f32.mrb[25].mxu0  ;;  %v10949_v32 = vld [vmem:[#allocation2 + $0x170] sm:$0xff] }
 0x31c   : > { %5755 = vst.msk [vmem:[#allocation2 + $0x1c0] sm:$0xff] %vm269_vm2, %v5691_v8  ;;  %v5692_v17 = vadd.f32 %v5607_v22, %v5238_v19  ;;  %v6365_v9 = vadd.f32 %v6266_v46, %v5911_v23  ;;  %v5914_v27 = vld [vmem:[#allocation2 + $0x1b8] sm:$0xff]  ;;  %v9050_v47 = vpop.f32.mrb[26].mxu0  ;;  %v6471_v8 = vld [vmem:[#allocation2 + $0xf0] sm:$0xff]  ;;  %v6469_v19 = vld [vmem:[#allocation2 + $0xe0] sm:$0xff] }
 0x31d   : > { %5758 = vst.msk [vmem:[#allocation2 + $0x1d8] sm:$0xff] %vm269_vm2, %v5694_v14  ;;  %6431 = vst.msk [vmem:[#allocation2 + $0x1b0] sm:$0xff] %vm269_vm2, %v6367_v15  ;;  %v6368_v62 = vadd.f32 %v9046_v55, %v5914_v27  ;;  %6749 = vrot.lane.b32.xlu1 %v6467_v35, %s9121_s26  ;;  %6557 = vrot.lane.b32.xlu0 %v10915_v37, %s9121_s26  ;;  %v5912_v1 = vld [vmem:[#allocation2 + $0x1a8] sm:$0xff]  ;;  %v6285_v13 = vpop.f32.mrb[27].mxu0  ;;  %v10969_v22 = vld [vmem:[#allocation2 + $0x160] sm:$0xff] }
 0x31e   : > { %5756 = vst.msk [vmem:[#allocation2 + $0x1c8] sm:$0xff] %vm269_vm2, %v5692_v17  ;;  %6429 = vst.msk [vmem:[#allocation2 + $0x1a0] sm:$0xff] %vm269_vm2, %v6365_v9  ;;  %v6366_v16 = vadd.f32 %v6269_v58, %v5912_v1  ;;  %v10980_v17 = vld [vmem:[#allocation2 + $0x178] sm:$0xff]  ;;  %v10991_v35 = vld [vmem:[#allocation2 + $0x168] sm:$0xff] }
 0x31f   : > { %6432 = vst.msk [vmem:[#allocation2 + $0x1b8] sm:$0xff] %vm269_vm2, %v6368_v62  ;;  %v11002_v1 = vld [vmem:[#allocation2 + $0x190] sm:$0xff] }
 0x320   : > { %6430 = vst.msk [vmem:[#allocation2 + $0x1a8] sm:$0xff] %vm269_vm2, %v6366_v16  ;;  %v8987_v30 = vpop.f32.mrb[28].mxu1  ;;  %v11012_v16 = vld [vmem:[#allocation2 + $0x180] sm:$0xff] }
 0x321   : > { %v5697_v28 = vadd.f32 %v8987_v30, %v5243_v21  ;;  %v5620_v59 = vpop.f32.mrb[29].mxu1  ;;  %6745 = vrot.lane.b32.xlu1 %v6465_v49, %s9121_s26  ;;  %6553 = vrot.lane.b32.xlu0 %v10926_v26, %s9121_s26  ;;  %v11022_v30 = vld [vmem:[#allocation2 + $0x198] sm:$0xff] }
 0x322   : > { %v5695_v31 = vadd.f32 %v5620_v59, %v5241_v2  ;;  %v8988_v51 = vpop.f32.mrb[30].mxu1  ;;  %v5917_v33 = vld [vmem:[#allocation2 + $0x1d0] sm:$0xff]  ;;  %v9053_v12 = vpop.f32.mrb[28].mxu0 }
 0x323   : > { %5761 = vst.msk [vmem:[#allocation2 + $0x1f0] sm:$0xff] %vm269_vm2, %v5697_v28  ;;  %v5698_v39 = vadd.f32 %v8988_v51, %v5244_v34  ;;  %v6371_v40 = vadd.f32 %v9049_v24, %v5917_v33  ;;  %v5623_v41 = vpop.f32.mrb[31].mxu1  ;;  %v5915_v42 = vld [vmem:[#allocation2 + $0x1c0] sm:$0xff]  ;;  %v6298_v43 = vpop.f32.mrb[29].mxu0  ;;  %v11032_v28 = vld [vmem:[#allocation2 + $0x188] sm:$0xff] }
 0x324   : > { %5759 = vst.msk [vmem:[#allocation2 + $0x1e0] sm:$0xff] %vm269_vm2, %v5695_v31  ;;  %v5696_v44 = vadd.f32 %v5623_v41, %v5242_v45  ;;  %v6369_v46 = vadd.f32 %v6282_v25, %v5915_v42  ;;  %v5918_v48 = vld [vmem:[#allocation2 + $0x1d8] sm:$0xff]  ;;  %v9054_v53 = vpop.f32.mrb[30].mxu0  ;;  %v11042_v59 = vld [vmem:[#allocation2 + $0x1b0] sm:$0xff] }
 0x325   : > { %5762 = vst.msk [vmem:[#allocation2 + $0x1f8] sm:$0xff] %vm269_vm2, %v5698_v39  ;;  %6435 = vst.msk [vmem:[#allocation2 + $0x1d0] sm:$0xff] %vm269_vm2, %v6371_v40  ;;  %v6372_v55 = vadd.f32 %v9050_v47, %v5918_v48  ;;  %6751 = vrot.lane.b32.xlu1 %v6468_v61, %s9121_s26  ;;  %6559 = vrot.lane.b32.xlu0 %v10933_v52, %s9121_s26  ;;  %v5916_v56 = vld [vmem:[#allocation2 + $0x1c8] sm:$0xff]  ;;  %v6301_v57 = vpop.f32.mrb[31].mxu0  ;;  %v11052_v34 = vld [vmem:[#allocation2 + $0x1a0] sm:$0xff] }
 0x326   : > { %5760 = vst.msk [vmem:[#allocation2 + $0x1e8] sm:$0xff] %vm269_vm2, %v5696_v44  ;;  %6433 = vst.msk [vmem:[#allocation2 + $0x1c0] sm:$0xff] %vm269_vm2, %v6369_v46  ;;  %v6370_v58 = vadd.f32 %v6285_v13, %v5916_v56  ;;  %v11068_v39 = vld [vmem:[#allocation2 + $0x1b8] sm:$0xff] }
 0x327   : > { %6436 = vst.msk [vmem:[#allocation2 + $0x1d8] sm:$0xff] %vm269_vm2, %v6372_v55  ;;  %v11084_v48 = vld [vmem:[#allocation2 + $0x1a8] sm:$0xff] }
 0x328   : > { %6434 = vst.msk [vmem:[#allocation2 + $0x1c8] sm:$0xff] %vm269_vm2, %v6370_v58 }
 0x329   : > { %6747 = vrot.lane.b32.xlu1 %v6466_v63, %s9121_s26  ;;  %6555 = vrot.lane.b32.xlu0 %v10944_v0, %s9121_s26 }
 0x32a   : > { %v5921_v3 = vld [vmem:[#allocation2 + $0x1f0] sm:$0xff] }
 0x32b   : > { %v6375_v4 = vadd.f32 %v9053_v12, %v5921_v3  ;;  %v5919_v6 = vld [vmem:[#allocation2 + $0x1e0] sm:$0xff] }
 0x32c   : > { %v6373_v50 = vadd.f32 %v6298_v43, %v5919_v6  ;;  %v5922_v20 = vld [vmem:[#allocation2 + $0x1f8] sm:$0xff]  ;;  %v11101_v3 = vld [vmem:[#allocation2 + $0x1d0] sm:$0xff] }
 0x32d   : > { %6439 = vst.msk [vmem:[#allocation2 + $0x1f0] sm:$0xff] %vm269_vm2, %v6375_v4  ;;  %v6376_v11 = vadd.f32 %v9054_v53, %v5922_v20  ;;  %6757 = vrot.lane.b32.xlu1 %v6471_v8, %s9121_s26  ;;  %6565 = vrot.lane.b32.xlu0 %v10949_v32, %s9121_s26  ;;  %v5920_v60 = vld [vmem:[#allocation2 + $0x1e8] sm:$0xff] }
 0x32e   : > { %6437 = vst.msk [vmem:[#allocation2 + $0x1e0] sm:$0xff] %vm269_vm2, %v6373_v50  ;;  %v6374_v24 = vadd.f32 %v6301_v57, %v5920_v60 }
 0x32f   : > { %6440 = vst.msk [vmem:[#allocation2 + $0x1f8] sm:$0xff] %vm269_vm2, %v6376_v11  ;;  %v6702_v14 = vpop.permute.xlu1 %6701 }
 0x330   : > { %6438 = vst.msk [vmem:[#allocation2 + $0x1e8] sm:$0xff] %vm269_vm2, %v6374_v24  ;;  %v10967_v15 = vadd.f32 %v6702_v14, %v10843_v38  ;;  %v6470_v38 = vld [vmem:[#allocation2 + $0xe8] sm:$0xff] }
 0x331   : > { %6753 = vrot.lane.b32.xlu1 %v6469_v19, %s9121_s26  ;;  %6561 = vrot.lane.b32.xlu0 %v10969_v22, %s9121_s26  ;;  %v11121_v19 = vld [vmem:[#allocation2 + $0x1c0] sm:$0xff] }
 0x332   : > { %6860 = vst.msk [vmem:[%s10963_s30 + $0x10] sm:$0xff] %vm6825_vm3, %v10967_v15  ;;  %v7135_v41 = vmul.f32 %v10967_v15, %v10967_v15  ;;  %v6964_v61 = vsel %vm6825_vm3, %v10967_v15, 0.0 }
 0x333   : > { %v6698_v23 = vpop.permute.xlu1 %6697 }
 0x334   : > { %v10978_v25 = vadd.f32 %v6698_v23, %v10854_v36  ;;  %v6472_v36 = vld [vmem:[#allocation2 + $0xf8] sm:$0xff]  ;;  %v7168_v53 = vsel %vm6825_vm3, %v7135_v41, 0.0 }
 0x335   : > { %6567 = vrot.lane.b32.xlu0 %v10980_v17, %s9121_s26  ;;  %6755 = vrot.lane.b32.xlu1 %v6470_v38, %s9121_s26 }
 0x336   : > { %6858 = vst.msk [vmem:[%s10963_s30] sm:$0xff] %vm6825_vm3, %v10978_v25  ;;  %v6961_v45 = vsel %vm6825_vm3, %v10978_v25, 0.0 }
 0x337   : > { %v6704_v9 = vpop.permute.xlu1 %6703 }
 0x338   : > { %v10989_v27 = vadd.f32 %v6704_v9, %v10861_v7 }
 0x339   : > { %6563 = vrot.lane.b32.xlu0 %v10991_v35, %s9121_s26  ;;  %6759 = vrot.lane.b32.xlu1 %v6472_v36, %s9121_s26 }
 0x33a   : > { %6861 = vst.msk [vmem:[%s10963_s30 + $0x18] sm:$0xff] %vm6825_vm3, %v10989_v27  ;;  %v7136_v55 = vmul.f32 %v10989_v27, %v10989_v27  ;;  %v6966_v6 = vsel %vm6825_vm3, %v10989_v27, 0.0 }
 0x33b   : > { %v6700_v47 = vpop.permute.xlu1 %6699 }
 0x33c   : > { %v11000_v62 = vadd.f32 %v6700_v47, %v10872_v10 }
 0x33d   : > { %6573 = vrot.lane.b32.xlu0 %v11002_v1, %s9121_s26 }
 0x33e   : > { %6859 = vst.msk [vmem:[%s10963_s30 + $0x8] sm:$0xff] %vm6825_vm3, %v11000_v62  ;;  %v7134_v51 = vmul.f32 %v11000_v62, %v11000_v62  ;;  %v6962_v12 = vsel %vm6825_vm3, %v11000_v62, 0.0 }
 0x33f   : > { %v6710_v7 = vpop.permute.xlu1 %6709 }
 0x340   : > { %v11010_v13 = vadd.f32 %v6710_v7, %v10879_v5  ;;  %v7166_v40 = vsel %vm6825_vm3, %v7134_v51, 0.0 }
 0x341   : > { %6569 = vrot.lane.b32.xlu0 %v11012_v16, %s9121_s26 }
 0x342   : > { %6864 = vst.msk [vmem:[%s10963_s30 + $0x30] sm:$0xff] %vm6825_vm3, %v11010_v13  ;;  %v7139_v36 = vmul.f32 %v11010_v13, %v11010_v13 }
 0x343   : > { %v6706_v10 = vpop.permute.xlu1 %6705 }
 0x344   : > { %v11020_v21 = vadd.f32 %v6706_v10, %v10890_v29 }
 0x345   : > { %6575 = vrot.lane.b32.xlu0 %v11022_v30, %s9121_s26 }
 0x346   : > { %6862 = vst.msk [vmem:[%s10963_s30 + $0x20] sm:$0xff] %vm6825_vm3, %v11020_v21  ;;  %v6968_v50 = vsel %vm6825_vm3, %v11020_v21, 0.0 }
 0x347   : > { %v6712_v5 = vpop.permute.xlu1 %6711 }
 0x348   : > { %v11030_v49 = vadd.f32 %v6712_v5, %v10897_v54  ;;  %v11134_v5 = vld [vmem:[#allocation2 + $0x1d8] sm:$0xff] }
 0x349   : > { %6571 = vrot.lane.b32.xlu0 %v11032_v28, %s9121_s26 }
 0x34a   : > { %6865 = vst.msk [vmem:[%s10963_s30 + $0x38] sm:$0xff] %vm6825_vm3, %v11030_v49  ;;  %v7140_v51 = vmul.f32 %v11030_v49, %v11030_v49 }
 0x34b   : > { %v6708_v29 = vpop.permute.xlu1 %6707 }
 0x34c   : > { %v11040_v2 = vadd.f32 %v6708_v29, %v10908_v18  ;;  %v7133_v18 = vmul.f32 %v10978_v25, %v10978_v25  ;;  %v6972_v29 = vsel %vm6825_vm3, %v11010_v13, 0.0 }
 0x34d   : > { %6581 = vrot.lane.b32.xlu0 %v11042_v59, %s9121_s26 }
 0x34e   : > { %6863 = vst.msk [vmem:[%s10963_s30 + $0x28] sm:$0xff] %vm6825_vm3, %v11040_v2  ;;  %v7165_v42 = vsel %vm6825_vm3, %v7133_v18, 0.0  ;;  %v7138_v4 = vmul.f32 %v11040_v2, %v11040_v2  ;;  %v6970_v24 = vsel %vm6825_vm3, %v11040_v2, 0.0 }
 0x34f   : > { %v6718_v54 = vpop.permute.xlu1 %6717  ;;  %v7167_v44 = vadd.f32 %v7166_v40, %v7165_v42  ;;  %v6974_v42 = vsel %vm6825_vm3, %v11030_v49, 0.0 }
 0x350   : > { %v11050_v31 = vadd.f32 %v6718_v54, %v10915_v37  ;;  %v7174_v38 = vsel %vm6825_vm3, %v7138_v4, 0.0  ;;  %v7176_v54 = vsel %vm6825_vm3, %v7139_v36, 0.0 }
 0x351   : > { %6577 = vrot.lane.b32.xlu0 %v11052_v34, %s9121_s26  ;;  %v7169_v58 = vadd.f32 %v7168_v53, %v7167_v44 }
 0x352   : > { %6868 = vst.msk [vmem:[%s10963_s30 + $0x50] sm:$0xff] %vm6825_vm3, %v11050_v31 }
 0x353   : > { %v6714_v33 = vpop.permute.xlu1 %6713 }
 0x354   : > { %v11066_v37 = vadd.f32 %v6714_v33, %v10926_v26  ;;  %v6963_v26 = vadd.f32 %v6962_v12, %v6961_v45  ;;  %v11151_v45 = vld [vmem:[#allocation2 + $0x1c8] sm:$0xff] }
 0x355   : > { %6583 = vrot.lane.b32.xlu0 %v11068_v39, %s9121_s26 }
 0x356   : > { %6866 = vst.msk [vmem:[%s10963_s30 + $0x40] sm:$0xff] %vm6825_vm3, %v11066_v37  ;;  %v6965_v56 = vadd.f32 %v6964_v61, %v6963_v26  ;;  %v6976_v26 = vsel %vm6825_vm3, %v11066_v37, 0.0 }
 0x357   : > { %v6720_v43 = vpop.permute.xlu1 %6719 }
 0x358   : > { %v11082_v46 = vadd.f32 %v6720_v43, %v10933_v52  ;;  %v7137_v52 = vmul.f32 %v11020_v21, %v11020_v21  ;;  %v6967_v20 = vadd.f32 %v6966_v6, %v6965_v56  ;;  %v7143_v6 = vmul.f32 %v11050_v31, %v11050_v31 }
 0x359   : > { %6579 = vrot.lane.b32.xlu0 %v11084_v48, %s9121_s26 }
 0x35a   : > { %6869 = vst.msk [vmem:[%s10963_s30 + $0x58] sm:$0xff] %vm6825_vm3, %v11082_v46  ;;  %v7172_v8 = vsel %vm6825_vm3, %v7137_v52, 0.0  ;;  %v6969_v23 = vadd.f32 %v6968_v50, %v6967_v20  ;;  %v11171_v52 = vld [vmem:[#allocation2 + $0x1f0] sm:$0xff] }
 0x35b   : > { %v6716_v57 = vpop.permute.xlu1 %6715 }
 0x35c   : > { %v11099_v63 = vadd.f32 %v6716_v57, %v10944_v0  ;;  %v7170_v0 = vsel %vm6825_vm3, %v7136_v55, 0.0  ;;  %v6971_v47 = vadd.f32 %v6970_v24, %v6969_v23  ;;  %v11193_v24 = vld [vmem:[#allocation2 + $0x1e0] sm:$0xff]  ;;  %v6980_v23 = vsel %vm6825_vm3, %v11050_v31, 0.0 }
 0x35d   : > { %6589 = vrot.lane.b32.xlu0 %v11101_v3, %s9121_s26  ;;  %v7171_v60 = vadd.f32 %v7170_v0, %v7169_v58 }
 0x35e   : > { %6867 = vst.msk [vmem:[%s10963_s30 + $0x48] sm:$0xff] %vm6825_vm3, %v11099_v63  ;;  %v6973_v18 = vadd.f32 %v6972_v29, %v6971_v47  ;;  %v7142_v41 = vmul.f32 %v11099_v63, %v11099_v63  ;;  %v6978_v55 = vsel %vm6825_vm3, %v11099_v63, 0.0 }
 0x35f   : > { %v6726_v11 = vpop.permute.xlu1 %6725  ;;  %v7173_v9 = vadd.f32 %v7172_v8, %v7171_v60 }
 0x360   : > { %v11119_v14 = vadd.f32 %v6726_v11, %v10949_v32  ;;  %v6975_v43 = vadd.f32 %v6974_v42, %v6973_v18  ;;  %v7182_v58 = vsel %vm6825_vm3, %v7142_v41, 0.0  ;;  %v9080_v11 = vld [vmem:[#allocation2 + $0x10] sm:$0xff]  ;;  %v11215_v18 = vld [vmem:[#allocation2 + $0x1e8] sm:$0xff] }
 0x361   : > { %6585 = vrot.lane.b32.xlu0 %v11121_v19, %s9121_s26  ;;  %v7175_v10 = vadd.f32 %v7174_v38, %v7173_v9  ;;  %v7144_v38 = vmul.f32 %v11082_v46, %v11082_v46 }
 0x362   : > { %6872 = vst.msk [vmem:[%s10963_s30 + $0x70] sm:$0xff] %vm6825_vm3, %v11119_v14  ;;  %v6977_v57 = vadd.f32 %v6976_v26, %v6975_v43 }
 0x363   : > { %v6722_v7 = vpop.permute.xlu1 %6721  ;;  %v7177_v12 = vadd.f32 %v7176_v54, %v7175_v10  ;;  %v9081_v54 = vld [vmem:[#allocation2] sm:$0xff] }
 0x364   : > { %v11132_v32 = vadd.f32 %v6722_v7, %v10969_v22  ;;  %v7141_v22 = vmul.f32 %v11066_v37, %v11066_v37  ;;  %v6979_v50 = vadd.f32 %v6978_v55, %v6977_v57  ;;  %v11240_v57 = vld [vmem:[#allocation2 + $0x1f8] sm:$0xff] }
 0x365   : > { %6591 = vrot.lane.b32.xlu0 %v11134_v5, %s9121_s26 }
 0x366   : > { %6870 = vst.msk [vmem:[%s10963_s30 + $0x60] sm:$0xff] %vm6825_vm3, %v11132_v32  ;;  %v7180_v44 = vsel %vm6825_vm3, %v7141_v22, 0.0  ;;  %v6981_v9 = vadd.f32 %v6980_v23, %v6979_v50  ;;  %v7145_v36 = vmul.f32 %v11132_v32, %v11132_v32  ;;  %v9083_v23 = vld [vmem:[#allocation2 + $0x8] sm:$0xff] }
 0x367   : > { %v6728_v33 = vpop.permute.xlu1 %6727 }
 0x368   : > { %v11149_v40 = vadd.f32 %v6728_v33, %v10980_v17  ;;  %v7178_v17 = vsel %vm6825_vm3, %v7140_v51, 0.0  ;;  %v6982_v33 = vsel %vm6825_vm3, %v11082_v46, 0.0  ;;  %v7188_v42 = vsel %vm6825_vm3, %v7145_v36, 0.0 }
 0x369   : > { %6587 = vrot.lane.b32.xlu0 %v11151_v45, %s9121_s26  ;;  %v7179_v53 = vadd.f32 %v7178_v17, %v7177_v12  ;;  %v6984_v12 = vsel %vm6825_vm3, %v11132_v32, 0.0  ;;  %v6983_v41 = vadd.f32 %v6982_v33, %v6981_v9 }
 0x36a   : > { %6873 = vst.msk [vmem:[%s10963_s30 + $0x78] sm:$0xff] %vm6825_vm3, %v11149_v40  ;;  %v7148_v9 = vmul.f32 %v11149_v40, %v11149_v40 }
 0x36b   : > { %v6724_v61 = vpop.permute.xlu1 %6723  ;;  %v7181_v4 = vadd.f32 %v7180_v44, %v7179_v53  ;;  %v9082_v53 = vld [vmem:[#allocation2 + $0x18] sm:$0xff] }
 0x36c   : > { %v11169_v56 = vadd.f32 %v6724_v61, %v10991_v35 }
 0x36d   : > { %6597 = vrot.lane.b32.xlu0 %v11171_v52, %s9121_s26  ;;  %v7183_v20 = vadd.f32 %v7182_v58, %v7181_v4  ;;  %v6985_v58 = vadd.f32 %v6984_v12, %v6983_v41 }
 0x36e   : > { %6871 = vst.msk [vmem:[%s10963_s30 + $0x68] sm:$0xff] %vm6825_vm3, %v11169_v56  ;;  %v7146_v22 = vmul.f32 %v11169_v56, %v11169_v56  ;;  %v6986_v44 = vsel %vm6825_vm3, %v11169_v56, 0.0 }
 0x36f   : > { %v6734_v0 = vpop.permute.xlu1 %6733  ;;  %v6542_v35 = vpop.permute.xlu0 %6541  ;;  %v6987_v50 = vadd.f32 %v6986_v44, %v6985_v58 }
 0x370   : > { %v11189_v8 = vadd.f32 %v6734_v0, %v11002_v1  ;;  %v11191_v60 = vsub.f32 %v9080_v11, %v6542_v35  ;;  %v7184_v1 = vsel %vm6825_vm3, %v7143_v6, 0.0  ;;  %v7190_v4 = vsel %vm6825_vm3, %v7146_v22, 0.0 }
 0x371   : > { %6593 = vrot.lane.b32.xlu0 %v11193_v24, %s9121_s26  ;;  %v7185_v10 = vadd.f32 %v7184_v1, %v7183_v20 }
 0x372   : > { %6876 = vst.msk [vmem:[%s10963_s30 + $0x90] sm:$0xff] %vm6825_vm3, %v11189_v8  ;;  %6828 = vst.msk [vmem:[%s11186_s8 + $0x10] sm:$0xff] %vm6825_vm3, %v11191_v60  ;;  %v7033_v33 = vmul.f32 %v11191_v60, %v11191_v60  ;;  %v6893_v44 = vsel %vm6825_vm3, %v11191_v60, 0.0 }
 0x373   : > { %v6730_v47 = vpop.permute.xlu1 %6729  ;;  %v6538_v7 = vpop.permute.xlu0 %6537 }
 0x374   : > { %v11211_v29 = vadd.f32 %v6730_v47, %v11012_v16  ;;  %v11213_v51 = vsub.f32 %v9081_v54, %v6538_v7  ;;  %v7186_v16 = vsel %vm6825_vm3, %v7144_v38, 0.0  ;;  %v6988_v38 = vsel %vm6825_vm3, %v11119_v14, 0.0 }
 0x375   : > { %6595 = vrot.lane.b32.xlu0 %v11215_v18, %s9121_s26  ;;  %v7187_v43 = vadd.f32 %v7186_v16, %v7185_v10  ;;  %v6989_v47 = vadd.f32 %v6988_v38, %v6987_v50  ;;  %v9084_v16 = vld [vmem:[#allocation2 + $0x30] sm:$0xff] }
 0x376   : > { %6874 = vst.msk [vmem:[%s10963_s30 + $0x80] sm:$0xff] %vm6825_vm3, %v11211_v29  ;;  %6826 = vst.msk [vmem:[%s11186_s8] sm:$0xff] %vm6825_vm3, %v11213_v51  ;;  %v7149_v7 = vmul.f32 %v11211_v29, %v11211_v29  ;;  %v7031_v38 = vmul.f32 %v11213_v51, %v11213_v51 }
 0x377   : > { %v6736_v26 = vpop.permute.xlu1 %6735  ;;  %v6544_v17 = vpop.permute.xlu0 %6543  ;;  %v7189_v6 = vadd.f32 %v7188_v42, %v7187_v43  ;;  %v6990_v42 = vsel %vm6825_vm3, %v11149_v40, 0.0  ;;  %v6996_v43 = vsel %vm6825_vm3, %v11189_v8, 0.0 }
 0x378   : > { %v11236_v61 = vadd.f32 %v6736_v26, %v11022_v30  ;;  %v11238_v55 = vsub.f32 %v9082_v53, %v6544_v17  ;;  %v7147_v30 = vmul.f32 %v11119_v14, %v11119_v14  ;;  %v7237_v26 = vmul.f32 %v10967_v15, %v11191_v60 }
 0x379   : > { %6599 = vrot.lane.b32.xlu0 %v11240_v57, %s9121_s26  ;;  %v7191_v20 = vadd.f32 %v7190_v4, %v7189_v6  ;;  %v7194_v17 = vsel %vm6825_vm3, %v7148_v9, 0.0  ;;  %v6991_v15 = vadd.f32 %v6990_v42, %v6989_v47  ;;  %v7196_v58 = vsel %vm6825_vm3, %v7149_v7, 0.0 }
 0x37a   : > { %6877 = vst.msk [vmem:[%s10963_s30 + $0x98] sm:$0xff] %vm6825_vm3, %v11236_v61  ;;  %6829 = vst.msk [vmem:[%s11186_s8 + $0x18] sm:$0xff] %vm6825_vm3, %v11238_v55  ;;  %v7192_v36 = vsel %vm6825_vm3, %v7147_v30, 0.0  ;;  %v7066_v30 = vsel %vm6825_vm3, %v7033_v33, 0.0  ;;  %v7235_v47 = vmul.f32 %v10978_v25, %v11213_v51 }
 0x37b   : > { %v6732_v0 = vpop.permute.xlu1 %6731  ;;  %v6540_v35 = vpop.permute.xlu0 %6539  ;;  %v7193_v22 = vadd.f32 %v7192_v36, %v7191_v20  ;;  %v7270_v20 = vsel %vm6825_vm3, %v7237_v26, 0.0 }
 0x37c   : > { %v11254_v11 = vadd.f32 %v6732_v0, %v11032_v28  ;;  %v6634_v1 = vsub.f32 %v9083_v23, %v6540_v35  ;;  %v7151_v28 = vmul.f32 %v11189_v8, %v11189_v8 }
 0x37d   : > { %v7195_v50 = vadd.f32 %v7194_v17, %v7193_v22  ;;  %v9086_v17 = vld [vmem:[#allocation2 + $0x38] sm:$0xff] }
 0x37e   : > { %6875 = vst.msk [vmem:[%s10963_s30 + $0x88] sm:$0xff] %vm6825_vm3, %v11254_v11  ;;  %6827 = vst.msk [vmem:[%s11186_s8 + $0x8] sm:$0xff] %vm6825_vm3, %v6634_v1  ;;  %v7200_v53 = vsel %vm6825_vm3, %v7151_v28, 0.0  ;;  %v7150_v4 = vmul.f32 %v11254_v11, %v11254_v11  ;;  %v7032_v0 = vmul.f32 %v6634_v1, %v6634_v1  ;;  %v7236_v9 = vmul.f32 %v11000_v62, %v6634_v1 }
 0x37f   : > { %v6742_v10 = vpop.permute.xlu1 %6741  ;;  %v6550_v54 = vpop.permute.xlu0 %6549  ;;  %v7197_v36 = vadd.f32 %v7196_v58, %v7195_v50  ;;  %v7152_v28 = vmul.f32 %v11236_v61, %v11236_v61  ;;  %v6994_v7 = vsel %vm6825_vm3, %v11254_v11, 0.0  ;;  %v6891_v62 = vsel %vm6825_vm3, %v6634_v1, 0.0 }
 0x380   : > { %v11273_v12 = vadd.f32 %v6742_v10, %v11042_v59  ;;  %v11275_v41 = vsub.f32 %v9084_v16, %v6550_v54  ;;  %v6992_v59 = vsel %vm6825_vm3, %v11211_v29, 0.0  ;;  %v7198_v10 = vsel %vm6825_vm3, %v7150_v4, 0.0  ;;  %v9085_v54 = vld [vmem:[#allocation2 + $0x20] sm:$0xff] }
 0x381   : > { %v6993_v23 = vadd.f32 %v6992_v59, %v6991_v15  ;;  %v7238_v16 = vmul.f32 %v10989_v27, %v11238_v55  ;;  %v7064_v42 = vsel %vm6825_vm3, %v7032_v0, 0.0  ;;  %v6890_v1 = vsel %vm6825_vm3, %v11213_v51, 0.0 }
 0x382   : > { %6880 = vst.msk [vmem:[%s10963_s30 + $0xb0] sm:$0xff] %vm6825_vm3, %v11273_v12  ;;  %6832 = vst.msk [vmem:[%s11186_s8 + $0x30] sm:$0xff] %vm6825_vm3, %v11275_v41  ;;  %v7063_v15 = vsel %vm6825_vm3, %v7031_v38, 0.0  ;;  %v7268_v4 = vsel %vm6825_vm3, %v7236_v9, 0.0  ;;  %v7267_v27 = vsel %vm6825_vm3, %v7235_v47, 0.0  ;;  %v7202_v51 = vsel %vm6825_vm3, %v7152_v28, 0.0 }
 0x383   : > { %v6738_v6 = vpop.permute.xlu1 %6737  ;;  %v6546_v60 = vpop.permute.xlu0 %6545  ;;  %v6995_v58 = vadd.f32 %v6994_v7, %v6993_v23  ;;  %v6895_v50 = vsel %vm6825_vm3, %v11238_v55, 0.0  ;;  %v7065_v0 = vadd.f32 %v7064_v42, %v7063_v15  ;;  %v7155_v23 = vmul.f32 %v11273_v12, %v11273_v12 }
 0x384   : > { %v11300_v35 = vadd.f32 %v6738_v6, %v11052_v34  ;;  %v7034_v34 = vmul.f32 %v11238_v55, %v11238_v55  ;;  %v6637_v22 = vsub.f32 %v9085_v54, %v6546_v60  ;;  %v6998_v6 = vsel %vm6825_vm3, %v11236_v61, 0.0  ;;  %v9087_v54 = vld [vmem:[#allocation2 + $0x28] sm:$0xff] }
 0x385   : > { %v6892_v60 = vadd.f32 %v6891_v62, %v6890_v1  ;;  %v7272_v47 = vsel %vm6825_vm3, %v7238_v16, 0.0  ;;  %v7269_v7 = vadd.f32 %v7268_v4, %v7267_v27  ;;  %v6997_v28 = vadd.f32 %v6996_v43, %v6995_v58  ;;  %v9088_v4 = vld [vmem:[#allocation2 + $0x50] sm:$0xff] }
 0x386   : > { %6878 = vst.msk [vmem:[%s10963_s30 + $0xa0] sm:$0xff] %vm6825_vm3, %v11300_v35  ;;  %6830 = vst.msk [vmem:[%s11186_s8 + $0x20] sm:$0xff] %vm6825_vm3, %v6637_v22  ;;  %v7037_v55 = vmul.f32 %v11275_v41, %v11275_v41  ;;  %v7153_v62 = vmul.f32 %v11300_v35, %v11300_v35  ;;  %v11360_v16 = vsel %vm6825_vm3, %v11275_v41, 0.0  ;;  %v7208_v43 = vsel %vm6825_vm3, %v7155_v23, 0.0 }
 0x387   : > { %v6744_v25 = vpop.permute.xlu1 %6743  ;;  %v6552_v33 = vpop.permute.xlu0 %6551  ;;  %v6894_v42 = vadd.f32 %v6893_v44, %v6892_v60  ;;  %v7271_v15 = vadd.f32 %v7270_v20, %v7269_v7  ;;  %v7000_v58 = vsel %vm6825_vm3, %v11300_v35, 0.0  ;;  %v7239_v60 = vmul.f32 %v11020_v21, %v6637_v22 }
 0x388   : > { %v11323_v26 = vadd.f32 %v6744_v25, %v11068_v39  ;;  %v11325_v59 = vsub.f32 %v9086_v17, %v6552_v33  ;;  %v7199_v39 = vadd.f32 %v7198_v10, %v7197_v36  ;;  %v7068_v36 = vsel %vm6825_vm3, %v7034_v34, 0.0 }
 0x389   : > { %v7004_v34 = vsel %vm6825_vm3, %v11273_v12, 0.0  ;;  %v7241_v17 = vmul.f32 %v11010_v13, %v11275_v41  ;;  %v11380_v13 = vsel %vm6825_vm3, %v7037_v55, 0.0  ;;  %v6999_v41 = vadd.f32 %v6998_v6, %v6997_v28 }
 0x38a   : > { %6881 = vst.msk [vmem:[%s10963_s30 + $0xb8] sm:$0xff] %vm6825_vm3, %v11323_v26  ;;  %6833 = vst.msk [vmem:[%s11186_s8 + $0x38] sm:$0xff] %vm6825_vm3, %v11325_v59  ;;  %v7201_v33 = vadd.f32 %v7200_v53, %v7199_v39  ;;  %v7204_v39 = vsel %vm6825_vm3, %v7153_v62, 0.0  ;;  %v6896_v23 = vadd.f32 %v6895_v50, %v6894_v42  ;;  %v7035_v20 = vmul.f32 %v6637_v22, %v6637_v22 }
 0x38b   : > { %v6740_v38 = vpop.permute.xlu1 %6739  ;;  %v6548_v9 = vpop.permute.xlu0 %6547  ;;  %v7273_v55 = vadd.f32 %v7272_v47, %v7271_v15 }
 0x38c   : > { %v11350_v10 = vadd.f32 %v6740_v38, %v11084_v48  ;;  %v6638_v25 = vsub.f32 %v9087_v54, %v6548_v9  ;;  %v7067_v48 = vadd.f32 %v7066_v30, %v7065_v0  ;;  %v7203_v0 = vadd.f32 %v7202_v51, %v7201_v33 }
 0x38d   : > { %v6897_v9 = vsel %vm6825_vm3, %v6637_v22, 0.0  ;;  %v7274_v54 = vsel %vm6825_vm3, %v7239_v60, 0.0  ;;  %v9090_v60 = vld [vmem:[#allocation2 + $0x58] sm:$0xff] }
 0x38e   : > { %6879 = vst.msk [vmem:[%s10963_s30 + $0xa8] sm:$0xff] %vm6825_vm3, %v11350_v10  ;;  %v7154_v53 = vmul.f32 %v11350_v10, %v11350_v10  ;;  %6831 = vst.msk [vmem:[%s11186_s8 + $0x28] sm:$0xff] %vm6825_vm3, %v6638_v25  ;;  %v7002_v38 = vsel %vm6825_vm3, %v11350_v10, 0.0  ;;  %v7240_v21 = vmul.f32 %v11040_v2, %v6638_v25  ;;  %v7205_v7 = vadd.f32 %v7204_v39, %v7203_v0 }
 0x38f   : > { %v6750_v44 = vpop.permute.xlu1 %6749  ;;  %v6558_v1 = vpop.permute.xlu0 %6557  ;;  %v7069_v28 = vadd.f32 %v7068_v36, %v7067_v48  ;;  %v6899_v42 = vsel %vm6825_vm3, %v6638_v25, 0.0  ;;  %v6898_v22 = vadd.f32 %v6897_v9, %v6896_v23  ;;  %v7156_v2 = vmul.f32 %v11323_v26, %v11323_v26 }
 0x390   : > { %v11375_v30 = vadd.f32 %v6750_v44, %v11101_v3  ;;  %v11377_v27 = vsub.f32 %v9088_v4, %v6558_v1  ;;  %v7001_v3 = vadd.f32 %v7000_v58, %v6999_v41  ;;  %v7206_v6 = vsel %vm6825_vm3, %v7154_v53, 0.0 }
 0x391   : > { %v7036_v44 = vmul.f32 %v6638_v25, %v6638_v25  ;;  %v7070_v53 = vsel %vm6825_vm3, %v7035_v20, 0.0  ;;  %v7207_v1 = vadd.f32 %v7206_v6, %v7205_v7  ;;  %v7242_v36 = vmul.f32 %v11030_v49, %v11325_v59  ;;  %v9089_v25 = vld [vmem:[#allocation2 + $0x40] sm:$0xff] }
 0x392   : > { %6884 = vst.msk [vmem:[%s10963_s30 + $0xd0] sm:$0xff] %vm6825_vm3, %v11375_v30  ;;  %6836 = vst.msk [vmem:[%s11186_s8 + $0x50] sm:$0xff] %vm6825_vm3, %v11377_v27  ;;  %v7003_v33 = vadd.f32 %v7002_v38, %v7001_v3  ;;  %v7276_v47 = vsel %vm6825_vm3, %v7240_v21, 0.0  ;;  %v7275_v4 = vadd.f32 %v7274_v54, %v7273_v55  ;;  %v6900_v41 = vadd.f32 %v6899_v42, %v6898_v22 }
 0x393   : > { %v6746_v51 = vpop.permute.xlu1 %6745  ;;  %v6554_v50 = vpop.permute.xlu0 %6553  ;;  %v7278_v23 = vsel %vm6825_vm3, %v7241_v17, 0.0  ;;  %v7072_v20 = vsel %vm6825_vm3, %v7036_v44, 0.0  ;;  %v7071_v3 = vadd.f32 %v7070_v53, %v7069_v28  ;;  %v7006_v9 = vsel %vm6825_vm3, %v11323_v26, 0.0  ;;  %v9091_v44 = vld [vmem:[#allocation2 + $0x48] sm:$0xff] }
 0x394   : > { %v11396_v62 = vadd.f32 %v6746_v51, %v11121_v19  ;;  %v7038_v19 = vmul.f32 %v11325_v59, %v11325_v59  ;;  %v11411_v48 = vsub.f32 %v9089_v25, %v6554_v50  ;;  %v7005_v49 = vadd.f32 %v7004_v34, %v7003_v33 }
 0x395   : > { %v7277_v6 = vadd.f32 %v7276_v47, %v7275_v4  ;;  %v7210_v34 = vsel %vm6825_vm3, %v7156_v2, 0.0  ;;  %v6903_v17 = vsel %vm6825_vm3, %v11325_v59, 0.0  ;;  %v7280_v51 = vsel %vm6825_vm3, %v7242_v36, 0.0 }
 0x396   : > { %6882 = vst.msk [vmem:[%s10963_s30 + $0xc0] sm:$0xff] %vm6825_vm3, %v11396_v62  ;;  %v7157_v38 = vmul.f32 %v11396_v62, %v11396_v62  ;;  %6834 = vst.msk [vmem:[%s11186_s8 + $0x40] sm:$0xff] %vm6825_vm3, %v11411_v48  ;;  %v7076_v21 = vsel %vm6825_vm3, %v7038_v19, 0.0  ;;  %v7073_v28 = vadd.f32 %v7072_v20, %v7071_v3  ;;  %v7008_v55 = vsel %vm6825_vm3, %v11396_v62, 0.0 }
 0x397   : > { %v6752_v15 = vpop.permute.xlu1 %6751  ;;  %v6560_v58 = vpop.permute.xlu0 %6559  ;;  %v7007_v33 = vadd.f32 %v7006_v9, %v7005_v49  ;;  %v7243_v42 = vmul.f32 %v11066_v37, %v11411_v48  ;;  %v7279_v53 = vadd.f32 %v7278_v23, %v7277_v6  ;;  %v7159_v19 = vmul.f32 %v11375_v30, %v11375_v30 }
 0x398   : > { %v11414_v39 = vadd.f32 %v6752_v15, %v11134_v5  ;;  %v11416_v0 = vsub.f32 %v9090_v60, %v6560_v58  ;;  %v7209_v5 = vadd.f32 %v7208_v43, %v7207_v1  ;;  %v6902_v43 = vadd.f32 %v11360_v16, %v6900_v41  ;;  %v9092_v41 = vld [vmem:[#allocation2 + $0x70] sm:$0xff] }
 0x399   : > { %v7212_v59 = vsel %vm6825_vm3, %v7157_v38, 0.0  ;;  %v7012_v1 = vsel %vm6825_vm3, %v11375_v30, 0.0  ;;  %v7009_v37 = vadd.f32 %v7008_v55, %v7007_v33  ;;  %v7075_v23 = vadd.f32 %v11380_v13, %v7073_v28 }
 0x39a   : > { %6885 = vst.msk [vmem:[%s10963_s30 + $0xd8] sm:$0xff] %vm6825_vm3, %v11414_v39  ;;  %6837 = vst.msk [vmem:[%s11186_s8 + $0x58] sm:$0xff] %vm6825_vm3, %v11416_v0  ;;  %v7211_v2 = vadd.f32 %v7210_v34, %v7209_v5  ;;  %v7245_v49 = vmul.f32 %v11050_v31, %v11377_v27  ;;  %v11473_v38 = vsel %vm6825_vm3, %v11377_v27, 0.0  ;;  %v7281_v3 = vadd.f32 %v7280_v51, %v7279_v53 }
 0x39b   : > { %v6748_v50 = vpop.permute.xlu1 %6747  ;;  %v6556_v7 = vpop.permute.xlu0 %6555  ;;  %v11485_v31 = vmul.f32 %v11377_v27, %v11377_v27  ;;  %v6904_v13 = vadd.f32 %v6903_v17, %v6902_v43  ;;  %v7039_v5 = vmul.f32 %v11411_v48, %v11411_v48  ;;  %v7160_v28 = vmul.f32 %v11414_v39, %v11414_v39 }
 0x39c   : > { %v11442_v54 = vadd.f32 %v6748_v50, %v11151_v45  ;;  %v6642_v22 = vsub.f32 %v9091_v44, %v6556_v7  ;;  %v7213_v15 = vadd.f32 %v7212_v59, %v7211_v2  ;;  %v7216_v50 = vsel %vm6825_vm3, %v7159_v19, 0.0  ;;  %v9093_v2 = vld [vmem:[#allocation2 + $0x60] sm:$0xff] }
 0x39d   : > { %v7286_v27 = vsel %vm6825_vm3, %v7245_v49, 0.0  ;;  %v7077_v17 = vadd.f32 %v7076_v21, %v7075_v23  ;;  %v7078_v53 = vsel %vm6825_vm3, %v7039_v5, 0.0  ;;  %v7246_v21 = vmul.f32 %v11082_v46, %v11416_v0 }
 0x39e   : > { %6883 = vst.msk [vmem:[%s10963_s30 + $0xc8] sm:$0xff] %vm6825_vm3, %v11442_v54  ;;  %v7010_v16 = vsel %vm6825_vm3, %v11442_v54, 0.0  ;;  %v7158_v45 = vmul.f32 %v11442_v54, %v11442_v54  ;;  %6835 = vst.msk [vmem:[%s11186_s8 + $0x48] sm:$0xff] %vm6825_vm3, %v6642_v22  ;;  %v7244_v36 = vmul.f32 %v11099_v63, %v6642_v22  ;;  %v7282_v63 = vsel %vm6825_vm3, %v7243_v42, 0.0 }
 0x39f   : > { %v6758_v47 = vpop.permute.xlu1 %6757  ;;  %v6566_v25 = vpop.permute.xlu0 %6565  ;;  %v7011_v20 = vadd.f32 %v7010_v16, %v7009_v37  ;;  %v7283_v7 = vadd.f32 %v7282_v63, %v7281_v3  ;;  %v7218_v19 = vsel %vm6825_vm3, %v7160_v28, 0.0  ;;  %v6907_v46 = vsel %vm6825_vm3, %v6642_v22, 0.0 }
 0x3a0   : > { %v7214_v58 = vsel %vm6825_vm3, %v7158_v45, 0.0  ;;  %v11463_v4 = vadd.f32 %v6758_v47, %v11171_v52  ;;  %v11465_v60 = vsub.f32 %v9092_v41, %v6566_v25  ;;  %v6905_v52 = vsel %vm6825_vm3, %v11411_v48, 0.0 }
 0x3a1   : > { %v7215_v9 = vadd.f32 %v7214_v58, %v7213_v15  ;;  %v7284_v6 = vsel %vm6825_vm3, %v7244_v36, 0.0  ;;  %v6906_v43 = vadd.f32 %v6905_v52, %v6904_v13  ;;  %v7013_v33 = vadd.f32 %v7012_v1, %v7011_v20  ;;  %v9094_v36 = vld [vmem:[#allocation2 + $0x78] sm:$0xff] }
 0x3a2   : > { %6888 = vst.msk [vmem:[%s10963_s30 + $0xf0] sm:$0xff] %vm6825_vm3, %v11463_v4  ;;  %6840 = vst.msk [vmem:[%s11186_s8 + $0x70] sm:$0xff] %vm6825_vm3, %v11465_v60  ;;  %v7040_v48 = vmul.f32 %v6642_v22, %v6642_v22  ;;  %v7285_v42 = vadd.f32 %v7284_v6, %v7283_v7  ;;  %v7079_v23 = vadd.f32 %v7078_v53, %v7077_v17  ;;  %v7288_v13 = vsel %vm6825_vm3, %v7246_v21, 0.0  ;;  %v9095_v7 = vld [vmem:[#allocation2 + $0x68] sm:$0xff] }
 0x3a3   : > { %v6754_v34 = vpop.permute.xlu1 %6753  ;;  %v6562_v51 = vpop.permute.xlu0 %6561  ;;  %v7217_v59 = vadd.f32 %v7216_v50, %v7215_v9  ;;  %v6908_v5 = vadd.f32 %v6907_v46, %v6906_v43  ;;  %v7042_v46 = vmul.f32 %v11416_v0, %v11416_v0 }
 0x3a4   : > { %v11494_v55 = vadd.f32 %v6754_v34, %v11193_v24  ;;  %v7014_v24 = vsel %vm6825_vm3, %v11414_v39, 0.0  ;;  %v11507_v16 = vsub.f32 %v9093_v2, %v6562_v51  ;;  %v7080_v49 = vsel %vm6825_vm3, %v7040_v48, 0.0 }
 0x3a5   : > { %v7015_v15 = vadd.f32 %v7014_v24, %v7013_v33  ;;  %v7287_v63 = vadd.f32 %v7286_v27, %v7285_v42  ;;  %v7219_v20 = vadd.f32 %v7218_v19, %v7217_v59  ;;  %v7081_v17 = vadd.f32 %v7080_v49, %v7079_v23  ;;  %v9096_v19 = vld [vmem:[#allocation2 + $0x90] sm:$0xff] }
 0x3a6   : > { %6886 = vst.msk [vmem:[%s10963_s30 + $0xe0] sm:$0xff] %vm6825_vm3, %v11494_v55  ;;  %v7161_v44 = vmul.f32 %v11494_v55, %v11494_v55  ;;  %v7016_v37 = vsel %vm6825_vm3, %v11494_v55, 0.0  ;;  %6838 = vst.msk [vmem:[%s11186_s8 + $0x60] sm:$0xff] %vm6825_vm3, %v11507_v16  ;;  %v7247_v41 = vmul.f32 %v11132_v32, %v11507_v16  ;;  %v7020_v33 = vsel %vm6825_vm3, %v11463_v4, 0.0 }
 0x3a7   : > { %v6568_v45 = vpop.permute.xlu0 %6567  ;;  %v6756_v1 = vpop.permute.xlu1 %6755  ;;  %v7017_v22 = vadd.f32 %v7016_v37, %v7015_v15  ;;  %v7289_v59 = vadd.f32 %v7288_v13, %v7287_v63  ;;  %v7249_v42 = vmul.f32 %v11119_v14, %v11465_v60  ;;  %v6913_v13 = vsel %vm6825_vm3, %v11507_v16, 0.0 }
 0x3a8   : > { %v11512_v47 = vsub.f32 %v9094_v36, %v6568_v45  ;;  %v11515_v25 = vadd.f32 %v6756_v1, %v11215_v18  ;;  %v7220_v58 = vsel %vm6825_vm3, %v7161_v44, 0.0  ;;  %v7163_v18 = vmul.f32 %v11463_v4, %v11463_v4 }
 0x3a9   : > { %v7221_v6 = vadd.f32 %v7220_v58, %v7219_v20  ;;  %v7290_v34 = vsel %vm6825_vm3, %v7247_v41, 0.0  ;;  %v7082_v36 = vsel %vm6825_vm3, %v11485_v31, 0.0  ;;  %v6910_v41 = vadd.f32 %v11473_v38, %v6908_v5 }
 0x3aa   : > { %6841 = vst.msk [vmem:[%s11186_s8 + $0x78] sm:$0xff] %vm6825_vm3, %v11512_v47  ;;  %6887 = vst.msk [vmem:[%s10963_s30 + $0xe8] sm:$0xff] %vm6825_vm3, %v11515_v25  ;;  %v7018_v3 = vsel %vm6825_vm3, %v11515_v25, 0.0  ;;  %v7162_v32 = vmul.f32 %v11515_v25, %v11515_v25  ;;  %v7224_v43 = vsel %vm6825_vm3, %v7163_v18, 0.0  ;;  %v7291_v24 = vadd.f32 %v7290_v34, %v7289_v59 }
 0x3ab   : > { %v6564_v52 = vpop.permute.xlu0 %6563  ;;  %v6760_v9 = vpop.permute.xlu1 %6759  ;;  %v7019_v51 = vadd.f32 %v7018_v3, %v7017_v22  ;;  %v7250_v14 = vmul.f32 %v11149_v40, %v11512_v47  ;;  %v7294_v23 = vsel %vm6825_vm3, %v7249_v42, 0.0  ;;  %v7083_v20 = vadd.f32 %v7082_v36, %v7081_v17 }
 0x3ac   : > { %v7222_v50 = vsel %vm6825_vm3, %v7162_v32, 0.0  ;;  %v6646_v28 = vsub.f32 %v9095_v7, %v6564_v52  ;;  %v11541_v27 = vadd.f32 %v6760_v9, %v11240_v57  ;;  %v7043_v31 = vmul.f32 %v11507_v16, %v11507_v16  ;;  %v9097_v52 = vld [vmem:[#allocation2 + $0x80] sm:$0xff] }
 0x3ad   : > { %v7223_v48 = vadd.f32 %v7222_v50, %v7221_v6  ;;  %v7021_v53 = vadd.f32 %v7020_v33, %v7019_v51  ;;  %v7296_v22 = vsel %vm6825_vm3, %v7250_v14, 0.0  ;;  %v6911_v9 = vsel %vm6825_vm3, %v11416_v0, 0.0 }
 0x3ae   : > { %6839 = vst.msk [vmem:[%s11186_s8 + $0x68] sm:$0xff] %vm6825_vm3, %v6646_v28  ;;  %v7248_v44 = vmul.f32 %v11169_v56, %v6646_v28  ;;  %6889 = vst.msk [vmem:[%s10963_s30 + $0xf8] sm:$0xff] %vm6825_vm3, %v11541_v27  ;;  %v7022_v2 = vsel %vm6825_vm3, %v11541_v27, 0.0  ;;  %v7164_v45 = vmul.f32 %v11541_v27, %v11541_v27  ;;  %v7044_v5 = vmul.f32 %v6646_v28, %v6646_v28 }
 0x3af   : > { %v6574_v57 = vpop.permute.xlu0 %6573  ;;  %v7225_v21 = vadd.f32 %v7224_v43, %v7223_v48  ;;  %v7023_v56 = vadd.f32 %v7022_v2, %v7021_v53  ;;  %v7084_v34 = vsel %vm6825_vm3, %v7042_v46, 0.0  ;;  %v6912_v51 = vadd.f32 %v6911_v9, %v6910_v41  ;;  %v9098_v48 = vld [vmem:[#allocation2 + $0x98] sm:$0xff] }
 0x3b0   : > { %v7292_v1 = vsel %vm6825_vm3, %v7248_v44, 0.0  ;;  %v11561_v37 = vsub.f32 %v9096_v19, %v6574_v57  ;;  %v7226_v58 = vsel %vm6825_vm3, %v7164_v45, 0.0  ;;  %v7086_v33 = vsel %vm6825_vm3, %v7043_v31, 0.0 }
 0x3b1   : > { %v7293_v15 = vadd.f32 %v7292_v1, %v7291_v24  ;;  %v7024_v40 = vrot.slane %v7023_v56, 4  ;;  %v7227_v49 = vadd.f32 %v7226_v58, %v7225_v21  ;;  %v6915_v59 = vsel %vm6825_vm3, %v6646_v28, 0.0  ;;  %v9099_v1 = vld [vmem:[#allocation2 + $0x88] sm:$0xff] }
 0x3b2   : > { %6844 = vst.msk [vmem:[%s11186_s8 + $0x90] sm:$0xff] %vm6825_vm3, %v11561_v37  ;;  %v7085_v43 = vadd.f32 %v7084_v34, %v7083_v20  ;;  %v6914_v42 = vadd.f32 %v6913_v13, %v6912_v51  ;;  %v7045_v57 = vmul.f32 %v11465_v60, %v11465_v60  ;;  %v7088_v24 = vsel %vm6825_vm3, %v7044_v5, 0.0 }
 0x3b3   : > { %v6570_v63 = vpop.permute.xlu0 %6569  ;;  %v7295_v18 = vadd.f32 %v7294_v23, %v7293_v15  ;;  %v7025_v3 = vadd.f32 %v7024_v40, %v7023_v56  ;;  %v7228_v32 = vrot.slane %v7227_v49, 4  ;;  %v6917_v15 = vsel %vm6825_vm3, %v11465_v60, 0.0 }
 0x3b4   : > { %v6649_v38 = vsub.f32 %v9097_v52, %v6570_v63  ;;  %v7087_v28 = vadd.f32 %v7086_v33, %v7085_v43  ;;  %v6916_v21 = vadd.f32 %v6915_v59, %v6914_v42  ;;  %v7253_v58 = vmul.f32 %v11189_v8, %v11561_v37 }
 0x3b5   : > { %v7297_v6 = vadd.f32 %v7296_v22, %v7295_v18  ;;  %v7026_v50 = vrot.slane %v7025_v3, 2  ;;  %v7229_v7 = vadd.f32 %v7228_v32, %v7227_v49  ;;  %v7090_v23 = vsel %vm6825_vm3, %v7045_v57, 0.0  ;;  %v9100_v18 = vld [vmem:[#allocation2 + $0xb0] sm:$0xff] }
 0x3b6   : > { %6842 = vst.msk [vmem:[%s11186_s8 + $0x80] sm:$0xff] %vm6825_vm3, %v6649_v38  ;;  %v7251_v0 = vmul.f32 %v11211_v29, %v6649_v38  ;;  %v7089_v19 = vadd.f32 %v7088_v24, %v7087_v28  ;;  %v6918_v40 = vadd.f32 %v6917_v15, %v6916_v21  ;;  %v7046_v60 = vmul.f32 %v11512_v47, %v11512_v47  ;;  %v9102_v28 = vld [vmem:[#allocation2 + $0xb8] sm:$0xff] }
 0x3b7   : > { %v6576_v17 = vpop.permute.xlu0 %6575  ;;  %v7027_v44 = vadd.f32 %v7026_v50, %v7025_v3  ;;  %v7230_v53 = vrot.slane %v7229_v7, 2  ;;  %v7047_v31 = vmul.f32 %v6649_v38, %v6649_v38  ;;  %v7302_v52 = vsel %vm6825_vm3, %v7253_v58, 0.0 }
 0x3b8   : > { %v11586_v16 = vsub.f32 %v9098_v48, %v6576_v17  ;;  %v7298_v14 = vsel %vm6825_vm3, %v7251_v0, 0.0  ;;  %v7091_v3 = vadd.f32 %v7090_v23, %v7089_v19  ;;  %v6921_v9 = vsel %vm6825_vm3, %v6649_v38, 0.0  ;;  %v9101_v17 = vld [vmem:[#allocation2 + $0xa0] sm:$0xff] }
 0x3b9   : > { %v7028_v29 = vrot.slane %v7027_v44, 1  ;;  %v7231_v2 = vadd.f32 %v7230_v53, %v7229_v7  ;;  %v7299_v63 = vadd.f32 %v7298_v14, %v7297_v6  ;;  %v7094_v50 = vsel %vm6825_vm3, %v7047_v31, 0.0 }
 0x3ba   : > { %6845 = vst.msk [vmem:[%s11186_s8 + $0x98] sm:$0xff] %vm6825_vm3, %v11586_v16  ;;  %v7254_v13 = vmul.f32 %v11236_v61, %v11586_v16  ;;  %v7049_v57 = vmul.f32 %v11561_v37, %v11561_v37  ;;  %v6927_v15 = vsel %vm6825_vm3, %v11586_v16, 0.0 }
 0x3bb   : > { %v6572_v45 = vpop.permute.xlu0 %6571  ;;  %v7029_v36 = vadd.f32 %v7028_v29, %v7027_v44  ;;  %v7232_v46 = vrot.slane %v7231_v2, 1 }
 0x3bc   : > { %v6650_v56 = vsub.f32 %v9099_v1, %v6572_v45  ;;  %v7304_v61 = vsel %vm6825_vm3, %v7254_v13, 0.0  ;;  %v6925_v45 = vsel %vm6825_vm3, %v11561_v37, 0.0  ;;  %v7098_v19 = vsel %vm6825_vm3, %v7049_v57, 0.0 }
 0x3bd   : > { %7030 = vst.msk [vmem:[%s11598_s19 + $0x1] sm:$0x1] %vm6959_vm4, %v7029_v36  ;;  %v7233_v49 = vadd.f32 %v7232_v46, %v7231_v2  ;;  %v9103_v36 = vld [vmem:[#allocation2 + $0xa8] sm:$0xff] }
 0x3be   : > { %6843 = vst.msk [vmem:[%s11186_s8 + $0x88] sm:$0xff] %vm6825_vm3, %v6650_v56  ;;  %v7252_v41 = vmul.f32 %v11254_v11, %v6650_v56  ;;  %v6919_v11 = vsel %vm6825_vm3, %v11512_v47, 0.0  ;;  %v7048_v5 = vmul.f32 %v6650_v56, %v6650_v56  ;;  %v7092_v47 = vsel %vm6825_vm3, %v7046_v60, 0.0 }
 0x3bf   : > { %v6582_v20 = vpop.permute.xlu0 %6581  ;;  %7234 = vst.msk [vmem:[%s11598_s19 + $0x3] sm:$0x1] %vm6959_vm4, %v7233_v49  ;;  %v6920_v6 = vadd.f32 %v6919_v11, %v6918_v40  ;;  %v6923_v7 = vsel %vm6825_vm3, %v6650_v56, 0.0  ;;  %v7093_v38 = vadd.f32 %v7092_v47, %v7091_v3 }
 0x3c0   : > { %v7300_v8 = vsel %vm6825_vm3, %v7252_v41, 0.0  ;;  %v11614_v22 = vsub.f32 %v9100_v18, %v6582_v20  ;;  %v7096_v0 = vsel %vm6825_vm3, %v7048_v5, 0.0 }
 0x3c1   : > { %v7301_v32 = vadd.f32 %v7300_v8, %v7299_v63  ;;  %v6922_v59 = vadd.f32 %v6921_v9, %v6920_v6  ;;  %v7095_v43 = vadd.f32 %v7094_v50, %v7093_v38  ;;  %v9104_v8 = vld [vmem:[#allocation2 + $0xd0] sm:$0xff] }
 0x3c2   : > { %6848 = vst.msk [vmem:[%s11186_s8 + $0xb0] sm:$0xff] %vm6825_vm3, %v11614_v22  ;;  %v7257_v41 = vmul.f32 %v11273_v12, %v11614_v22  ;;  %v7053_v9 = vmul.f32 %v11614_v22, %v11614_v22 }
 0x3c3   : > { %v7303_v34 = vadd.f32 %v7302_v52, %v7301_v32  ;;  %v6578_v51 = vpop.permute.xlu0 %6577  ;;  %v6924_v42 = vadd.f32 %v6923_v7, %v6922_v59  ;;  %v7097_v29 = vadd.f32 %v7096_v0, %v7095_v43 }
 0x3c4   : > { %v6653_v33 = vsub.f32 %v9101_v17, %v6578_v51  ;;  %v9105_v51 = vld [vmem:[#allocation2 + $0xc0] sm:$0xff]  ;;  %v6933_v17 = vsel %vm6825_vm3, %v11614_v22, 0.0  ;;  %v7106_v38 = vsel %vm6825_vm3, %v7053_v9, 0.0 }
 0x3c5   : > { %v7305_v44 = vadd.f32 %v7304_v61, %v7303_v34  ;;  %v6926_v14 = vadd.f32 %v6925_v45, %v6924_v42  ;;  %v7099_v58 = vadd.f32 %v7098_v19, %v7097_v29  ;;  %v9106_v42 = vld [vmem:[#allocation2 + $0xd8] sm:$0xff]  ;;  %v9107_v45 = vld [vmem:[#allocation2 + $0xc8] sm:$0xff] }
 0x3c6   : > { %6846 = vst.msk [vmem:[%s11186_s8 + $0xa0] sm:$0xff] %vm6825_vm3, %v6653_v33  ;;  %v7255_v48 = vmul.f32 %v11300_v35, %v6653_v33  ;;  %v7050_v35 = vmul.f32 %v11586_v16, %v11586_v16  ;;  %v7051_v1 = vmul.f32 %v6653_v33, %v6653_v33  ;;  %v6929_v37 = vsel %vm6825_vm3, %v6653_v33, 0.0 }
 0x3c7   : > { %v6584_v53 = vpop.permute.xlu0 %6583  ;;  %v6928_v63 = vadd.f32 %v6927_v15, %v6926_v14 }
 0x3c8   : > { %v7306_v24 = vsel %vm6825_vm3, %v7255_v48, 0.0  ;;  %v6656_v21 = vsub.f32 %v9102_v28, %v6584_v53  ;;  %v7100_v49 = vsel %vm6825_vm3, %v7050_v35, 0.0  ;;  %v7102_v20 = vsel %vm6825_vm3, %v7051_v1, 0.0 }
 0x3c9   : > { %v7307_v2 = vadd.f32 %v7306_v24, %v7305_v44  ;;  %v7101_v11 = vadd.f32 %v7100_v49, %v7099_v58  ;;  %v6930_v3 = vadd.f32 %v6929_v37, %v6928_v63  ;;  %v9108_v49 = vld [vmem:[#allocation2 + $0xf0] sm:$0xff] }
 0x3ca   : > { %6849 = vst.msk [vmem:[%s11186_s8 + $0xb8] sm:$0xff] %vm6825_vm3, %v6656_v21  ;;  %v7258_v16 = vmul.f32 %v11323_v26, %v6656_v21  ;;  %v7054_v0 = vmul.f32 %v6656_v21, %v6656_v21  ;;  %v6935_v24 = vsel %vm6825_vm3, %v6656_v21, 0.0 }
 0x3cb   : > { %v6580_v56 = vpop.permute.xlu0 %6579  ;;  %v7103_v26 = vadd.f32 %v7102_v20, %v7101_v11 }
 0x3cc   : > { %v6654_v46 = vsub.f32 %v9103_v36, %v6580_v56  ;;  %v7312_v34 = vsel %vm6825_vm3, %v7258_v16, 0.0  ;;  %v7108_v29 = vsel %vm6825_vm3, %v7054_v0, 0.0 }
 0x3ce   : > { %6847 = vst.msk [vmem:[%s11186_s8 + $0xa8] sm:$0xff] %vm6825_vm3, %v6654_v46  ;;  %v7052_v23 = vmul.f32 %v6654_v46, %v6654_v46  ;;  %v7256_v40 = vmul.f32 %v11350_v10, %v6654_v46  ;;  %v6931_v31 = vsel %vm6825_vm3, %v6654_v46, 0.0  ;;  %v7310_v10 = vsel %vm6825_vm3, %v7257_v41, 0.0 }
 0x3cf   : > { %v6590_v60 = vpop.permute.xlu0 %6589  ;;  %v6932_v13 = vadd.f32 %v6931_v31, %v6930_v3  ;;  %v9109_v3 = vld [vmem:[#allocation2 + $0xe0] sm:$0xff] }
 0x3d0   : > { %v7308_v12 = vsel %vm6825_vm3, %v7256_v40, 0.0  ;;  %v6659_v18 = vsub.f32 %v9104_v8, %v6590_v60  ;;  %v7104_v52 = vsel %vm6825_vm3, %v7052_v23, 0.0 }
 0x3d1   : > { %v7309_v32 = vadd.f32 %v7308_v12, %v7307_v2  ;;  %v7105_v50 = vadd.f32 %v7104_v52, %v7103_v26  ;;  %v6934_v59 = vadd.f32 %v6933_v17, %v6932_v13 }
 0x3d2   : > { %6852 = vst.msk [vmem:[%s11186_s8 + $0xd0] sm:$0xff] %vm6825_vm3, %v6659_v18  ;;  %v7261_v56 = vmul.f32 %v11375_v30, %v6659_v18  ;;  %v7057_v46 = vmul.f32 %v6659_v18, %v6659_v18  ;;  %v6941_v60 = vsel %vm6825_vm3, %v6659_v18, 0.0 }
 0x3d3   : > { %v7311_v5 = vadd.f32 %v7310_v10, %v7309_v32  ;;  %v6586_v6 = vpop.permute.xlu0 %6585  ;;  %v7107_v53 = vadd.f32 %v7106_v38, %v7105_v50  ;;  %v9110_v50 = vld [vmem:[#allocation2 + $0xe8] sm:$0xff] }
 0x3d4   : > { %v6657_v47 = vsub.f32 %v9105_v51, %v6586_v6  ;;  %v7318_v16 = vsel %vm6825_vm3, %v7261_v56, 0.0 }
 0x3d5   : > { %v7313_v7 = vadd.f32 %v7312_v34, %v7311_v5  ;;  %v7109_v14 = vadd.f32 %v7108_v29, %v7107_v53 }
 0x3d6   : > { %6850 = vst.msk [vmem:[%s11186_s8 + $0xc0] sm:$0xff] %vm6825_vm3, %v6657_v47  ;;  %v7259_v33 = vmul.f32 %v11396_v62, %v6657_v47  ;;  %v7055_v48 = vmul.f32 %v6657_v47, %v6657_v47  ;;  %v6937_v22 = vsel %vm6825_vm3, %v6657_v47, 0.0  ;;  %v6936_v62 = vadd.f32 %v6935_v24, %v6934_v59 }
 0x3d7   : > { %v6592_v61 = vpop.permute.xlu0 %6591 }
 0x3d8   : > { %v7314_v43 = vsel %vm6825_vm3, %v7259_v33, 0.0  ;;  %v6660_v44 = vsub.f32 %v9106_v42, %v6592_v61  ;;  %v7110_v2 = vsel %vm6825_vm3, %v7055_v48, 0.0  ;;  %v6938_v1 = vadd.f32 %v6937_v22, %v6936_v62  ;;  %v9111_v22 = vld [vmem:[#allocation2 + $0xf8] sm:$0xff] }
 0x3d9   : > { %v7315_v57 = vadd.f32 %v7314_v43, %v7313_v7  ;;  %v7111_v15 = vadd.f32 %v7110_v2, %v7109_v14 }
 0x3da   : > { %6853 = vst.msk [vmem:[%s11186_s8 + $0xd8] sm:$0xff] %vm6825_vm3, %v6660_v44  ;;  %v7262_v37 = vmul.f32 %v11414_v39, %v6660_v44  ;;  %v7114_v39 = vsel %vm6825_vm3, %v7057_v46, 0.0  ;;  %v7058_v8 = vmul.f32 %v6660_v44, %v6660_v44  ;;  %v6943_v9 = vsel %vm6825_vm3, %v6660_v44, 0.0 }
 0x3db   : > { %v6588_v28 = vpop.permute.xlu0 %6587 }
 0x3dc   : > { %v6658_v35 = vsub.f32 %v9107_v45, %v6588_v28  ;;  %v7320_v11 = vsel %vm6825_vm3, %v7262_v37, 0.0  ;;  %v7116_v34 = vsel %vm6825_vm3, %v7058_v8, 0.0 }
 0x3de   : > { %6851 = vst.msk [vmem:[%s11186_s8 + $0xc8] sm:$0xff] %vm6825_vm3, %v6658_v35  ;;  %v6939_v21 = vsel %vm6825_vm3, %v6658_v35, 0.0  ;;  %v7056_v19 = vmul.f32 %v6658_v35, %v6658_v35  ;;  %v7260_v36 = vmul.f32 %v11442_v54, %v6658_v35 }
 0x3df   : > { %v6940_v58 = vadd.f32 %v6939_v21, %v6938_v1  ;;  %v6598_v41 = vpop.permute.xlu0 %6597 }
 0x3e0   : > { %v7112_v23 = vsel %vm6825_vm3, %v7056_v19, 0.0  ;;  %v7316_v40 = vsel %vm6825_vm3, %v7260_v36, 0.0  ;;  %v6663_v30 = vsub.f32 %v9108_v49, %v6598_v41 }
 0x3e1   : > { %v7113_v63 = vadd.f32 %v7112_v23, %v7111_v15  ;;  %v7317_v20 = vadd.f32 %v7316_v40, %v7315_v57  ;;  %v6942_v54 = vadd.f32 %v6941_v60, %v6940_v58 }
 0x3e2   : > { %6856 = vst.msk [vmem:[%s11186_s8 + $0xf0] sm:$0xff] %vm6825_vm3, %v6663_v30  ;;  %v7061_v17 = vmul.f32 %v6663_v30, %v6663_v30  ;;  %v7265_v61 = vmul.f32 %v11463_v4, %v6663_v30  ;;  %v6949_v53 = vsel %vm6825_vm3, %v6663_v30, 0.0 }
 0x3e3   : > { %v7319_v31 = vadd.f32 %v7318_v16, %v7317_v20  ;;  %v6594_v12 = vpop.permute.xlu0 %6593  ;;  %v7115_v10 = vadd.f32 %v7114_v39, %v7113_v63  ;;  %v6944_v5 = vadd.f32 %v6943_v9, %v6942_v54 }
 0x3e4   : > { %v6661_v32 = vsub.f32 %v9109_v3, %v6594_v12  ;;  %v7122_v4 = vsel %vm6825_vm3, %v7061_v17, 0.0  ;;  %v7326_v45 = vsel %vm6825_vm3, %v7265_v61, 0.0 }
 0x3e5   : > { %v7321_v52 = vadd.f32 %v7320_v11, %v7319_v31  ;;  %v7117_v33 = vadd.f32 %v7116_v34, %v7115_v10 }
 0x3e6   : > { %6854 = vst.msk [vmem:[%s11186_s8 + $0xe0] sm:$0xff] %vm6825_vm3, %v6661_v32  ;;  %v6945_v18 = vsel %vm6825_vm3, %v6661_v32, 0.0  ;;  %v7059_v26 = vmul.f32 %v6661_v32, %v6661_v32  ;;  %v7263_v13 = vmul.f32 %v11494_v55, %v6661_v32 }
 0x3e7   : > { %v6596_v6 = vpop.permute.xlu0 %6595  ;;  %v6946_v38 = vadd.f32 %v6945_v18, %v6944_v5 }
 0x3e8   : > { %v7118_v51 = vsel %vm6825_vm3, %v7059_v26, 0.0  ;;  %v7322_v47 = vsel %vm6825_vm3, %v7263_v13, 0.0  ;;  %v6662_v7 = vsub.f32 %v9110_v50, %v6596_v6 }
 0x3e9   : > { %v7323_v59 = vadd.f32 %v7322_v47, %v7321_v52  ;;  %v7119_v43 = vadd.f32 %v7118_v51, %v7117_v33 }
 0x3ea   : > { %6855 = vst.msk [vmem:[%s11186_s8 + $0xe8] sm:$0xff] %vm6825_vm3, %v6662_v7  ;;  %v6947_v55 = vsel %vm6825_vm3, %v6662_v7, 0.0  ;;  %v7060_v0 = vmul.f32 %v6662_v7, %v6662_v7  ;;  %v7264_v48 = vmul.f32 %v11515_v25, %v6662_v7 }
 0x3eb   : > { %v6948_v42 = vadd.f32 %v6947_v55, %v6946_v38  ;;  %v6600_v44 = vpop.permute.xlu0 %6599 }
 0x3ec   : > { %v7120_v57 = vsel %vm6825_vm3, %v7060_v0, 0.0  ;;  %v7324_v24 = vsel %vm6825_vm3, %v7264_v48, 0.0  ;;  %v6664_v62 = vsub.f32 %v9111_v22, %v6600_v44 }
 0x3ed   : > { %v7121_v28 = vadd.f32 %v7120_v57, %v7119_v43  ;;  %v7325_v29 = vadd.f32 %v7324_v24, %v7323_v59  ;;  %v6950_v2 = vadd.f32 %v6949_v53, %v6948_v42 }
 0x3ee   : > { %6857 = vst.msk [vmem:[%s11186_s8 + $0xf8] sm:$0xff] %vm6825_vm3, %v6664_v62  ;;  %v6951_v25 = vsel %vm6825_vm3, %v6664_v62, 0.0  ;;  %v7062_v35 = vmul.f32 %v6664_v62, %v6664_v62  ;;  %v7266_v14 = vmul.f32 %v11541_v27, %v6664_v62 }
 0x3ef   : > { %v6952_v1 = vadd.f32 %v6951_v25, %v6950_v2  ;;  %v7123_v56 = vadd.f32 %v7122_v4, %v7121_v28  ;;  %v7327_v21 = vadd.f32 %v7326_v45, %v7325_v29 }
 0x3f0   : > { %v7124_v19 = vsel %vm6825_vm3, %v7062_v35, 0.0  ;;  %v7328_v36 = vsel %vm6825_vm3, %v7266_v14, 0.0 }
 0x3f1   : > { %v6953_v46 = vrot.slane %v6952_v1, 4  ;;  %v7125_v15 = vadd.f32 %v7124_v19, %v7123_v56  ;;  %v7329_v58 = vadd.f32 %v7328_v36, %v7327_v21 }
 0x3f3   : > { %v6954_v41 = vadd.f32 %v6953_v46, %v6952_v1  ;;  %v7126_v37 = vrot.slane %v7125_v15, 4  ;;  %v7330_v23 = vrot.slane %v7329_v58, 4 }
 0x3f5   : > { %v6955_v40 = vrot.slane %v6954_v41, 2  ;;  %v7127_v49 = vadd.f32 %v7126_v37, %v7125_v15  ;;  %v7331_v30 = vadd.f32 %v7330_v23, %v7329_v58 }
 0x3f7   : > { %v6956_v27 = vadd.f32 %v6955_v40, %v6954_v41  ;;  %v7128_v63 = vrot.slane %v7127_v49, 2  ;;  %v7332_v20 = vrot.slane %v7331_v30, 2 }
 0x3f9   : > { %v6957_v60 = vrot.slane %v6956_v27, 1  ;;  %v7129_v16 = vadd.f32 %v7128_v63, %v7127_v49  ;;  %v7333_v54 = vadd.f32 %v7332_v20, %v7331_v30 }
 0x3fb   : > { %v6958_v31 = vadd.f32 %v6957_v60, %v6956_v27  ;;  %v7130_v12 = vrot.slane %v7129_v16, 1  ;;  %v7334_v39 = vrot.slane %v7333_v54, 1 }
 0x3fd   : > { %6960 = vst.msk [vmem:[%s11598_s19] sm:$0x1] %vm6959_vm4, %v6958_v31  ;;  %v7131_v8 = vadd.f32 %v7130_v12, %v7129_v16  ;;  %v7335_v11 = vadd.f32 %v7334_v39, %v7333_v54 }
 0x3ff   : > { %7132 = vst.msk [vmem:[%s11598_s19 + $0x2] sm:$0x1] %vm6959_vm4, %v7131_v8  ;;  %7336 = vst.msk [vmem:[%s11598_s19 + $0x4] sm:$0x1] %vm6959_vm4, %v7335_v11 }
 0x400 PF: > { %s16_s18 = sadd.s32 1, %s9118_s18  }
 0x401   : > { %p13_p4 = scmp.ge.s32.totalorder %s16_s18, 4  }
 0x403   :  { %15 = sbr.rel (!%p13_p4) target bundleno = 1 (0x1), region = 101 }

</bundles_post_ra>
